<compile_context>
chip_gen: v5e
topology: v5e:2x2
jax: 0.10.0
libtpu: 0.0.40
codegen_flags: <defaults>
</compile_context>

<pallas_src>
import functools

import jax
import jax.numpy as jnp
from jax import lax
from jax.experimental import pallas as pl
from jax.experimental.pallas import tpu as pltpu

EPS = 1e-6
_F32 = jnp.float32
_HIGHEST = jax.lax.Precision.HIGHEST


def routing_kernel(u_ref, v_ref, b_scr, *, n_iterations, n_out, d, chunk):
    # u_ref : (Bt, n_in, n_out*d)  input dtype (f32 or bf16)
    # v_ref : (Bt, 1,   n_out*d)   f32 output
    # b_scr : (Bt, n_in, n_out)    f32 routing logits (VMEM scratch)
    bt_blk, n_in, nod = u_ref.shape
    n_chunks = n_in // chunk
    unroll = n_chunks <= 8

    # 0/1 segment matrices (built once per grid step, consumed by the MXU):
    #   seg   (nod, n_out): sums the d lanes belonging to each output capsule.
    #   seg_t (n_out, nod): broadcasts a per-capsule scalar back over its d lanes.
    m_i = lax.broadcasted_iota(jnp.int32, (nod, n_out), 0)
    j_i = lax.broadcasted_iota(jnp.int32, (nod, n_out), 1)
    seg = ((m_i >= j_i * d) & (m_i < (j_i + 1) * d)).astype(_F32)
    j_t = lax.broadcasted_iota(jnp.int32, (n_out, nod), 0)
    m_t = lax.broadcasted_iota(jnp.int32, (n_out, nod), 1)
    seg_t = ((m_t >= j_t * d) & (m_t < (j_t + 1) * d)).astype(_F32)

    def seg_dot(a, b):
        return jnp.dot(a, b, preferred_element_type=_F32, precision=_HIGHEST)

    def softmax_lanes(x):  # softmax over the n_out (lane) axis, max-subtracted
        m = jnp.max(x, axis=-1, keepdims=True)
        e = jnp.exp(x - m)
        return e / jnp.sum(e, axis=-1, keepdims=True)

    def squash_flat(s):  # s: (1, nod) -> squash independently per output capsule
        sqr = seg_dot(s * s, seg)        # (1, n_out) per-capsule squared norm (MXU)
        sqr_flat = seg_dot(sqr, seg_t)   # (1, nod)   broadcast back (MXU)
        scale = sqr_flat * lax.rsqrt(sqr_flat + EPS) / (1.0 + sqr_flat)
        return s * scale

    for bt in range(bt_blk):

        def u_chunk_at(ci):
            row0 = pl.multiple_of(ci * chunk, chunk)
            return u_ref[bt, pl.ds(row0, chunk), :].astype(_F32), row0

        # ---- iteration 0: b == 0  =>  c == 1/n_out (uniform) ----
        def pass0(ci, s_acc):
            u_c, _ = u_chunk_at(ci)
            return s_acc + jnp.sum(u_c, axis=0, keepdims=True)

        s_flat = lax.fori_loop(0, n_chunks, pass0, jnp.zeros((1, nod), _F32),
                               unroll=unroll) * (1.0 / n_out)
        v_flat = squash_flat(s_flat)

        # ---- iterations 1..n-1: fused logit-update + softmax + weighted sum ----
        for r in range(1, n_iterations):
            first = r == 1
            last = r == n_iterations - 1
            v_prev = v_flat

            def pass_r(ci, s_acc, v_prev=v_prev, first=first, last=last):
                u_c, row0 = u_chunk_at(ci)
                # b[i, j] += sum_k u[i, j*d+k] * v[j*d+k]   -> (chunk, nod)@(nod, n_out) on MXU
                db = seg_dot(u_c * v_prev, seg)
                b_new = db if first else b_scr[bt, pl.ds(row0, chunk), :] + db
                if not last:  # last iteration's logits are never read again
                    b_scr[bt, pl.ds(row0, chunk), :] = b_new
                c = softmax_lanes(b_new)                    # (chunk, n_out)
                c_flat = seg_dot(c, seg_t)                  # (chunk, nod) lane expansion (MXU)
                return s_acc + jnp.sum(c_flat * u_c, axis=0, keepdims=True)

            s_flat = lax.fori_loop(0, n_chunks, pass_r, jnp.zeros((1, nod), _F32),
                                   unroll=unroll)
            v_flat = squash_flat(s_flat)

        v_ref[bt] = v_flat.astype(v_ref.dtype)


def _round_up(x, m):
    return ((x + m - 1) // m) * m


def _pick_chunk(n_in, cap=512):
    if n_in <= cap:
        return n_in
    fallback = 1
    for c in range(cap, 0, -1):
        if n_in % c == 0:
            if c % 8 == 0:
                return c
            fallback = max(fallback, c)
    return fallback


def _pick_block_batch(B, n_in, nod, n_out, itemsize,
                      budget=20 * 1024 * 1024, cap=8):
    # double-buffered input block + f32 logit scratch, with lane padding
    per_sample = (2 * n_in * _round_up(nod, 128) * itemsize
                  + n_in * _round_up(n_out, 128) * 4)
    bt = max(1, min(cap, budget // max(per_sample, 1), B))
    if B >= 2:  # keep >= 2 grid steps so both v7x TensorCores get work
        bt = min(bt, -(-B // 2))
    return int(bt)


def routing_by_agreement(u_hat, n_iterations=3, *, block_batch=None, chunk=None,
                         interpret=False):
    """u_hat: (B, n_in_caps, n_out_caps, out_dim) float32/bf16 -> (B, n_out_caps, out_dim) f32."""
    B, n_in, n_out, d = u_hat.shape
    nod = n_out * d
    if not jnp.issubdtype(u_hat.dtype, jnp.floating):
        u_hat = u_hat.astype(jnp.float32)

    u2 = u_hat.reshape(B, n_in, nod)  # lane-dense view; contiguous -> free

    itemsize = jnp.dtype(u_hat.dtype).itemsize
    if block_batch is None:
        block_batch = _pick_block_batch(B, n_in, nod, n_out, itemsize)
    Bt = int(min(block_batch, B))
    if chunk is None:
        chunk = _pick_chunk(n_in)
    chunk = int(chunk)
    if n_in % chunk != 0:
        chunk = n_in  # safe fallback: single chunk

    Bp = pl.cdiv(B, Bt) * Bt
    if Bp != B:  # pad batch; padded samples are computed then discarded
        u2 = jnp.pad(u2, ((0, Bp - B), (0, 0), (0, 0)))

    kernel = functools.partial(routing_kernel, n_iterations=int(n_iterations),
                               n_out=n_out, d=d, chunk=chunk)
    v2 = pl.pallas_call(
        kernel,
        out_shape=jax.ShapeDtypeStruct((Bp, 1, nod), jnp.float32),
        grid=(Bp // Bt,),
        in_specs=[pl.BlockSpec((Bt, n_in, nod), lambda i: (i, 0, 0))],
        out_specs=pl.BlockSpec((Bt, 1, nod), lambda i: (i, 0, 0)),
        scratch_shapes=[pltpu.VMEM((Bt, n_in, n_out), jnp.float32)],
        compiler_params=pltpu.CompilerParams(
            dimension_semantics=("parallel",),
            vmem_limit_bytes=32 * 1024 * 1024),
        interpret=interpret,
    )(u2)
    return v2.reshape(Bp, n_out, d)[:B]


# ----------------------------- pure-JAX reference -----------------------------

def _squash_ref(t, axis=-1):
    sqr = jnp.sum(t * t, axis=axis, keepdims=True)
    norm = jnp.sqrt(sqr + EPS)
    return sqr * t / ((1.0 + sqr) * norm)


def routing_reference(u_hat, n_iterations=3):
    """Mirrors the PyTorch forward exactly."""
    u_hat = u_hat.astype(jnp.float32)
    B, n_in, n_out, d = u_hat.shape
    b = jnp.zeros((B, n_in, n_out, 1), jnp.float32)
    v = None
    for r in range(n_iterations):
        c = jax.nn.softmax(b, axis=2)
        s = jnp.sum(c * u_hat, axis=1, keepdims=True)
        v = _squash_ref(s, axis=-1)
        if r < n_iterations - 1:
            b = b + jnp.sum(v * u_hat, axis=-1, keepdims=True)
    return v.reshape(B, n_out, d)


if __name__ == "__main__":
    # Small deterministic example: (batch, n_in_caps, n_out_caps, out_dim)
    batch, n_in_caps, n_out_caps, out_dim = 4, 64, 8, 16
    key = jax.random.PRNGKey(0)
    u_hat = jax.random.normal(key, (batch, n_in_caps, n_out_caps, out_dim),
                              dtype=jnp.float32)

    # float32 path
    v = jax.block_until_ready(routing_by_agreement(u_hat, n_iterations=3))
    v_ref = routing_reference(u_hat, n_iterations=3)
    assert v.shape == (batch, n_out_caps, out_dim)
    assert bool(jnp.allclose(v, v_ref, atol=1e-4, rtol=1e-4)), "f32 mismatch vs reference"

    # bf16-input path (halves HBM traffic; accumulation stays f32 in-kernel)
    u_bf16 = u_hat.astype(jnp.bfloat16)
    v_bf = jax.block_until_ready(routing_by_agreement(u_bf16, n_iterations=3))
    v_bf_ref = routing_reference(u_bf16.astype(jnp.float32), n_iterations=3)
    assert bool(jnp.allclose(v_bf, v_bf_ref, atol=1e-4, rtol=1e-4)), "bf16 mismatch vs reference"

    print("KERNEL_OK")
</pallas_src>

<mosaic_0001>
module attributes {stable_mosaic.version = 11 : i64} {
  func.func @routing_kernel(%arg0: i32, %arg1: memref<2x64x128xf32, #tpu.memory_space<vmem>>, %arg2: memref<2x1x128xf32, #tpu.memory_space<vmem>>, %arg3: memref<2x64x8xf32, #tpu.memory_space<vmem>>) attributes {dimension_semantics = [#tpu.dimension_semantics<parallel>], iteration_bounds = array<i64: 2>, scalar_prefetch = 0 : i64, scratch_operands = 1 : i64, tpu.core_type = #tpu.core_type<tc>, window_params = [{transform_indices = @transform_0, window_bounds = array<i64: 2, 64, 128>}, {transform_indices = @transform_1, window_bounds = array<i64: 2, 1, 128>}]} {
    %0 = tpu.iota {dimensions = array<i32: 0>} : vector<128x8xi32>
    %1 = tpu.iota {dimensions = array<i32: 1>} : vector<128x8xi32>
    %c16_i32 = arith.constant 16 : i32
    %2 = vector.broadcast %c16_i32 : i32 to vector<128x8xi32>
    %3 = arith.muli %1, %2 : vector<128x8xi32>
    %4 = arith.cmpi sge, %0, %3 : vector<128x8xi32>
    %c1_i32 = arith.constant 1 : i32
    %5 = vector.broadcast %c1_i32 : i32 to vector<128x8xi32>
    %6 = arith.addi %1, %5 : vector<128x8xi32>
    %c16_i32_0 = arith.constant 16 : i32
    %7 = vector.broadcast %c16_i32_0 : i32 to vector<128x8xi32>
    %8 = arith.muli %6, %7 : vector<128x8xi32>
    %9 = arith.cmpi slt, %0, %8 : vector<128x8xi32>
    %10 = arith.andi %4, %9 : vector<128x8xi1>
    %11 = arith.extui %10 : vector<128x8xi1> to vector<128x8xi32>
    %12 = arith.sitofp %11 : vector<128x8xi32> to vector<128x8xf32>
    %13 = tpu.iota {dimensions = array<i32: 0>} : vector<8x128xi32>
    %14 = tpu.iota {dimensions = array<i32: 1>} : vector<8x128xi32>
    %c16_i32_1 = arith.constant 16 : i32
    %15 = vector.broadcast %c16_i32_1 : i32 to vector<8x128xi32>
    %16 = arith.muli %13, %15 : vector<8x128xi32>
    %17 = arith.cmpi sge, %14, %16 : vector<8x128xi32>
    %c1_i32_2 = arith.constant 1 : i32
    %18 = vector.broadcast %c1_i32_2 : i32 to vector<8x128xi32>
    %19 = arith.addi %13, %18 : vector<8x128xi32>
    %c16_i32_3 = arith.constant 16 : i32
    %20 = vector.broadcast %c16_i32_3 : i32 to vector<8x128xi32>
    %21 = arith.muli %19, %20 : vector<8x128xi32>
    %22 = arith.cmpi slt, %14, %21 : vector<8x128xi32>
    %23 = arith.andi %17, %22 : vector<8x128xi1>
    %24 = arith.extui %23 : vector<8x128xi1> to vector<8x128xi32>
    %25 = arith.sitofp %24 : vector<8x128xi32> to vector<8x128xf32>
    %cst = arith.constant 0.000000e+00 : f32
    %26 = vector.broadcast %cst : f32 to vector<1x128xf32>
    %c0_i32 = arith.constant 0 : i32
    %c64_i32 = arith.constant 64 : i32
    %27 = arith.muli %c0_i32, %c64_i32 : i32
    %28 = tpu.assume_multiple %27, 64 : i32
    %c0 = arith.constant 0 : index
    %29 = arith.index_cast %28 : i32 to index
    %c0_4 = arith.constant 0 : index
    %30 = vector.load %arg1[%c0, %29, %c0_4] : memref<2x64x128xf32, #tpu.memory_space<vmem>>, vector<1x64x128xf32>
    %31 = vector.shape_cast %30 : vector<1x64x128xf32> to vector<64x128xf32>
    %cst_5 = arith.constant dense<0.000000e+00> : vector<128xf32>
    %32 = vector.multi_reduction <add>, %31, %cst_5 [0] : vector<64x128xf32> to vector<128xf32>
    %33 = vector.shape_cast %32 : vector<128xf32> to vector<1x128xf32>
    %34 = arith.addf %26, %33 : vector<1x128xf32>
    %c1_i32_6 = arith.constant 1 : i32
    %cst_7 = arith.constant 1.250000e-01 : f32
    %35 = vector.broadcast %cst_7 : f32 to vector<1x128xf32>
    %36 = arith.mulf %34, %35 : vector<1x128xf32>
    %37 = arith.mulf %36, %36 : vector<1x128xf32>
    %cst_8 = arith.constant dense<0.000000e+00> : vector<1x8xf32>
    %38 = tpu.matmul %37, %12, %cst_8 {dimension_numbers = #tpu.dot_dimension_numbers<[1], [0], [0], [1], [0, 0, 1, 1], [], []>, precision = #tpu.contract_precision<fp32>} : vector<1x128xf32>, vector<128x8xf32>, vector<1x8xf32> -> vector<1x8xf32>
    %cst_9 = arith.constant dense<0.000000e+00> : vector<1x128xf32>
    %39 = tpu.matmul %38, %25, %cst_9 {dimension_numbers = #tpu.dot_dimension_numbers<[1], [0], [0], [1], [0, 0, 1, 1], [], []>, precision = #tpu.contract_precision<fp32>} : vector<1x8xf32>, vector<8x128xf32>, vector<1x128xf32> -> vector<1x128xf32>
    %cst_10 = arith.constant 9.99999997E-7 : f32
    %40 = vector.broadcast %cst_10 : f32 to vector<1x128xf32>
    %41 = arith.addf %39, %40 : vector<1x128xf32>
    %42 = math.rsqrt %41 : vector<1x128xf32>
    %43 = arith.mulf %39, %42 : vector<1x128xf32>
    %cst_11 = arith.constant 1.000000e+00 : f32
    %44 = vector.broadcast %cst_11 : f32 to vector<1x128xf32>
    %45 = arith.addf %44, %39 : vector<1x128xf32>
    %46 = arith.divf %43, %45 : vector<1x128xf32>
    %47 = arith.mulf %36, %46 : vector<1x128xf32>
    %cst_12 = arith.constant 0.000000e+00 : f32
    %48 = vector.broadcast %cst_12 : f32 to vector<1x128xf32>
    %c0_i32_13 = arith.constant 0 : i32
    %c64_i32_14 = arith.constant 64 : i32
    %49 = arith.muli %c0_i32_13, %c64_i32_14 : i32
    %50 = tpu.assume_multiple %49, 64 : i32
    %c0_15 = arith.constant 0 : index
    %51 = arith.index_cast %50 : i32 to index
    %c0_16 = arith.constant 0 : index
    %52 = vector.load %arg1[%c0_15, %51, %c0_16] : memref<2x64x128xf32, #tpu.memory_space<vmem>>, vector<1x64x128xf32>
    %53 = vector.shape_cast %52 : vector<1x64x128xf32> to vector<64x128xf32>
    %54 = vector.broadcast %47 : vector<1x128xf32> to vector<64x128xf32>
    %55 = arith.mulf %53, %54 : vector<64x128xf32>
    %cst_17 = arith.constant dense<0.000000e+00> : vector<64x8xf32>
    %56 = tpu.matmul %55, %12, %cst_17 {dimension_numbers = #tpu.dot_dimension_numbers<[1], [0], [0], [1], [0, 0, 1, 1], [], []>, precision = #tpu.contract_precision<fp32>} : vector<64x128xf32>, vector<128x8xf32>, vector<64x8xf32> -> vector<64x8xf32>
    %c0_18 = arith.constant 0 : index
    %57 = arith.index_cast %50 : i32 to index
    %c0_19 = arith.constant 0 : index
    %58 = vector.load %arg3[%c0_18, %57, %c0_19] : memref<2x64x8xf32, #tpu.memory_space<vmem>>, vector<1x64x8xf32>
    %59 = vector.shape_cast %58 : vector<1x64x8xf32> to vector<64x8xf32>
    %60 = vector.shape_cast %56 : vector<64x8xf32> to vector<1x64x8xf32>
    tpu.vector_store %arg3[%c0_18, %57, %c0_19], %60 {strides = array<i32>} : memref<2x64x8xf32, #tpu.memory_space<vmem>>, vector<1x64x8xf32>,
    %cst_20 = arith.constant dense<0xFF800000> : vector<64xf32>
    %61 = vector.multi_reduction <maximumf>, %56, %cst_20 [1] : vector<64x8xf32> to vector<64xf32>
    %62 = vector.shape_cast %61 : vector<64xf32> to vector<64x1xf32>
    %63 = vector.broadcast %62 : vector<64x1xf32> to vector<64x8xf32>
    %64 = arith.subf %56, %63 : vector<64x8xf32>
    %65 = math.exp %64 : vector<64x8xf32>
    %cst_21 = arith.constant dense<0.000000e+00> : vector<64xf32>
    %66 = vector.multi_reduction <add>, %65, %cst_21 [1] : vector<64x8xf32> to vector<64xf32>
    %67 = vector.shape_cast %66 : vector<64xf32> to vector<64x1xf32>
    %68 = vector.broadcast %67 : vector<64x1xf32> to vector<64x8xf32>
    %69 = arith.divf %65, %68 : vector<64x8xf32>
    %cst_22 = arith.constant dense<0.000000e+00> : vector<64x128xf32>
    %70 = tpu.matmul %69, %25, %cst_22 {dimension_numbers = #tpu.dot_dimension_numbers<[1], [0], [0], [1], [0, 0, 1, 1], [], []>, precision = #tpu.contract_precision<fp32>} : vector<64x8xf32>, vector<8x128xf32>, vector<64x128xf32> -> vector<64x128xf32>
    %71 = arith.mulf %70, %53 : vector<64x128xf32>
    %cst_23 = arith.constant dense<0.000000e+00> : vector<128xf32>
    %72 = vector.multi_reduction <add>, %71, %cst_23 [0] : vector<64x128xf32> to vector<128xf32>
    %73 = vector.shape_cast %72 : vector<128xf32> to vector<1x128xf32>
    %74 = arith.addf %48, %73 : vector<1x128xf32>
    %c1_i32_24 = arith.constant 1 : i32
    %75 = arith.mulf %74, %74 : vector<1x128xf32>
    %cst_25 = arith.constant dense<0.000000e+00> : vector<1x8xf32>
    %76 = tpu.matmul %75, %12, %cst_25 {dimension_numbers = #tpu.dot_dimension_numbers<[1], [0], [0], [1], [0, 0, 1, 1], [], []>, precision = #tpu.contract_precision<fp32>} : vector<1x128xf32>, vector<128x8xf32>, vector<1x8xf32> -> vector<1x8xf32>
    %cst_26 = arith.constant dense<0.000000e+00> : vector<1x128xf32>
    %77 = tpu.matmul %76, %25, %cst_26 {dimension_numbers = #tpu.dot_dimension_numbers<[1], [0], [0], [1], [0, 0, 1, 1], [], []>, precision = #tpu.contract_precision<fp32>} : vector<1x8xf32>, vector<8x128xf32>, vector<1x128xf32> -> vector<1x128xf32>
    %cst_27 = arith.constant 9.99999997E-7 : f32
    %78 = vector.broadcast %cst_27 : f32 to vector<1x128xf32>
    %79 = arith.addf %77, %78 : vector<1x128xf32>
    %80 = math.rsqrt %79 : vector<1x128xf32>
    %81 = arith.mulf %77, %80 : vector<1x128xf32>
    %cst_28 = arith.constant 1.000000e+00 : f32
    %82 = vector.broadcast %cst_28 : f32 to vector<1x128xf32>
    %83 = arith.addf %82, %77 : vector<1x128xf32>
    %84 = arith.divf %81, %83 : vector<1x128xf32>
    %85 = arith.mulf %74, %84 : vector<1x128xf32>
    %cst_29 = arith.constant 0.000000e+00 : f32
    %86 = vector.broadcast %cst_29 : f32 to vector<1x128xf32>
    %c0_i32_30 = arith.constant 0 : i32
    %c64_i32_31 = arith.constant 64 : i32
    %87 = arith.muli %c0_i32_30, %c64_i32_31 : i32
    %88 = tpu.assume_multiple %87, 64 : i32
    %c0_32 = arith.constant 0 : index
    %89 = arith.index_cast %88 : i32 to index
    %c0_33 = arith.constant 0 : index
    %90 = vector.load %arg1[%c0_32, %89, %c0_33] : memref<2x64x128xf32, #tpu.memory_space<vmem>>, vector<1x64x128xf32>
    %91 = vector.shape_cast %90 : vector<1x64x128xf32> to vector<64x128xf32>
    %92 = vector.broadcast %85 : vector<1x128xf32> to vector<64x128xf32>
    %93 = arith.mulf %91, %92 : vector<64x128xf32>
    %cst_34 = arith.constant dense<0.000000e+00> : vector<64x8xf32>
    %94 = tpu.matmul %93, %12, %cst_34 {dimension_numbers = #tpu.dot_dimension_numbers<[1], [0], [0], [1], [0, 0, 1, 1], [], []>, precision = #tpu.contract_precision<fp32>} : vector<64x128xf32>, vector<128x8xf32>, vector<64x8xf32> -> vector<64x8xf32>
    %c0_35 = arith.constant 0 : index
    %95 = arith.index_cast %88 : i32 to index
    %c0_36 = arith.constant 0 : index
    %96 = vector.load %arg3[%c0_35, %95, %c0_36] : memref<2x64x8xf32, #tpu.memory_space<vmem>>, vector<1x64x8xf32>
    %97 = vector.shape_cast %96 : vector<1x64x8xf32> to vector<64x8xf32>
    %98 = arith.addf %97, %94 : vector<64x8xf32>
    %cst_37 = arith.constant dense<0xFF800000> : vector<64xf32>
    %99 = vector.multi_reduction <maximumf>, %98, %cst_37 [1] : vector<64x8xf32> to vector<64xf32>
    %100 = vector.shape_cast %99 : vector<64xf32> to vector<64x1xf32>
    %101 = vector.broadcast %100 : vector<64x1xf32> to vector<64x8xf32>
    %102 = arith.subf %98, %101 : vector<64x8xf32>
    %103 = math.exp %102 : vector<64x8xf32>
    %cst_38 = arith.constant dense<0.000000e+00> : vector<64xf32>
    %104 = vector.multi_reduction <add>, %103, %cst_38 [1] : vector<64x8xf32> to vector<64xf32>
    %105 = vector.shape_cast %104 : vector<64xf32> to vector<64x1xf32>
    %106 = vector.broadcast %105 : vector<64x1xf32> to vector<64x8xf32>
    %107 = arith.divf %103, %106 : vector<64x8xf32>
    %cst_39 = arith.constant dense<0.000000e+00> : vector<64x128xf32>
    %108 = tpu.matmul %107, %25, %cst_39 {dimension_numbers = #tpu.dot_dimension_numbers<[1], [0], [0], [1], [0, 0, 1, 1], [], []>, precision = #tpu.contract_precision<fp32>} : vector<64x8xf32>, vector<8x128xf32>, vector<64x128xf32> -> vector<64x128xf32>
    %109 = arith.mulf %108, %91 : vector<64x128xf32>
    %cst_40 = arith.constant dense<0.000000e+00> : vector<128xf32>
    %110 = vector.multi_reduction <add>, %109, %cst_40 [0] : vector<64x128xf32> to vector<128xf32>
    %111 = vector.shape_cast %110 : vector<128xf32> to vector<1x128xf32>
    %112 = arith.addf %86, %111 : vector<1x128xf32>
    %c1_i32_41 = arith.constant 1 : i32
    %113 = arith.mulf %112, %112 : vector<1x128xf32>
    %cst_42 = arith.constant dense<0.000000e+00> : vector<1x8xf32>
    %114 = tpu.matmul %113, %12, %cst_42 {dimension_numbers = #tpu.dot_dimension_numbers<[1], [0], [0], [1], [0, 0, 1, 1], [], []>, precision = #tpu.contract_precision<fp32>} : vector<1x128xf32>, vector<128x8xf32>, vector<1x8xf32> -> vector<1x8xf32>
    %cst_43 = arith.constant dense<0.000000e+00> : vector<1x128xf32>
    %115 = tpu.matmul %114, %25, %cst_43 {dimension_numbers = #tpu.dot_dimension_numbers<[1], [0], [0], [1], [0, 0, 1, 1], [], []>, precision = #tpu.contract_precision<fp32>} : vector<1x8xf32>, vector<8x128xf32>, vector<1x128xf32> -> vector<1x128xf32>
    %cst_44 = arith.constant 9.99999997E-7 : f32
    %116 = vector.broadcast %cst_44 : f32 to vector<1x128xf32>
    %117 = arith.addf %115, %116 : vector<1x128xf32>
    %118 = math.rsqrt %117 : vector<1x128xf32>
    %119 = arith.mulf %115, %118 : vector<1x128xf32>
    %cst_45 = arith.constant 1.000000e+00 : f32
    %120 = vector.broadcast %cst_45 : f32 to vector<1x128xf32>
    %121 = arith.addf %120, %115 : vector<1x128xf32>
    %122 = arith.divf %119, %121 : vector<1x128xf32>
    %123 = arith.mulf %112, %122 : vector<1x128xf32>
    %c0_46 = arith.constant 0 : index
    %c0_47 = arith.constant 0 : index
    %c0_48 = arith.constant 0 : index
    %124 = vector.load %arg2[%c0_46, %c0_47, %c0_48] : memref<2x1x128xf32, #tpu.memory_space<vmem>>, vector<1x1x128xf32>
    %125 = vector.shape_cast %124 : vector<1x1x128xf32> to vector<1x128xf32>
    %126 = vector.shape_cast %123 : vector<1x128xf32> to vector<1x1x128xf32>
    tpu.vector_store %arg2[%c0_46, %c0_47, %c0_48], %126 {strides = array<i32>} : memref<2x1x128xf32, #tpu.memory_space<vmem>>, vector<1x1x128xf32>,
    %cst_49 = arith.constant 0.000000e+00 : f32
    %127 = vector.broadcast %cst_49 : f32 to vector<1x128xf32>
    %c0_i32_50 = arith.constant 0 : i32
    %c64_i32_51 = arith.constant 64 : i32
    %128 = arith.muli %c0_i32_50, %c64_i32_51 : i32
    %129 = tpu.assume_multiple %128, 64 : i32
    %c1 = arith.constant 1 : index
    %130 = arith.index_cast %129 : i32 to index
    %c0_52 = arith.constant 0 : index
    %131 = vector.load %arg1[%c1, %130, %c0_52] : memref<2x64x128xf32, #tpu.memory_space<vmem>>, vector<1x64x128xf32>
    %132 = vector.shape_cast %131 : vector<1x64x128xf32> to vector<64x128xf32>
    %cst_53 = arith.constant dense<0.000000e+00> : vector<128xf32>
    %133 = vector.multi_reduction <add>, %132, %cst_53 [0] : vector<64x128xf32> to vector<128xf32>
    %134 = vector.shape_cast %133 : vector<128xf32> to vector<1x128xf32>
    %135 = arith.addf %127, %134 : vector<1x128xf32>
    %c1_i32_54 = arith.constant 1 : i32
    %cst_55 = arith.constant 1.250000e-01 : f32
    %136 = vector.broadcast %cst_55 : f32 to vector<1x128xf32>
    %137 = arith.mulf %135, %136 : vector<1x128xf32>
    %138 = arith.mulf %137, %137 : vector<1x128xf32>
    %cst_56 = arith.constant dense<0.000000e+00> : vector<1x8xf32>
    %139 = tpu.matmul %138, %12, %cst_56 {dimension_numbers = #tpu.dot_dimension_numbers<[1], [0], [0], [1], [0, 0, 1, 1], [], []>, precision = #tpu.contract_precision<fp32>} : vector<1x128xf32>, vector<128x8xf32>, vector<1x8xf32> -> vector<1x8xf32>
    %cst_57 = arith.constant dense<0.000000e+00> : vector<1x128xf32>
    %140 = tpu.matmul %139, %25, %cst_57 {dimension_numbers = #tpu.dot_dimension_numbers<[1], [0], [0], [1], [0, 0, 1, 1], [], []>, precision = #tpu.contract_precision<fp32>} : vector<1x8xf32>, vector<8x128xf32>, vector<1x128xf32> -> vector<1x128xf32>
    %cst_58 = arith.constant 9.99999997E-7 : f32
    %141 = vector.broadcast %cst_58 : f32 to vector<1x128xf32>
    %142 = arith.addf %140, %141 : vector<1x128xf32>
    %143 = math.rsqrt %142 : vector<1x128xf32>
    %144 = arith.mulf %140, %143 : vector<1x128xf32>
    %cst_59 = arith.constant 1.000000e+00 : f32
    %145 = vector.broadcast %cst_59 : f32 to vector<1x128xf32>
    %146 = arith.addf %145, %140 : vector<1x128xf32>
    %147 = arith.divf %144, %146 : vector<1x128xf32>
    %148 = arith.mulf %137, %147 : vector<1x128xf32>
    %cst_60 = arith.constant 0.000000e+00 : f32
    %149 = vector.broadcast %cst_60 : f32 to vector<1x128xf32>
    %c0_i32_61 = arith.constant 0 : i32
    %c64_i32_62 = arith.constant 64 : i32
    %150 = arith.muli %c0_i32_61, %c64_i32_62 : i32
    %151 = tpu.assume_multiple %150, 64 : i32
    %c1_63 = arith.constant 1 : index
    %152 = arith.index_cast %151 : i32 to index
    %c0_64 = arith.constant 0 : index
    %153 = vector.load %arg1[%c1_63, %152, %c0_64] : memref<2x64x128xf32, #tpu.memory_space<vmem>>, vector<1x64x128xf32>
    %154 = vector.shape_cast %153 : vector<1x64x128xf32> to vector<64x128xf32>
    %155 = vector.broadcast %148 : vector<1x128xf32> to vector<64x128xf32>
    %156 = arith.mulf %154, %155 : vector<64x128xf32>
    %cst_65 = arith.constant dense<0.000000e+00> : vector<64x8xf32>
    %157 = tpu.matmul %156, %12, %cst_65 {dimension_numbers = #tpu.dot_dimension_numbers<[1], [0], [0], [1], [0, 0, 1, 1], [], []>, precision = #tpu.contract_precision<fp32>} : vector<64x128xf32>, vector<128x8xf32>, vector<64x8xf32> -> vector<64x8xf32>
    %c1_66 = arith.constant 1 : index
    %158 = arith.index_cast %151 : i32 to index
    %c0_67 = arith.constant 0 : index
    %159 = vector.load %arg3[%c1_66, %158, %c0_67] : memref<2x64x8xf32, #tpu.memory_space<vmem>>, vector<1x64x8xf32>
    %160 = vector.shape_cast %159 : vector<1x64x8xf32> to vector<64x8xf32>
    %161 = vector.shape_cast %157 : vector<64x8xf32> to vector<1x64x8xf32>
    tpu.vector_store %arg3[%c1_66, %158, %c0_67], %161 {strides = array<i32>} : memref<2x64x8xf32, #tpu.memory_space<vmem>>, vector<1x64x8xf32>,
    %cst_68 = arith.constant dense<0xFF800000> : vector<64xf32>
    %162 = vector.multi_reduction <maximumf>, %157, %cst_68 [1] : vector<64x8xf32> to vector<64xf32>
    %163 = vector.shape_cast %162 : vector<64xf32> to vector<64x1xf32>
    %164 = vector.broadcast %163 : vector<64x1xf32> to vector<64x8xf32>
    %165 = arith.subf %157, %164 : vector<64x8xf32>
    %166 = math.exp %165 : vector<64x8xf32>
    %cst_69 = arith.constant dense<0.000000e+00> : vector<64xf32>
    %167 = vector.multi_reduction <add>, %166, %cst_69 [1] : vector<64x8xf32> to vector<64xf32>
    %168 = vector.shape_cast %167 : vector<64xf32> to vector<64x1xf32>
    %169 = vector.broadcast %168 : vector<64x1xf32> to vector<64x8xf32>
    %170 = arith.divf %166, %169 : vector<64x8xf32>
    %cst_70 = arith.constant dense<0.000000e+00> : vector<64x128xf32>
    %171 = tpu.matmul %170, %25, %cst_70 {dimension_numbers = #tpu.dot_dimension_numbers<[1], [0], [0], [1], [0, 0, 1, 1], [], []>, precision = #tpu.contract_precision<fp32>} : vector<64x8xf32>, vector<8x128xf32>, vector<64x128xf32> -> vector<64x128xf32>
    %172 = arith.mulf %171, %154 : vector<64x128xf32>
    %cst_71 = arith.constant dense<0.000000e+00> : vector<128xf32>
    %173 = vector.multi_reduction <add>, %172, %cst_71 [0] : vector<64x128xf32> to vector<128xf32>
    %174 = vector.shape_cast %173 : vector<128xf32> to vector<1x128xf32>
    %175 = arith.addf %149, %174 : vector<1x128xf32>
    %c1_i32_72 = arith.constant 1 : i32
    %176 = arith.mulf %175, %175 : vector<1x128xf32>
    %cst_73 = arith.constant dense<0.000000e+00> : vector<1x8xf32>
    %177 = tpu.matmul %176, %12, %cst_73 {dimension_numbers = #tpu.dot_dimension_numbers<[1], [0], [0], [1], [0, 0, 1, 1], [], []>, precision = #tpu.contract_precision<fp32>} : vector<1x128xf32>, vector<128x8xf32>, vector<1x8xf32> -> vector<1x8xf32>
    %cst_74 = arith.constant dense<0.000000e+00> : vector<1x128xf32>
    %178 = tpu.matmul %177, %25, %cst_74 {dimension_numbers = #tpu.dot_dimension_numbers<[1], [0], [0], [1], [0, 0, 1, 1], [], []>, precision = #tpu.contract_precision<fp32>} : vector<1x8xf32>, vector<8x128xf32>, vector<1x128xf32> -> vector<1x128xf32>
    %cst_75 = arith.constant 9.99999997E-7 : f32
    %179 = vector.broadcast %cst_75 : f32 to vector<1x128xf32>
    %180 = arith.addf %178, %179 : vector<1x128xf32>
    %181 = math.rsqrt %180 : vector<1x128xf32>
    %182 = arith.mulf %178, %181 : vector<1x128xf32>
    %cst_76 = arith.constant 1.000000e+00 : f32
    %183 = vector.broadcast %cst_76 : f32 to vector<1x128xf32>
    %184 = arith.addf %183, %178 : vector<1x128xf32>
    %185 = arith.divf %182, %184 : vector<1x128xf32>
    %186 = arith.mulf %175, %185 : vector<1x128xf32>
    %cst_77 = arith.constant 0.000000e+00 : f32
    %187 = vector.broadcast %cst_77 : f32 to vector<1x128xf32>
    %c0_i32_78 = arith.constant 0 : i32
    %c64_i32_79 = arith.constant 64 : i32
    %188 = arith.muli %c0_i32_78, %c64_i32_79 : i32
    %189 = tpu.assume_multiple %188, 64 : i32
    %c1_80 = arith.constant 1 : index
    %190 = arith.index_cast %189 : i32 to index
    %c0_81 = arith.constant 0 : index
    %191 = vector.load %arg1[%c1_80, %190, %c0_81] : memref<2x64x128xf32, #tpu.memory_space<vmem>>, vector<1x64x128xf32>
    %192 = vector.shape_cast %191 : vector<1x64x128xf32> to vector<64x128xf32>
    %193 = vector.broadcast %186 : vector<1x128xf32> to vector<64x128xf32>
    %194 = arith.mulf %192, %193 : vector<64x128xf32>
    %cst_82 = arith.constant dense<0.000000e+00> : vector<64x8xf32>
    %195 = tpu.matmul %194, %12, %cst_82 {dimension_numbers = #tpu.dot_dimension_numbers<[1], [0], [0], [1], [0, 0, 1, 1], [], []>, precision = #tpu.contract_precision<fp32>} : vector<64x128xf32>, vector<128x8xf32>, vector<64x8xf32> -> vector<64x8xf32>
    %c1_83 = arith.constant 1 : index
    %196 = arith.index_cast %189 : i32 to index
    %c0_84 = arith.constant 0 : index
    %197 = vector.load %arg3[%c1_83, %196, %c0_84] : memref<2x64x8xf32, #tpu.memory_space<vmem>>, vector<1x64x8xf32>
    %198 = vector.shape_cast %197 : vector<1x64x8xf32> to vector<64x8xf32>
    %199 = arith.addf %198, %195 : vector<64x8xf32>
    %cst_85 = arith.constant dense<0xFF800000> : vector<64xf32>
    %200 = vector.multi_reduction <maximumf>, %199, %cst_85 [1] : vector<64x8xf32> to vector<64xf32>
    %201 = vector.shape_cast %200 : vector<64xf32> to vector<64x1xf32>
    %202 = vector.broadcast %201 : vector<64x1xf32> to vector<64x8xf32>
    %203 = arith.subf %199, %202 : vector<64x8xf32>
    %204 = math.exp %203 : vector<64x8xf32>
    %cst_86 = arith.constant dense<0.000000e+00> : vector<64xf32>
    %205 = vector.multi_reduction <add>, %204, %cst_86 [1] : vector<64x8xf32> to vector<64xf32>
    %206 = vector.shape_cast %205 : vector<64xf32> to vector<64x1xf32>
    %207 = vector.broadcast %206 : vector<64x1xf32> to vector<64x8xf32>
    %208 = arith.divf %204, %207 : vector<64x8xf32>
    %cst_87 = arith.constant dense<0.000000e+00> : vector<64x128xf32>
    %209 = tpu.matmul %208, %25, %cst_87 {dimension_numbers = #tpu.dot_dimension_numbers<[1], [0], [0], [1], [0, 0, 1, 1], [], []>, precision = #tpu.contract_precision<fp32>} : vector<64x8xf32>, vector<8x128xf32>, vector<64x128xf32> -> vector<64x128xf32>
    %210 = arith.mulf %209, %192 : vector<64x128xf32>
    %cst_88 = arith.constant dense<0.000000e+00> : vector<128xf32>
    %211 = vector.multi_reduction <add>, %210, %cst_88 [0] : vector<64x128xf32> to vector<128xf32>
    %212 = vector.shape_cast %211 : vector<128xf32> to vector<1x128xf32>
    %213 = arith.addf %187, %212 : vector<1x128xf32>
    %c1_i32_89 = arith.constant 1 : i32
    %214 = arith.mulf %213, %213 : vector<1x128xf32>
    %cst_90 = arith.constant dense<0.000000e+00> : vector<1x8xf32>
    %215 = tpu.matmul %214, %12, %cst_90 {dimension_numbers = #tpu.dot_dimension_numbers<[1], [0], [0], [1], [0, 0, 1, 1], [], []>, precision = #tpu.contract_precision<fp32>} : vector<1x128xf32>, vector<128x8xf32>, vector<1x8xf32> -> vector<1x8xf32>
    %cst_91 = arith.constant dense<0.000000e+00> : vector<1x128xf32>
    %216 = tpu.matmul %215, %25, %cst_91 {dimension_numbers = #tpu.dot_dimension_numbers<[1], [0], [0], [1], [0, 0, 1, 1], [], []>, precision = #tpu.contract_precision<fp32>} : vector<1x8xf32>, vector<8x128xf32>, vector<1x128xf32> -> vector<1x128xf32>
    %cst_92 = arith.constant 9.99999997E-7 : f32
    %217 = vector.broadcast %cst_92 : f32 to vector<1x128xf32>
    %218 = arith.addf %216, %217 : vector<1x128xf32>
    %219 = math.rsqrt %218 : vector<1x128xf32>
    %220 = arith.mulf %216, %219 : vector<1x128xf32>
    %cst_93 = arith.constant 1.000000e+00 : f32
    %221 = vector.broadcast %cst_93 : f32 to vector<1x128xf32>
    %222 = arith.addf %221, %216 : vector<1x128xf32>
    %223 = arith.divf %220, %222 : vector<1x128xf32>
    %224 = arith.mulf %213, %223 : vector<1x128xf32>
    %c1_94 = arith.constant 1 : index
    %c0_95 = arith.constant 0 : index
    %c0_96 = arith.constant 0 : index
    %225 = vector.load %arg2[%c1_94, %c0_95, %c0_96] : memref<2x1x128xf32, #tpu.memory_space<vmem>>, vector<1x1x128xf32>
    %226 = vector.shape_cast %225 : vector<1x1x128xf32> to vector<1x128xf32>
    %227 = vector.shape_cast %224 : vector<1x128xf32> to vector<1x1x128xf32>
    tpu.vector_store %arg2[%c1_94, %c0_95, %c0_96], %227 {strides = array<i32>} : memref<2x1x128xf32, #tpu.memory_space<vmem>>, vector<1x1x128xf32>,
    return
  }
  func.func @transform_0(%arg0: i32) -> (i32, i32, i32) {
    %c0_i32 = arith.constant 0 : i32
    %c0_i32_0 = arith.constant 0 : i32
    %c0_i32_1 = arith.constant 0 : i32
    return %arg0, %c0_i32, %c0_i32_0 : i32, i32, i32
  }
  func.func @transform_1(%arg0: i32) -> (i32, i32, i32) {
    %c0_i32 = arith.constant 0 : i32
    %c0_i32_0 = arith.constant 0 : i32
    %c0_i32_1 = arith.constant 0 : i32
    return %arg0, %c0_i32, %c0_i32_0 : i32, i32, i32
  }
}

</mosaic_0001>

<bundles_post_ra>
// kernel: tpu_custom_call.1
= control target key start
LH: loop header
LB: loop body
LE: loop exit
PB: predicated region body
PF: predicated region fallthrough
CT: control target
= control target key end

     0   :  { %6 = vsyncpa [#allocation4], 0  ;;  %s12768_s0 = inlined_call_operand.hbm [shape: f32[4,64,128], index: 0, kind: input, shape index: {}]   ;;  %s12769_s1 = inlined_call_operand.hbm [shape: f32[4,1,128], index: 1, kind: output, shape index: {}]  }
   0x1   :  { %8 = vsyncpa [#allocation4 + $0x1], 0 }
   0x2   :  { %9 = vsyncpa [#allocation5], 0 }
   0x3   :  { %11 = vsyncpa [#allocation5 + $0x1], 0  ;;  %s9159_s6 = smov 0   ;;  %s9161_s7 = smov 0  }
   0x4   :  { %s9163_s8 = smov 0   ;;  %s9165_s9 = smov 0  }
   0x5 LB: > { %s9180_s10 = sadd.s32 4294967295, %s9141_s9   ;;  %s8249_s11 = sadd.s32 4294967294, %s9141_s9   ;;  %s9141_s9 = sphi %s9165_s9, %s13723_s9   ;;  %s9137_s8 = sphi %s9163_s8, %s13722_s8   ;;  %s9133_s7 = sphi %s9161_s7, %s13721_s7   ;;  %s9129_s6 = sphi %s9159_s6, %s13720_s6  }
   0x6   : > { %s9184_s12 = sadd.s32 1, %s9141_s9   ;;  %s24_s13 = sadd.s32 1, %s9137_s8 }
   0x7   : > { %s21_s14 = ssub.s32 %s9141_s9, %s9184_s12  ;;  %p31_p0 = scmp.ne.s32.totalorder %s9137_s8, %s9133_s7 }
   0x8   : > { %p22_p1 = scmp.eq.s32.totalorder %s21_s14, 0  ;;  %p32_p2 = scmp.eq.s32.totalorder %s9141_s9, 0 }
   0x9   : > { %p37_p3 = scmp.ne.s32.totalorder %s9133_s7, %s9129_s6  ;;  %p38_p4 = scmp.eq.s32.totalorder %s9180_s10, 0 }
   0xa   : > { %s9196_s15 = scalar_select %p22_p1, %s9137_s8, %s24_s13  }
   0xb   : > { %p9198_p5 = por %p32_p2, %p31_p0  ;;  %p9202_p6 = por %p38_p4, %p37_p3 }
   0xc   : > { %p61_p7 = scmp.eq.s32.totalorder %s9180_s10, 1  ;;  %p67_p8 = scmp.eq.s32.totalorder %s8249_s11, 1 }
   0xd   : > { %p8821_p10 = scmp.lt.s32.totalorder %s9141_s9, 2  ;;  %s87_s20 = sand.u32 1, %s9137_s8  }
   0xe   : > { %p9209_p11 = por %p61_p7, %p31_p0  ;;  %p9213_p12 = por %p67_p8, %p37_p3 }
   0xf   : > { %s8808_s21 = sshll.u32 %s9141_s9, 7  ;;  %s8252_s22 = sshll.u32 %s87_s20, 7 }
  0x10   : > { %s97_s25 = scalar_lea.hbm %s12768_s0, %s8808_s21  ;;  %s91_s27 = scalar_lea.vmem [#allocation3], %s8252_s22 }
  0x11   : > { %s98_s26 = sshll.u32 %s97_s25, 4  ;;  %s100_s28 = sshll.u32 %s91_s27, 4  ;;  %s99_s26 = int_to_ptr.hbm [resolvable:$true] %s98_s26  ;;  %s101_s28 = int_to_ptr.vmem [resolvable:$true] %s100_s28 }
  0x12   : > { %p9224_p13 = pnand %p8821_p10, %p9198_p5  ;;  %p8256_p0 = scmp.ge.s32.totalorder %s9141_s9, 1 }
  0x13   : > { %p108_p1 = scmp.lt.s32.totalorder %s9141_s9, 3  ;;  %s88_s30 = scalar_lea.sflag [#allocation4], %s87_s20 }
  0x14   : > { %s9045_s2 = sshra.s32 %s99_s26, 4  ;;  %p9049_p3 = pneg %p9224_p13  ;;  %s9046_s2 = int_to_ptr.hbm [resolvable:$true] %s9045_s2 }
  0x15   : > { %s9047_s3 = scalar_lea.hbm %s9046_s2, 128  ;;  %s9052_s11 = scalar_lea.hbm %s12768_s0, 256 }
  0x16   : > { %p9048_p2 = scmp.ne.s32.totalorder %s9046_s2, %s9047_s3  ;;  %p9053_p5 = scmp.lt.s32.totalorder %s9046_s2, %s12768_s0 }
  0x17   : > { %p9054_p8 = scmp.lt.s32.totalorder %s9052_s11, %s9047_s3 }
  0x18   : > { %p9050_p4 = pnand %p9049_p3, %p9048_p2 }
  0x19   : > { %p9055_p10 = por %p9054_p8, %p9053_p5 }
  0x1a   : > { %p9051_p7 = pneg %p9050_p4 }
  0x1c   : > { %p9056_p9 = pnand %p9055_p10, %p9051_p7 }
  0x1e   : > { %9059 = shalt.err (!%p9056_p9)
}
  0x1f   : > { %s9143_s16 = smov 128   ;;  %s9144_s20 = smov 8  }
  0x20   : > { %8816 = dma.hbm_to_vmem [thread:$0]  (!%p9224_p13), %s99_s26, 2048, %s101_s28, %s88_s30, %s9143_s16, %s9143_s16, %s9144_s20  }
  0x21   : > { %p109_p2 = pnand %p8256_p0, %p108_p1 }
  0x23   : > { %112 = sbr.rel (%p109_p2) target bundleno = 5066 (0x13ca), region = 24 }
  0x28   : > { %s9245_s21 = sand.u32 1, %s9133_s7   ;;  %v140_v0 = vlaneseq }
  0x29   : > { %s8257_s22 = sshll.u32 %s9245_s21, 7  ;;  %s115_s23 = scalar_lea.sflag [#allocation4], %s9245_s21 }
  0x2a   : > { %s9249_s24 = scalar_lea.vmem [#allocation3], %s8257_s22 }
  0x2b   : > { %9120 = dma.done.wait (%p9202_p6), %s115_s23, 2048  }
  0x2c   : > { %9122 = vsyncadd (%p9202_p6), %s115_s23, 4294965248  ;;  %v9255_v1 = vshrl.u32 %v140_v0, 7  ;;  %v9257_v2 = vand.u32 127, %v140_v0  ;;  %v13093_v13 = vmov 0  ;;  %v12780_v14 = vmov 1.0   ;;  %s8258_s17 = sshll.u32 %s9245_s21, 1 }
  0x2d   : > { %v12785_v16 = vmov 0.0   ;;  %v13108_v34 = vmov 0  ;;  %v13113_v39 = vmov 0  ;;  %v13121_v49 = vmov 0  ;;  %s11482_s25 = scalar_lea.vmem [#allocation6], %s8258_s17  ;;  %s8804_s26 = sshll.u32 %s9180_s10, 1 }
  0x2e   : > { %v156_v3 = vadd.s32 120, %v9255_v1  ;;  %v9261_v4 = vmul.u32 16, %v9257_v2  ;;  %v176_v5 = vadd.s32 1, %v9257_v2  ;;  %v155_v6 = vadd.s32 112, %v9255_v1  ;;  %s8170_s29 = scalar_lea.hbm %s12769_s1, %s8804_s26  ;;  %s8171_s10 = sshll.u32 %s11482_s25, 4  ;;  %s8172_s10 = int_to_ptr.vmem [resolvable:$true] %s8171_s10 }
  0x2f   : > { %v154_v7 = vadd.s32 104, %v9255_v1  ;;  %v153_v8 = vadd.s32 96, %v9255_v1  ;;  %v152_v9 = vadd.s32 88, %v9255_v1  ;;  %v151_v10 = vadd.s32 80, %v9255_v1  ;;  %s8173_s30 = sshll.u32 %s8170_s29, 4  ;;  %s8160_s2 = scalar_lea.sflag [#allocation5], %s9245_s21  ;;  %s8174_s30 = int_to_ptr.hbm [resolvable:$true] %s8173_s30 }
  0x30   : > { %vm175_vm0 = vcmp.ge.s32.totalorder %v156_v3, %v9261_v4  ;;  %v9270_v11 = vmul.u32 16, %v176_v5  ;;  %vm174_vm1 = vcmp.ge.s32.totalorder %v155_v6, %v9261_v4  ;;  %v150_v12 = vadd.s32 72, %v9255_v1  ;;  %s9089_s3 = sshra.s32 %s8174_s30, 4  ;;  %s9095_s13 = scalar_lea.hbm %s12769_s1, 4  ;;  %s9090_s3 = int_to_ptr.hbm [resolvable:$true] %s9089_s3 }
  0x31   : > { %vm173_vm2 = vcmp.ge.s32.totalorder %v154_v7, %v9261_v4  ;;  %vm172_vm3 = vcmp.ge.s32.totalorder %v153_v8, %v9261_v4  ;;  %vm171_vm4 = vcmp.ge.s32.totalorder %v152_v9, %v9261_v4  ;;  %vm170_vm5 = vcmp.ge.s32.totalorder %v151_v10, %v9261_v4  ;;  %s9091_s4 = scalar_lea.hbm %s9090_s3, 2  ;;  %p9096_p0 = scmp.lt.s32.totalorder %s9090_s3, %s12769_s1 }
  0x32   : > { %vm193_vm6 = vcmp.lt.s32.totalorder %v156_v3, %v9270_v11  ;;  %vm192_vm7 = vcmp.lt.s32.totalorder %v155_v6, %v9270_v11  ;;  %vm191_vm8 = vcmp.lt.s32.totalorder %v154_v7, %v9270_v11  ;;  %vm190_vm9 = vcmp.lt.s32.totalorder %v153_v8, %v9270_v11  ;;  %p9092_p6 = scmp.ne.s32.totalorder %s9090_s3, %s9091_s4  ;;  %p9097_p1 = scmp.lt.s32.totalorder %s9095_s13, %s9091_s4 }
  0x33   : > { %vm9282_vm10 = vmand %vm175_vm0, %vm193_vm6  ;;  %vm189_vm11 = vcmp.lt.s32.totalorder %v152_v9, %v9270_v11  ;;  %vm188_vm12 = vcmp.lt.s32.totalorder %v151_v10, %v9270_v11  ;;  %vm169_vm13 = vcmp.ge.s32.totalorder %v150_v12, %v9261_v4  ;;  %vm187_vm14 = vcmp.lt.s32.totalorder %v150_v12, %v9270_v11 }
  0x34   : > { %v13094_v13 = vsel %vm9282_vm10, 4294967295, %v13093_v13  ;;  %8276 = vmatpush.msk.msra.mxu0 %vm9282_vm10, %v12780_v14  ;;  %vm9295_vm15 = vmand %vm174_vm1, %vm192_vm7  ;;  %v8274_v17 = vsel %vm9282_vm10, 1.0, %v12785_v16  ;;  %v149_v18 = vadd.s32 64, %v9255_v1  ;;  %v148_v19 = vadd.s32 56, %v9255_v1  ;;  %8292 = vmatpush.msk.msra.mxu3 %vm9282_vm10, %v12780_v14  ;;  %p9093_p9 = pnand %p9092_p6, %p9209_p11  ;;  %p9098_p3 = por %p9097_p1, %p9096_p0 }
  0x35   : > { %v147_v20 = vadd.s32 48, %v9255_v1  ;;  %vm9312_vm0 = vmand %vm173_vm2, %vm191_vm8  ;;  %v9316_v22 = vsub.f32 %v8274_v17, %v8274_v17  ;;  %v8273_v23 = vsel %vm9295_vm15, 1.0, %v12785_v16  ;;  %v9322_v24 = vadd.s32 40, %v9255_v1 }
  0x36   : > { %v9325_v25 = vadd.s32 32, %v9255_v1  ;;  %8277 = vmatpush.msk.msra.mxu0 %vm9295_vm15, %v12780_v14  ;;  %vm9334_vm1 = vmand %vm172_vm3, %vm190_vm9  ;;  %v9338_v27 = vsub.f32 %v8273_v23, %v8273_v23  ;;  %v8272_v28 = vsel %vm9312_vm0, 1.0, %v12785_v16  ;;  %vm168_vm2 = vcmp.ge.s32.totalorder %v149_v18, %v9261_v4  ;;  %8293 = vmatpush.msk.msra.mxu3 %vm9295_vm15, %v12780_v14  ;;  %p9094_p13 = pneg %p9093_p9 }
  0x37   : > { %13099 = vst [vmem:[#allocation9_spill] sm:$0xff] %v9316_v22  ;;  %vm186_vm6 = vcmp.lt.s32.totalorder %v149_v18, %v9270_v11  ;;  %v9349_v29 = vand.u32 4294901760, %v9316_v22  ;;  %vm9355_vm3 = vmand %vm171_vm4, %vm189_vm11  ;;  %v9359_v31 = vsub.f32 %v8272_v28, %v8272_v28  ;;  %v8271_v32 = vsel %vm9334_vm1, 1.0, %v12785_v16  ;;  %418 = vmatpush.msra.mxu2 %v9316_v22 }
  0x38   : > { %13102 = vst [vmem:[#allocation10_spill] sm:$0xff] %v9338_v27  ;;  %vm167_vm7 = vcmp.ge.s32.totalorder %v148_v19, %v9261_v4  ;;  %8278 = vmatpush.msk.msra.mxu0 %vm9312_vm0, %v12780_v14  ;;  %v9370_v33 = vand.u32 4294901760, %v9338_v27  ;;  %vm9376_vm4 = vmand %vm170_vm5, %vm188_vm12  ;;  %v9380_v35 = vsub.f32 %v8271_v32, %v8271_v32  ;;  %v8270_v36 = vsel %vm9355_vm3, 1.0, %v12785_v16  ;;  %8294 = vmatpush.msk.msra.mxu3 %vm9312_vm0, %v12780_v14  ;;  %p9099_p4 = pnand %p9098_p3, %p9094_p13 }
  0x39   : > { %13103 = vst [vmem:[#allocation11_spill] sm:$0xff] %v9349_v29  ;;  %v13109_v34 = vsel %vm9376_vm4, 4294967295, %v13108_v34  ;;  %vm185_vm8 = vcmp.lt.s32.totalorder %v148_v19, %v9270_v11  ;;  %v318_v37 = vsub.f32 %v9316_v22, %v9349_v29  ;;  %v9392_v38 = vand.u32 4294901760, %v9359_v31  ;;  %vm9398_vm5 = vmand %vm169_vm13, %vm187_vm14  ;;  %421 = vmatpush.msra.mxu2 %v9338_v27 }
  0x3a   : > { %13106 = vst [vmem:[#allocation12_spill] sm:$0xff] %v9359_v31  ;;  %v13114_v39 = vsel %vm9398_vm5, 4294967295, %v13113_v39  ;;  %v9402_v40 = vsub.f32 %v8270_v36, %v8270_v36  ;;  %v8269_v41 = vsel %vm9376_vm4, 1.0, %v12785_v16  ;;  %8279 = vmatpush.msk.msra.mxu0 %vm9334_vm1, %v12780_v14  ;;  %v324_v42 = vsub.f32 %v9338_v27, %v9370_v33  ;;  %8295 = vmatpush.msk.msra.mxu3 %vm9334_vm1, %v12780_v14  ;;  %vm9435_vm9 = vmand %vm168_vm2, %vm186_vm6 }
  0x3b   : > { %13107 = vst [vmem:[#allocation13_spill] sm:$0xff] %v9370_v33  ;;  %v9414_v43 = vand.u32 4294901760, %v9380_v35  ;;  %v9416_v44 = vsub.f32 %v8269_v41, %v8269_v41  ;;  %v8268_v45 = vsel %vm9398_vm5, 1.0, %v12785_v16  ;;  %v9424_v46 = vand.u32 4294901760, %v318_v37  ;;  %424 = vmatpush.msra.mxu2 %v9359_v31  ;;  %vm9465_vm12 = vmand %vm167_vm7, %vm185_vm8 }
  0x3c   : > { %13110 = vst [vmem:[#allocation14_spill] sm:$0xff] %v13109_v34  ;;  %v330_v47 = vsub.f32 %v9359_v31, %v9392_v38  ;;  %v9429_v48 = vand.u32 4294901760, %v9402_v40  ;;  %v13122_v49 = vsel %vm9435_vm9, 4294967295, %v13121_v49  ;;  %v9439_v50 = vsub.f32 %v8268_v45, %v8268_v45  ;;  %8280 = vmatpush.msk.msra.mxu0 %vm9355_vm3, %v12780_v14  ;;  %8296 = vmatpush.msk.msra.mxu3 %vm9355_vm3, %v12780_v14 }
  0x3d   : > { %13111 = vst [vmem:[#allocation15_spill] sm:$0xff] %v9380_v35  ;;  %v9442_v51 = vand.u32 4294901760, %v324_v42  ;;  %v336_v52 = vsub.f32 %v9380_v35, %v9414_v43  ;;  %v9450_v53 = vand.u32 4294901760, %v9416_v44  ;;  %vm166_vm11 = vcmp.ge.s32.totalorder %v147_v20, %v9261_v4  ;;  %320 = vmatpush.msra.mxu1 %v9424_v46  ;;  %427 = vmatpush.msra.mxu2 %v9380_v35 }
  0x3e   : > { %13112 = vst [vmem:[#allocation16_spill] sm:$0xff] %v9392_v38  ;;  %v9457_v54 = vand.u32 4294901760, %v330_v47  ;;  %v342_v55 = vsub.f32 %v9402_v40, %v9429_v48  ;;  %v13128_v56 = vmov 0  ;;  %v9470_v57 = vand.u32 4294901760, %v9439_v50  ;;  %8281 = vmatpush.msk.msra.mxu0 %vm9376_vm4, %v12780_v14  ;;  %8297 = vmatpush.msk.msra.mxu3 %vm9376_vm4, %v12780_v14 }
  0x3f   : > { %13115 = vst [vmem:[#allocation17_spill] sm:$0xff] %v13114_v39  ;;  %v13129_v56 = vsel %vm9465_vm12, 4294967295, %v13128_v56  ;;  %vm184_vm13 = vcmp.lt.s32.totalorder %v147_v20, %v9270_v11  ;;  %v348_v58 = vsub.f32 %v9416_v44, %v9450_v53  ;;  %v13132_v59 = vmov 0  ;;  %326 = vmatpush.msra.mxu1 %v9442_v51  ;;  %430 = vmatpush.msra.mxu2 %v9402_v40 }
  0x40   : > { %13116 = vst [vmem:[#allocation18_spill] sm:$0xff] %v9402_v40  ;;  %vm9479_vm14 = vmand %vm166_vm11, %vm184_vm13  ;;  %v8267_v60 = vsel %vm9435_vm9, 1.0, %v12785_v16  ;;  %vm165_vm2 = vcmp.ge.s32.totalorder %v9322_v24, %v9261_v4  ;;  %v9492_v61 = vand.u32 4294901760, %v336_v52  ;;  %v9494_v62 = vand.u32 4294901760, %v342_v55  ;;  %8282 = vmatpush.msk.msra.mxu0 %vm9398_vm5, %v12780_v14  ;;  %8298 = vmatpush.msk.msra.mxu3 %vm9398_vm5, %v12780_v14 }
  0x41   : > { %13117 = vst [vmem:[#allocation19_spill] sm:$0xff] %v9414_v43  ;;  %v13133_v59 = vsel %vm9479_vm14, 4294967295, %v13132_v59  ;;  %v9496_v63 = vsub.f32 %v8267_v60, %v8267_v60  ;;  %vm183_vm6 = vcmp.lt.s32.totalorder %v9322_v24, %v9270_v11  ;;  %v354_v0 = vsub.f32 %v9439_v50, %v9470_v57  ;;  %332 = vmatpush.msra.mxu1 %v9457_v54 }
  0x42   : > { %13118 = vst [vmem:[#allocation20_spill] sm:$0xff] %v9416_v44  ;;  %vm9506_vm7 = vmand %vm165_vm2, %vm183_vm6  ;;  %v13138_v3 = vmov 0  ;;  %v8266_v5 = vsel %vm9465_vm12, 1.0, %v12785_v16  ;;  %vm164_vm8 = vcmp.ge.s32.totalorder %v9325_v25, %v9261_v4  ;;  %vm182_vm11 = vcmp.lt.s32.totalorder %v9325_v25, %v9270_v11  ;;  %433 = vmatpush.msra.mxu2 %v9416_v44  ;;  %8283 = vmatpush.msk.msra.mxu0 %vm9435_vm9, %v12780_v14 }
  0x43   : > { %13119 = vst [vmem:[#allocation21_spill] sm:$0xff] %v9424_v46  ;;  %v13139_v3 = vsel %vm9506_vm7, 4294967295, %v13138_v3  ;;  %v9521_v6 = vand.u32 4294901760, %v348_v58  ;;  %v9524_v7 = vand.u32 4294901760, %v9496_v63  ;;  %v9526_v8 = vsub.f32 %v8266_v5, %v8266_v5  ;;  %vm9528_vm13 = vmand %vm164_vm8, %vm182_vm11  ;;  %8299 = vmatpush.msk.msra.mxu3 %vm9435_vm9, %v12780_v14  ;;  %338 = vmatpush.msra.mxu1 %v9492_v61  ;;  %v9617_v5 = vld [vmem:[%s9249_s24 + $0x8] sm:$0xff] }
  0x44   : > { %13120 = vst [vmem:[#allocation22_spill] sm:$0xff] %v9429_v48  ;;  %v13144_v9 = vmov 0  ;;  %v8265_v10 = vsel %vm9479_vm14, 1.0, %v12785_v16  ;;  %v144_v17 = vadd.s32 24, %v9255_v1  ;;  %v8264_v18 = vsel %vm9506_vm7, 1.0, %v12785_v16  ;;  %436 = vmatpush.msra.mxu2 %v9439_v50  ;;  %8284 = vmatpush.msk.msra.mxu0 %vm9465_vm12, %v12780_v14 }
  0x45   : > { %13123 = vst [vmem:[#allocation23_spill] sm:$0xff] %v13122_v49  ;;  %v13145_v9 = vsel %vm9528_vm13, 4294967295, %v13144_v9  ;;  %v9539_v12 = vsub.f32 %v8265_v10, %v8265_v10  ;;  %v143_v19 = vadd.s32 16, %v9255_v1  ;;  %v360_v20 = vsub.f32 %v9496_v63, %v9524_v7  ;;  %8300 = vmatpush.msk.msra.mxu3 %vm9465_vm12, %v12780_v14  ;;  %344 = vmatpush.msra.mxu1 %v9494_v62 }
  0x46   : > { %13124 = vst [vmem:[#allocation24_spill] sm:$0xff] %v9439_v50  ;;  %v9553_v23 = vand.u32 4294901760, %v9526_v8  ;;  %v9555_v24 = vsub.f32 %v8264_v18, %v8264_v18  ;;  %v8263_v25 = vsel %vm9528_vm13, 1.0, %v12785_v16  ;;  %vm163_vm2 = vcmp.ge.s32.totalorder %v144_v17, %v9261_v4  ;;  %439 = vmatpush.msra.mxu2 %v9496_v63  ;;  %8285 = vmatpush.msk.msra.mxu0 %vm9479_vm14, %v12780_v14 }
  0x47   : > { %13125 = vst [vmem:[#allocation25_spill] sm:$0xff] %v9442_v51  ;;  %v9565_v28 = vand.u32 4294901760, %v9539_v12  ;;  %vm181_vm6 = vcmp.lt.s32.totalorder %v144_v17, %v9270_v11  ;;  %vm162_vm8 = vcmp.ge.s32.totalorder %v143_v19, %v9261_v4  ;;  %v9574_v32 = vand.u32 4294901760, %v354_v0  ;;  %8301 = vmatpush.msk.msra.mxu3 %vm9479_vm14, %v12780_v14  ;;  %350 = vmatpush.msra.mxu1 %v9521_v6  ;;  %v9614_v0 = vld [vmem:[%s9249_s24] sm:$0xff] }
  0x48   : > { %13126 = vst [vmem:[#allocation26_spill] sm:$0xff] %v9450_v53  ;;  %v366_v36 = vsub.f32 %v9526_v8, %v9553_v23  ;;  %vm9578_vm11 = vmand %vm163_vm2, %vm181_vm6  ;;  %v13152_v37 = vmov 0  ;;  %v9583_v41 = vand.u32 4294901760, %v9555_v24  ;;  %vm180_vm9 = vcmp.lt.s32.totalorder %v143_v19, %v9270_v11  ;;  %442 = vmatpush.msra.mxu2 %v9526_v8  ;;  %8286 = vmatpush.msk.msra.mxu0 %vm9506_vm7, %v12780_v14 }
  0x49   : > { %13127 = vst [vmem:[#allocation27_spill] sm:$0xff] %v9457_v54  ;;  %v13153_v37 = vsel %vm9578_vm11, 4294967295, %v13152_v37  ;;  %vm9590_vm12 = vmand %vm162_vm8, %vm180_vm9  ;;  %v13156_v42 = vmov 0  ;;  %v9594_v45 = vsub.f32 %v8263_v25, %v8263_v25  ;;  %v142_v47 = vadd.s32 8, %v9255_v1  ;;  %8302 = vmatpush.msk.msra.mxu3 %vm9506_vm7, %v12780_v14  ;;  %356 = vmatpush.msra.mxu1 %v9574_v32  ;;  %v9726_v54 = vld [vmem:[%s9249_s24 + $0x28] sm:$0xff] }
  0x4a   : > { %13130 = vst [vmem:[#allocation28_spill] sm:$0xff] %v13129_v56  ;;  %v13157_v42 = vsel %vm9590_vm12, 4294967295, %v13156_v42  ;;  %v8262_v52 = vsel %vm9578_vm11, 1.0, %v12785_v16  ;;  %v9604_v55 = vand.u32 4294901760, %v360_v20  ;;  %v372_v58 = vsub.f32 %v9539_v12, %v9565_v28  ;;  %445 = vmatpush.msra.mxu2 %v9539_v12  ;;  %8287 = vmatpush.msk.msra.mxu0 %vm9528_vm13, %v12780_v14 }
  0x4b   : > { %13131 = vst [vmem:[#allocation29_spill] sm:$0xff] %v9470_v57  ;;  %v9608_v60 = vsub.f32 %v8262_v52, %v8262_v52  ;;  %v9622_v10 = vand.u32 4294901760, %v366_v36  ;;  %v9625_v17 = vand.u32 4294901760, %v9594_v45  ;;  %vm161_vm2 = vcmp.ge.s32.totalorder %v142_v47, %v9261_v4  ;;  %v9649_v36 = vld [vmem:[%s9249_s24 + $0x10] sm:$0xff]  ;;  %8303 = vmatpush.msk.msra.mxu3 %vm9528_vm13, %v12780_v14  ;;  %v9683_v14 = vld [vmem:[%s9249_s24 + $0x18] sm:$0xff] }
  0x4c   : > { %13134 = vst [vmem:[#allocation30_spill] sm:$0xff] %v13133_v59  ;;  %vm179_vm6 = vcmp.lt.s32.totalorder %v142_v47, %v9270_v11  ;;  %v378_v18 = vsub.f32 %v9555_v24, %v9583_v41  ;;  %v13166_v19 = vmov 0  ;;  %vm178_vm9 = vcmp.lt.s32.totalorder %v9255_v1, %v9270_v11  ;;  %362 = vmatpush.msra.mxu1 %v9604_v55 }
  0x4d   : > { %13135 = vst [vmem:[#allocation31_spill] sm:$0xff] %v9492_v61  ;;  %vm9635_vm8 = vmand %vm161_vm2, %vm179_vm6  ;;  %v9640_v20 = vand.u32 4294901760, %v9608_v60  ;;  %v8261_v25 = vsel %vm9590_vm12, 1.0, %v12785_v16  ;;  %vm13171_vm2 = vcmp.ge.s32.totalorder %v9255_v1, %v9261_v4  ;;  %v13172_v47 = vmov 0  ;;  %448 = vmatpush.msra.mxu2 %v9555_v24 }
  0x4e   : > { %13136 = vst [vmem:[#allocation32_spill] sm:$0xff] %v9494_v62  ;;  %v13167_v19 = vsel %vm9635_vm8, 4294967295, %v13166_v19  ;;  %vm9657_vm6 = vmand %vm13171_vm2, %vm178_vm9  ;;  %v9661_v11 = vsub.f32 %v8261_v25, %v8261_v25  ;;  %v8260_v52 = vsel %vm9635_vm8, 1.0, %v12785_v16  ;;  %v9672_v4 = vand.u32 4294901760, %v372_v58  ;;  %368 = vmatpush.msra.mxu1 %v9622_v10 }
  0x4f   : > { %13137 = vst [vmem:[#allocation33_spill] sm:$0xff] %v9496_v63  ;;  %v13173_v47 = vsel %vm9657_vm6, 4294967295, %v13172_v47  ;;  %v384_v25 = vsub.f32 %v9594_v45, %v9625_v17  ;;  %v8259_v62 = vsel %vm9657_vm6, 1.0, %v12785_v16  ;;  %v13179_v61 = vmov 1.0   ;;  %451 = vmatpush.msra.mxu2 %v9594_v45 }
  0x50   : > { %13140 = vst [vmem:[#allocation34_spill] sm:$0xff] %v13139_v3  ;;  %8288 = vmatpush.msk.msra.mxu0 %vm9578_vm11, %v13179_v61  ;;  %v9689_v58 = vand.u32 4294901760, %v9661_v11  ;;  %8304 = vmatpush.msk.msra.mxu3 %vm9578_vm11, %v13179_v61  ;;  %v9698_v16 = vand.u32 4294901760, %v378_v18  ;;  %vm13192_vm9 = vnez %v13122_v49  ;;  %vm13193_vm2 = vnez %v13129_v56 }
  0x51   : > { %13141 = vst [vmem:[#allocation35_spill] sm:$0xff] %v9521_v6  ;;  %v9676_v6 = vsub.f32 %v8260_v52, %v8260_v52  ;;  %374 = vmatpush.msra.mxu1 %v9672_v4  ;;  %v9717_v18 = vand.u32 4294901760, %v384_v25  ;;  %454 = vmatpush.msra.mxu2 %v9608_v60 }
  0x52   : > { %13142 = vst [vmem:[#allocation36_spill] sm:$0xff] %v9524_v7  ;;  %8289 = vmatpush.msk.msra.mxu0 %vm9590_vm12, %v13179_v61  ;;  %8305 = vmatpush.msk.msra.mxu3 %vm9590_vm12, %v13179_v61 }
  0x53   : > { %13143 = vst [vmem:[#allocation37_spill] sm:$0xff] %v9526_v8  ;;  %380 = vmatpush.msra.mxu1 %v9698_v16  ;;  %457 = vmatpush.msra.mxu2 %v9661_v11 }
  0x54   : > { %13146 = vst [vmem:[#allocation38_spill] sm:$0xff] %v13145_v9  ;;  %8290 = vmatpush.msk.msra.mxu0 %vm9635_vm8, %v13179_v61  ;;  %8306 = vmatpush.msk.msra.mxu3 %vm9635_vm8, %v13179_v61 }
  0x55   : > { %13147 = vst [vmem:[#allocation39_spill] sm:$0xff] %v9539_v12  ;;  %386 = vmatpush.msra.mxu1 %v9717_v18  ;;  %460 = vmatpush.msra.mxu2 %v9676_v6 }
  0x56   : > { %13148 = vst [vmem:[#allocation40_spill] sm:$0xff] %v9553_v23  ;;  %8291 = vmatpush.msk.msra.mxu0 %vm9657_vm6, %v13179_v61  ;;  %8307 = vmatpush.msk.msra.mxu3 %vm9657_vm6, %v13179_v61 }
  0x57   : > { %13149 = vst [vmem:[#allocation41_spill] sm:$0xff] %v9555_v24 }
  0x58   : > { %13150 = vst [vmem:[#allocation42_spill] sm:$0xff] %v9565_v28  ;;  %512 = vmatpush.msrb.mxu0 %v9349_v29 }
  0x59   : > { %13151 = vst [vmem:[#allocation43_spill] sm:$0xff] %v9574_v32  ;;  %v258_v32 = vadd.f32 %v9617_v5, %v9614_v0 }
  0x5a   : > { %13154 = vst [vmem:[#allocation44_spill] sm:$0xff] %v13153_v37  ;;  %516 = vmatpush.msrb.mxu0 %v9370_v33 }
  0x5b   : > { %13155 = vst [vmem:[#allocation45_spill] sm:$0xff] %v9583_v41  ;;  %v259_v52 = vadd.f32 %v258_v32, %v9649_v36 }
  0x5c   : > { %13158 = vst [vmem:[#allocation46_spill] sm:$0xff] %v13157_v42  ;;  %520 = vmatpush.msrb.mxu0 %v9392_v38 }
  0x5d   : > { %13159 = vst [vmem:[#allocation47_spill] sm:$0xff] %v9594_v45  ;;  %v260_v32 = vadd.f32 %v259_v52, %v9683_v14 }
  0x5e   : > { %13160 = vst [vmem:[#allocation48_spill] sm:$0xff] %v9604_v55  ;;  %v9703_v55 = vand.u32 4294901760, %v9676_v6  ;;  %524 = vmatpush.msrb.mxu0 %v9414_v43 }
  0x5f   : > { %13161 = vst [vmem:[#allocation49_spill] sm:$0xff] %v9608_v60 }
  0x60   : > { %13162 = vst [vmem:[#allocation50_spill] sm:$0xff] %v9614_v0  ;;  %v390_v0 = vsub.f32 %v9608_v60, %v9640_v20  ;;  %528 = vmatpush.msrb.mxu0 %v9429_v48 }
  0x61   : > { %13163 = vst [vmem:[#allocation51_spill] sm:$0xff] %v9617_v5  ;;  %v9691_v5 = vsub.f32 %v8259_v62, %v8259_v62  ;;  %v9707_v62 = vld [vmem:[%s9249_s24 + $0x20] sm:$0xff] }
  0x62   : > { %13164 = vst [vmem:[#allocation52_spill] sm:$0xff] %v9622_v10  ;;  %v261_v25 = vadd.f32 %v260_v32, %v9707_v62  ;;  %v9736_v52 = vand.u32 4294901760, %v390_v0  ;;  %532 = vmatpush.msrb.mxu0 %v9450_v53 }
  0x63   : > { %13165 = vst [vmem:[#allocation53_spill] sm:$0xff] %v9625_v17  ;;  %v9722_v10 = vand.u32 4294901760, %v9691_v5  ;;  %463 = vmatpush.msra.mxu2 %v9691_v5 }
  0x64   : > { %13168 = vst [vmem:[#allocation54_spill] sm:$0xff] %v13167_v19  ;;  %v262_v51 = vadd.f32 %v261_v25, %v9726_v54  ;;  %392 = vmatpush.msra.mxu1 %v9736_v52  ;;  %536 = vmatpush.msrb.mxu0 %v9470_v57 }
  0x65   : > { %13169 = vst [vmem:[#allocation55_spill] sm:$0xff] %v9640_v20  ;;  %v408_v32 = vsub.f32 %v9691_v5, %v9722_v10 }
  0x66   : > { %13170 = vst [vmem:[#allocation56_spill] sm:$0xff] %v9649_v36  ;;  %v396_v36 = vsub.f32 %v9661_v11, %v9689_v58  ;;  %540 = vmatpush.msrb.mxu0 %v9524_v7 }
  0x67   : > { %13174 = vst [vmem:[#allocation57_spill] sm:$0xff] %v13173_v47 }
  0x68   : > { %13175 = vst [vmem:[#allocation58_spill] sm:$0xff] %v9661_v11  ;;  %v9752_v0 = vand.u32 4294901760, %v396_v36  ;;  %544 = vmatpush.msrb.mxu0 %v9553_v23 }
  0x69   : > { %13176 = vst [vmem:[#allocation59_spill] sm:$0xff] %v9672_v4  ;;  %v9742_v4 = vld [vmem:[%s9249_s24 + $0x30] sm:$0xff] }
  0x6a   : > { %13177 = vst [vmem:[#allocation60_spill] sm:$0xff] %v9676_v6  ;;  %398 = vmatpush.msra.mxu1 %v9752_v0  ;;  %548 = vmatpush.msrb.mxu0 %v9565_v28 }
  0x6b   : > { %13178 = vst [vmem:[#allocation61_spill] sm:$0xff] %v9683_v14  ;;  %v402_v14 = vsub.f32 %v9676_v6, %v9703_v55 }
  0x6c   : > { %13180 = vst [vmem:[#allocation62_spill] sm:$0xff] %v9689_v58  ;;  %552 = vmatpush.msrb.mxu0 %v9583_v41 }
  0x6d   : > { %13181 = vst [vmem:[#allocation63_spill] sm:$0xff] %v9691_v5  ;;  %v9763_v25 = vand.u32 4294901760, %v402_v14 }
  0x6e   : > { %13182 = vst [vmem:[#allocation64_spill] sm:$0xff] %v9698_v16  ;;  %v263_v16 = vadd.f32 %v262_v51, %v9742_v4  ;;  %556 = vmatpush.msrb.mxu0 %v9625_v17 }
  0x6f   : > { %13183 = vst [vmem:[#allocation65_spill] sm:$0xff] %v9703_v55  ;;  %404 = vmatpush.msra.mxu1 %v9763_v25 }
  0x70   : > { %13184 = vst [vmem:[#allocation66_spill] sm:$0xff] %v9707_v62  ;;  %v9758_v62 = vld [vmem:[%s9249_s24 + $0x38] sm:$0xff]  ;;  %560 = vmatpush.msrb.mxu0 %v9640_v20 }
  0x71   : > { %13185 = vst [vmem:[#allocation67_spill] sm:$0xff] %v9717_v18  ;;  %v264_v36 = vadd.f32 %v263_v16, %v9758_v62 }
  0x72   : > { %13186 = vst [vmem:[#allocation68_spill] sm:$0xff] %v9722_v10  ;;  %564 = vmatpush.msrb.mxu0 %v9689_v58 }
  0x73   : > { %13187 = vst [vmem:[#allocation69_spill] sm:$0xff] %v9726_v54  ;;  %v9769_v54 = vand.u32 4294901760, %v408_v32  ;;  %v265_v29 = vrot.slane %v264_v36, 4 }
  0x74   : > { %13188 = vst [vmem:[#allocation70_spill] sm:$0xff] %v9736_v52  ;;  %568 = vmatpush.msrb.mxu0 %v9703_v55 }
  0x75   : > { %13189 = vst [vmem:[#allocation71_spill] sm:$0xff] %v9752_v0  ;;  %v266_v51 = vadd.f32 %v265_v29, %v264_v36  ;;  %410 = vmatpush.msra.mxu1 %v9769_v54 }
  0x76   : > { %13190 = vst [vmem:[#allocation72_spill] sm:$0xff] %v9763_v25  ;;  %572 = vmatpush.msrb.mxu0 %v9722_v10 }
  0x77   : > { %13191 = vst [vmem:[#allocation73_spill] sm:$0xff] %v9769_v54  ;;  %8308 = vmatpush.msk.msrb.mxu1 %vm9282_vm10, %v13179_v61  ;;  %v267_v14 = vrot.slane %v266_v51, 2 }
  0x79   : > { %8309 = vmatpush.msk.msrb.mxu1 %vm9295_vm15, %v13179_v61  ;;  %v268_v16 = vadd.f32 %v267_v14, %v266_v51 }
  0x7b   : > { %8310 = vmatpush.msk.msrb.mxu1 %vm9312_vm0, %v13179_v61  ;;  %v269_v29 = vrot.slane %v268_v16, 1 }
  0x7d   : > { %8311 = vmatpush.msk.msrb.mxu1 %vm9334_vm1, %v13179_v61  ;;  %v270_v32 = vadd.f32 %v269_v29, %v268_v16 }
  0x7f   : > { %8312 = vmatpush.msk.msrb.mxu1 %vm9355_vm3, %v13179_v61  ;;  %v9795_v36 = vmul.f32 0.125, %v270_v32 }
  0x81   : > { %8313 = vmatpush.msk.msrb.mxu1 %vm9376_vm4, %v13179_v61  ;;  %v273_v51 = vmul.f32 %v9795_v36, %v9795_v36 }
  0x83   : > { %8314 = vmatpush.msk.msrb.mxu1 %vm9398_vm5, %v13179_v61  ;;  %v306_v14 = vand.u32 4294901760, %v273_v51 }
  0x85   : > { %8315 = vmatpush.msk.msrb.mxu1 %vm13192_vm9, %v13179_v61  ;;  %v307_v16 = vsub.f32 %v273_v51, %v306_v14 }
  0x86   : > { %412 = vmatmul.f32.vlgmr.msra.gmra.mxu1 %v306_v14 }
  0x87   : > { %8316 = vmatpush.msk.msrb.mxu1 %vm13193_vm2, %v13179_v61  ;;  %466 = vmatmul.f32.vlgmr.msra.gmra.mxu2 %v307_v16  ;;  %v308_v29 = vand.u32 4294901760, %v307_v16 }
  0x89   : > { %8317 = vmatpush.msk.msrb.mxu1 %vm9479_vm14, %v13179_v61  ;;  %v309_v32 = vsub.f32 %v307_v16, %v308_v29  ;;  %505 = vmatmul.f32.vlgmr.msra.gmra.mxu3 %v308_v29  ;;  %v242_v16 = vmul.u32 16, %v9255_v1 }
  0x8b   : > { %v310_v51 = vand.u32 4294901760, %v309_v32  ;;  %8318 = vmatpush.msk.msrb.mxu1 %vm9506_vm7, %v13179_v61  ;;  %v13194_v32 = vmov 0 }
  0x8d   : > { %311 = vmatmul.f32.vlgmr.msra.gmra.mxu0 %v310_v51  ;;  %8319 = vmatpush.msk.msrb.mxu1 %vm9528_vm13, %v13179_v61  ;;  %v13196_v51 = vmov 0.0  }
  0x8e   : > { %1031 = vmatpush.msra.mxu0 %v9316_v22 }
  0x8f   : > { %8320 = vmatpush.msk.msrb.mxu1 %vm9578_vm11, %v13179_v61 }
  0x90   : > { %1034 = vmatpush.msra.mxu0 %v9338_v27 }
  0x91   : > { %8321 = vmatpush.msk.msrb.mxu1 %vm9590_vm12, %v13179_v61 }
  0x92   : > { %1037 = vmatpush.msra.mxu0 %v9359_v31 }
  0x93   : > { %8322 = vmatpush.msk.msrb.mxu1 %vm9635_vm8, %v13179_v61 }
  0x94   : > { %1040 = vmatpush.msra.mxu0 %v9380_v35 }
  0x95   : > { %574 = vmatmul.f32.vlgmr.msrb.gmra.mxu0 %v306_v14  ;;  %8323 = vmatpush.msk.msrb.mxu1 %vm9657_vm6, %v13179_v61 }
  0x96   : > { %611 = vmatmul.f32.vlgmr.msrb.gmra.mxu1 %v306_v14  ;;  %1043 = vmatpush.msra.mxu0 %v9402_v40  ;;  %v244_v14 = vadd.s32 1, %v9255_v1 }
  0x97   : > { %8343 = vmatpush.msk.msra.mxu1 %vm9282_vm10, %v13179_v61 }
  0x98   : > { %1046 = vmatpush.msra.mxu0 %v9416_v44  ;;  %v245_v29 = vmul.u32 16, %v244_v14 }
  0x99   : > { %8344 = vmatpush.msk.msra.mxu1 %vm9295_vm15, %v13179_v61 }
  0x9a   : > { %1049 = vmatpush.msra.mxu0 %v9439_v50 }
  0x9b   : > { %8345 = vmatpush.msk.msra.mxu1 %vm9312_vm0, %v13179_v61 }
  0x9c   : > { %1052 = vmatpush.msra.mxu0 %v9496_v63 }
  0x9d   : > { %8346 = vmatpush.msk.msra.mxu1 %vm9334_vm1, %v13179_v61 }
  0x9e   : > { %1055 = vmatpush.msra.mxu0 %v9526_v8 }
  0x9f   : > { %8347 = vmatpush.msk.msra.mxu1 %vm9355_vm3, %v13179_v61 }
  0xa0   : > { %1058 = vmatpush.msra.mxu0 %v9539_v12 }
  0xa1   : > { %8348 = vmatpush.msk.msra.mxu1 %vm9376_vm4, %v13179_v61 }
  0xa2   : > { %1061 = vmatpush.msra.mxu0 %v9555_v24 }
  0xa3   : > { %8349 = vmatpush.msk.msra.mxu1 %vm9398_vm5, %v13179_v61 }
  0xa4   : > { %1064 = vmatpush.msra.mxu0 %v9594_v45 }
  0xa5   : > { %8350 = vmatpush.msk.msra.mxu1 %vm13192_vm9, %v13179_v61 }
  0xa6   : > { %1067 = vmatpush.msra.mxu0 %v9608_v60 }
  0xa7   : > { %8351 = vmatpush.msk.msra.mxu1 %vm13193_vm2, %v13179_v61 }
  0xa8   : > { %1070 = vmatpush.msra.mxu0 %v9661_v11 }
  0xa9   : > { %8352 = vmatpush.msk.msra.mxu1 %vm9479_vm14, %v13179_v61 }
  0xaa   : > { %1073 = vmatpush.msra.mxu0 %v9676_v6 }
  0xab   : > { %8353 = vmatpush.msk.msra.mxu1 %vm9506_vm7, %v13179_v61 }
  0xac   : > { %1076 = vmatpush.msra.mxu0 %v9691_v5 }
  0xad   : > { %8354 = vmatpush.msk.msra.mxu1 %vm9528_vm13, %v13179_v61  ;;  %vm243_vm13 = vcmp.ge.s32.totalorder %v9257_v2, %v242_v16 }
  0xaf   : > { %8355 = vmatpush.msk.msra.mxu1 %vm9578_vm11, %v13179_v61  ;;  %vm246_vm11 = vcmp.lt.s32.totalorder %v9257_v2, %v245_v29 }
  0xb0   : > { %vm9907_vm7 = vmand %vm243_vm13, %vm246_vm11  ;;  %vm12837_vm13 = vcmask 64512   ;;  %vm13210_vm11 = vnez %v13139_v3 }
  0xb1   : > { %8356 = vmatpush.msk.msra.mxu1 %vm9590_vm12, %v13179_v61  ;;  %v13195_v32 = vsel %vm9907_vm7, 4294967295, %v13194_v32  ;;  %v8275_v5 = vsel %vm9907_vm7, 1.0, %v13196_v51  ;;  %8324 = vmatpush.msk.msrb.mxu2 %vm9907_vm7, %v13179_v61 }
  0xb2   : > { %8375 = vmatpush.msk.msrb.mxu0 %vm9907_vm7, %v13179_v61  ;;  %v9920_v1 = vsub.f32 %v8275_v5, %v8275_v5 }
  0xb3   : > { %8357 = vmatpush.msk.msra.mxu1 %vm9635_vm8, %v13179_v61 }
  0xb4   : > { %13197 = vst [vmem:[#allocation74_spill] sm:$0xff] %v9920_v1  ;;  %v9923_v2 = vand.u32 4294901760, %v9920_v1  ;;  %688 = vmatpush.msra.mxu2 %v9920_v1 }
  0xb5   : > { %8358 = vmatpush.msk.msra.mxu1 %vm9657_vm6, %v13179_v61 }
  0xb6   : > { %13198 = vst [vmem:[#allocation75_spill] sm:$0xff] %v9923_v2  ;;  %v663_v14 = vsub.f32 %v9920_v1, %v9923_v2 }
  0xb8   : > { %v9928_v16 = vand.u32 4294901760, %v663_v14 }
  0xba   : > { %13199 = vst [vmem:[#allocation76_spill] sm:$0xff] %v9928_v16  ;;  %665 = vmatpush.msrb.mxu3 %v9928_v16  ;;  %1687 = vmatpush.msrb.mxu1 %v9928_v16 }
  0xbc   : > { %8325 = vmatpush.msk.msra.mxu3 %vm9907_vm7, %v13179_v61 }
 0x103   : > { %v413_v5 = vpop.f32.mrf.mxu1 }
 0x10a   : > { %v312_v29 = vpop.f32.mrf.mxu0  ;;  %v467_v51 = vpop.f32.mrf.mxu2 }
 0x10b   : > { %v414_v6 = vadd.f32 %v413_v5, %v312_v29 }
 0x10c   : > { %v506_v11 = vpop.f32.mrf.mxu3 }
 0x10d   : > { %v468_v60 = vadd.f32 %v467_v51, %v414_v6  ;;  %v13200_v6 = vld [vmem:[#allocation25_spill] sm:$0xff] }
 0x10f   : > { %v507_v45 = vadd.f32 %v506_v11, %v468_v60  ;;  %v13208_v60 = vld [vmem:[#allocation59_spill] sm:$0xff]  ;;  %v13209_v11 = vld [vmem:[#allocation64_spill] sm:$0xff] }
 0x112   : > { %v575_v24 = vpop.f32.mrf.mxu0 }
 0x113   : > { %v576_v12 = vadd.f32 %v575_v24, %v507_v45  ;;  %v612_v8 = vpop.f32.mrf.mxu1  ;;  %v13206_v24 = vld [vmem:[#allocation48_spill] sm:$0xff] }
 0x114   : > { %v13207_v45 = vld [vmem:[#allocation52_spill] sm:$0xff] }
 0x115   : > { %v613_v14 = vadd.f32 %v612_v8, %v576_v12  ;;  %v13201_v8 = vld [vmem:[#allocation27_spill] sm:$0xff] }
 0x116   : > { %v13202_v12 = vld [vmem:[#allocation31_spill] sm:$0xff] }
 0x117   : > { %v617_v63 = vsel %vm12837_vm13, %v613_v14, 0  ;;  %vm13211_vm13 = vnez %v13145_v9 }
 0x118   : > { %v636_v50 = vand.u32 4294901760, %v617_v63 }
 0x11a   : > { %v637_v16 = vsub.f32 %v617_v63, %v636_v50  ;;  %667 = vmatmul.f32.vlgmr.msrb.gmra.mxu3 %v636_v50  ;;  %v13203_v63 = vld [vmem:[#allocation32_spill] sm:$0xff] }
 0x11b   : > { %8326 = vmatpush.msk.msrb.mxu3 %vm9907_vm7, %v13179_v61  ;;  %vm13212_vm7 = vnez %v13153_v37 }
 0x11c   : > { %v638_v44 = vand.u32 4294901760, %v637_v16 }
 0x11e   : > { %v639_v40 = vsub.f32 %v637_v16, %v638_v44 }
 0x120   : > { %v640_v5 = vand.u32 4294901760, %v639_v40  ;;  %v13204_v40 = vld [vmem:[#allocation35_spill] sm:$0xff] }
 0x122   : > { %641 = vmatmul.f32.vlgmr.msrb.gmra.mxu2 %v640_v5  ;;  %715 = vmatmul.f32.vlgmr.msra.gmra.mxu3 %v638_v44  ;;  %v13205_v44 = vld [vmem:[#allocation43_spill] sm:$0xff] }
 0x123   : > { %737 = vmatpush.msrb.mxu2 %v9923_v2  ;;  %905 = vmatpush.msra.mxu3 %v9424_v46 }
 0x125   : > { %911 = vmatpush.msra.mxu3 %v13200_v6 }
 0x127   : > { %917 = vmatpush.msra.mxu3 %v13201_v8 }
 0x129   : > { %923 = vmatpush.msra.mxu3 %v13202_v12 }
 0x12a   : > { %691 = vmatmul.f32.vlgmr.msra.gmra.mxu2 %v637_v16  ;;  %761 = vmatmul.f32.vlgmr.msrb.gmra.mxu3 %v636_v50 }
 0x12b   : > { %8327 = vmatpush.msk.msra.mxu2 %vm9282_vm10, %v13179_v61  ;;  %929 = vmatpush.msra.mxu3 %v13203_v63 }
 0x12d   : > { %8328 = vmatpush.msk.msra.mxu2 %vm9295_vm15, %v13179_v61  ;;  %935 = vmatpush.msra.mxu3 %v13204_v40 }
 0x12f   : > { %8329 = vmatpush.msk.msra.mxu2 %vm9312_vm0, %v13179_v61  ;;  %941 = vmatpush.msra.mxu3 %v13205_v44 }
 0x131   : > { %8330 = vmatpush.msk.msra.mxu2 %vm9334_vm1, %v13179_v61  ;;  %947 = vmatpush.msra.mxu3 %v13206_v24 }
 0x132   : > { %739 = vmatmul.f32.vlgmr.msrb.gmra.mxu2 %v636_v50  ;;  %v13213_v50 = vld [vmem:[#allocation11_spill] sm:$0xff] }
 0x133   : > { %8331 = vmatpush.msk.msra.mxu2 %vm9355_vm3, %v13179_v61  ;;  %953 = vmatpush.msra.mxu3 %v13207_v45 }
 0x135   : > { %8332 = vmatpush.msk.msra.mxu2 %vm9376_vm4, %v13179_v61  ;;  %959 = vmatpush.msra.mxu3 %v13208_v60 }
 0x137   : > { %8333 = vmatpush.msk.msra.mxu2 %vm9398_vm5, %v13179_v61  ;;  %965 = vmatpush.msra.mxu3 %v13209_v11 }
 0x139   : > { %8334 = vmatpush.msk.msra.mxu2 %vm13192_vm9, %v13179_v61  ;;  %971 = vmatpush.msra.mxu3 %v9717_v18 }
 0x13b   : > { %8335 = vmatpush.msk.msra.mxu2 %vm13193_vm2, %v13179_v61  ;;  %977 = vmatpush.msra.mxu3 %v9736_v52 }
 0x13d   : > { %8336 = vmatpush.msk.msra.mxu2 %vm9479_vm14, %v13179_v61  ;;  %983 = vmatpush.msra.mxu3 %v9752_v0 }
 0x13f   : > { %8337 = vmatpush.msk.msra.mxu2 %vm13210_vm11, %v13179_v61  ;;  %989 = vmatpush.msra.mxu3 %v9763_v25 }
 0x141   : > { %8338 = vmatpush.msk.msra.mxu2 %vm13211_vm13, %v13179_v61  ;;  %995 = vmatpush.msra.mxu3 %v9769_v54 }
 0x143   : > { %8359 = vmatpush.msk.msrb.mxu3 %vm9282_vm10, %v13179_v61  ;;  %8339 = vmatpush.msk.msra.mxu2 %vm13212_vm7, %v13179_v61 }
 0x145   : > { %8360 = vmatpush.msk.msrb.mxu3 %vm9295_vm15, %v13179_v61  ;;  %8340 = vmatpush.msk.msra.mxu2 %vm9590_vm12, %v13179_v61 }
 0x147   : > { %8361 = vmatpush.msk.msrb.mxu3 %vm9312_vm0, %v13179_v61  ;;  %8341 = vmatpush.msk.msra.mxu2 %vm9635_vm8, %v13179_v61 }
 0x149   : > { %8362 = vmatpush.msk.msrb.mxu3 %vm9334_vm1, %v13179_v61  ;;  %8342 = vmatpush.msk.msra.mxu2 %vm9657_vm6, %v13179_v61 }
 0x14b   : > { %1202 = vmatpush.msrb.mxu2 %v13213_v50  ;;  %8363 = vmatpush.msk.msrb.mxu3 %vm9355_vm3, %v13179_v61 }
 0x14d   : > { %1206 = vmatpush.msrb.mxu2 %v9370_v33  ;;  %8364 = vmatpush.msk.msrb.mxu3 %vm9376_vm4, %v13179_v61 }
 0x14f   : > { %1210 = vmatpush.msrb.mxu2 %v9392_v38  ;;  %8365 = vmatpush.msk.msrb.mxu3 %vm9398_vm5, %v13179_v61 }
 0x151   : > { %1214 = vmatpush.msrb.mxu2 %v9414_v43  ;;  %8366 = vmatpush.msk.msrb.mxu3 %vm13192_vm9, %v13179_v61 }
 0x153   : > { %1218 = vmatpush.msrb.mxu2 %v9429_v48  ;;  %8367 = vmatpush.msk.msrb.mxu3 %vm13193_vm2, %v13179_v61 }
 0x155   : > { %1222 = vmatpush.msrb.mxu2 %v9450_v53  ;;  %8368 = vmatpush.msk.msrb.mxu3 %vm9479_vm14, %v13179_v61 }
 0x157   : > { %1226 = vmatpush.msrb.mxu2 %v9470_v57  ;;  %8369 = vmatpush.msk.msrb.mxu3 %vm13210_vm11, %v13179_v61 }
 0x159   : > { %1230 = vmatpush.msrb.mxu2 %v9524_v7  ;;  %8370 = vmatpush.msk.msrb.mxu3 %vm13211_vm13, %v13179_v61 }
 0x15b   : > { %1234 = vmatpush.msrb.mxu2 %v9553_v23  ;;  %8371 = vmatpush.msk.msrb.mxu3 %vm13212_vm7, %v13179_v61 }
 0x15d   : > { %1238 = vmatpush.msrb.mxu2 %v9565_v28  ;;  %8372 = vmatpush.msk.msrb.mxu3 %vm9590_vm12, %v13179_v61 }
 0x15f   : > { %1242 = vmatpush.msrb.mxu2 %v9583_v41  ;;  %8373 = vmatpush.msk.msrb.mxu3 %vm9635_vm8, %v13179_v61 }
 0x161   : > { %1246 = vmatpush.msrb.mxu2 %v9625_v17  ;;  %8374 = vmatpush.msk.msrb.mxu3 %vm9657_vm6, %v13179_v61 }
 0x163   : > { %1250 = vmatpush.msrb.mxu2 %v9640_v20 }
 0x165   : > { %1254 = vmatpush.msrb.mxu2 %v9689_v58 }
 0x167   : > { %1258 = vmatpush.msrb.mxu2 %v9703_v55 }
 0x169   : > { %1262 = vmatpush.msrb.mxu2 %v9722_v10 }
 0x19d   : > { %v668_v16 = vpop.f32.mrf.mxu3 }
 0x1a5   : > { %v642_v29 = vpop.f32.mrf.mxu2  ;;  %v716_v51 = vpop.f32.mrf.mxu3 }
 0x1a6   : > { %v669_v5 = vadd.f32 %v668_v16, %v642_v29 }
 0x1ad   : > { %v692_v14 = vpop.f32.mrf.mxu2  ;;  %v762_v7 = vpop.f32.mrf.mxu3 }
 0x1ae   : > { %v693_v41 = vadd.f32 %v692_v14, %v669_v5  ;;  %v13215_v5 = vld [vmem:[#allocation51_spill] sm:$0xff] }
 0x1b0   : > { %v717_v28 = vadd.f32 %v716_v51, %v693_v41 }
 0x1b5   : > { %v740_v17 = vpop.f32.mrf.mxu2 }
 0x1b6   : > { %v741_v23 = vadd.f32 %v740_v17, %v717_v28 }
 0x1b8   : > { %v763_v57 = vadd.f32 %v762_v7, %v741_v23 }
 0x1ba   : > { %v765_v53 = vadd.f32 1e-06, %v763_v57  ;;  %v777_v48 = vadd.f32 1.0, %v763_v57 }
 0x1bc   : > { %8861 = vrsqrt.f32 %v765_v53  ;;  %v789_v41 = vand.u32 2147483648, %v777_v48  ;;  %vm783_vm12 = vweird.f32 %v777_v48  ;;  %v787_v28 = vand.u32 2147483647, %v777_v48 }
 0x1bd   : > { %8863 = vrcp.f32 %v777_v48  ;;  %vm772_vm7 = vweird.f32 %v765_v53 }
 0x1be   : > { %v790_v51 = vor.u32 1.1754944e-38, %v789_v41  ;;  %vm788_vm14 = vcmp.eq.f32.partialorder %v787_v28, 8.507059e+37 }
 0x1c2   : > { %v8862_v58 = vpop.eup %8861 }
 0x1c3   : > { %v8864_v20 = vpop.eup %8863  ;;  %v767_v55 = vmul.f32 %v8862_v58, %v765_v53  ;;  %vm773_vm8 = vweird.f32 %v8862_v58 }
 0x1c4   : > { %v779_v35 = vmul.f32 %v8864_v20, %v777_v48  ;;  %vm784_vm6 = vweird.f32 %v8864_v20  ;;  %vm774_vm11 = vmor %vm772_vm7, %vm773_vm8  ;;  %vm13222_vm7 = vnez %v13139_v3  ;;  %vm13223_vm8 = vnez %v13145_v9 }
 0x1c5   : > { %v768_v10 = vmul.f32 %v8862_v58, %v767_v55  ;;  %vm785_vm13 = vmor %vm783_vm12, %vm784_vm6  ;;  %vm13216_vm12 = vnez %v13195_v32  ;;  %vm13224_vm6 = vnez %v13153_v37 }
 0x1c6   : > { %v780_v43 = vsub.f32 1.0, %v779_v35 }
 0x1c7   : > { %v769_v31 = vmul.f32 0.5, %v768_v10 }
 0x1c8   : > { %v781_v38 = vmul.f32 %v8864_v20, %v780_v43 }
 0x1c9   : > { %v770_v16 = vsub.f32 1.5, %v769_v31  ;;  %v13214_v31 = vld [vmem:[#allocation50_spill] sm:$0xff] }
 0x1ca   : > { %v782_v29 = vadd.f32 %v8864_v20, %v781_v38 }
 0x1cb   : > { %v771_v7 = vmul.f32 %v8862_v58, %v770_v16 }
 0x1cc   : > { %v786_v23 = vsel %vm785_vm13, %v8864_v20, %v782_v29  ;;  %vm13225_vm13 = vnez %v13157_v42 }
 0x1cd   : > { %v775_v17 = vsel %vm774_vm11, %v8862_v58, %v771_v7  ;;  %v791_v55 = vsel %vm788_vm14, %v790_v51, %v786_v23  ;;  %vm13221_vm14 = vnez %v13133_v59  ;;  %vm13226_vm11 = vnez %v13167_v19 }
 0x1ce   : > { %v776_v14 = vmul.f32 %v775_v17, %v763_v57 }
 0x1d0   : > { %v792_v35 = vmul.f32 %v791_v55, %v776_v14  ;;  %v13218_v14 = vld [vmem:[#allocation61_spill] sm:$0xff] }
 0x1d2   : > { %v793_v43 = vmul.f32 %v792_v35, %v9795_v36  ;;  %v13217_v36 = vld [vmem:[#allocation56_spill] sm:$0xff] }
 0x1d4   : > { %v10069_v10 = vperm.slane %v793_v43, 0 }
 0x1d6   : > { %v795_v38 = vmul.f32 %v10069_v10, %v13214_v31  ;;  %v796_v48 = vmul.f32 %v10069_v10, %v13215_v5  ;;  %v797_v41 = vmul.f32 %v10069_v10, %v13217_v36  ;;  %v798_v55 = vmul.f32 %v10069_v10, %v13218_v14 }
 0x1d8   : > { %v10075_v53 = vand.u32 4294901760, %v795_v38  ;;  %v10077_v16 = vand.u32 4294901760, %v796_v48  ;;  %v10091_v23 = vand.u32 4294901760, %v797_v41  ;;  %v10098_v31 = vand.u32 4294901760, %v798_v55 }
 0x1da   : > { %997 = vmatmul.f32.vlgmr.msra.gmra.mxu3 %v10075_v53  ;;  %v836_v57 = vsub.f32 %v795_v38, %v10075_v53  ;;  %v844_v58 = vsub.f32 %v796_v48, %v10077_v16  ;;  %v852_v51 = vsub.f32 %v797_v41, %v10091_v23  ;;  %v860_v5 = vsub.f32 %v798_v55, %v10098_v31  ;;  %v13219_v48 = vld [vmem:[#allocation66_spill] sm:$0xff] }
 0x1db   : > { %8376 = vmatpush.msk.msra.mxu3 %vm13216_vm12, %v13179_v61 }
 0x1dc   : > { %1079 = vmatmul.f32.vlgmr.msra.gmra.mxu0 %v836_v57  ;;  %v837_v20 = vand.u32 4294901760, %v836_v57  ;;  %v845_v7 = vand.u32 4294901760, %v844_v58  ;;  %v853_v43 = vand.u32 4294901760, %v852_v51 }
 0x1dd   : > { %1864 = vmatpush.msra.mxu0 %v9923_v2 }
 0x1de   : > { %1153 = vmatmul.f32.vlgmr.msra.gmra.mxu1 %v837_v20  ;;  %v838_v29 = vsub.f32 %v836_v57, %v837_v20  ;;  %v846_v17 = vsub.f32 %v844_v58, %v845_v7  ;;  %v854_v38 = vsub.f32 %v852_v51, %v853_v43  ;;  %v799_v57 = vmul.f32 %v10069_v10, %v13219_v48 }
 0x1df   : > { %8377 = vmatpush.msk.msra.mxu1 %vm13216_vm12, %v13179_v61  ;;  %vm13227_vm12 = vnez %v13173_v47 }
 0x1e0   : > { %v839_v28 = vand.u32 4294901760, %v838_v29  ;;  %v847_v35 = vand.u32 4294901760, %v846_v17  ;;  %v855_v20 = vand.u32 4294901760, %v854_v38  ;;  %v10104_v36 = vand.u32 4294901760, %v799_v57 }
 0x1e2   : > { %840 = vmatmul.f32.vlgmr.msra.gmra.mxu2 %v839_v28  ;;  %1001 = vmatmul.f32.gmra.mxu3 %v10077_v16  ;;  %v868_v29 = vsub.f32 %v799_v57, %v10104_v36  ;;  %v13220_v28 = vld [vmem:[#allocation69_spill] sm:$0xff] }
 0x1e3   : > { %1738 = vmatpush.msra.mxu2 %v9920_v1 }
 0x1e4   : > { %1084 = vmatmul.f32.gmra.mxu0 %v844_v58  ;;  %v861_v58 = vand.u32 4294901760, %v860_v5 }
 0x1e6   : > { %1159 = vmatmul.f32.gmra.mxu1 %v845_v7  ;;  %v862_v41 = vsub.f32 %v860_v5, %v861_v58  ;;  %v800_v7 = vmul.f32 %v10069_v10, %v13220_v28 }
 0x1e8   : > { %v863_v17 = vand.u32 4294901760, %v862_v41  ;;  %v10110_v14 = vand.u32 4294901760, %v800_v7 }
 0x1ea   : > { %848 = vmatmul.f32.gmra.mxu2 %v847_v35  ;;  %1005 = vmatmul.f32.gmra.mxu3 %v10091_v23  ;;  %v876_v35 = vsub.f32 %v800_v7, %v10110_v14 }
 0x1ec   : > { %1089 = vmatmul.f32.gmra.mxu0 %v852_v51  ;;  %v869_v51 = vand.u32 4294901760, %v868_v29 }
 0x1ee   : > { %1165 = vmatmul.f32.gmra.mxu1 %v853_v43  ;;  %v870_v55 = vsub.f32 %v868_v29, %v869_v51  ;;  %v801_v43 = vmul.f32 %v10069_v10, %v9742_v4 }
 0x1f0   : > { %v871_v38 = vand.u32 4294901760, %v870_v55  ;;  %v10116_v48 = vand.u32 4294901760, %v801_v43 }
 0x1f2   : > { %856 = vmatmul.f32.gmra.mxu2 %v855_v20  ;;  %1009 = vmatmul.f32.gmra.mxu3 %v10098_v31  ;;  %v884_v20 = vsub.f32 %v801_v43, %v10116_v48 }
 0x1f4   : > { %1094 = vmatmul.f32.gmra.mxu0 %v860_v5  ;;  %v877_v5 = vand.u32 4294901760, %v876_v35 }
 0x1f6   : > { %1171 = vmatmul.f32.gmra.mxu1 %v861_v58  ;;  %v878_v57 = vsub.f32 %v876_v35, %v877_v5  ;;  %v802_v58 = vmul.f32 %v10069_v10, %v9758_v62 }
 0x1f8   : > { %v879_v41 = vand.u32 4294901760, %v878_v57  ;;  %v891_v28 = vand.u32 4294901760, %v802_v58 }
 0x1fa   : > { %864 = vmatmul.f32.gmra.mxu2 %v863_v17  ;;  %1013 = vmatmul.f32.gmra.mxu3 %v10104_v36  ;;  %v892_v7 = vsub.f32 %v802_v58, %v891_v28 }
 0x1fc   : > { %1099 = vmatmul.f32.gmra.mxu0 %v868_v29  ;;  %v885_v29 = vand.u32 4294901760, %v884_v20 }
 0x1fe   : > { %1177 = vmatmul.f32.gmra.mxu1 %v869_v51  ;;  %v886_v4 = vsub.f32 %v884_v20, %v885_v29  ;;  %v893_v51 = vand.u32 4294901760, %v892_v7 }
 0x200   : > { %v887_v17 = vand.u32 4294901760, %v886_v4  ;;  %v894_v55 = vsub.f32 %v892_v7, %v893_v51 }
 0x202   : > { %872 = vmatmul.f32.gmra.mxu2 %v871_v38  ;;  %1017 = vmatmul.f32.gmra.mxu3 %v10110_v14 }
 0x204   : > { %1104 = vmatmul.f32.gmra.mxu0 %v876_v35  ;;  %v895_v35 = vand.u32 4294901760, %v894_v55 }
 0x206   : > { %1183 = vmatmul.f32.gmra.mxu1 %v877_v5 }
 0x20a   : > { %880 = vmatmul.f32.gmra.mxu2 %v879_v41  ;;  %1021 = vmatmul.f32.gmra.mxu3 %v10116_v48 }
 0x20c   : > { %1109 = vmatmul.f32.gmra.mxu0 %v884_v20 }
 0x20e   : > { %1189 = vmatmul.f32.gmra.mxu1 %v885_v29 }
 0x212   : > { %888 = vmatmul.f32.gmra.mxu2 %v887_v17  ;;  %1025 = vmatmul.f32.gmra.mxu3 %v891_v28 }
 0x214   : > { %1114 = vmatmul.f32.gmra.mxu0 %v892_v7 }
 0x216   : > { %1195 = vmatmul.f32.gmra.mxu1 %v893_v51 }
 0x21a   : > { %896 = vmatmul.f32.gmra.mxu2 %v895_v35  ;;  %1329 = vmatmul.f32.vlgmr.msrb.gmra.mxu3 %v10075_v53 }
 0x21b   : > { %2017 = vmatpush.msrb.mxu3 %v9424_v46 }
 0x21d   : > { %2023 = vmatpush.msrb.mxu3 %v13200_v6 }
 0x21f   : > { %2029 = vmatpush.msrb.mxu3 %v13201_v8 }
 0x221   : > { %2035 = vmatpush.msrb.mxu3 %v13202_v12  ;;  %v13286_v12 = vld [vmem:[#allocation65_spill] sm:$0xff] }
 0x222   : > { %1264 = vmatmul.f32.vlgmr.msrb.gmra.mxu2 %v10075_v53  ;;  %1333 = vmatmul.f32.gmra.mxu3 %v10077_v16 }
 0x223   : > { %8378 = vmatpush.msk.msrb.mxu2 %vm9282_vm10, %v13179_v61  ;;  %2041 = vmatpush.msrb.mxu3 %v13203_v63 }
 0x225   : > { %8379 = vmatpush.msk.msrb.mxu2 %vm9295_vm15, %v13179_v61  ;;  %2047 = vmatpush.msrb.mxu3 %v13204_v40 }
 0x227   : > { %8380 = vmatpush.msk.msrb.mxu2 %vm9312_vm0, %v13179_v61  ;;  %2053 = vmatpush.msrb.mxu3 %v13205_v44  ;;  %v13280_v44 = vld [vmem:[#allocation63_spill] sm:$0xff] }
 0x229   : > { %8381 = vmatpush.msk.msrb.mxu2 %vm9334_vm1, %v13179_v61  ;;  %2059 = vmatpush.msrb.mxu3 %v13206_v24 }
 0x22a   : > { %1268 = vmatmul.f32.gmra.mxu2 %v10077_v16  ;;  %1337 = vmatmul.f32.gmra.mxu3 %v10091_v23 }
 0x22b   : > { %8382 = vmatpush.msk.msrb.mxu2 %vm9355_vm3, %v13179_v61  ;;  %2065 = vmatpush.msrb.mxu3 %v13207_v45 }
 0x22d   : > { %8383 = vmatpush.msk.msrb.mxu2 %vm9376_vm4, %v13179_v61  ;;  %2071 = vmatpush.msrb.mxu3 %v13208_v60 }
 0x22f   : > { %8384 = vmatpush.msk.msrb.mxu2 %vm9398_vm5, %v13179_v61  ;;  %2077 = vmatpush.msrb.mxu3 %v13209_v11 }
 0x231   : > { %8385 = vmatpush.msk.msrb.mxu2 %vm13192_vm9, %v13179_v61  ;;  %2083 = vmatpush.msrb.mxu3 %v9717_v18 }
 0x232   : > { %1272 = vmatmul.f32.gmra.mxu2 %v10091_v23  ;;  %1341 = vmatmul.f32.gmra.mxu3 %v10098_v31 }
 0x233   : > { %8386 = vmatpush.msk.msrb.mxu2 %vm13193_vm2, %v13179_v61  ;;  %2089 = vmatpush.msrb.mxu3 %v9736_v52 }
 0x235   : > { %8387 = vmatpush.msk.msrb.mxu2 %vm13221_vm14, %v13179_v61  ;;  %2095 = vmatpush.msrb.mxu3 %v9752_v0 }
 0x237   : > { %8388 = vmatpush.msk.msrb.mxu2 %vm13222_vm7, %v13179_v61  ;;  %2101 = vmatpush.msrb.mxu3 %v9763_v25  ;;  %vm13247_vm7 = vcmask 64512  }
 0x239   : > { %8389 = vmatpush.msk.msrb.mxu2 %vm13223_vm8, %v13179_v61  ;;  %2107 = vmatpush.msrb.mxu3 %v9769_v54 }
 0x23a   : > { %1276 = vmatmul.f32.gmra.mxu2 %v10098_v31  ;;  %1345 = vmatmul.f32.gmra.mxu3 %v10104_v36 }
 0x23b   : > { %8390 = vmatpush.msk.msrb.mxu2 %vm13224_vm6, %v13179_v61 }
 0x23d   : > { %8391 = vmatpush.msk.msrb.mxu2 %vm13225_vm13, %v13179_v61 }
 0x23f   : > { %8392 = vmatpush.msk.msrb.mxu2 %vm13226_vm11, %v13179_v61 }
 0x241   : > { %8393 = vmatpush.msk.msrb.mxu2 %vm13227_vm12, %v13179_v61  ;;  %vm13228_vm12 = vcmask 64512  }
 0x242   : > { %1280 = vmatmul.f32.gmra.mxu2 %v10104_v36  ;;  %1349 = vmatmul.f32.gmra.mxu3 %v10110_v14  ;;  %vm13229_vm11 = vmmov %vm13228_vm12 }
 0x243   : > { %vm13230_vm13 = vmmov %vm13229_vm11 }
 0x244   : > { %vm13231_vm6 = vmmov %vm13229_vm11 }
 0x24a   : > { %1284 = vmatmul.f32.gmra.mxu2 %v10110_v14  ;;  %1353 = vmatmul.f32.gmra.mxu3 %v10116_v48 }
 0x252   : > { %1288 = vmatmul.f32.gmra.mxu2 %v10116_v48  ;;  %1357 = vmatmul.f32.gmra.mxu3 %v891_v28 }
 0x259   : > { %v1080_v14 = vpop.f32.mrf.mxu0 }
 0x25a   : > { %1292 = vmatmul.f32.gmra.mxu2 %v891_v28 }
 0x25b   : > { %v1154_v41 = vpop.f32.mrf.mxu1 }
 0x25d   : > { %v998_v62 = vpop.f32.mrf.mxu3 }
 0x261   : > { %v1085_v28 = vpop.f32.mrf.mxu0 }
 0x263   : > { %v1160_v51 = vpop.f32.mrf.mxu1 }
 0x265   : > { %v841_v10 = vpop.f32.mrf.mxu2  ;;  %v1002_v53 = vpop.f32.mrf.mxu3 }
 0x266   : > { %v999_v4 = vadd.f32 %v998_v62, %v841_v10 }
 0x268   : > { %v1081_v55 = vadd.f32 %v1080_v14, %v999_v4 }
 0x269   : > { %v1090_v35 = vpop.f32.mrf.mxu0 }
 0x26a   : > { %v1155_v25 = vadd.f32 %v1154_v41, %v1081_v55 }
 0x26b   : > { %v1166_v45 = vpop.f32.mrf.mxu1 }
 0x26d   : > { %v849_v16 = vpop.f32.mrf.mxu2  ;;  %v1006_v23 = vpop.f32.mrf.mxu3 }
 0x26e   : > { %v1003_v54 = vadd.f32 %v1002_v53, %v849_v16 }
 0x270   : > { %v1086_v11 = vadd.f32 %v1085_v28, %v1003_v54 }
 0x271   : > { %v1095_v16 = vpop.f32.mrf.mxu0 }
 0x272   : > { %v1161_v24 = vadd.f32 %v1160_v51, %v1086_v11 }
 0x275   : > { %v857_v31 = vpop.f32.mrf.mxu2  ;;  %v1010_v43 = vpop.f32.mrf.mxu3 }
 0x276   : > { %v1007_v10 = vadd.f32 %v1006_v23, %v857_v31 }
 0x278   : > { %v1091_v41 = vadd.f32 %v1090_v35, %v1007_v10 }
 0x27d   : > { %v865_v38 = vpop.f32.mrf.mxu2  ;;  %v1014_v5 = vpop.f32.mrf.mxu3 }
 0x285   : > { %v873_v36 = vpop.f32.mrf.mxu2  ;;  %v1018_v57 = vpop.f32.mrf.mxu3 }
 0x286   : > { %v1015_v51 = vadd.f32 %v1014_v5, %v873_v36 }
 0x28d   : > { %v881_v20 = vpop.f32.mrf.mxu2  ;;  %v10201_v58 = vpop.f32.mrf.mxu3 }
 0x295   : > { %v10203_v29 = vpop.f32.mrf.mxu2  ;;  %v10205_v48 = vpop.f32.mrf.mxu3 }
 0x29d   : > { %v10207_v7 = vpop.f32.mrf.mxu2  ;;  %v1330_v17 = vpop.f32.mrf.mxu3 }
 0x2a5   : > { %v1265_v0 = vpop.f32.mrf.mxu2  ;;  %v1334_v52 = vpop.f32.mrf.mxu3 }
 0x2a6   : > { %v1266_v18 = vadd.f32 %v1265_v0, %v1155_v25  ;;  %v1011_v0 = vadd.f32 %v1010_v43, %v865_v38  ;;  %v1167_v25 = vadd.f32 %v1166_v45, %v1091_v41 }
 0x2a8   : > { %v10209_v60 = vadd.f32 %v1330_v17, %v1266_v18  ;;  %v1172_v18 = vpop.f32.mrf.mxu1  ;;  %v1096_v31 = vadd.f32 %v1095_v16, %v1011_v0  ;;  %v1019_v16 = vadd.f32 %v1018_v57, %v881_v20 }
 0x2aa   : > { %1361 = vst.msk [vmem:[#allocation2] sm:$0xff] %vm13228_vm12, %v10209_v60  ;;  %v1369_v62 = vsel %vm13229_vm11, %v10209_v60, -inf  ;;  %vm13232_vm12 = vmmov %vm13231_vm6  ;;  %v1173_v35 = vadd.f32 %v1172_v18, %v1096_v31 }
 0x2ab   : > { %1370 = vmax.xlane.f32.xlu0 %v1369_v62  ;;  %vm13233_vm11 = vmmov %vm13231_vm6 }
 0x2ad   : > { %v1269_v14 = vpop.f32.mrf.mxu2  ;;  %v1338_v4 = vpop.f32.mrf.mxu3 }
 0x2ae   : > { %v1270_v53 = vadd.f32 %v1269_v14, %v1161_v24  ;;  %v1100_v24 = vpop.f32.mrf.mxu0 }
 0x2af   : > { %v1101_v45 = vadd.f32 %v1100_v24, %v1015_v51 }
 0x2b0   : > { %v10215_v55 = vadd.f32 %v1334_v52, %v1270_v53  ;;  %v1178_v62 = vpop.f32.mrf.mxu1 }
 0x2b1   : > { %v1179_v41 = vadd.f32 %v1178_v62, %v1101_v45  ;;  %v1027_v62 = vadd.f32 %v10205_v48, %v10207_v7 }
 0x2b2   : > { %1362 = vst.msk [vmem:[#allocation2 + $0x8] sm:$0xff] %vm13230_vm13, %v10215_v55  ;;  %v1372_v54 = vsel %vm13231_vm6, %v10215_v55, -inf  ;;  %vm13234_vm13 = vmmov %vm13231_vm6 }
 0x2b3   : > { %1373 = vmax.xlane.f32.xlu0 %v1372_v54 }
 0x2b5   : > { %v1273_v28 = vpop.f32.mrf.mxu2  ;;  %v1342_v11 = vpop.f32.mrf.mxu3 }
 0x2b6   : > { %v1274_v23 = vadd.f32 %v1273_v28, %v1167_v25  ;;  %v1105_v53 = vpop.f32.mrf.mxu0 }
 0x2b7   : > { %v1106_v18 = vadd.f32 %v1105_v53, %v1019_v16 }
 0x2b8   : > { %v10221_v17 = vadd.f32 %v1338_v4, %v1274_v23  ;;  %v1184_v36 = vpop.f32.mrf.mxu1  ;;  %v1023_v23 = vadd.f32 %v10201_v58, %v10203_v29 }
 0x2ba   : > { %1363 = vst.msk [vmem:[#allocation2 + $0x10] sm:$0xff] %vm13232_vm12, %v10221_v17  ;;  %v1375_v52 = vsel %vm13233_vm11, %v10221_v17, -inf  ;;  %vm13235_vm12 = vmmov %vm13231_vm6 }
 0x2bb   : > { %1376 = vmax.xlane.f32.xlu1 %v1375_v52  ;;  %vm13236_vm11 = vmmov %vm13231_vm6 }
 0x2bd   : > { %v1277_v10 = vpop.f32.mrf.mxu2  ;;  %v1346_v14 = vpop.f32.mrf.mxu3 }
 0x2be   : > { %v1278_v43 = vadd.f32 %v1277_v10, %v1173_v35  ;;  %v1110_v57 = vpop.f32.mrf.mxu0 }
 0x2bf   : > { %v1111_v24 = vadd.f32 %v1110_v57, %v1023_v23 }
 0x2c0   : > { %v10227_v38 = vadd.f32 %v1342_v11, %v1278_v43  ;;  %v1185_v11 = vadd.f32 %v1184_v36, %v1106_v18  ;;  %v1190_v51 = vpop.f32.mrf.mxu1 }
 0x2c1   : > { %v1191_v10 = vadd.f32 %v1190_v51, %v1111_v24 }
 0x2c2   : > { %1364 = vst.msk [vmem:[#allocation2 + $0x18] sm:$0xff] %vm13231_vm6, %v10227_v38  ;;  %v1378_v4 = vsel %vm13234_vm13, %v10227_v38, -inf  ;;  %vm13237_vm13 = vmmov %vm13231_vm6 }
 0x2c3   : > { %1379 = vmax.xlane.f32.xlu1 %v1378_v4 }
 0x2c5   : > { %v1281_v54 = vpop.f32.mrf.mxu2  ;;  %v1350_v28 = vpop.f32.mrf.mxu3 }
 0x2c6   : > { %v1282_v5 = vadd.f32 %v1281_v54, %v1179_v41  ;;  %v1115_v58 = vpop.f32.mrf.mxu0 }
 0x2c7   : > { %v1116_v29 = vadd.f32 %v1115_v58, %v1027_v62 }
 0x2c8   : > { %v10233_v0 = vadd.f32 %v1346_v14, %v1282_v5  ;;  %v1196_v16 = vpop.f32.mrf.mxu1 }
 0x2c9   : > { %v1197_v41 = vadd.f32 %v1196_v16, %v1116_v29 }
 0x2ca   : > { %1365 = vst.msk [vmem:[#allocation2 + $0x20] sm:$0xff] %vm13235_vm12, %v10233_v0  ;;  %v1381_v25 = vsel %vm13236_vm11, %v10233_v0, -inf  ;;  %vm13238_vm12 = vmmov %vm13231_vm6 }
 0x2cb   : > { %1382 = vmax.xlane.f32.xlu2 %v1381_v25  ;;  %vm13239_vm11 = vmmov %vm13231_vm6 }
 0x2cd   : > { %v1285_v20 = vpop.f32.mrf.mxu2  ;;  %v1354_v43 = vpop.f32.mrf.mxu3 }
 0x2ce   : > { %v1286_v31 = vadd.f32 %v1285_v20, %v1185_v11 }
 0x2d0   : > { %v1351_v52 = vadd.f32 %v1350_v28, %v1286_v31 }
 0x2d2   : > { %1366 = vst.msk [vmem:[#allocation2 + $0x28] sm:$0xff] %vm13231_vm6, %v1351_v52  ;;  %v1384_v35 = vsel %vm13237_vm13, %v1351_v52, -inf  ;;  %vm13240_vm13 = vmmov %vm13231_vm6 }
 0x2d3   : > { %1385 = vmax.xlane.f32.xlu2 %v1384_v35 }
 0x2d5   : > { %v1289_v45 = vpop.f32.mrf.mxu2  ;;  %v1358_v36 = vpop.f32.mrf.mxu3 }
 0x2d6   : > { %v1290_v14 = vadd.f32 %v1289_v45, %v1191_v10 }
 0x2d8   : > { %v1355_v4 = vadd.f32 %v1354_v43, %v1290_v14 }
 0x2da   : > { %1367 = vst.msk [vmem:[#allocation2 + $0x30] sm:$0xff] %vm13238_vm12, %v1355_v4  ;;  %v1387_v53 = vsel %vm13239_vm11, %v1355_v4, -inf  ;;  %vm13241_vm12 = vmmov %vm13231_vm6 }
 0x2db   : > { %1388 = vmax.xlane.f32.xlu0 %v1387_v53  ;;  %vm13242_vm11 = vmmov %vm13231_vm6 }
 0x2dd   : > { %v1293_v54 = vpop.f32.mrf.mxu2 }
 0x2de   : > { %v1294_v5 = vadd.f32 %v1293_v54, %v1197_v41 }
 0x2e0   : > { %v1359_v18 = vadd.f32 %v1358_v36, %v1294_v5 }
 0x2e2   : > { %1368 = vst.msk [vmem:[#allocation2 + $0x38] sm:$0xff] %vm13231_vm6, %v1359_v18  ;;  %v1390_v48 = vsel %vm13240_vm13, %v1359_v18, -inf  ;;  %vm13243_vm13 = vmmov %vm13231_vm6 }
 0x2e3   : > { %1391 = vmax.xlane.f32.xlu2 %v1390_v48 }
 0x31e   : > { %v1371_v7 = vpop.xlane.xlu0 %1370 }
 0x31f   : > { %v1393_v25 = vsub.f32 %v10209_v60, %v1371_v7 }
 0x321   : > { %v1401_v28 = vmul.f32 1.442695, %v1393_v25 }
 0x323   : > { %8865 = vpow2.f32 %v1401_v28 }
 0x326   : > { %v1374_v23 = vpop.xlane.xlu0 %1373 }
 0x327   : > { %v1394_v11 = vsub.f32 %v10215_v55, %v1374_v23 }
 0x329   : > { %v10251_v57 = vpop.eup %8865  ;;  %v1403_v20 = vmul.f32 1.442695, %v1394_v11 }
 0x32a   : > { %v1417_v31 = vsel %vm13241_vm12, %v10251_v57, 0.0  ;;  %vm13244_vm12 = vmmov %vm13231_vm6 }
 0x32b   : > { %8867 = vpow2.f32 %v1403_v20  ;;  %1418 = vadd.xlane.f32.xlu1 %v1417_v31 }
 0x32e   : > { %v1377_v24 = vpop.xlane.xlu1 %1376 }
 0x32f   : > { %v1395_v51 = vsub.f32 %v10221_v17, %v1377_v24 }
 0x331   : > { %v10256_v35 = vpop.eup %8867  ;;  %v1405_v62 = vmul.f32 1.442695, %v1395_v51 }
 0x332   : > { %v1420_v60 = vsel %vm13242_vm11, %v10256_v35, 0.0  ;;  %vm13245_vm11 = vmmov %vm13231_vm6 }
 0x333   : > { %8869 = vpow2.f32 %v1405_v62  ;;  %1421 = vadd.xlane.f32.xlu0 %v1420_v60 }
 0x336   : > { %v1380_v55 = vpop.xlane.xlu1 %1379 }
 0x337   : > { %v1396_v10 = vsub.f32 %v10227_v38, %v1380_v55 }
 0x339   : > { %v10261_v43 = vpop.eup %8869  ;;  %v1407_v45 = vmul.f32 1.442695, %v1396_v10 }
 0x33a   : > { %v1423_v14 = vsel %vm13231_vm6, %v10261_v43, 0.0 }
 0x33b   : > { %8871 = vpow2.f32 %v1407_v45  ;;  %1424 = vadd.xlane.f32.xlu1 %v1423_v14 }
 0x33e   : > { %v1383_v17 = vpop.xlane.xlu2 %1382 }
 0x33f   : > { %v1397_v58 = vsub.f32 %v10233_v0, %v1383_v17 }
 0x341   : > { %v10266_v29 = vpop.eup %8871  ;;  %v1409_v53 = vmul.f32 1.442695, %v1397_v58 }
 0x342   : > { %v1426_v16 = vsel %vm13243_vm13, %v10266_v29, 0.0  ;;  %vm13246_vm13 = vmmov %vm13231_vm6 }
 0x343   : > { %8873 = vpow2.f32 %v1409_v53  ;;  %1427 = vadd.xlane.f32.xlu2 %v1426_v16 }
 0x346   : > { %v1386_v38 = vpop.xlane.xlu2 %1385 }
 0x347   : > { %v1398_v41 = vsub.f32 %v1351_v52, %v1386_v38 }
 0x349   : > { %v10270_v54 = vpop.eup %8873  ;;  %v1411_v5 = vmul.f32 1.442695, %v1398_v41 }
 0x34a   : > { %v1429_v36 = vsel %vm13244_vm12, %v10270_v54, 0.0 }
 0x34b   : > { %8875 = vpow2.f32 %v1411_v5  ;;  %1430 = vadd.xlane.f32.xlu0 %v1429_v36 }
 0x34e   : > { %v1389_v48 = vpop.xlane.xlu0 %1388 }
 0x34f   : > { %v1399_v0 = vsub.f32 %v1355_v4, %v1389_v48 }
 0x351   : > { %v10274_v7 = vpop.eup %8875  ;;  %v1413_v25 = vmul.f32 1.442695, %v1399_v0 }
 0x352   : > { %v1432_v28 = vsel %vm13245_vm11, %v10274_v7, 0.0 }
 0x353   : > { %8877 = vpow2.f32 %v1413_v25  ;;  %1433 = vadd.xlane.f32.xlu1 %v1432_v28 }
 0x356   : > { %v1392_v23 = vpop.xlane.xlu2 %1391 }
 0x357   : > { %v1400_v52 = vsub.f32 %v1359_v18, %v1392_v23 }
 0x359   : > { %v10278_v11 = vpop.eup %8877  ;;  %v1415_v20 = vmul.f32 1.442695, %v1400_v52 }
 0x35a   : > { %v1435_v31 = vsel %vm13231_vm6, %v10278_v11, 0.0 }
 0x35b   : > { %8879 = vpow2.f32 %v1415_v20  ;;  %1436 = vadd.xlane.f32.xlu2 %v1435_v31 }
 0x361   : > { %v10282_v24 = vpop.eup %8879 }
 0x362   : > { %v1438_v4 = vsel %vm13246_vm13, %v10282_v24, 0.0 }
 0x363   : > { %1439 = vadd.xlane.f32.xlu0 %v1438_v4 }
 0x39e   : > { %v1419_v51 = vpop.xlane.xlu1 %1418 }
 0x39f   : > { %8881 = vrcp.f32 %v1419_v51  ;;  %v1452_v10 = vand.u32 2147483648, %v1419_v51  ;;  %v1450_v14 = vand.u32 2147483647, %v1419_v51  ;;  %vm1446_vm11 = vweird.f32 %v1419_v51 }
 0x3a1   : > { %v1453_v53 = vor.u32 1.1754944e-38, %v1452_v10  ;;  %vm1451_vm8 = vcmp.eq.f32.partialorder %v1450_v14, 8.507059e+37 }
 0x3a5   : > { %v8882_v62 = vpop.eup %8881 }
 0x3a6   : > { %v1442_v60 = vmul.f32 %v8882_v62, %v1419_v51  ;;  %v1422_v55 = vpop.xlane.xlu0 %1421  ;;  %vm1447_vm12 = vweird.f32 %v8882_v62 }
 0x3a7   : > { %8883 = vrcp.f32 %v1422_v55  ;;  %vm1448_vm6 = vmor %vm1446_vm11, %vm1447_vm12  ;;  %v1467_v0 = vand.u32 2147483648, %v1422_v55  ;;  %v1465_v28 = vand.u32 2147483647, %v1422_v55  ;;  %vm1461_vm12 = vweird.f32 %v1422_v55 }
 0x3a8   : > { %v1443_v18 = vsub.f32 1.0, %v1442_v60 }
 0x3a9   : > { %v1468_v4 = vor.u32 1.1754944e-38, %v1467_v0 }
 0x3aa   : > { %v1444_v45 = vmul.f32 %v8882_v62, %v1443_v18 }
 0x3ac   : > { %v1445_v17 = vadd.f32 %v8882_v62, %v1444_v45 }
 0x3ad   : > { %v8884_v58 = vpop.eup %8883 }
 0x3ae   : > { %v1449_v16 = vsel %vm1448_vm6, %v8882_v62, %v1445_v17  ;;  %v1457_v38 = vmul.f32 %v8884_v58, %v1422_v55  ;;  %v1425_v41 = vpop.xlane.xlu1 %1424  ;;  %vm1462_vm13 = vweird.f32 %v8884_v58  ;;  %vm13248_vm6 = vcmask 64512  }
 0x3af   : > { %v1454_v5 = vsel %vm1451_vm8, %v1453_v53, %v1449_v16  ;;  %8885 = vrcp.f32 %v1425_v41  ;;  %vm1463_vm11 = vmor %vm1461_vm12, %vm1462_vm13  ;;  %vm1466_vm8 = vcmp.eq.f32.partialorder %v1465_v28, 8.507059e+37  ;;  %v1480_v14 = vand.u32 2147483647, %v1425_v41 }
 0x3b0   : > { %v1458_v36 = vsub.f32 1.0, %v1457_v38  ;;  %v1455_v48 = vmul.f32 %v10251_v57, %v1454_v5  ;;  %v1482_v17 = vand.u32 2147483648, %v1425_v41  ;;  %vm1476_vm13 = vweird.f32 %v1425_v41 }
 0x3b2   : > { %v1459_v25 = vmul.f32 %v8884_v58, %v1458_v36  ;;  %v1562_v23 = vsel %vm13247_vm7, %v1455_v48, 0  ;;  %v1483_v48 = vor.u32 1.1754944e-38, %v1482_v17 }
 0x3b3   : > { %v10288_v52 = vand.u32 4294901760, %v1562_v23 }
 0x3b4   : > { %v1460_v20 = vadd.f32 %v8884_v58, %v1459_v25 }
 0x3b5   : > { %v8886_v31 = vpop.eup %8885  ;;  %1689 = vmatmul.f32.vlgmr.msrb.gmra.mxu1 %v10288_v52  ;;  %v1603_v51 = vsub.f32 %v1562_v23, %v10288_v52 }
 0x3b6   : > { %v1464_v62 = vsel %vm1463_vm11, %v8884_v58, %v1460_v20  ;;  %v1472_v57 = vmul.f32 %v8886_v31, %v1425_v41  ;;  %v10292_v60 = vpop.xlane.xlu2 %1427  ;;  %8394 = vmatpush.msk.msrb.mxu1 %vm9282_vm10, %v13179_v61  ;;  %vm1477_vm7 = vweird.f32 %v8886_v31  ;;  %vm1481_vm11 = vcmp.eq.f32.partialorder %v1480_v14, 8.507059e+37 }
 0x3b7   : > { %v1469_v18 = vsel %vm1466_vm8, %v1468_v4, %v1464_v62  ;;  %8887 = vrcp.f32 %v10292_v60  ;;  %1741 = vmatmul.f32.vlgmr.msra.gmra.mxu2 %v1603_v51  ;;  %v1604_v10 = vand.u32 4294901760, %v1603_v51  ;;  %vm1478_vm12 = vmor %vm1476_vm13, %vm1477_vm7  ;;  %v1497_v62 = vand.u32 2147483648, %v10292_v60 }
 0x3b8   : > { %v1473_v55 = vsub.f32 1.0, %v1472_v57  ;;  %v1470_v45 = vmul.f32 %v10256_v35, %v1469_v18  ;;  %8395 = vmatpush.msk.msrb.mxu1 %vm9295_vm15, %v13179_v61  ;;  %2209 = vmatpush.msra.mxu2 %v13213_v50  ;;  %v13249_v57 = vld [vmem:[#allocation16_spill] sm:$0xff]  ;;  %vm13250_vm7 = vmmov %vm13248_vm6 }
 0x3b9   : > { %1800 = vmatmul.f32.vlgmr.msra.gmra.mxu3 %v1604_v10  ;;  %v1605_v53 = vsub.f32 %v1603_v51, %v1604_v10  ;;  %v1495_v51 = vand.u32 2147483647, %v10292_v60 }
 0x3ba   : > { %v1474_v58 = vmul.f32 %v8886_v31, %v1473_v55  ;;  %v1565_v16 = vsel %vm13248_vm6, %v1470_v45, 0  ;;  %8396 = vmatpush.msk.msrb.mxu1 %vm9312_vm0, %v13179_v61  ;;  %8410 = vmatpush.msk.msra.mxu3 %vm9282_vm10, %v13179_v61  ;;  %v13251_v45 = vld [vmem:[#allocation12_spill] sm:$0xff]  ;;  %vm1491_vm6 = vweird.f32 %v10292_v60 }
 0x3bb   : > { %v10307_v38 = vand.u32 4294901760, %v1565_v16  ;;  %2213 = vmatpush.msra.mxu2 %v9370_v33  ;;  %v1606_v5 = vand.u32 4294901760, %v1605_v53  ;;  %v13278_v33 = vld [vmem:[#allocation60_spill] sm:$0xff] }
 0x3bc   : > { %v1475_v35 = vadd.f32 %v8886_v31, %v1474_v58  ;;  %8397 = vmatpush.msk.msrb.mxu1 %vm9334_vm1, %v13179_v61  ;;  %8411 = vmatpush.msk.msra.mxu3 %vm9295_vm15, %v13179_v61  ;;  %v13252_v58 = vld [vmem:[#allocation19_spill] sm:$0xff] }
 0x3bd   : > { %v8888_v36 = vpop.eup %8887  ;;  %1693 = vmatmul.f32.gmra.mxu1 %v10307_v38  ;;  %v1611_v0 = vsub.f32 %v1565_v16, %v10307_v38  ;;  %1607 = vmatmul.f32.vlgmr.msrb.gmra.mxu0 %v1606_v5  ;;  %v1498_v16 = vor.u32 1.1754944e-38, %v1497_v62  ;;  %v13253_v5 = vld [vmem:[#allocation15_spill] sm:$0xff]  ;;  %v13256_v62 = vld [vmem:[#allocation22_spill] sm:$0xff] }
 0x3be   : > { %v1479_v25 = vsel %vm1478_vm12, %v8886_v31, %v1475_v35  ;;  %v1487_v41 = vmul.f32 %v8888_v36, %v10292_v60  ;;  %v10322_v28 = vpop.xlane.xlu0 %1430  ;;  %8398 = vmatpush.msk.msrb.mxu1 %vm9355_vm3, %v13179_v61  ;;  %2115 = vmatpush.msrb.mxu0 %v9316_v22  ;;  %vm1492_vm8 = vweird.f32 %v8888_v36  ;;  %vm1496_vm12 = vcmp.eq.f32.partialorder %v1495_v51, 8.507059e+37  ;;  %v13255_v51 = vld [vmem:[#allocation20_spill] sm:$0xff] }
 0x3bf   : > { %v1484_v23 = vsel %vm1481_vm11, %v1483_v48, %v1479_v25  ;;  %8889 = vrcp.f32 %v10322_v28  ;;  %1746 = vmatmul.f32.gmra.mxu2 %v1611_v0  ;;  %v1612_v4 = vand.u32 4294901760, %v1611_v0  ;;  %8412 = vmatpush.msk.msra.mxu3 %vm9312_vm0, %v13179_v61  ;;  %vm1493_vm13 = vmor %vm1491_vm6, %vm1492_vm8  ;;  %vm13259_vm6 = vnez %v13139_v3 }
 0x3c0   : > { %v1488_v20 = vsub.f32 1.0, %v1487_v41  ;;  %v1485_v31 = vmul.f32 %v10261_v43, %v1484_v23  ;;  %8399 = vmatpush.msk.msrb.mxu1 %vm9376_vm4, %v13179_v61  ;;  %2118 = vmatpush.msrb.mxu0 %v9338_v27  ;;  %v13254_v41 = vld [vmem:[#allocation18_spill] sm:$0xff]  ;;  %vm13257_vm8 = vmmov %vm13250_vm7 }
 0x3c1   : > { %2217 = vmatpush.msra.mxu2 %v13249_v57  ;;  %1806 = vmatmul.f32.gmra.mxu3 %v1612_v4  ;;  %v1613_v43 = vsub.f32 %v1611_v0, %v1612_v4  ;;  %v1510_v4 = vand.u32 2147483647, %v10322_v28 }
 0x3c2   : > { %v1489_v18 = vmul.f32 %v8888_v36, %v1488_v20  ;;  %v1568_v55 = vsel %vm13250_vm7, %v1485_v31, 0  ;;  %8400 = vmatpush.msk.msrb.mxu1 %vm9398_vm5, %v13179_v61  ;;  %2121 = vmatpush.msrb.mxu0 %v13251_v45  ;;  %v1512_v31 = vand.u32 2147483648, %v10322_v28  ;;  %vm1506_vm7 = vweird.f32 %v10322_v28 }
 0x3c3   : > { %v10344_v10 = vand.u32 4294901760, %v1568_v55  ;;  %8413 = vmatpush.msk.msra.mxu3 %vm9334_vm1, %v13179_v61  ;;  %v1614_v17 = vand.u32 4294901760, %v1613_v43  ;;  %2221 = vmatpush.msra.mxu2 %v13252_v58  ;;  %v13271_v58 = vld [vmem:[#allocation47_spill] sm:$0xff] }
 0x3c4   : > { %v1490_v14 = vadd.f32 %v8888_v36, %v1489_v18  ;;  %8401 = vmatpush.msk.msrb.mxu1 %vm13192_vm9, %v13179_v61  ;;  %2124 = vmatpush.msrb.mxu0 %v13253_v5 }
 0x3c5   : > { %v8890_v53 = vpop.eup %8889  ;;  %1697 = vmatmul.f32.gmra.mxu1 %v10344_v10  ;;  %v1619_v35 = vsub.f32 %v1568_v55, %v10344_v10  ;;  %1615 = vmatmul.f32.gmra.mxu0 %v1614_v17 }
 0x3c6   : > { %v1494_v48 = vsel %vm1493_vm13, %v8888_v36, %v1490_v14  ;;  %v1502_v60 = vmul.f32 %v8890_v53, %v10322_v28  ;;  %v10359_v0 = vpop.xlane.xlu1 %1433  ;;  %8414 = vmatpush.msk.msra.mxu3 %vm9355_vm3, %v13179_v61  ;;  %2127 = vmatpush.msrb.mxu0 %v13254_v41  ;;  %vm1507_vm11 = vweird.f32 %v8890_v53  ;;  %v13258_v14 = vld [vmem:[#allocation24_spill] sm:$0xff] }
 0x3c7   : > { %v1499_v25 = vsel %vm1496_vm12, %v1498_v16, %v1494_v48  ;;  %8891 = vrcp.f32 %v10359_v0  ;;  %1751 = vmatmul.f32.gmra.mxu2 %v1619_v35  ;;  %v1620_v20 = vand.u32 4294901760, %v1619_v35  ;;  %8402 = vmatpush.msk.msrb.mxu1 %vm13193_vm2, %v13179_v61  ;;  %vm1508_vm13 = vmor %vm1506_vm7, %vm1507_vm11  ;;  %vm1511_vm12 = vcmp.eq.f32.partialorder %v1510_v4, 8.507059e+37 }
 0x3c8   : > { %v1503_v23 = vsub.f32 1.0, %v1502_v60  ;;  %v1500_v36 = vmul.f32 %v10266_v29, %v1499_v25  ;;  %8415 = vmatpush.msk.msra.mxu3 %vm9376_vm4, %v13179_v61  ;;  %2130 = vmatpush.msrb.mxu0 %v13255_v51  ;;  %v1513_v60 = vor.u32 1.1754944e-38, %v1512_v31  ;;  %v13262_v31 = vld [vmem:[#allocation37_spill] sm:$0xff]  ;;  %vm13263_vm11 = vnez %v13145_v9 }
 0x3c9   : > { %2225 = vmatpush.msra.mxu2 %v13256_v62  ;;  %1812 = vmatmul.f32.gmra.mxu3 %v1620_v20  ;;  %v1621_v29 = vsub.f32 %v1619_v35, %v1620_v20  ;;  %v13260_v35 = vld [vmem:[#allocation26_spill] sm:$0xff]  ;;  %v1525_v4 = vand.u32 2147483647, %v10359_v0  ;;  %vm13266_vm7 = vcmask 64512  }
 0x3ca   : > { %v1504_v18 = vmul.f32 %v8890_v53, %v1503_v23  ;;  %v1571_v43 = vsel %vm13257_vm8, %v1500_v36, 0  ;;  %8403 = vmatpush.msk.msrb.mxu1 %vm13221_vm14, %v13179_v61  ;;  %2133 = vmatpush.msrb.mxu0 %v13258_v14  ;;  %v13261_v23 = vld [vmem:[#allocation33_spill] sm:$0xff] }
 0x3cb   : > { %v10381_v55 = vand.u32 4294901760, %v1571_v43  ;;  %8416 = vmatpush.msk.msra.mxu3 %vm9398_vm5, %v13179_v61  ;;  %v1622_v16 = vand.u32 4294901760, %v1621_v29  ;;  %2229 = vmatpush.msra.mxu2 %v13260_v35  ;;  %v13268_v35 = vld [vmem:[#allocation41_spill] sm:$0xff] }
 0x3cc   : > { %v1505_v17 = vadd.f32 %v8890_v53, %v1504_v18  ;;  %8404 = vmatpush.msk.msrb.mxu1 %vm13259_vm6, %v13179_v61  ;;  %2136 = vmatpush.msrb.mxu0 %v13261_v23 }
 0x3cd   : > { %v8892_v48 = vpop.eup %8891  ;;  %1701 = vmatmul.f32.gmra.mxu1 %v10381_v55  ;;  %v1627_v25 = vsub.f32 %v1571_v43, %v10381_v55  ;;  %1623 = vmatmul.f32.gmra.mxu0 %v1622_v16  ;;  %v13264_v16 = vld [vmem:[#allocation39_spill] sm:$0xff] }
 0x3ce   : > { %v1509_v20 = vsel %vm1508_vm13, %v8890_v53, %v1505_v17  ;;  %v1517_v28 = vmul.f32 %v8892_v48, %v10359_v0  ;;  %v10396_v36 = vpop.xlane.xlu2 %1436  ;;  %8417 = vmatpush.msk.msra.mxu3 %vm13192_vm9, %v13179_v61  ;;  %2139 = vmatpush.msrb.mxu0 %v13262_v31  ;;  %v1527_v17 = vand.u32 2147483648, %v10359_v0  ;;  %vm1522_vm8 = vweird.f32 %v8892_v48 }
 0x3cf   : > { %v1514_v18 = vsel %vm1511_vm12, %v1513_v60, %v1509_v20  ;;  %8893 = vrcp.f32 %v10396_v36  ;;  %1756 = vmatmul.f32.gmra.mxu2 %v1627_v25  ;;  %v1628_v43 = vand.u32 4294901760, %v1627_v25  ;;  %8405 = vmatpush.msk.msrb.mxu1 %vm13263_vm11, %v13179_v61  ;;  %v13265_v60 = vld [vmem:[#allocation29_spill] sm:$0xff]  ;;  %vm13267_vm13 = vnez %v13153_v37 }
 0x3d0   : > { %v1518_v29 = vsub.f32 1.0, %v1517_v28  ;;  %v1515_v53 = vmul.f32 %v10270_v54, %v1514_v18  ;;  %8418 = vmatpush.msk.msra.mxu3 %vm13193_vm2, %v13179_v61  ;;  %2142 = vmatpush.msrb.mxu0 %v13264_v16  ;;  %vm1521_vm12 = vweird.f32 %v10359_v0  ;;  %vm13269_vm2 = vnez %v13157_v42 }
 0x3d1   : > { %2233 = vmatpush.msra.mxu2 %v13265_v60  ;;  %1818 = vmatmul.f32.gmra.mxu3 %v1628_v43  ;;  %v1629_v54 = vsub.f32 %v1627_v25, %v1628_v43  ;;  %v13270_v25 = vld [vmem:[#allocation36_spill] sm:$0xff] }
 0x3d2   : > { %v1519_v20 = vmul.f32 %v8892_v48, %v1518_v29  ;;  %v1574_v28 = vsel %vm13266_vm7, %v1515_v53, 0  ;;  %8406 = vmatpush.msk.msrb.mxu1 %vm13267_vm13, %v13179_v61  ;;  %2145 = vmatpush.msrb.mxu0 %v13268_v35  ;;  %vm1523_vm7 = vmor %vm1521_vm12, %vm1522_vm8  ;;  %v1528_v53 = vor.u32 1.1754944e-38, %v1527_v17  ;;  %v13272_v17 = vld [vmem:[#allocation49_spill] sm:$0xff]  ;;  %vm13273_vm8 = vnez %v13167_v19 }
 0x3d3   : > { %v10418_v18 = vand.u32 4294901760, %v1574_v28  ;;  %8419 = vmatpush.msk.msra.mxu3 %vm13221_vm14, %v13179_v61  ;;  %v1630_v29 = vand.u32 4294901760, %v1629_v54  ;;  %2237 = vmatpush.msra.mxu2 %v13270_v25  ;;  %vm1526_vm14 = vcmp.eq.f32.partialorder %v1525_v4, 8.507059e+37  ;;  %v13274_v4 = vld [vmem:[#allocation58_spill] sm:$0xff]  ;;  %vm13276_vm12 = vcmask 64512  }
 0x3d4   : > { %v1520_v62 = vadd.f32 %v8892_v48, %v1519_v20  ;;  %8407 = vmatpush.msk.msrb.mxu1 %vm13269_vm2, %v13179_v61  ;;  %2148 = vmatpush.msrb.mxu0 %v13271_v58 }
 0x3d5   : > { %v8894_v43 = vpop.eup %8893  ;;  %1705 = vmatmul.f32.gmra.mxu1 %v10418_v18  ;;  %v1635_v60 = vsub.f32 %v1574_v28, %v10418_v18  ;;  %1631 = vmatmul.f32.gmra.mxu0 %v1630_v29  ;;  %v13275_v29 = vld [vmem:[#allocation40_spill] sm:$0xff] }
 0x3d6   : > { %v1524_v57 = vsel %vm1523_vm7, %v8892_v48, %v1520_v62  ;;  %v1532_v0 = vmul.f32 %v8894_v43, %v10396_v36  ;;  %v10433_v20 = vpop.xlane.xlu0 %1439  ;;  %8420 = vmatpush.msk.msra.mxu3 %vm13259_vm6, %v13179_v61  ;;  %2151 = vmatpush.msrb.mxu0 %v13272_v17  ;;  %v1540_v48 = vand.u32 2147483647, %v10396_v36  ;;  %vm13277_vm7 = vnez %v13173_v47 }
 0x3d7   : > { %v1529_v54 = vsel %vm1526_vm14, %v1528_v53, %v1524_v57  ;;  %8895 = vrcp.f32 %v10433_v20  ;;  %1761 = vmatmul.f32.gmra.mxu2 %v1635_v60  ;;  %v1636_v25 = vand.u32 4294901760, %v1635_v60  ;;  %8408 = vmatpush.msk.msrb.mxu1 %vm13273_vm8, %v13179_v61  ;;  %v1542_v57 = vand.u32 2147483648, %v10396_v36 }
 0x3d8   : > { %v1533_v28 = vsub.f32 1.0, %v1532_v0  ;;  %v1530_v62 = vmul.f32 %v10274_v7, %v1529_v54  ;;  %8421 = vmatpush.msk.msra.mxu3 %vm13263_vm11, %v13179_v61  ;;  %2154 = vmatpush.msrb.mxu0 %v13274_v4  ;;  %vm1537_vm14 = vweird.f32 %v8894_v43  ;;  %vm1536_vm11 = vweird.f32 %v10396_v36 }
 0x3d9   : > { %2241 = vmatpush.msra.mxu2 %v13275_v29  ;;  %1824 = vmatmul.f32.gmra.mxu3 %v1636_v25  ;;  %v1637_v7 = vsub.f32 %v1635_v60, %v1636_v25  ;;  %v13279_v29 = vld [vmem:[#allocation42_spill] sm:$0xff]  ;;  %v1543_v25 = vor.u32 1.1754944e-38, %v1542_v57  ;;  %vm1541_vm6 = vcmp.eq.f32.partialorder %v1540_v48, 8.507059e+37 }
 0x3da   : > { %v1534_v53 = vmul.f32 %v8894_v43, %v1533_v28  ;;  %v1577_v0 = vsel %vm13276_vm12, %v1530_v62, 0  ;;  %8409 = vmatpush.msk.msrb.mxu1 %vm13277_vm7, %v13179_v61  ;;  %2157 = vmatpush.msrb.mxu0 %v13278_v33  ;;  %vm1538_vm12 = vmor %vm1536_vm11, %vm1537_vm14  ;;  %vm1551_vm14 = vweird.f32 %v10433_v20 }
 0x3db   : > { %v10455_v54 = vand.u32 4294901760, %v1577_v0  ;;  %8422 = vmatpush.msk.msra.mxu3 %vm13267_vm13, %v13179_v61  ;;  %v1638_v28 = vand.u32 4294901760, %v1637_v7  ;;  %2245 = vmatpush.msra.mxu2 %v13279_v29  ;;  %v13281_v29 = vld [vmem:[#allocation45_spill] sm:$0xff] }
 0x3dc   : > { %v1535_v50 = vadd.f32 %v8894_v43, %v1534_v53  ;;  %2160 = vmatpush.msrb.mxu0 %v13280_v44 }
 0x3dd   : > { %v8896_v60 = vpop.eup %8895  ;;  %1709 = vmatmul.f32.gmra.mxu1 %v10455_v54  ;;  %v1643_v62 = vsub.f32 %v1577_v0, %v10455_v54  ;;  %1639 = vmatmul.f32.gmra.mxu0 %v1638_v28  ;;  %v1555_v0 = vand.u32 2147483647, %v10433_v20  ;;  %v13283_v28 = vld [vmem:[#allocation53_spill] sm:$0xff] }
 0x3de   : > { %v1539_v40 = vsel %vm1538_vm12, %v8894_v43, %v1535_v50  ;;  %v1547_v63 = vmul.f32 %v8896_v60, %v10433_v20  ;;  %8423 = vmatpush.msk.msra.mxu3 %vm13269_vm2, %v13179_v61  ;;  %2249 = vmatpush.msra.mxu2 %v13281_v29  ;;  %v1557_v50 = vand.u32 2147483648, %v10433_v20  ;;  %vm1552_vm11 = vweird.f32 %v8896_v60 }
 0x3df   : > { %v1544_v36 = vsel %vm1541_vm6, %v1543_v25, %v1539_v40  ;;  %1766 = vmatmul.f32.gmra.mxu2 %v1643_v62  ;;  %v1644_v53 = vand.u32 4294901760, %v1643_v62  ;;  %vm13282_vm6 = vcmask 64512   ;;  %vm1553_vm12 = vmor %vm1551_vm14, %vm1552_vm11 }
 0x3e0   : > { %v1548_v7 = vsub.f32 1.0, %v1547_v63  ;;  %v1545_v57 = vmul.f32 %v10278_v11, %v1544_v36  ;;  %8424 = vmatpush.msk.msra.mxu3 %vm13273_vm8, %v13179_v61  ;;  %2253 = vmatpush.msra.mxu2 %v13283_v28  ;;  %v13284_v36 = vld [vmem:[#allocation55_spill] sm:$0xff]  ;;  %vm1556_vm8 = vcmp.eq.f32.partialorder %v1555_v0, 8.507059e+37 }
 0x3e1   : > { %v1645_v43 = vsub.f32 %v1643_v62, %v1644_v53  ;;  %1830 = vmatmul.f32.gmra.mxu3 %v1644_v53  ;;  %v1558_v62 = vor.u32 1.1754944e-38, %v1557_v50 }
 0x3e2   : > { %v1549_v48 = vmul.f32 %v8896_v60, %v1548_v7  ;;  %v1580_v40 = vsel %vm13282_vm6, %v1545_v57, 0  ;;  %8425 = vmatpush.msk.msra.mxu3 %vm13277_vm7, %v13179_v61  ;;  %2257 = vmatpush.msra.mxu2 %v13284_v36  ;;  %v13285_v57 = vld [vmem:[#allocation62_spill] sm:$0xff]  ;;  %v13287_v36 = vld [vmem:[#allocation68_spill] sm:$0xff] }
 0x3e3   : > { %v1646_v63 = vand.u32 4294901760, %v1645_v43  ;;  %v1650_v11 = vand.u32 4294901760, %v1580_v40 }
 0x3e4   : > { %v1550_v25 = vadd.f32 %v8896_v60, %v1549_v48  ;;  %2261 = vmatpush.msra.mxu2 %v13285_v57 }
 0x3e5   : > { %1713 = vmatmul.f32.gmra.mxu1 %v1650_v11  ;;  %v1651_v7 = vsub.f32 %v1580_v40, %v1650_v11  ;;  %1647 = vmatmul.f32.gmra.mxu0 %v1646_v63 }
 0x3e6   : > { %v1554_v53 = vsel %vm1553_vm12, %v8896_v60, %v1550_v25  ;;  %2265 = vmatpush.msra.mxu2 %v13286_v12 }
 0x3e7   : > { %v1559_v43 = vsel %vm1556_vm8, %v1558_v62, %v1554_v53  ;;  %1771 = vmatmul.f32.gmra.mxu2 %v1651_v7  ;;  %v1652_v28 = vand.u32 4294901760, %v1651_v7  ;;  %vm13289_vm8 = vnez %v13195_v32 }
 0x3e8   : > { %v1560_v29 = vmul.f32 %v10282_v24, %v1559_v43  ;;  %2269 = vmatpush.msra.mxu2 %v13287_v36  ;;  %v13288_v24 = vld [vmem:[#allocation76_spill] sm:$0xff] }
 0x3e9   : > { %v1653_v48 = vsub.f32 %v1651_v7, %v1652_v28  ;;  %1836 = vmatmul.f32.gmra.mxu3 %v1652_v28 }
 0x3ea   : > { %v1583_v20 = vsel %vm13282_vm6, %v1560_v29, 0 }
 0x3eb   : > { %v1654_v50 = vand.u32 4294901760, %v1653_v48  ;;  %v1658_v40 = vand.u32 4294901760, %v1583_v20 }
 0x3ed   : > { %1717 = vmatmul.f32.gmra.mxu1 %v1658_v40  ;;  %v1659_v60 = vsub.f32 %v1583_v20, %v1658_v40  ;;  %1655 = vmatmul.f32.gmra.mxu0 %v1654_v50 }
 0x3ef   : > { %1776 = vmatmul.f32.gmra.mxu2 %v1659_v60  ;;  %v1660_v0 = vand.u32 4294901760, %v1659_v60 }
 0x3f1   : > { %v1661_v63 = vsub.f32 %v1659_v60, %v1660_v0  ;;  %1842 = vmatmul.f32.gmra.mxu3 %v1660_v0 }
 0x3f3   : > { %v1662_v25 = vand.u32 4294901760, %v1661_v63 }
 0x3f5   : > { %1916 = vmatmul.f32.vlgmr.msra.gmra.mxu1 %v10288_v52  ;;  %1663 = vmatmul.f32.gmra.mxu0 %v1662_v25 }
 0x3f6   : > { %2361 = vmatpush.msra.mxu1 %v13288_v24 }
 0x3fd   : > { %1920 = vmatmul.f32.gmra.mxu1 %v10307_v38  ;;  %1866 = vmatmul.f32.vlgmr.msra.gmra.mxu0 %v10288_v52 }
 0x3fe   : > { %8426 = vmatpush.msk.msra.mxu0 %vm13289_vm8, %v13179_v61 }
 0x405   : > { %1924 = vmatmul.f32.gmra.mxu1 %v10344_v10  ;;  %1870 = vmatmul.f32.gmra.mxu0 %v10307_v38 }
 0x40d   : > { %1928 = vmatmul.f32.gmra.mxu1 %v10381_v55  ;;  %1874 = vmatmul.f32.gmra.mxu0 %v10344_v10 }
 0x415   : > { %1932 = vmatmul.f32.gmra.mxu1 %v10418_v18  ;;  %1878 = vmatmul.f32.gmra.mxu0 %v10381_v55 }
 0x41d   : > { %1936 = vmatmul.f32.gmra.mxu1 %v10455_v54  ;;  %1882 = vmatmul.f32.gmra.mxu0 %v10418_v18 }
 0x425   : > { %1940 = vmatmul.f32.gmra.mxu1 %v1650_v11  ;;  %1886 = vmatmul.f32.gmra.mxu0 %v10455_v54 }
 0x42d   : > { %1944 = vmatmul.f32.gmra.mxu1 %v1658_v40  ;;  %1890 = vmatmul.f32.gmra.mxu0 %v1650_v11 }
 0x432   : > { %v1690_v52 = vpop.f32.mrf.mxu1 }
 0x435   : > { %1894 = vmatmul.f32.gmra.mxu0 %v1658_v40 }
 0x43a   : > { %v1694_v38 = vpop.f32.mrf.mxu1  ;;  %v1608_v29 = vpop.f32.mrf.mxu0 }
 0x43b   : > { %v1742_v18 = vpop.f32.mrf.mxu2  ;;  %v1691_v42 = vadd.f32 %v1690_v52, %v1608_v29 }
 0x43c   : > { %v1801_v0 = vpop.f32.mrf.mxu3 }
 0x43d   : > { %v1743_v3 = vadd.f32 %v1742_v18, %v1691_v42  ;;  %v9019_v18 = vld [vmem:[%s9249_s24 + $0x30] sm:$0xff] }
 0x43f   : > { %v1802_v39 = vadd.f32 %v1801_v0, %v1743_v3 }
 0x442   : > { %v1698_v28 = vpop.f32.mrf.mxu1  ;;  %v1616_v62 = vpop.f32.mrf.mxu0 }
 0x443   : > { %v1747_v63 = vpop.f32.mrf.mxu2  ;;  %v1695_v19 = vadd.f32 %v1694_v38, %v1616_v62 }
 0x444   : > { %v1807_v40 = vpop.f32.mrf.mxu3 }
 0x445   : > { %v1748_v31 = vadd.f32 %v1747_v63, %v1695_v19 }
 0x447   : > { %v1808_v51 = vadd.f32 %v1807_v40, %v1748_v31 }
 0x44a   : > { %v1702_v10 = vpop.f32.mrf.mxu1  ;;  %v1624_v7 = vpop.f32.mrf.mxu0 }
 0x44b   : > { %v1752_v12 = vpop.f32.mrf.mxu2  ;;  %v1699_v16 = vadd.f32 %v1698_v28, %v1624_v7 }
 0x44c   : > { %v1813_v8 = vpop.f32.mrf.mxu3 }
 0x44d   : > { %v1753_v14 = vadd.f32 %v1752_v12, %v1699_v16 }
 0x44f   : > { %v1814_v45 = vadd.f32 %v1813_v8, %v1753_v14 }
 0x452   : > { %v1706_v53 = vpop.f32.mrf.mxu1  ;;  %v1632_v43 = vpop.f32.mrf.mxu0 }
 0x453   : > { %v1757_v2 = vpop.f32.mrf.mxu2  ;;  %v1703_v9 = vadd.f32 %v1702_v10, %v1632_v43 }
 0x454   : > { %v1819_v44 = vpop.f32.mrf.mxu3 }
 0x455   : > { %v1758_v56 = vadd.f32 %v1757_v2, %v1703_v9 }
 0x457   : > { %v1820_v52 = vadd.f32 %v1819_v44, %v1758_v56 }
 0x45a   : > { %v1710_v55 = vpop.f32.mrf.mxu1  ;;  %v1640_v48 = vpop.f32.mrf.mxu0 }
 0x45b   : > { %v1762_v17 = vpop.f32.mrf.mxu2  ;;  %v1707_v59 = vadd.f32 %v1706_v53, %v1640_v48  ;;  %v9018_v48 = vld [vmem:[%s9249_s24 + $0x28] sm:$0xff] }
 0x45c   : > { %v1825_v24 = vpop.f32.mrf.mxu3 }
 0x45d   : > { %v1763_v34 = vadd.f32 %v1762_v17, %v1707_v59 }
 0x45f   : > { %v1826_v42 = vadd.f32 %v1825_v24, %v1763_v34  ;;  %v9014_v34 = vld [vmem:[%s9249_s24] sm:$0xff] }
 0x462   : > { %v1714_v20 = vpop.f32.mrf.mxu1  ;;  %v1648_v50 = vpop.f32.mrf.mxu0 }
 0x463   : > { %v1767_v35 = vpop.f32.mrf.mxu2  ;;  %v1711_v41 = vadd.f32 %v1710_v55, %v1648_v50 }
 0x464   : > { %v1831_v23 = vpop.f32.mrf.mxu3 }
 0x465   : > { %v1768_v29 = vadd.f32 %v1767_v35, %v1711_v41 }
 0x467   : > { %v1832_v2 = vadd.f32 %v1831_v23, %v1768_v29  ;;  %v9016_v23 = vld [vmem:[%s9249_s24 + $0x18] sm:$0xff] }
 0x46a   : > { %v1718_v60 = vpop.f32.mrf.mxu1  ;;  %v1656_v54 = vpop.f32.mrf.mxu0 }
 0x46b   : > { %v1715_v49 = vadd.f32 %v1714_v20, %v1656_v54  ;;  %v1772_v38 = vpop.f32.mrf.mxu2 }
 0x46c   : > { %v1837_v9 = vpop.f32.mrf.mxu3 }
 0x46d   : > { %v1773_v10 = vadd.f32 %v1772_v38, %v1715_v49 }
 0x46f   : > { %v1838_v59 = vadd.f32 %v1837_v9, %v1773_v10 }
 0x472   : > { %v1917_v11 = vpop.f32.mrf.mxu1  ;;  %v1664_v25 = vpop.f32.mrf.mxu0 }
 0x473   : > { %v1777_v35 = vpop.f32.mrf.mxu2 }
 0x474   : > { %v1843_v53 = vpop.f32.mrf.mxu3 }
 0x47a   : > { %v1921_v36 = vpop.f32.mrf.mxu1  ;;  %v1867_v57 = vpop.f32.mrf.mxu0 }
 0x47b   : > { %v1868_v19 = vadd.f32 %v1867_v57, %v1802_v39 }
 0x47d   : > { %v1918_v16 = vadd.f32 %v1917_v11, %v1868_v19 }
 0x47f   : > { %v1948_v49 = vmul.f32 %v9014_v34, %v1918_v16  ;;  %v13302_v34 = vld [vmem:[#allocation24_spill] sm:$0xff] }
 0x482   : > { %v1871_v6 = vpop.f32.mrf.mxu0  ;;  %v1925_v46 = vpop.f32.mrf.mxu1 }
 0x483   : > { %v1872_v27 = vadd.f32 %v1871_v6, %v1808_v51  ;;  %v1719_v6 = vadd.f32 %v1718_v60, %v1664_v25  ;;  %v9013_v51 = vld [vmem:[%s9249_s24 + $0x8] sm:$0xff] }
 0x485   : > { %v1922_v12 = vadd.f32 %v1921_v36, %v1872_v27  ;;  %v9015_v27 = vld [vmem:[%s9249_s24 + $0x10] sm:$0xff] }
 0x487   : > { %v1949_v14 = vmul.f32 %v9013_v51, %v1922_v12  ;;  %v13294_v51 = vld [vmem:[#allocation15_spill] sm:$0xff] }
 0x48a   : > { %v1875_v33 = vpop.f32.mrf.mxu0  ;;  %v1929_v4 = vpop.f32.mrf.mxu1 }
 0x48b   : > { %v1876_v28 = vadd.f32 %v1875_v33, %v1814_v45 }
 0x48d   : > { %v1926_v3 = vadd.f32 %v1925_v46, %v1876_v28  ;;  %v1778_v46 = vadd.f32 %v1777_v35, %v1719_v6  ;;  %v13310_v35 = vld [vmem:[#allocation39_spill] sm:$0xff] }
 0x48f   : > { %v1844_v43 = vadd.f32 %v1843_v53, %v1778_v46  ;;  %v13311_v46 = vld [vmem:[#allocation46_spill] sm:$0xff]  ;;  %v13321_v53 = vld [vmem:[#allocation63_spill] sm:$0xff] }
 0x492   : > { %v1879_v47 = vpop.f32.mrf.mxu0  ;;  %v1933_v58 = vpop.f32.mrf.mxu1 }
 0x493   : > { %v1880_v31 = vadd.f32 %v1879_v47, %v1820_v52  ;;  %v1950_v47 = vmul.f32 %v9015_v27, %v1926_v3  ;;  %v13290_v3 = vld [vmem:[#allocation10_spill] sm:$0xff]  ;;  %v13305_v27 = vld [vmem:[#allocation33_spill] sm:$0xff] }
 0x495   : > { %v1930_v56 = vadd.f32 %v1929_v4, %v1880_v31  ;;  %v9017_v4 = vld [vmem:[%s9249_s24 + $0x20] sm:$0xff] }
 0x497   : > { %v1951_v17 = vmul.f32 %v9016_v23, %v1930_v56  ;;  %v13296_v56 = vld [vmem:[#allocation18_spill] sm:$0xff] }
 0x498   : > { %v13313_v23 = vld [vmem:[#allocation54_spill] sm:$0xff] }
 0x49a   : > { %v1883_v37 = vpop.f32.mrf.mxu0  ;;  %v1937_v5 = vpop.f32.mrf.mxu1 }
 0x49b   : > { %v1884_v8 = vadd.f32 %v1883_v37, %v1826_v42  ;;  %v1956_v37 = vadd.f32 %v1949_v14, %v1948_v49  ;;  %v13303_v49 = vld [vmem:[#allocation34_spill] sm:$0xff] }
 0x49c   : > { %vm13304_vm12 = vnez %v13303_v49 }
 0x49d   : > { %v1934_v45 = vadd.f32 %v1933_v58, %v1884_v8  ;;  %v1957_v57 = vadd.f32 %v1956_v37, %v1950_v47  ;;  %v13306_v47 = vld [vmem:[#allocation38_spill] sm:$0xff]  ;;  %v13312_v37 = vld [vmem:[#allocation41_spill] sm:$0xff] }
 0x49e   : > { %vm13307_vm6 = vnez %v13306_v47 }
 0x49f   : > { %v1952_v24 = vmul.f32 %v9017_v4, %v1934_v45  ;;  %v1958_v55 = vadd.f32 %v1957_v57, %v1951_v17  ;;  %v13308_v45 = vld [vmem:[#allocation37_spill] sm:$0xff]  ;;  %v13315_v17 = vld [vmem:[#allocation47_spill] sm:$0xff]  ;;  %v13317_v57 = vld [vmem:[#allocation76_spill] sm:$0xff] }
 0x4a0   : > { %v13318_v4 = vld [vmem:[#allocation49_spill] sm:$0xff] }
 0x4a1   : > { %v1959_v58 = vadd.f32 %v1958_v55, %v1952_v24  ;;  %v13319_v24 = vld [vmem:[#allocation58_spill] sm:$0xff] }
 0x4a2   : > { %v1887_v62 = vpop.f32.mrf.mxu0  ;;  %v1941_v33 = vpop.f32.mrf.mxu1 }
 0x4a3   : > { %v1888_v44 = vadd.f32 %v1887_v62, %v1832_v2 }
 0x4a5   : > { %v1938_v36 = vadd.f32 %v1937_v5, %v1888_v44  ;;  %v9020_v5 = vld [vmem:[%s9249_s24 + $0x38] sm:$0xff] }
 0x4a6   : > { %v13297_v44 = vld [vmem:[#allocation28_spill] sm:$0xff] }
 0x4a7   : > { %v1953_v20 = vmul.f32 %v9018_v48, %v1938_v36  ;;  %vm13298_vm11 = vnez %v13297_v44  ;;  %v13316_v36 = vld [vmem:[#allocation57_spill] sm:$0xff] }
 0x4a9   : > { %v1960_v63 = vadd.f32 %v1959_v58, %v1953_v20 }
 0x4aa   : > { %v1891_v39 = vpop.f32.mrf.mxu0  ;;  %v1945_v54 = vpop.f32.mrf.mxu1 }
 0x4ab   : > { %v1892_v41 = vadd.f32 %v1891_v39, %v1838_v59  ;;  %v13292_v59 = vld [vmem:[#allocation12_spill] sm:$0xff]  ;;  %v13300_v39 = vld [vmem:[#allocation30_spill] sm:$0xff] }
 0x4ac   : > { %vm13301_vm14 = vnez %v13300_v39 }
 0x4ad   : > { %v1942_v7 = vadd.f32 %v1941_v33, %v1892_v41  ;;  %v13299_v33 = vld [vmem:[#allocation20_spill] sm:$0xff] }
 0x4ae   : > { %v13309_v41 = vld [vmem:[#allocation44_spill] sm:$0xff] }
 0x4af   : > { %v1954_v60 = vmul.f32 %v9019_v18, %v1942_v7  ;;  %v13320_v7 = vld [vmem:[#allocation60_spill] sm:$0xff] }
 0x4b1   : > { %v1961_v25 = vadd.f32 %v1960_v63, %v1954_v60 }
 0x4b2   : > { %v1895_v50 = vpop.f32.mrf.mxu0 }
 0x4b3   : > { %v1896_v0 = vadd.f32 %v1895_v50, %v1844_v43 }
 0x4b5   : > { %v1946_v11 = vadd.f32 %v1945_v54, %v1896_v0 }
 0x4b7   : > { %v1955_v40 = vmul.f32 %v9020_v5, %v1946_v11 }
 0x4b9   : > { %v1962_v38 = vadd.f32 %v1961_v25, %v1955_v40 }
 0x4bb   : > { %v1963_v62 = vrot.slane %v1962_v38, 4 }
 0x4bd   : > { %v1964_v52 = vadd.f32 %v1963_v62, %v1962_v38 }
 0x4bf   : > { %v1965_v29 = vrot.slane %v1964_v52, 2 }
 0x4c1   : > { %v1966_v19 = vadd.f32 %v1965_v29, %v1964_v52  ;;  %v13323_v52 = vld [vmem:[#allocation75_spill] sm:$0xff]  ;;  %v13324_v29 = vld [vmem:[#allocation21_spill] sm:$0xff] }
 0x4c3   : > { %v1967_v28 = vrot.slane %v1966_v19, 1 }
 0x4c5   : > { %v10513_v10 = vadd.f32 %v1967_v28, %v1966_v19  ;;  %v13325_v19 = vld [vmem:[#allocation25_spill] sm:$0xff]  ;;  %v13326_v28 = vld [vmem:[#allocation27_spill] sm:$0xff] }
 0x4c7   : > { %v1970_v42 = vmul.f32 %v10513_v10, %v10513_v10 }
 0x4c9   : > { %v2003_v12 = vand.u32 4294901760, %v1970_v42 }
 0x4cb   : > { %2109 = vmatmul.f32.vlgmr.msrb.gmra.mxu3 %v2003_v12  ;;  %v2004_v31 = vsub.f32 %v1970_v42, %v2003_v12  ;;  %v13327_v42 = vld [vmem:[#allocation31_spill] sm:$0xff] }
 0x4cc   : > { %8445 = vmatpush.msk.msrb.mxu3 %vm9282_vm10, %v13179_v61 }
 0x4cd   : > { %2163 = vmatmul.f32.vlgmr.msrb.gmra.mxu0 %v2004_v31  ;;  %v2005_v9 = vand.u32 4294901760, %v2004_v31 }
 0x4ce   : > { %2384 = vmatpush.msrb.mxu0 %v9920_v1  ;;  %8446 = vmatpush.msk.msrb.mxu3 %vm9295_vm15, %v13179_v61 }
 0x4cf   : > { %2202 = vmatmul.f32.vlgmr.msrb.gmra.mxu1 %v2005_v9  ;;  %v2006_v2 = vsub.f32 %v2004_v31, %v2005_v9  ;;  %v13329_v31 = vld [vmem:[#allocation35_spill] sm:$0xff] }
 0x4d0   : > { %8427 = vmatpush.msk.msrb.mxu1 %vm13289_vm8, %v13179_v61  ;;  %8447 = vmatpush.msk.msrb.mxu3 %vm9312_vm0, %v13179_v61  ;;  %v13330_v9 = vld [vmem:[#allocation43_spill] sm:$0xff] }
 0x4d1   : > { %v2007_v16 = vand.u32 4294901760, %v2006_v2  ;;  %v13331_v2 = vld [vmem:[#allocation48_spill] sm:$0xff] }
 0x4d2   : > { %8448 = vmatpush.msk.msrb.mxu3 %vm9334_vm1, %v13179_v61 }
 0x4d3   : > { %2008 = vmatmul.f32.vlgmr.msrb.gmra.mxu2 %v2007_v16  ;;  %2308 = vmatmul.f32.vlgmr.msra.gmra.mxu3 %v2003_v12  ;;  %v13332_v16 = vld [vmem:[#allocation52_spill] sm:$0xff] }
 0x4d4   : > { %2735 = vmatpush.msrb.mxu2 %v9316_v22  ;;  %8449 = vmatpush.msk.msrb.mxu3 %vm9355_vm3, %v13179_v61 }
 0x4d6   : > { %2738 = vmatpush.msrb.mxu2 %v13290_v3  ;;  %8450 = vmatpush.msk.msrb.mxu3 %vm9376_vm4, %v13179_v61 }
 0x4d8   : > { %2741 = vmatpush.msrb.mxu2 %v13292_v59  ;;  %8451 = vmatpush.msk.msrb.mxu3 %vm9398_vm5, %v13179_v61 }
 0x4da   : > { %2744 = vmatpush.msrb.mxu2 %v13294_v51  ;;  %8452 = vmatpush.msk.msrb.mxu3 %vm13192_vm9, %v13179_v61 }
 0x4db   : > { %2271 = vmatmul.f32.vlgmr.msra.gmra.mxu2 %v2003_v12  ;;  %v13328_v12 = vld [vmem:[#allocation32_spill] sm:$0xff] }
 0x4dc   : > { %2747 = vmatpush.msrb.mxu2 %v13296_v56  ;;  %8453 = vmatpush.msk.msrb.mxu3 %vm13298_vm11, %v13179_v61 }
 0x4de   : > { %2750 = vmatpush.msrb.mxu2 %v13299_v33  ;;  %8454 = vmatpush.msk.msrb.mxu3 %vm13301_vm14, %v13179_v61 }
 0x4e0   : > { %2753 = vmatpush.msrb.mxu2 %v13302_v34  ;;  %8455 = vmatpush.msk.msrb.mxu3 %vm13304_vm12, %v13179_v61  ;;  %vm13314_vm12 = vnez %v13313_v23 }
 0x4e2   : > { %2756 = vmatpush.msrb.mxu2 %v13305_v27  ;;  %8456 = vmatpush.msk.msrb.mxu3 %vm13307_vm6, %v13179_v61 }
 0x4e4   : > { %2759 = vmatpush.msrb.mxu2 %v13308_v45  ;;  %8457 = vmatpush.msk.msrb.mxu3 %vm13267_vm13, %v13179_v61 }
 0x4e6   : > { %2762 = vmatpush.msrb.mxu2 %v13310_v35  ;;  %8458 = vmatpush.msk.msrb.mxu3 %vm13269_vm2, %v13179_v61 }
 0x4e8   : > { %2765 = vmatpush.msrb.mxu2 %v13312_v37  ;;  %8459 = vmatpush.msk.msrb.mxu3 %vm13314_vm12, %v13179_v61 }
 0x4ea   : > { %2768 = vmatpush.msrb.mxu2 %v13315_v17  ;;  %8460 = vmatpush.msk.msrb.mxu3 %vm13277_vm7, %v13179_v61  ;;  %vm13322_vm7 = vcmask 64512  }
 0x4ec   : > { %3399 = vmatpush.msra.mxu3 %v13317_v57  ;;  %2771 = vmatpush.msrb.mxu2 %v13318_v4  ;;  %v13352_v57 = vld [vmem:[#allocation45_spill] sm:$0xff] }
 0x4ee   : > { %2774 = vmatpush.msrb.mxu2 %v13319_v24  ;;  %v13357_v24 = vld [vmem:[#allocation68_spill] sm:$0xff] }
 0x4f0   : > { %2777 = vmatpush.msrb.mxu2 %v13320_v7  ;;  %v13354_v7 = vld [vmem:[#allocation55_spill] sm:$0xff] }
 0x4f2   : > { %2780 = vmatpush.msrb.mxu2 %v13321_v53  ;;  %v13353_v53 = vld [vmem:[#allocation53_spill] sm:$0xff] }
 0x4f4   : > { %8477 = vmatpush.msk.msra.mxu2 %vm13289_vm8, %v13179_v61 }
 0x54a   : > { %v2164_v20 = vpop.f32.mrf.mxu0 }
 0x54c   : > { %v2203_v58 = vpop.f32.mrf.mxu1 }
 0x54e   : > { %v2110_v43 = vpop.f32.mrf.mxu3 }
 0x556   : > { %v2009_v55 = vpop.f32.mrf.mxu2  ;;  %v2309_v54 = vpop.f32.mrf.mxu3 }
 0x557   : > { %v2111_v48 = vadd.f32 %v2110_v43, %v2009_v55  ;;  %v13333_v43 = vld [vmem:[#allocation59_spill] sm:$0xff]  ;;  %v13334_v55 = vld [vmem:[#allocation64_spill] sm:$0xff] }
 0x559   : > { %v2165_v50 = vadd.f32 %v2164_v20, %v2111_v48  ;;  %v13335_v48 = vld [vmem:[#allocation67_spill] sm:$0xff]  ;;  %v13336_v20 = vld [vmem:[#allocation70_spill] sm:$0xff] }
 0x55b   : > { %v2204_v18 = vadd.f32 %v2203_v58, %v2165_v50  ;;  %v13337_v50 = vld [vmem:[#allocation71_spill] sm:$0xff]  ;;  %v13339_v58 = vld [vmem:[#allocation72_spill] sm:$0xff] }
 0x55e   : > { %v2272_v60 = vpop.f32.mrf.mxu2 }
 0x55f   : > { %v2273_v0 = vadd.f32 %v2272_v60, %v2204_v18  ;;  %v13340_v18 = vld [vmem:[#allocation73_spill] sm:$0xff]  ;;  %v13342_v60 = vld [vmem:[#allocation11_spill] sm:$0xff] }
 0x561   : > { %v2310_v63 = vadd.f32 %v2309_v54, %v2273_v0  ;;  %v13343_v0 = vld [vmem:[#allocation13_spill] sm:$0xff]  ;;  %v13344_v54 = vld [vmem:[#allocation16_spill] sm:$0xff] }
 0x563   : > { %v2313_v11 = vsel %vm13322_vm7, %v2310_v63, 0  ;;  %vm13338_vm7 = vnez %v13303_v49  ;;  %v13345_v63 = vld [vmem:[#allocation19_spill] sm:$0xff] }
 0x564   : > { %v2332_v25 = vand.u32 4294901760, %v2313_v11 }
 0x566   : > { %v2333_v5 = vsub.f32 %v2313_v11, %v2332_v25  ;;  %2363 = vmatmul.f32.vlgmr.msra.gmra.mxu1 %v2332_v25  ;;  %v13346_v11 = vld [vmem:[#allocation22_spill] sm:$0xff] }
 0x567   : > { %8428 = vmatpush.msk.msra.mxu1 %vm13289_vm8, %v13179_v61 }
 0x568   : > { %v2334_v40 = vand.u32 4294901760, %v2333_v5 }
 0x56a   : > { %v2335_v38 = vsub.f32 %v2333_v5, %v2334_v40 }
 0x56c   : > { %v2336_v62 = vand.u32 4294901760, %v2335_v38  ;;  %v13350_v38 = vld [vmem:[#allocation40_spill] sm:$0xff] }
 0x56e   : > { %2337 = vmatmul.f32.vlgmr.msra.gmra.mxu0 %v2336_v62  ;;  %2411 = vmatmul.f32.vlgmr.msrb.gmra.mxu1 %v2334_v40  ;;  %v13349_v40 = vld [vmem:[#allocation36_spill] sm:$0xff]  ;;  %v13351_v62 = vld [vmem:[#allocation42_spill] sm:$0xff] }
 0x56f   : > { %2433 = vmatpush.msra.mxu0 %v13323_v52  ;;  %2609 = vmatpush.msrb.mxu1 %v13324_v29 }
 0x571   : > { %2615 = vmatpush.msrb.mxu1 %v13325_v19 }
 0x573   : > { %2621 = vmatpush.msrb.mxu1 %v13326_v28 }
 0x575   : > { %2627 = vmatpush.msrb.mxu1 %v13327_v42 }
 0x576   : > { %2387 = vmatmul.f32.vlgmr.msrb.gmra.mxu0 %v2333_v5  ;;  %2457 = vmatmul.f32.vlgmr.msra.gmra.mxu1 %v2332_v25  ;;  %v13348_v5 = vld [vmem:[#allocation29_spill] sm:$0xff] }
 0x577   : > { %8429 = vmatpush.msk.msrb.mxu0 %vm9282_vm10, %v13179_v61  ;;  %2633 = vmatpush.msrb.mxu1 %v13328_v12 }
 0x579   : > { %8430 = vmatpush.msk.msrb.mxu0 %vm9295_vm15, %v13179_v61  ;;  %2639 = vmatpush.msrb.mxu1 %v13329_v31 }
 0x57b   : > { %8431 = vmatpush.msk.msrb.mxu0 %vm9312_vm0, %v13179_v61  ;;  %2645 = vmatpush.msrb.mxu1 %v13330_v9 }
 0x57d   : > { %8432 = vmatpush.msk.msrb.mxu0 %vm9334_vm1, %v13179_v61  ;;  %2651 = vmatpush.msrb.mxu1 %v13331_v2 }
 0x57e   : > { %2435 = vmatmul.f32.vlgmr.msra.gmra.mxu0 %v2332_v25  ;;  %v13347_v25 = vld [vmem:[#allocation26_spill] sm:$0xff] }
 0x57f   : > { %8433 = vmatpush.msk.msrb.mxu0 %vm9355_vm3, %v13179_v61  ;;  %2657 = vmatpush.msrb.mxu1 %v13332_v16 }
 0x581   : > { %8434 = vmatpush.msk.msrb.mxu0 %vm9376_vm4, %v13179_v61  ;;  %2663 = vmatpush.msrb.mxu1 %v13333_v43 }
 0x583   : > { %8435 = vmatpush.msk.msrb.mxu0 %vm9398_vm5, %v13179_v61  ;;  %2669 = vmatpush.msrb.mxu1 %v13334_v55 }
 0x585   : > { %8436 = vmatpush.msk.msrb.mxu0 %vm13192_vm9, %v13179_v61  ;;  %2675 = vmatpush.msrb.mxu1 %v13335_v48 }
 0x587   : > { %8437 = vmatpush.msk.msrb.mxu0 %vm13298_vm11, %v13179_v61  ;;  %2681 = vmatpush.msrb.mxu1 %v13336_v20 }
 0x589   : > { %8438 = vmatpush.msk.msrb.mxu0 %vm13301_vm14, %v13179_v61  ;;  %2687 = vmatpush.msrb.mxu1 %v13337_v50 }
 0x58b   : > { %8439 = vmatpush.msk.msrb.mxu0 %vm13338_vm7, %v13179_v61  ;;  %2693 = vmatpush.msrb.mxu1 %v13339_v58 }
 0x58d   : > { %8440 = vmatpush.msk.msrb.mxu0 %vm13307_vm6, %v13179_v61  ;;  %2699 = vmatpush.msrb.mxu1 %v13340_v18 }
 0x58f   : > { %8461 = vmatpush.msk.msra.mxu1 %vm9282_vm10, %v13179_v61  ;;  %8441 = vmatpush.msk.msrb.mxu0 %vm13267_vm13, %v13179_v61  ;;  %vm13341_vm10 = vnez %v13316_v36 }
 0x591   : > { %8462 = vmatpush.msk.msra.mxu1 %vm9295_vm15, %v13179_v61  ;;  %8442 = vmatpush.msk.msrb.mxu0 %vm13269_vm2, %v13179_v61 }
 0x593   : > { %8463 = vmatpush.msk.msra.mxu1 %vm9312_vm0, %v13179_v61  ;;  %8443 = vmatpush.msk.msrb.mxu0 %vm13314_vm12, %v13179_v61 }
 0x595   : > { %8464 = vmatpush.msk.msra.mxu1 %vm9334_vm1, %v13179_v61  ;;  %8444 = vmatpush.msk.msrb.mxu0 %vm13341_vm10, %v13179_v61 }
 0x597   : > { %2906 = vmatpush.msra.mxu0 %v13342_v60  ;;  %8465 = vmatpush.msk.msra.mxu1 %vm9355_vm3, %v13179_v61 }
 0x599   : > { %2910 = vmatpush.msra.mxu0 %v13343_v0  ;;  %8466 = vmatpush.msk.msra.mxu1 %vm9376_vm4, %v13179_v61 }
 0x59b   : > { %2914 = vmatpush.msra.mxu0 %v13344_v54  ;;  %8467 = vmatpush.msk.msra.mxu1 %vm9398_vm5, %v13179_v61 }
 0x59d   : > { %2918 = vmatpush.msra.mxu0 %v13345_v63  ;;  %8468 = vmatpush.msk.msra.mxu1 %vm13192_vm9, %v13179_v61 }
 0x59f   : > { %2922 = vmatpush.msra.mxu0 %v13346_v11  ;;  %8469 = vmatpush.msk.msra.mxu1 %vm13298_vm11, %v13179_v61 }
 0x5a1   : > { %2926 = vmatpush.msra.mxu0 %v13347_v25  ;;  %8470 = vmatpush.msk.msra.mxu1 %vm13301_vm14, %v13179_v61 }
 0x5a3   : > { %2930 = vmatpush.msra.mxu0 %v13348_v5  ;;  %8471 = vmatpush.msk.msra.mxu1 %vm13338_vm7, %v13179_v61 }
 0x5a5   : > { %2934 = vmatpush.msra.mxu0 %v13349_v40  ;;  %8472 = vmatpush.msk.msra.mxu1 %vm13307_vm6, %v13179_v61 }
 0x5a7   : > { %2938 = vmatpush.msra.mxu0 %v13350_v38  ;;  %8473 = vmatpush.msk.msra.mxu1 %vm13267_vm13, %v13179_v61  ;;  %v13355_v38 = vld [vmem:[#allocation62_spill] sm:$0xff] }
 0x5a9   : > { %2942 = vmatpush.msra.mxu0 %v13351_v62  ;;  %8474 = vmatpush.msk.msra.mxu1 %vm13269_vm2, %v13179_v61  ;;  %v13356_v62 = vld [vmem:[#allocation65_spill] sm:$0xff] }
 0x5ab   : > { %2946 = vmatpush.msra.mxu0 %v13352_v57  ;;  %8475 = vmatpush.msk.msra.mxu1 %vm13314_vm12, %v13179_v61 }
 0x5ad   : > { %2950 = vmatpush.msra.mxu0 %v13353_v53  ;;  %8476 = vmatpush.msk.msra.mxu1 %vm13341_vm10, %v13179_v61 }
 0x5af   : > { %2954 = vmatpush.msra.mxu0 %v13354_v7 }
 0x5b1   : > { %2958 = vmatpush.msra.mxu0 %v13355_v38 }
 0x5b3   : > { %2962 = vmatpush.msra.mxu0 %v13356_v62 }
 0x5b5   : > { %2966 = vmatpush.msra.mxu0 %v13357_v24 }
 0x5e3   : > { %v2364_v4 = vpop.f32.mrf.mxu1 }
 0x5eb   : > { %v2338_v57 = vpop.f32.mrf.mxu0  ;;  %v2412_v17 = vpop.f32.mrf.mxu1 }
 0x5ec   : > { %v2365_v37 = vadd.f32 %v2364_v4, %v2338_v57 }
 0x5f3   : > { %v2388_v40 = vpop.f32.mrf.mxu0  ;;  %v2458_v27 = vpop.f32.mrf.mxu1 }
 0x5f4   : > { %v2389_v5 = vadd.f32 %v2388_v40, %v2365_v37  ;;  %v2491_v40 = vld [vmem:[%s9249_s24 + $0x8] sm:$0xff] }
 0x5f6   : > { %v2413_v35 = vadd.f32 %v2412_v17, %v2389_v5  ;;  %v2490_v5 = vld [vmem:[%s9249_s24] sm:$0xff] }
 0x5fb   : > { %v2436_v53 = vpop.f32.mrf.mxu0 }
 0x5fc   : > { %v2437_v45 = vadd.f32 %v2436_v53, %v2413_v35 }
 0x5fe   : > { %v2459_v25 = vadd.f32 %v2458_v27, %v2437_v45 }
 0x600   : > { %v2461_v34 = vadd.f32 1e-06, %v2459_v25  ;;  %v2473_v11 = vadd.f32 1.0, %v2459_v25 }
 0x602   : > { %8897 = vrsqrt.f32 %v2461_v34  ;;  %v2485_v37 = vand.u32 2147483648, %v2473_v11  ;;  %vm2479_vm2 = vweird.f32 %v2473_v11  ;;  %v2483_v27 = vand.u32 2147483647, %v2473_v11 }
 0x603   : > { %8899 = vrcp.f32 %v2473_v11  ;;  %vm2468_vm13 = vweird.f32 %v2461_v34 }
 0x604   : > { %v2486_v53 = vor.u32 1.1754944e-38, %v2485_v37  ;;  %vm2484_vm14 = vcmp.eq.f32.partialorder %v2483_v27, 8.507059e+37 }
 0x608   : > { %v8898_v38 = vpop.eup %8897 }
 0x609   : > { %v8900_v7 = vpop.eup %8899  ;;  %v2463_v62 = vmul.f32 %v8898_v38, %v2461_v34  ;;  %vm2469_vm12 = vweird.f32 %v8898_v38 }
 0x60a   : > { %v2475_v33 = vmul.f32 %v8900_v7, %v2473_v11  ;;  %vm2480_vm10 = vweird.f32 %v8900_v7  ;;  %vm2470_vm7 = vmor %vm2468_vm13, %vm2469_vm12  ;;  %vm13360_vm13 = vnez %v13303_v49  ;;  %vm13362_vm12 = vnez %v13309_v41 }
 0x60b   : > { %v2464_v24 = vmul.f32 %v8898_v38, %v2463_v62  ;;  %vm2481_vm6 = vmor %vm2479_vm2, %vm2480_vm10  ;;  %vm13358_vm10 = vnez %v13094_v13  ;;  %vm13359_vm2 = vnez %v13300_v39 }
 0x60c   : > { %v2476_v56 = vsub.f32 1.0, %v2475_v33 }
 0x60d   : > { %v2465_v51 = vmul.f32 0.5, %v2464_v24 }
 0x60e   : > { %v2477_v63 = vmul.f32 %v8900_v7, %v2476_v56 }
 0x60f   : > { %v2466_v57 = vsub.f32 1.5, %v2465_v51 }
 0x610   : > { %v2478_v35 = vadd.f32 %v8900_v7, %v2477_v63 }
 0x611   : > { %v2467_v45 = vmul.f32 %v8898_v38, %v2466_v57 }
 0x612   : > { %v2482_v17 = vsel %vm2481_vm6, %v8900_v7, %v2478_v35  ;;  %v2492_v7 = vld [vmem:[%s9249_s24 + $0x10] sm:$0xff]  ;;  %vm13363_vm6 = vnez %v13311_v46 }
 0x613   : > { %v2471_v4 = vsel %vm2470_vm7, %v8898_v38, %v2467_v45  ;;  %v2487_v56 = vsel %vm2484_vm14, %v2486_v53, %v2482_v17  ;;  %vm13361_vm14 = vnez %v13306_v47  ;;  %vm13364_vm7 = vnez %v13313_v23 }
 0x614   : > { %v2472_v33 = vmul.f32 %v2471_v4, %v2459_v25  ;;  %v2493_v4 = vld [vmem:[%s9249_s24 + $0x18] sm:$0xff] }
 0x616   : > { %v2488_v24 = vmul.f32 %v2487_v56, %v2472_v33 }
 0x618   : > { %v2489_v51 = vmul.f32 %v2488_v24, %v10513_v10 }
 0x61a   : > { %v10725_v63 = vperm.slane %v2489_v51, 0 }
 0x61c   : > { %v2499_v11 = vmul.f32 %v10725_v63, %v2490_v5  ;;  %v2500_v34 = vmul.f32 %v10725_v63, %v2491_v40  ;;  %v2501_v37 = vmul.f32 %v10725_v63, %v2492_v7  ;;  %v2502_v56 = vmul.f32 %v10725_v63, %v2493_v4  ;;  %v2494_v40 = vld [vmem:[%s9249_s24 + $0x20] sm:$0xff] }
 0x61d   : > { %v2503_v7 = vmul.f32 %v10725_v63, %v2494_v40 }
 0x61e   : > { %v10729_v62 = vand.u32 4294901760, %v2499_v11  ;;  %v10731_v57 = vand.u32 4294901760, %v2500_v34  ;;  %v10745_v17 = vand.u32 4294901760, %v2501_v37  ;;  %v10752_v5 = vand.u32 4294901760, %v2502_v56 }
 0x620   : > { %2701 = vmatmul.f32.vlgmr.msrb.gmra.mxu1 %v10729_v62  ;;  %v2540_v25 = vsub.f32 %v2499_v11, %v10729_v62  ;;  %v2548_v38 = vsub.f32 %v2500_v34, %v10731_v57  ;;  %v2556_v33 = vsub.f32 %v2501_v37, %v10745_v17  ;;  %v2564_v34 = vsub.f32 %v2502_v56, %v10752_v5  ;;  %v2495_v37 = vld [vmem:[%s9249_s24 + $0x28] sm:$0xff]  ;;  %v2496_v56 = vld [vmem:[%s9249_s24 + $0x30] sm:$0xff] }
 0x621   : > { %8478 = vmatpush.msk.msrb.mxu1 %vm13289_vm8, %v13179_v61  ;;  %v2505_v40 = vmul.f32 %v10725_v63, %v2496_v56 }
 0x622   : > { %2783 = vmatmul.f32.vlgmr.msrb.gmra.mxu2 %v2540_v25  ;;  %v2541_v10 = vand.u32 4294901760, %v2540_v25  ;;  %v2549_v45 = vand.u32 4294901760, %v2548_v38  ;;  %v2557_v51 = vand.u32 4294901760, %v2556_v33 }
 0x623   : > { %3576 = vmatpush.msrb.mxu2 %v13323_v52 }
 0x624   : > { %2857 = vmatmul.f32.vlgmr.msrb.gmra.mxu3 %v2541_v10  ;;  %v2542_v35 = vsub.f32 %v2540_v25, %v2541_v10  ;;  %v2550_v53 = vsub.f32 %v2548_v38, %v2549_v45  ;;  %v2558_v11 = vsub.f32 %v2556_v33, %v2557_v51  ;;  %v2565_v10 = vand.u32 4294901760, %v2564_v34 }
 0x625   : > { %8479 = vmatpush.msk.msrb.mxu3 %vm13289_vm8, %v13179_v61  ;;  %vm13365_vm8 = vnez %v13316_v36 }
 0x626   : > { %v2543_v27 = vand.u32 4294901760, %v2542_v35  ;;  %v2551_v24 = vand.u32 4294901760, %v2550_v53  ;;  %v2559_v25 = vand.u32 4294901760, %v2558_v11  ;;  %v2566_v35 = vsub.f32 %v2564_v34, %v2565_v10 }
 0x628   : > { %2544 = vmatmul.f32.vlgmr.msrb.gmra.mxu0 %v2543_v27  ;;  %2705 = vmatmul.f32.gmra.mxu1 %v10731_v57  ;;  %v2567_v4 = vand.u32 4294901760, %v2566_v35 }
 0x629   : > { %3450 = vmatpush.msrb.mxu0 %v9920_v1 }
 0x62a   : > { %2788 = vmatmul.f32.gmra.mxu2 %v2548_v38  ;;  %v10758_v38 = vand.u32 4294901760, %v2503_v7 }
 0x62c   : > { %2863 = vmatmul.f32.gmra.mxu3 %v2549_v45  ;;  %v2572_v27 = vsub.f32 %v2503_v7, %v10758_v38  ;;  %v2504_v45 = vmul.f32 %v10725_v63, %v2495_v37  ;;  %v10770_v7 = vand.u32 4294901760, %v2505_v40 }
 0x62e   : > { %v2573_v53 = vand.u32 4294901760, %v2572_v27  ;;  %v2588_v37 = vsub.f32 %v2505_v40, %v10770_v7 }
 0x630   : > { %2552 = vmatmul.f32.gmra.mxu0 %v2551_v24  ;;  %2709 = vmatmul.f32.gmra.mxu1 %v10745_v17  ;;  %v2574_v24 = vsub.f32 %v2572_v27, %v2573_v53 }
 0x632   : > { %2793 = vmatmul.f32.gmra.mxu2 %v2556_v33  ;;  %v10764_v33 = vand.u32 4294901760, %v2504_v45  ;;  %v2575_v11 = vand.u32 4294901760, %v2574_v24 }
 0x634   : > { %2869 = vmatmul.f32.gmra.mxu3 %v2557_v51  ;;  %v2580_v51 = vsub.f32 %v2504_v45, %v10764_v33  ;;  %v2589_v45 = vand.u32 4294901760, %v2588_v37 }
 0x638   : > { %2560 = vmatmul.f32.gmra.mxu0 %v2559_v25  ;;  %2713 = vmatmul.f32.gmra.mxu1 %v10752_v5  ;;  %v2497_v25 = vld [vmem:[%s9249_s24 + $0x38] sm:$0xff] }
 0x639   : > { %v2506_v35 = vmul.f32 %v10725_v63, %v2497_v25 }
 0x63a   : > { %2798 = vmatmul.f32.gmra.mxu2 %v2564_v34  ;;  %v2581_v34 = vand.u32 4294901760, %v2580_v51 }
 0x63c   : > { %2875 = vmatmul.f32.gmra.mxu3 %v2565_v10  ;;  %v2582_v10 = vsub.f32 %v2580_v51, %v2581_v34 }
 0x640   : > { %2568 = vmatmul.f32.gmra.mxu0 %v2567_v4  ;;  %2717 = vmatmul.f32.gmra.mxu1 %v10758_v38  ;;  %v10776_v4 = vand.u32 4294901760, %v2506_v35 }
 0x642   : > { %2803 = vmatmul.f32.gmra.mxu2 %v2572_v27  ;;  %v2583_v27 = vand.u32 4294901760, %v2582_v10  ;;  %v2596_v56 = vsub.f32 %v2506_v35, %v10776_v4 }
 0x644   : > { %2881 = vmatmul.f32.gmra.mxu3 %v2573_v53  ;;  %v2590_v53 = vsub.f32 %v2588_v37, %v2589_v45 }
 0x646   : > { %v2591_v24 = vand.u32 4294901760, %v2590_v53 }
 0x648   : > { %2576 = vmatmul.f32.gmra.mxu0 %v2575_v11  ;;  %2721 = vmatmul.f32.gmra.mxu1 %v10764_v33  ;;  %v2597_v11 = vand.u32 4294901760, %v2596_v56 }
 0x64a   : > { %2808 = vmatmul.f32.gmra.mxu2 %v2580_v51  ;;  %v2598_v63 = vsub.f32 %v2596_v56, %v2597_v11 }
 0x64c   : > { %2887 = vmatmul.f32.gmra.mxu3 %v2581_v34  ;;  %v2599_v51 = vand.u32 4294901760, %v2598_v63 }
 0x650   : > { %2584 = vmatmul.f32.gmra.mxu0 %v2583_v27  ;;  %2725 = vmatmul.f32.gmra.mxu1 %v10770_v7 }
 0x652   : > { %2813 = vmatmul.f32.gmra.mxu2 %v2588_v37 }
 0x654   : > { %2893 = vmatmul.f32.gmra.mxu3 %v2589_v45 }
 0x658   : > { %2592 = vmatmul.f32.gmra.mxu0 %v2591_v24  ;;  %2729 = vmatmul.f32.gmra.mxu1 %v10776_v4 }
 0x65a   : > { %2818 = vmatmul.f32.gmra.mxu2 %v2596_v56 }
 0x65c   : > { %2899 = vmatmul.f32.gmra.mxu3 %v2597_v11 }
 0x660   : > { %2600 = vmatmul.f32.gmra.mxu0 %v2599_v51  ;;  %3033 = vmatmul.f32.vlgmr.msra.gmra.mxu1 %v10729_v62 }
 0x661   : > { %3729 = vmatpush.msra.mxu1 %v13324_v29 }
 0x663   : > { %3735 = vmatpush.msra.mxu1 %v13325_v19 }
 0x665   : > { %3741 = vmatpush.msra.mxu1 %v13326_v28 }
 0x667   : > { %3747 = vmatpush.msra.mxu1 %v13327_v42 }
 0x668   : > { %2968 = vmatmul.f32.vlgmr.msra.gmra.mxu0 %v10729_v62  ;;  %3037 = vmatmul.f32.gmra.mxu1 %v10731_v57 }
 0x669   : > { %8480 = vmatpush.msk.msra.mxu0 %vm13358_vm10, %v13179_v61  ;;  %3753 = vmatpush.msra.mxu1 %v13328_v12 }
 0x66b   : > { %8481 = vmatpush.msk.msra.mxu0 %vm9295_vm15, %v13179_v61  ;;  %3759 = vmatpush.msra.mxu1 %v13329_v31  ;;  %v3065_v31 = vld [vmem:[#allocation2] sm:$0xff] }
 0x66d   : > { %8482 = vmatpush.msk.msra.mxu0 %vm9312_vm0, %v13179_v61  ;;  %3765 = vmatpush.msra.mxu1 %v13330_v9 }
 0x66f   : > { %8483 = vmatpush.msk.msra.mxu0 %vm9334_vm1, %v13179_v61  ;;  %3771 = vmatpush.msra.mxu1 %v13331_v2 }
 0x670   : > { %2972 = vmatmul.f32.gmra.mxu0 %v10731_v57  ;;  %3041 = vmatmul.f32.gmra.mxu1 %v10745_v17 }
 0x671   : > { %8484 = vmatpush.msk.msra.mxu0 %vm9355_vm3, %v13179_v61  ;;  %3777 = vmatpush.msra.mxu1 %v13332_v16 }
 0x673   : > { %8485 = vmatpush.msk.msra.mxu0 %vm9376_vm4, %v13179_v61  ;;  %3783 = vmatpush.msra.mxu1 %v13333_v43 }
 0x675   : > { %8486 = vmatpush.msk.msra.mxu0 %vm9398_vm5, %v13179_v61  ;;  %3789 = vmatpush.msra.mxu1 %v13334_v55 }
 0x677   : > { %8487 = vmatpush.msk.msra.mxu0 %vm13192_vm9, %v13179_v61  ;;  %3795 = vmatpush.msra.mxu1 %v13335_v48 }
 0x678   : > { %2976 = vmatmul.f32.gmra.mxu0 %v10745_v17  ;;  %3045 = vmatmul.f32.gmra.mxu1 %v10752_v5 }
 0x679   : > { %8488 = vmatpush.msk.msra.mxu0 %vm13298_vm11, %v13179_v61  ;;  %3801 = vmatpush.msra.mxu1 %v13336_v20 }
 0x67b   : > { %8489 = vmatpush.msk.msra.mxu0 %vm13359_vm2, %v13179_v61  ;;  %3807 = vmatpush.msra.mxu1 %v13337_v50 }
 0x67d   : > { %8490 = vmatpush.msk.msra.mxu0 %vm13360_vm13, %v13179_v61  ;;  %3813 = vmatpush.msra.mxu1 %v13339_v58  ;;  %vm13377_vm13 = vcmask 64512  }
 0x67f   : > { %8491 = vmatpush.msk.msra.mxu0 %vm13361_vm14, %v13179_v61  ;;  %3819 = vmatpush.msra.mxu1 %v13340_v18 }
 0x680   : > { %2980 = vmatmul.f32.gmra.mxu0 %v10752_v5  ;;  %3049 = vmatmul.f32.gmra.mxu1 %v10758_v38 }
 0x681   : > { %8492 = vmatpush.msk.msra.mxu0 %vm13362_vm12, %v13179_v61 }
 0x683   : > { %8493 = vmatpush.msk.msra.mxu0 %vm13363_vm6, %v13179_v61 }
 0x685   : > { %8494 = vmatpush.msk.msra.mxu0 %vm13364_vm7, %v13179_v61 }
 0x687   : > { %8495 = vmatpush.msk.msra.mxu0 %vm13365_vm8, %v13179_v61  ;;  %vm13366_vm8 = vcmask 64512  }
 0x688   : > { %2984 = vmatmul.f32.gmra.mxu0 %v10758_v38  ;;  %3053 = vmatmul.f32.gmra.mxu1 %v10764_v33  ;;  %vm13367_vm7 = vmmov %vm13366_vm8 }
 0x689   : > { %vm13374_vm6 = vmmov %vm13367_vm7 }
 0x690   : > { %2988 = vmatmul.f32.gmra.mxu0 %v10764_v33  ;;  %3057 = vmatmul.f32.gmra.mxu1 %v10770_v7 }
 0x698   : > { %2992 = vmatmul.f32.gmra.mxu0 %v10770_v7  ;;  %3061 = vmatmul.f32.gmra.mxu1 %v10776_v4 }
 0x69d   : > { %v2702_v62 = vpop.f32.mrf.mxu1 }
 0x6a0   : > { %2996 = vmatmul.f32.gmra.mxu0 %v10776_v4 }
 0x6a5   : > { %v2545_v57 = vpop.f32.mrf.mxu0  ;;  %v2706_v17 = vpop.f32.mrf.mxu1 }
 0x6a6   : > { %v2784_v7 = vpop.f32.mrf.mxu2  ;;  %v2703_v24 = vadd.f32 %v2702_v62, %v2545_v57 }
 0x6a7   : > { %v2858_v45 = vpop.f32.mrf.mxu3 }
 0x6a8   : > { %v2785_v18 = vadd.f32 %v2784_v7, %v2703_v24 }
 0x6aa   : > { %v2859_v58 = vadd.f32 %v2858_v45, %v2785_v18  ;;  %v3066_v45 = vld [vmem:[#allocation2 + $0x8] sm:$0xff] }
 0x6ad   : > { %v2553_v5 = vpop.f32.mrf.mxu0  ;;  %v2710_v40 = vpop.f32.mrf.mxu1 }
 0x6ae   : > { %v2789_v4 = vpop.f32.mrf.mxu2  ;;  %v2707_v50 = vadd.f32 %v2706_v17, %v2553_v5 }
 0x6af   : > { %v2864_v51 = vpop.f32.mrf.mxu3 }
 0x6b0   : > { %v2790_v16 = vadd.f32 %v2789_v4, %v2707_v50 }
 0x6b2   : > { %v2865_v42 = vadd.f32 %v2864_v51, %v2790_v16 }
 0x6b5   : > { %v2561_v34 = vpop.f32.mrf.mxu0  ;;  %v2714_v25 = vpop.f32.mrf.mxu1 }
 0x6b6   : > { %v2794_v20 = vpop.f32.mrf.mxu2  ;;  %v2711_v28 = vadd.f32 %v2710_v40, %v2561_v34 }
 0x6b7   : > { %v2870_v9 = vpop.f32.mrf.mxu3 }
 0x6b8   : > { %v2795_v5 = vadd.f32 %v2794_v20, %v2711_v28 }
 0x6ba   : > { %v2871_v50 = vadd.f32 %v2870_v9, %v2795_v5 }
 0x6bd   : > { %v2569_v38 = vpop.f32.mrf.mxu0  ;;  %v2718_v10 = vpop.f32.mrf.mxu1 }
 0x6be   : > { %v2799_v17 = vpop.f32.mrf.mxu2 }
 0x6c5   : > { %v2577_v37 = vpop.f32.mrf.mxu0  ;;  %v10861_v35 = vpop.f32.mrf.mxu1 }
 0x6c6   : > { %v2804_v24 = vpop.f32.mrf.mxu2 }
 0x6cd   : > { %v2585_v33 = vpop.f32.mrf.mxu0  ;;  %v10863_v27 = vpop.f32.mrf.mxu1 }
 0x6d5   : > { %v10865_v53 = vpop.f32.mrf.mxu0  ;;  %v10867_v56 = vpop.f32.mrf.mxu1 }
 0x6dd   : > { %v10869_v11 = vpop.f32.mrf.mxu0  ;;  %v3034_v63 = vpop.f32.mrf.mxu1 }
 0x6e5   : > { %v2969_v48 = vpop.f32.mrf.mxu0  ;;  %v3038_v55 = vpop.f32.mrf.mxu1 }
 0x6e6   : > { %v2970_v43 = vadd.f32 %v2969_v48, %v2859_v58  ;;  %v2715_v58 = vadd.f32 %v2714_v25, %v2569_v38 }
 0x6e8   : > { %v3035_v2 = vadd.f32 %v3034_v63, %v2970_v43  ;;  %v2876_v43 = vpop.f32.mrf.mxu3  ;;  %v2800_v34 = vadd.f32 %v2799_v17, %v2715_v58 }
 0x6ea   : > { %v10871_v12 = vadd.f32 %v3065_v31, %v3035_v2  ;;  %v2877_v28 = vadd.f32 %v2876_v43, %v2800_v34  ;;  %v2727_v34 = vadd.f32 %v10863_v27, %v10865_v53 }
 0x6ec   : > { %v3081_v62 = vsel %vm13366_vm8, %v10871_v12, -inf  ;;  %vm13368_vm8 = vmmov %vm13367_vm7 }
 0x6ed   : > { %v2973_v57 = vpop.f32.mrf.mxu0  ;;  %v3042_v19 = vpop.f32.mrf.mxu1  ;;  %3082 = vmax.xlane.f32.xlu1 %v3081_v62 }
 0x6ee   : > { %v2974_v18 = vadd.f32 %v2973_v57, %v2865_v42  ;;  %v3067_v42 = vld [vmem:[#allocation2 + $0x10] sm:$0xff] }
 0x6f0   : > { %v3039_v7 = vadd.f32 %v3038_v55, %v2974_v18  ;;  %v2719_v55 = vadd.f32 %v2718_v10, %v2577_v37  ;;  %v2882_v9 = vpop.f32.mrf.mxu3  ;;  %v3068_v18 = vld [vmem:[#allocation2 + $0x18] sm:$0xff] }
 0x6f2   : > { %v10875_v48 = vadd.f32 %v3066_v45, %v3039_v7  ;;  %v2805_v51 = vadd.f32 %v2804_v24, %v2719_v55  ;;  %v2723_v7 = vadd.f32 %v10861_v35, %v2585_v33 }
 0x6f4   : > { %v3084_v31 = vsel %vm13367_vm7, %v10875_v48, -inf  ;;  %v2883_v17 = vadd.f32 %v2882_v9, %v2805_v51 }
 0x6f5   : > { %v2977_v2 = vpop.f32.mrf.mxu0  ;;  %3085 = vmax.xlane.f32.xlu2 %v3084_v31  ;;  %v3046_v40 = vpop.f32.mrf.mxu1  ;;  %v3069_v31 = vld [vmem:[#allocation2 + $0x20] sm:$0xff] }
 0x6f6   : > { %v2978_v16 = vadd.f32 %v2977_v2, %v2871_v50 }
 0x6f8   : > { %v3043_v4 = vadd.f32 %v3042_v19, %v2978_v16  ;;  %v2809_v19 = vpop.f32.mrf.mxu2  ;;  %v2888_v43 = vpop.f32.mrf.mxu3 }
 0x6f9   : > { %v2810_v50 = vadd.f32 %v2809_v19, %v2723_v7 }
 0x6fa   : > { %v10879_v63 = vadd.f32 %v3067_v42, %v3043_v4 }
 0x6fc   : > { %v3087_v20 = vsel %vm13368_vm8, %v10879_v63, -inf  ;;  %vm13369_vm8 = vmmov %vm13367_vm7 }
 0x6fd   : > { %v2981_v25 = vpop.f32.mrf.mxu0  ;;  %3088 = vmax.xlane.f32.xlu0 %v3087_v20  ;;  %v3050_v57 = vpop.f32.mrf.mxu1  ;;  %v3070_v20 = vld [vmem:[#allocation2 + $0x28] sm:$0xff] }
 0x6fe   : > { %v2982_v38 = vadd.f32 %v2981_v25, %v2877_v28 }
 0x700   : > { %v3047_v62 = vadd.f32 %v3046_v40, %v2982_v38  ;;  %v2889_v40 = vadd.f32 %v2888_v43, %v2810_v50  ;;  %v2814_v33 = vpop.f32.mrf.mxu2  ;;  %v2894_v55 = vpop.f32.mrf.mxu3  ;;  %v2731_v38 = vadd.f32 %v10867_v56, %v10869_v11  ;;  %v3072_v11 = vld [vmem:[#allocation2 + $0x38] sm:$0xff] }
 0x701   : > { %v2815_v42 = vadd.f32 %v2814_v33, %v2727_v34 }
 0x702   : > { %v10883_v5 = vadd.f32 %v3068_v18, %v3047_v62 }
 0x703   : > { %v2895_v25 = vadd.f32 %v2894_v55, %v2815_v42 }
 0x704   : > { %v3090_v10 = vsel %vm13367_vm7, %v10883_v5, -inf }
 0x705   : > { %v2985_v37 = vpop.f32.mrf.mxu0  ;;  %3091 = vmax.xlane.f32.xlu1 %v3090_v10  ;;  %v3054_v16 = vpop.f32.mrf.mxu1 }
 0x706   : > { %v2986_v45 = vadd.f32 %v2985_v37, %v2883_v17  ;;  %v3071_v17 = vld [vmem:[#allocation2 + $0x30] sm:$0xff] }
 0x708   : > { %v3051_v58 = vadd.f32 %v3050_v57, %v2986_v45  ;;  %v2819_v57 = vpop.f32.mrf.mxu2  ;;  %v2900_v10 = vpop.f32.mrf.mxu3 }
 0x709   : > { %v2820_v18 = vadd.f32 %v2819_v57, %v2731_v38 }
 0x70a   : > { %v10888_v2 = vadd.f32 %v3069_v31, %v3051_v58 }
 0x70b   : > { %v2901_v37 = vadd.f32 %v2900_v10, %v2820_v18 }
 0x70c   : > { %v3093_v35 = vsel %vm13369_vm8, %v10888_v2, -inf  ;;  %vm13370_vm8 = vmmov %vm13367_vm7 }
 0x70d   : > { %v2989_v4 = vpop.f32.mrf.mxu0  ;;  %3094 = vmax.xlane.f32.xlu2 %v3093_v35  ;;  %v3058_v62 = vpop.f32.mrf.mxu1 }
 0x70e   : > { %v2990_v24 = vadd.f32 %v2989_v4, %v2889_v40 }
 0x710   : > { %v3055_v28 = vadd.f32 %v3054_v16, %v2990_v24 }
 0x712   : > { %v3078_v9 = vadd.f32 %v3070_v20, %v3055_v28 }
 0x714   : > { %v3096_v51 = vsel %vm13367_vm7, %v3078_v9, -inf }
 0x715   : > { %v2993_v27 = vpop.f32.mrf.mxu0  ;;  %3097 = vmax.xlane.f32.xlu0 %v3096_v51  ;;  %v3062_v58 = vpop.f32.mrf.mxu1 }
 0x716   : > { %v2994_v53 = vadd.f32 %v2993_v27, %v2895_v25 }
 0x718   : > { %v3059_v19 = vadd.f32 %v3058_v62, %v2994_v53 }
 0x71a   : > { %v3079_v7 = vadd.f32 %v3071_v17, %v3059_v19 }
 0x71c   : > { %v3099_v45 = vsel %vm13370_vm8, %v3079_v7, -inf  ;;  %vm13371_vm8 = vmmov %vm13367_vm7 }
 0x71d   : > { %v2997_v43 = vpop.f32.mrf.mxu0  ;;  %3100 = vmax.xlane.f32.xlu1 %v3099_v45 }
 0x71e   : > { %v2998_v50 = vadd.f32 %v2997_v43, %v2901_v37 }
 0x720   : > { %v3063_v56 = vadd.f32 %v3062_v58, %v2998_v50 }
 0x722   : > { %v3080_v31 = vadd.f32 %v3072_v11, %v3063_v56 }
 0x724   : > { %v3102_v16 = vsel %vm13367_vm7, %v3080_v31, -inf }
 0x725   : > { %3103 = vmax.xlane.f32.xlu0 %v3102_v16 }
 0x760   : > { %v3083_v40 = vpop.xlane.xlu1 %3082 }
 0x761   : > { %v3105_v34 = vsub.f32 %v10871_v12, %v3083_v40 }
 0x763   : > { %v3113_v35 = vmul.f32 1.442695, %v3105_v34 }
 0x765   : > { %8901 = vpow2.f32 %v3113_v35 }
 0x768   : > { %v3086_v33 = vpop.xlane.xlu2 %3085 }
 0x769   : > { %v3106_v4 = vsub.f32 %v10875_v48, %v3086_v33 }
 0x76b   : > { %v10901_v24 = vpop.eup %8901  ;;  %v3115_v42 = vmul.f32 1.442695, %v3106_v4 }
 0x76c   : > { %v3129_v28 = vsel %vm13371_vm8, %v10901_v24, 0.0  ;;  %vm13372_vm8 = vmmov %vm13367_vm7 }
 0x76d   : > { %8903 = vpow2.f32 %v3115_v42  ;;  %3130 = vadd.xlane.f32.xlu2 %v3129_v28 }
 0x770   : > { %v3089_v55 = vpop.xlane.xlu0 %3088 }
 0x771   : > { %v3107_v20 = vsub.f32 %v10879_v63, %v3089_v55 }
 0x773   : > { %v10906_v25 = vpop.eup %8903  ;;  %v3117_v38 = vmul.f32 1.442695, %v3107_v20 }
 0x774   : > { %v3132_v12 = vsel %vm13367_vm7, %v10906_v25, 0.0 }
 0x775   : > { %8905 = vpow2.f32 %v3117_v38  ;;  %3133 = vadd.xlane.f32.xlu1 %v3132_v12 }
 0x778   : > { %v3092_v48 = vpop.xlane.xlu1 %3091 }
 0x779   : > { %v3108_v51 = vsub.f32 %v10883_v5, %v3092_v48 }
 0x77b   : > { %v10911_v62 = vpop.eup %8905  ;;  %v3119_v27 = vmul.f32 1.442695, %v3108_v51 }
 0x77c   : > { %v3135_v53 = vsel %vm13372_vm8, %v10911_v62, 0.0  ;;  %vm13373_vm8 = vmmov %vm13367_vm7 }
 0x77d   : > { %8907 = vpow2.f32 %v3119_v27  ;;  %3136 = vadd.xlane.f32.xlu2 %v3135_v53 }
 0x780   : > { %v3095_v63 = vpop.xlane.xlu2 %3094 }
 0x781   : > { %v3109_v57 = vsub.f32 %v10888_v2, %v3095_v63 }
 0x783   : > { %v10916_v18 = vpop.eup %8907  ;;  %v3121_v19 = vmul.f32 1.442695, %v3109_v57 }
 0x784   : > { %v3138_v17 = vsel %vm13367_vm7, %v10916_v18, 0.0  ;;  %vm13375_vm7 = vmmov %vm13374_vm6 }
 0x785   : > { %8909 = vpow2.f32 %v3121_v19  ;;  %3139 = vadd.xlane.f32.xlu0 %v3138_v17 }
 0x788   : > { %v3098_v5 = vpop.xlane.xlu0 %3097 }
 0x789   : > { %v3110_v10 = vsub.f32 %v3078_v9, %v3098_v5 }
 0x78b   : > { %v10920_v37 = vpop.eup %8909  ;;  %v3123_v45 = vmul.f32 1.442695, %v3110_v10 }
 0x78c   : > { %v3141_v43 = vsel %vm13373_vm8, %v10920_v37, 0.0  ;;  %vm13376_vm8 = vmmov %vm13374_vm6 }
 0x78d   : > { %8911 = vpow2.f32 %v3123_v45  ;;  %3142 = vadd.xlane.f32.xlu1 %v3141_v43 }
 0x790   : > { %v3101_v50 = vpop.xlane.xlu1 %3100 }
 0x791   : > { %v3111_v2 = vsub.f32 %v3079_v7, %v3101_v50 }
 0x793   : > { %v10924_v58 = vpop.eup %8911  ;;  %v3125_v56 = vmul.f32 1.442695, %v3111_v2 }
 0x794   : > { %v3144_v11 = vsel %vm13374_vm6, %v10924_v58, 0.0 }
 0x795   : > { %8913 = vpow2.f32 %v3125_v56  ;;  %3145 = vadd.xlane.f32.xlu2 %v3144_v11 }
 0x798   : > { %v3104_v16 = vpop.xlane.xlu0 %3103 }
 0x799   : > { %v3112_v9 = vsub.f32 %v3080_v31, %v3104_v16 }
 0x79b   : > { %v10928_v40 = vpop.eup %8913  ;;  %v3127_v34 = vmul.f32 1.442695, %v3112_v9 }
 0x79c   : > { %v3147_v35 = vsel %vm13375_vm7, %v10928_v40, 0.0 }
 0x79d   : > { %8915 = vpow2.f32 %v3127_v34  ;;  %3148 = vadd.xlane.f32.xlu0 %v3147_v35 }
 0x7a3   : > { %v10932_v33 = vpop.eup %8915 }
 0x7a4   : > { %v3150_v7 = vsel %vm13376_vm8, %v10932_v33, 0.0 }
 0x7a5   : > { %3151 = vadd.xlane.f32.xlu1 %v3150_v7 }
 0x7e0   : > { %v3131_v4 = vpop.xlane.xlu2 %3130 }
 0x7e1   : > { %8917 = vrcp.f32 %v3131_v4  ;;  %v3164_v20 = vand.u32 2147483648, %v3131_v4  ;;  %v3162_v12 = vand.u32 2147483647, %v3131_v4  ;;  %vm3158_vm7 = vweird.f32 %v3131_v4 }
 0x7e3   : > { %v3165_v27 = vor.u32 1.1754944e-38, %v3164_v20  ;;  %vm3163_vm14 = vcmp.eq.f32.partialorder %v3162_v12, 8.507059e+37 }
 0x7e7   : > { %v8918_v42 = vpop.eup %8917 }
 0x7e8   : > { %v3154_v28 = vmul.f32 %v8918_v42, %v3131_v4  ;;  %v3134_v55 = vpop.xlane.xlu1 %3133  ;;  %vm3159_vm6 = vweird.f32 %v8918_v42 }
 0x7e9   : > { %8919 = vrcp.f32 %v3134_v55  ;;  %vm3160_vm12 = vmor %vm3158_vm7, %vm3159_vm6  ;;  %v3179_v10 = vand.u32 2147483648, %v3134_v55  ;;  %v3177_v43 = vand.u32 2147483647, %v3134_v55  ;;  %vm3173_vm6 = vweird.f32 %v3134_v55 }
 0x7ea   : > { %v3155_v31 = vsub.f32 1.0, %v3154_v28  ;;  %vm13378_vm7 = vcmask 64512  }
 0x7eb   : > { %v3180_v16 = vor.u32 1.1754944e-38, %v3179_v10 }
 0x7ec   : > { %v3156_v38 = vmul.f32 %v8918_v42, %v3155_v31 }
 0x7ee   : > { %v3157_v48 = vadd.f32 %v8918_v42, %v3156_v38 }
 0x7ef   : > { %v8920_v51 = vpop.eup %8919 }
 0x7f0   : > { %v3161_v53 = vsel %vm3160_vm12, %v8918_v42, %v3157_v48  ;;  %v3169_v63 = vmul.f32 %v8920_v51, %v3134_v55  ;;  %v3137_v57 = vpop.xlane.xlu2 %3136  ;;  %vm3174_vm8 = vweird.f32 %v8920_v51 }
 0x7f1   : > { %v3166_v19 = vsel %vm3163_vm14, %v3165_v27, %v3161_v53  ;;  %8921 = vrcp.f32 %v3137_v57  ;;  %vm3175_vm12 = vmor %vm3173_vm6, %vm3174_vm8  ;;  %vm3178_vm14 = vcmp.eq.f32.partialorder %v3177_v43, 8.507059e+37  ;;  %v3192_v55 = vand.u32 2147483647, %v3137_v57 }
 0x7f2   : > { %v3167_v17 = vmul.f32 %v10901_v24, %v3166_v19  ;;  %v3170_v5 = vsub.f32 1.0, %v3169_v63  ;;  %v3194_v31 = vand.u32 2147483648, %v3137_v57  ;;  %vm3188_vm8 = vweird.f32 %v3137_v57 }
 0x7f4   : > { %v3171_v45 = vmul.f32 %v8920_v51, %v3170_v5  ;;  %v3274_v50 = vsel %vm13377_vm13, %v3167_v17, 0  ;;  %v3195_v53 = vor.u32 1.1754944e-38, %v3194_v31 }
 0x7f5   : > { %v10938_v2 = vand.u32 4294901760, %v3274_v50 }
 0x7f6   : > { %v3172_v56 = vadd.f32 %v8920_v51, %v3171_v45 }
 0x7f7   : > { %v8922_v11 = vpop.eup %8921  ;;  %3401 = vmatmul.f32.vlgmr.msra.gmra.mxu3 %v10938_v2  ;;  %v3315_v9 = vsub.f32 %v3274_v50, %v10938_v2 }
 0x7f8   : > { %v3176_v34 = vsel %vm3175_vm12, %v8920_v51, %v3172_v56  ;;  %v3184_v24 = vmul.f32 %v8922_v11, %v3137_v57  ;;  %v10942_v35 = vpop.xlane.xlu0 %3139  ;;  %8496 = vmatpush.msk.msra.mxu3 %vm13358_vm10, %v13179_v61  ;;  %vm3189_vm13 = vweird.f32 %v8922_v11  ;;  %vm3193_vm12 = vcmp.eq.f32.partialorder %v3192_v55, 8.507059e+37  ;;  %v13381_v55 = vld [vmem:[#allocation15_spill] sm:$0xff] }
 0x7f9   : > { %v3181_v7 = vsel %vm3178_vm14, %v3180_v16, %v3176_v34  ;;  %8923 = vrcp.f32 %v10942_v35  ;;  %3453 = vmatmul.f32.vlgmr.msrb.gmra.mxu0 %v3315_v9  ;;  %v3316_v42 = vand.u32 4294901760, %v3315_v9  ;;  %vm3190_vm6 = vmor %vm3188_vm8, %vm3189_vm13  ;;  %v3207_v50 = vand.u32 2147483647, %v10942_v35 }
 0x7fa   : > { %v3185_v4 = vsub.f32 1.0, %v3184_v24  ;;  %v3182_v28 = vmul.f32 %v10906_v25, %v3181_v7  ;;  %8497 = vmatpush.msk.msra.mxu3 %vm9295_vm15, %v13179_v61  ;;  %3921 = vmatpush.msrb.mxu0 %v13342_v60  ;;  %v3209_v56 = vand.u32 2147483648, %v10942_v35  ;;  %vm13379_vm13 = vmmov %vm13378_vm7  ;;  %v13380_v7 = vld [vmem:[#allocation19_spill] sm:$0xff] }
 0x7fb   : > { %3512 = vmatmul.f32.vlgmr.msrb.gmra.mxu1 %v3316_v42  ;;  %v3317_v38 = vsub.f32 %v3315_v9, %v3316_v42 }
 0x7fc   : > { %v3186_v20 = vmul.f32 %v8922_v11, %v3185_v4  ;;  %v3277_v12 = vsel %vm13378_vm7, %v3182_v28, 0  ;;  %8498 = vmatpush.msk.msra.mxu3 %vm9312_vm0, %v13179_v61  ;;  %8512 = vmatpush.msk.msrb.mxu1 %vm13358_vm10, %v13179_v61  ;;  %vm3203_vm7 = vweird.f32 %v10942_v35  ;;  %v3210_v42 = vor.u32 1.1754944e-38, %v3209_v56 }
 0x7fd   : > { %v10957_v48 = vand.u32 4294901760, %v3277_v12  ;;  %3925 = vmatpush.msrb.mxu0 %v13343_v0  ;;  %v3318_v51 = vand.u32 4294901760, %v3317_v38 }
 0x7fe   : > { %v3187_v25 = vadd.f32 %v8922_v11, %v3186_v20  ;;  %8499 = vmatpush.msk.msra.mxu3 %vm9334_vm1, %v13179_v61  ;;  %8513 = vmatpush.msk.msrb.mxu1 %vm9295_vm15, %v13179_v61 }
 0x7ff   : > { %v8924_v27 = vpop.eup %8923  ;;  %3405 = vmatmul.f32.gmra.mxu3 %v10957_v48  ;;  %v3323_v63 = vsub.f32 %v3277_v12, %v10957_v48  ;;  %3319 = vmatmul.f32.vlgmr.msra.gmra.mxu2 %v3318_v51  ;;  %v13382_v12 = vld [vmem:[#allocation18_spill] sm:$0xff] }
 0x800   : > { %v3191_v19 = vsel %vm3190_vm6, %v8922_v11, %v3187_v25  ;;  %v3199_v57 = vmul.f32 %v8924_v27, %v10942_v35  ;;  %v10972_v17 = vpop.xlane.xlu1 %3142  ;;  %8500 = vmatpush.msk.msra.mxu3 %vm9355_vm3, %v13179_v61  ;;  %3827 = vmatpush.msra.mxu2 %v9316_v22  ;;  %vm3204_vm14 = vweird.f32 %v8924_v27  ;;  %vm3208_vm6 = vcmp.eq.f32.partialorder %v3207_v50, 8.507059e+37 }
 0x801   : > { %v3196_v5 = vsel %vm3193_vm12, %v3195_v53, %v3191_v19  ;;  %8925 = vrcp.f32 %v10972_v17  ;;  %3458 = vmatmul.f32.gmra.mxu0 %v3323_v63  ;;  %v3324_v45 = vand.u32 4294901760, %v3323_v63  ;;  %8514 = vmatpush.msk.msrb.mxu1 %vm9312_vm0, %v13179_v61  ;;  %vm3205_vm8 = vmor %vm3203_vm7, %vm3204_vm14  ;;  %v3222_v53 = vand.u32 2147483647, %v10972_v17  ;;  %v13383_v19 = vld [vmem:[#allocation20_spill] sm:$0xff] }
 0x802   : > { %v3200_v10 = vsub.f32 1.0, %v3199_v57  ;;  %v3197_v43 = vmul.f32 %v10911_v62, %v3196_v5  ;;  %8501 = vmatpush.msk.msra.mxu3 %vm9376_vm4, %v13179_v61  ;;  %3830 = vmatpush.msra.mxu2 %v13290_v3  ;;  %v13384_v57 = vld [vmem:[#allocation22_spill] sm:$0xff]  ;;  %vm13385_vm14 = vmmov %vm13379_vm13  ;;  %vm13387_vm7 = vnez %v13303_v49 }
 0x803   : > { %3929 = vmatpush.msrb.mxu0 %v13344_v54  ;;  %3518 = vmatmul.f32.gmra.mxu1 %v3324_v45  ;;  %v3325_v62 = vsub.f32 %v3323_v63, %v3324_v45  ;;  %v3224_v63 = vand.u32 2147483648, %v10972_v17  ;;  %v13414_v54 = vld [vmem:[#allocation65_spill] sm:$0xff] }
 0x804   : > { %v3201_v11 = vmul.f32 %v8924_v27, %v3200_v10  ;;  %v3280_v16 = vsel %vm13379_vm13, %v3197_v43, 0  ;;  %8502 = vmatpush.msk.msra.mxu3 %vm9398_vm5, %v13179_v61  ;;  %3833 = vmatpush.msra.mxu2 %v13292_v59  ;;  %v13386_v43 = vld [vmem:[#allocation24_spill] sm:$0xff]  ;;  %vm3218_vm13 = vweird.f32 %v10972_v17 }
 0x805   : > { %v10994_v9 = vand.u32 4294901760, %v3280_v16  ;;  %8515 = vmatpush.msk.msrb.mxu1 %vm9334_vm1, %v13179_v61  ;;  %v3326_v24 = vand.u32 4294901760, %v3325_v62  ;;  %3933 = vmatpush.msrb.mxu0 %v13380_v7 }
 0x806   : > { %v3202_v34 = vadd.f32 %v8924_v27, %v3201_v11  ;;  %8503 = vmatpush.msk.msra.mxu3 %vm13192_vm9, %v13179_v61  ;;  %3836 = vmatpush.msra.mxu2 %v13381_v55  ;;  %v13388_v11 = vld [vmem:[#allocation26_spill] sm:$0xff] }
 0x807   : > { %v8926_v4 = vpop.eup %8925  ;;  %3409 = vmatmul.f32.gmra.mxu3 %v10994_v9  ;;  %v3331_v28 = vsub.f32 %v3280_v16, %v10994_v9  ;;  %3327 = vmatmul.f32.gmra.mxu2 %v3326_v24  ;;  %v3225_v16 = vor.u32 1.1754944e-38, %v3224_v63  ;;  %v13389_v24 = vld [vmem:[#allocation33_spill] sm:$0xff] }
 0x808   : > { %v3206_v31 = vsel %vm3205_vm8, %v8924_v27, %v3202_v34  ;;  %v3214_v35 = vmul.f32 %v8926_v4, %v10972_v17  ;;  %v11009_v20 = vpop.xlane.xlu2 %3145  ;;  %8516 = vmatpush.msk.msrb.mxu1 %vm9355_vm3, %v13179_v61  ;;  %3839 = vmatpush.msra.mxu2 %v13382_v12  ;;  %vm3219_vm12 = vweird.f32 %v8926_v4  ;;  %v13393_v63 = vld [vmem:[#allocation29_spill] sm:$0xff] }
 0x809   : > { %v3211_v38 = vsel %vm3208_vm6, %v3210_v42, %v3206_v31  ;;  %8927 = vrcp.f32 %v11009_v20  ;;  %3463 = vmatmul.f32.gmra.mxu0 %v3331_v28  ;;  %v3332_v51 = vand.u32 4294901760, %v3331_v28  ;;  %8504 = vmatpush.msk.msra.mxu3 %vm13298_vm11, %v13179_v61  ;;  %vm3220_vm8 = vmor %vm3218_vm13, %vm3219_vm12  ;;  %vm3223_vm6 = vcmp.eq.f32.partialorder %v3222_v53, 8.507059e+37  ;;  %v13392_v53 = vld [vmem:[#allocation39_spill] sm:$0xff] }
 0x80a   : > { %v3215_v25 = vsub.f32 1.0, %v3214_v35  ;;  %v3212_v27 = vmul.f32 %v10916_v18, %v3211_v38  ;;  %8517 = vmatpush.msk.msrb.mxu1 %vm9376_vm4, %v13179_v61  ;;  %3842 = vmatpush.msra.mxu2 %v13383_v19  ;;  %v13390_v35 = vld [vmem:[#allocation37_spill] sm:$0xff]  ;;  %vm13391_vm12 = vnez %v13306_v47  ;;  %vm13394_vm13 = vcmask 64512  }
 0x80b   : > { %3937 = vmatpush.msrb.mxu0 %v13384_v57  ;;  %3524 = vmatmul.f32.gmra.mxu1 %v3332_v51  ;;  %v3333_v18 = vsub.f32 %v3331_v28, %v3332_v51  ;;  %v3237_v51 = vand.u32 2147483647, %v11009_v20 }
 0x80c   : > { %v3216_v5 = vmul.f32 %v8926_v4, %v3215_v25  ;;  %v3283_v10 = vsel %vm13385_vm14, %v3212_v27, 0  ;;  %8505 = vmatpush.msk.msra.mxu3 %vm13359_vm2, %v13179_v61  ;;  %3845 = vmatpush.msra.mxu2 %v13386_v43  ;;  %v3239_v27 = vand.u32 2147483648, %v11009_v20 }
 0x80d   : > { %v11031_v45 = vand.u32 4294901760, %v3283_v10  ;;  %8518 = vmatpush.msk.msrb.mxu1 %vm9398_vm5, %v13179_v61  ;;  %v3334_v56 = vand.u32 4294901760, %v3333_v18  ;;  %3941 = vmatpush.msrb.mxu0 %v13388_v11  ;;  %v13408_v11 = vld [vmem:[#allocation63_spill] sm:$0xff] }
 0x80e   : > { %v3217_v50 = vadd.f32 %v8926_v4, %v3216_v5  ;;  %8506 = vmatpush.msk.msra.mxu3 %vm13387_vm7, %v13179_v61  ;;  %3848 = vmatpush.msra.mxu2 %v13389_v24 }
 0x80f   : > { %v8928_v62 = vpop.eup %8927  ;;  %3413 = vmatmul.f32.gmra.mxu3 %v11031_v45  ;;  %v3339_v34 = vsub.f32 %v3283_v10, %v11031_v45  ;;  %3335 = vmatmul.f32.gmra.mxu2 %v3334_v56 }
 0x810   : > { %v3221_v42 = vsel %vm3220_vm8, %v8926_v4, %v3217_v50  ;;  %v3229_v17 = vmul.f32 %v8928_v62, %v11009_v20  ;;  %v11046_v28 = vpop.xlane.xlu0 %3148  ;;  %8519 = vmatpush.msk.msrb.mxu1 %vm13192_vm9, %v13179_v61  ;;  %3851 = vmatpush.msra.mxu2 %v13390_v35  ;;  %vm3234_vm14 = vweird.f32 %v8928_v62  ;;  %vm13395_vm8 = vnez %v13309_v41  ;;  %v13396_v50 = vld [vmem:[#allocation41_spill] sm:$0xff] }
 0x811   : > { %v3226_v31 = vsel %vm3223_vm6, %v3225_v16, %v3221_v42  ;;  %8929 = vrcp.f32 %v11046_v28  ;;  %3468 = vmatmul.f32.gmra.mxu0 %v3339_v34  ;;  %v3340_v25 = vand.u32 4294901760, %v3339_v34  ;;  %8507 = vmatpush.msk.msra.mxu3 %vm13391_vm12, %v13179_v61  ;;  %vm3233_vm6 = vweird.f32 %v11009_v20 }
 0x812   : > { %v3230_v38 = vsub.f32 1.0, %v3229_v17  ;;  %v3227_v4 = vmul.f32 %v10920_v37, %v3226_v31  ;;  %8520 = vmatpush.msk.msrb.mxu1 %vm13298_vm11, %v13179_v61  ;;  %3854 = vmatpush.msra.mxu2 %v13392_v53  ;;  %vm13397_vm11 = vnez %v13311_v46  ;;  %v3240_v17 = vor.u32 1.1754944e-38, %v3239_v27  ;;  %v13400_v27 = vld [vmem:[#allocation49_spill] sm:$0xff] }
 0x813   : > { %3945 = vmatpush.msrb.mxu0 %v13393_v63  ;;  %3530 = vmatmul.f32.gmra.mxu1 %v3340_v25  ;;  %v3341_v37 = vsub.f32 %v3339_v34, %v3340_v25  ;;  %v13398_v34 = vld [vmem:[#allocation36_spill] sm:$0xff] }
 0x814   : > { %v3231_v5 = vmul.f32 %v8928_v62, %v3230_v38  ;;  %v3286_v18 = vsel %vm13394_vm13, %v3227_v4, 0  ;;  %8508 = vmatpush.msk.msra.mxu3 %vm13395_vm8, %v13179_v61  ;;  %3857 = vmatpush.msra.mxu2 %v13396_v50  ;;  %vm3235_vm13 = vmor %vm3233_vm6, %vm3234_vm14  ;;  %v13399_v38 = vld [vmem:[#allocation47_spill] sm:$0xff]  ;;  %vm13401_vm14 = vnez %v13313_v23  ;;  %vm13404_vm6 = vcmask 64512  }
 0x815   : > { %v11068_v10 = vand.u32 4294901760, %v3286_v18  ;;  %8521 = vmatpush.msk.msrb.mxu1 %vm13359_vm2, %v13179_v61  ;;  %v3342_v16 = vand.u32 4294901760, %v3341_v37  ;;  %3949 = vmatpush.msrb.mxu0 %v13398_v34  ;;  %vm3238_vm2 = vcmp.eq.f32.partialorder %v3237_v51, 8.507059e+37  ;;  %v3252_v51 = vand.u32 2147483647, %v11046_v28  ;;  %v13406_v34 = vld [vmem:[#allocation60_spill] sm:$0xff] }
 0x816   : > { %v3232_v56 = vadd.f32 %v8928_v62, %v3231_v5  ;;  %8509 = vmatpush.msk.msra.mxu3 %vm13397_vm11, %v13179_v61  ;;  %3860 = vmatpush.msra.mxu2 %v13399_v38 }
 0x817   : > { %v8930_v42 = vpop.eup %8929  ;;  %3417 = vmatmul.f32.gmra.mxu3 %v11068_v10  ;;  %v3347_v31 = vsub.f32 %v3286_v18, %v11068_v10  ;;  %3343 = vmatmul.f32.gmra.mxu2 %v3342_v16  ;;  %v13402_v16 = vld [vmem:[#allocation58_spill] sm:$0xff] }
 0x818   : > { %v3236_v25 = vsel %vm3235_vm13, %v8928_v62, %v3232_v56  ;;  %v3244_v20 = vmul.f32 %v8930_v42, %v11046_v28  ;;  %v11083_v4 = vpop.xlane.xlu1 %3151  ;;  %8522 = vmatpush.msk.msrb.mxu1 %vm13387_vm7, %v13179_v61  ;;  %3863 = vmatpush.msra.mxu2 %v13400_v27  ;;  %v3254_v56 = vand.u32 2147483648, %v11046_v28  ;;  %vm13405_vm13 = vnez %v13316_v36 }
 0x819   : > { %v3241_v5 = vsel %vm3238_vm2, %v3240_v17, %v3236_v25  ;;  %8931 = vrcp.f32 %v11083_v4  ;;  %3473 = vmatmul.f32.gmra.mxu0 %v3347_v31  ;;  %v3348_v18 = vand.u32 4294901760, %v3347_v31  ;;  %8510 = vmatpush.msk.msra.mxu3 %vm13401_vm14, %v13179_v61  ;;  %v13403_v17 = vld [vmem:[#allocation40_spill] sm:$0xff]  ;;  %vm3249_vm2 = vweird.f32 %v8930_v42 }
 0x81a   : > { %v3245_v37 = vsub.f32 1.0, %v3244_v20  ;;  %v3242_v62 = vmul.f32 %v10924_v58, %v3241_v5  ;;  %8523 = vmatpush.msk.msrb.mxu1 %vm13391_vm12, %v13179_v61  ;;  %3866 = vmatpush.msra.mxu2 %v13402_v16  ;;  %vm3248_vm12 = vweird.f32 %v11046_v28  ;;  %vm3253_vm7 = vcmp.eq.f32.partialorder %v3252_v51, 8.507059e+37 }
 0x81b   : > { %3953 = vmatpush.msrb.mxu0 %v13403_v17  ;;  %3536 = vmatmul.f32.gmra.mxu1 %v3348_v18  ;;  %v3349_v58 = vsub.f32 %v3347_v31, %v3348_v18  ;;  %v13407_v17 = vld [vmem:[#allocation42_spill] sm:$0xff]  ;;  %v3255_v18 = vor.u32 1.1754944e-38, %v3254_v56 }
 0x81c   : > { %v3246_v25 = vmul.f32 %v8930_v42, %v3245_v37  ;;  %v3289_v20 = vsel %vm13404_vm6, %v3242_v62, 0  ;;  %8511 = vmatpush.msk.msra.mxu3 %vm13405_vm13, %v13179_v61  ;;  %3869 = vmatpush.msra.mxu2 %v13406_v34  ;;  %vm3250_vm6 = vmor %vm3248_vm12, %vm3249_vm2  ;;  %vm3263_vm2 = vweird.f32 %v11083_v4 }
 0x81d   : > { %v11105_v5 = vand.u32 4294901760, %v3289_v20  ;;  %8524 = vmatpush.msk.msrb.mxu1 %vm13395_vm8, %v13179_v61  ;;  %v3350_v37 = vand.u32 4294901760, %v3349_v58  ;;  %3957 = vmatpush.msrb.mxu0 %v13407_v17  ;;  %v13409_v17 = vld [vmem:[#allocation45_spill] sm:$0xff] }
 0x81e   : > { %v3247_v63 = vadd.f32 %v8930_v42, %v3246_v25  ;;  %3872 = vmatpush.msra.mxu2 %v13408_v11 }
 0x81f   : > { %v8932_v31 = vpop.eup %8931  ;;  %3421 = vmatmul.f32.gmra.mxu3 %v11105_v5  ;;  %v3355_v62 = vsub.f32 %v3289_v20, %v11105_v5  ;;  %3351 = vmatmul.f32.gmra.mxu2 %v3350_v37  ;;  %v3267_v20 = vand.u32 2147483647, %v11083_v4  ;;  %v13411_v37 = vld [vmem:[#allocation53_spill] sm:$0xff] }
 0x820   : > { %v3251_v57 = vsel %vm3250_vm6, %v8930_v42, %v3247_v63  ;;  %v3259_v7 = vmul.f32 %v8932_v31, %v11083_v4  ;;  %8525 = vmatpush.msk.msrb.mxu1 %vm13397_vm11, %v13179_v61  ;;  %3961 = vmatpush.msrb.mxu0 %v13409_v17  ;;  %v3269_v63 = vand.u32 2147483648, %v11083_v4  ;;  %vm3264_vm12 = vweird.f32 %v8932_v31 }
 0x821   : > { %v3256_v28 = vsel %vm3253_vm7, %v3255_v18, %v3251_v57  ;;  %3478 = vmatmul.f32.gmra.mxu0 %v3355_v62  ;;  %v3356_v25 = vand.u32 4294901760, %v3355_v62  ;;  %vm13410_vm7 = vcmask 64512   ;;  %vm3265_vm6 = vmor %vm3263_vm2, %vm3264_vm12 }
 0x822   : > { %v3260_v58 = vsub.f32 1.0, %v3259_v7  ;;  %v3257_v56 = vmul.f32 %v10928_v40, %v3256_v28  ;;  %8526 = vmatpush.msk.msrb.mxu1 %vm13401_vm14, %v13179_v61  ;;  %3965 = vmatpush.msrb.mxu0 %v13411_v37  ;;  %v13412_v28 = vld [vmem:[#allocation55_spill] sm:$0xff]  ;;  %vm3268_vm14 = vcmp.eq.f32.partialorder %v3267_v20, 8.507059e+37 }
 0x823   : > { %v3357_v42 = vsub.f32 %v3355_v62, %v3356_v25  ;;  %3542 = vmatmul.f32.gmra.mxu1 %v3356_v25  ;;  %v3270_v62 = vor.u32 1.1754944e-38, %v3269_v63 }
 0x824   : > { %v3261_v51 = vmul.f32 %v8932_v31, %v3260_v58  ;;  %v3292_v57 = vsel %vm13410_vm7, %v3257_v56, 0  ;;  %8527 = vmatpush.msk.msrb.mxu1 %vm13405_vm13, %v13179_v61  ;;  %3969 = vmatpush.msrb.mxu0 %v13412_v28  ;;  %v13413_v56 = vld [vmem:[#allocation62_spill] sm:$0xff]  ;;  %v13415_v28 = vld [vmem:[#allocation68_spill] sm:$0xff] }
 0x825   : > { %v3358_v7 = vand.u32 4294901760, %v3357_v42  ;;  %v3362_v40 = vand.u32 4294901760, %v3292_v57 }
 0x826   : > { %v3262_v18 = vadd.f32 %v8932_v31, %v3261_v51  ;;  %3973 = vmatpush.msrb.mxu0 %v13413_v56 }
 0x827   : > { %3425 = vmatmul.f32.gmra.mxu3 %v3362_v40  ;;  %v3363_v58 = vsub.f32 %v3292_v57, %v3362_v40  ;;  %3359 = vmatmul.f32.gmra.mxu2 %v3358_v7 }
 0x828   : > { %v3266_v25 = vsel %vm3265_vm6, %v8932_v31, %v3262_v18  ;;  %3977 = vmatpush.msrb.mxu0 %v13414_v54 }
 0x829   : > { %v3271_v42 = vsel %vm3268_vm14, %v3270_v62, %v3266_v25  ;;  %3483 = vmatmul.f32.gmra.mxu0 %v3363_v58  ;;  %v3364_v37 = vand.u32 4294901760, %v3363_v58  ;;  %vm13417_vm14 = vnez %v13195_v32 }
 0x82a   : > { %v3272_v17 = vmul.f32 %v10932_v33, %v3271_v42  ;;  %3981 = vmatpush.msrb.mxu0 %v13415_v28  ;;  %v13416_v33 = vld [vmem:[#allocation76_spill] sm:$0xff] }
 0x82b   : > { %v3365_v51 = vsub.f32 %v3363_v58, %v3364_v37  ;;  %3548 = vmatmul.f32.gmra.mxu1 %v3364_v37 }
 0x82c   : > { %v3295_v4 = vsel %vm13410_vm7, %v3272_v17, 0 }
 0x82d   : > { %v3366_v63 = vand.u32 4294901760, %v3365_v51  ;;  %v3370_v57 = vand.u32 4294901760, %v3295_v4 }
 0x82f   : > { %3429 = vmatmul.f32.gmra.mxu3 %v3370_v57  ;;  %v3371_v31 = vsub.f32 %v3295_v4, %v3370_v57  ;;  %3367 = vmatmul.f32.gmra.mxu2 %v3366_v63 }
 0x831   : > { %3488 = vmatmul.f32.gmra.mxu0 %v3371_v31  ;;  %v3372_v20 = vand.u32 4294901760, %v3371_v31 }
 0x833   : > { %v3373_v7 = vsub.f32 %v3371_v31, %v3372_v20  ;;  %3554 = vmatmul.f32.gmra.mxu1 %v3372_v20 }
 0x835   : > { %v3374_v18 = vand.u32 4294901760, %v3373_v7 }
 0x837   : > { %3628 = vmatmul.f32.vlgmr.msrb.gmra.mxu3 %v10938_v2  ;;  %3375 = vmatmul.f32.gmra.mxu2 %v3374_v18 }
 0x838   : > { %4073 = vmatpush.msrb.mxu3 %v13416_v33 }
 0x83f   : > { %3632 = vmatmul.f32.gmra.mxu3 %v10957_v48  ;;  %3578 = vmatmul.f32.vlgmr.msrb.gmra.mxu2 %v10938_v2 }
 0x840   : > { %8528 = vmatpush.msk.msrb.mxu2 %vm13417_vm14, %v13179_v61 }
 0x847   : > { %3636 = vmatmul.f32.gmra.mxu3 %v10994_v9  ;;  %3582 = vmatmul.f32.gmra.mxu2 %v10957_v48 }
 0x84f   : > { %3640 = vmatmul.f32.gmra.mxu3 %v11031_v45  ;;  %3586 = vmatmul.f32.gmra.mxu2 %v10994_v9 }
 0x857   : > { %3644 = vmatmul.f32.gmra.mxu3 %v11068_v10  ;;  %3590 = vmatmul.f32.gmra.mxu2 %v11031_v45 }
 0x85f   : > { %3648 = vmatmul.f32.gmra.mxu3 %v11105_v5  ;;  %3594 = vmatmul.f32.gmra.mxu2 %v11068_v10 }
 0x867   : > { %3652 = vmatmul.f32.gmra.mxu3 %v3362_v40  ;;  %3598 = vmatmul.f32.gmra.mxu2 %v11105_v5 }
 0x86f   : > { %3656 = vmatmul.f32.gmra.mxu3 %v3370_v57  ;;  %3602 = vmatmul.f32.gmra.mxu2 %v3362_v40 }
 0x876   : > { %v3454_v10 = vpop.f32.mrf.mxu0 }
 0x877   : > { %3606 = vmatmul.f32.gmra.mxu2 %v3370_v57 }
 0x878   : > { %v3513_v20 = vpop.f32.mrf.mxu1 }
 0x87a   : > { %v3402_v2 = vpop.f32.mrf.mxu3 }
 0x87e   : > { %v3459_v7 = vpop.f32.mrf.mxu0 }
 0x880   : > { %v3519_v18 = vpop.f32.mrf.mxu1 }
 0x882   : > { %v3406_v48 = vpop.f32.mrf.mxu3  ;;  %v3320_v17 = vpop.f32.mrf.mxu2 }
 0x883   : > { %v3403_v46 = vadd.f32 %v3402_v2, %v3320_v17 }
 0x885   : > { %v3455_v49 = vadd.f32 %v3454_v10, %v3403_v46  ;;  %v9027_v10 = vld [vmem:[%s9249_s24 + $0x30] sm:$0xff] }
 0x886   : > { %v3464_v54 = vpop.f32.mrf.mxu0 }
 0x887   : > { %v3514_v59 = vadd.f32 %v3513_v20, %v3455_v49 }
 0x888   : > { %v3525_v0 = vpop.f32.mrf.mxu1 }
 0x88a   : > { %v3410_v37 = vpop.f32.mrf.mxu3  ;;  %v3328_v62 = vpop.f32.mrf.mxu2 }
 0x88b   : > { %v3407_v23 = vadd.f32 %v3406_v48, %v3328_v62 }
 0x88d   : > { %v3460_v35 = vadd.f32 %v3459_v7, %v3407_v23 }
 0x88e   : > { %v3469_v52 = vpop.f32.mrf.mxu0 }
 0x88f   : > { %v3520_v12 = vadd.f32 %v3519_v18, %v3460_v35 }
 0x890   : > { %v3531_v11 = vpop.f32.mrf.mxu1 }
 0x892   : > { %v3414_v9 = vpop.f32.mrf.mxu3  ;;  %v3336_v58 = vpop.f32.mrf.mxu2 }
 0x893   : > { %v3411_v53 = vadd.f32 %v3410_v37, %v3336_v58 }
 0x895   : > { %v3465_v43 = vadd.f32 %v3464_v54, %v3411_v53 }
 0x896   : > { %v3474_v27 = vpop.f32.mrf.mxu0 }
 0x897   : > { %v3526_v3 = vadd.f32 %v3525_v0, %v3465_v43 }
 0x898   : > { %v3537_v33 = vpop.f32.mrf.mxu1 }
 0x89a   : > { %v3418_v25 = vpop.f32.mrf.mxu3  ;;  %v3344_v42 = vpop.f32.mrf.mxu2 }
 0x89b   : > { %v3415_v47 = vadd.f32 %v3414_v9, %v3344_v42 }
 0x89d   : > { %v3470_v19 = vadd.f32 %v3469_v52, %v3415_v47 }
 0x89e   : > { %v3479_v50 = vpop.f32.mrf.mxu0 }
 0x89f   : > { %v3532_v37 = vadd.f32 %v3531_v11, %v3470_v19 }
 0x8a0   : > { %v3543_v24 = vpop.f32.mrf.mxu1 }
 0x8a2   : > { %v3422_v45 = vpop.f32.mrf.mxu3  ;;  %v3352_v51 = vpop.f32.mrf.mxu2 }
 0x8a3   : > { %v3419_v39 = vadd.f32 %v3418_v25, %v3352_v51 }
 0x8a5   : > { %v3475_v6 = vadd.f32 %v3474_v27, %v3419_v39 }
 0x8a6   : > { %v3484_v48 = vpop.f32.mrf.mxu0 }
 0x8a7   : > { %v3538_v47 = vadd.f32 %v3537_v33, %v3475_v6 }
 0x8a8   : > { %v3549_v52 = vpop.f32.mrf.mxu1 }
 0x8aa   : > { %v3426_v4 = vpop.f32.mrf.mxu3  ;;  %v3360_v63 = vpop.f32.mrf.mxu2 }
 0x8ab   : > { %v3423_v44 = vadd.f32 %v3422_v45, %v3360_v63  ;;  %v9026_v45 = vld [vmem:[%s9249_s24 + $0x28] sm:$0xff] }
 0x8ad   : > { %v3480_v2 = vadd.f32 %v3479_v50, %v3423_v44 }
 0x8af   : > { %v3544_v49 = vadd.f32 %v3543_v24, %v3480_v2 }
 0x8b0   : > { %v3555_v25 = vpop.f32.mrf.mxu1 }
 0x8b2   : > { %v3430_v31 = vpop.f32.mrf.mxu3  ;;  %v3368_v5 = vpop.f32.mrf.mxu2 }
 0x8b3   : > { %v3427_v14 = vadd.f32 %v3426_v4, %v3368_v5 }
 0x8b5   : > { %v3485_v9 = vadd.f32 %v3484_v48, %v3427_v14 }
 0x8ba   : > { %v3629_v40 = vpop.f32.mrf.mxu3  ;;  %v3376_v57 = vpop.f32.mrf.mxu2 }
 0x8bb   : > { %v3431_v0 = vadd.f32 %v3430_v31, %v3376_v57 }
 0x8c2   : > { %v3633_v28 = vpop.f32.mrf.mxu3  ;;  %v3579_v56 = vpop.f32.mrf.mxu2 }
 0x8c3   : > { %v3580_v17 = vadd.f32 %v3579_v56, %v3514_v59 }
 0x8c5   : > { %v3630_v35 = vadd.f32 %v3629_v40, %v3580_v17 }
 0x8ca   : > { %v3583_v60 = vpop.f32.mrf.mxu2  ;;  %v3637_v29 = vpop.f32.mrf.mxu3 }
 0x8cb   : > { %v3584_v8 = vadd.f32 %v3583_v60, %v3520_v12  ;;  %v3550_v60 = vadd.f32 %v3549_v52, %v3485_v9  ;;  %v9021_v12 = vld [vmem:[%s9249_s24 + $0x8] sm:$0xff] }
 0x8cd   : > { %v3634_v46 = vadd.f32 %v3633_v28, %v3584_v8  ;;  %v9022_v8 = vld [vmem:[%s9249_s24] sm:$0xff] }
 0x8ce   : > { %v3660_v19 = vmul.f32 %v9022_v8, %v3630_v35  ;;  %v13430_v8 = vld [vmem:[#allocation24_spill] sm:$0xff] }
 0x8cf   : > { %v3661_v43 = vmul.f32 %v9021_v12, %v3634_v46  ;;  %v13422_v12 = vld [vmem:[#allocation15_spill] sm:$0xff] }
 0x8d1   : > { %v3668_v24 = vadd.f32 %v3661_v43, %v3660_v19  ;;  %v13431_v19 = vld [vmem:[#allocation34_spill] sm:$0xff] }
 0x8d2   : > { %v3587_v34 = vpop.f32.mrf.mxu2  ;;  %v3641_v16 = vpop.f32.mrf.mxu3  ;;  %vm13432_vm6 = vnez %v13431_v19 }
 0x8d3   : > { %v3588_v23 = vadd.f32 %v3587_v34, %v3526_v3  ;;  %v9024_v34 = vld [vmem:[%s9249_s24 + $0x18] sm:$0xff] }
 0x8d5   : > { %v3638_v53 = vadd.f32 %v3637_v29, %v3588_v23  ;;  %v3489_v29 = vpop.f32.mrf.mxu0 }
 0x8da   : > { %v3591_v36 = vpop.f32.mrf.mxu2  ;;  %v3645_v38 = vpop.f32.mrf.mxu3 }
 0x8db   : > { %v3592_v54 = vadd.f32 %v3591_v36, %v3532_v37  ;;  %v9023_v36 = vld [vmem:[%s9249_s24 + $0x10] sm:$0xff] }
 0x8dc   : > { %v3662_v6 = vmul.f32 %v9023_v36, %v3638_v53  ;;  %v13433_v36 = vld [vmem:[#allocation33_spill] sm:$0xff] }
 0x8dd   : > { %v3642_v44 = vadd.f32 %v3641_v16, %v3592_v54  ;;  %v9025_v16 = vld [vmem:[%s9249_s24 + $0x20] sm:$0xff] }
 0x8de   : > { %v3669_v56 = vadd.f32 %v3668_v24, %v3662_v6  ;;  %v13434_v6 = vld [vmem:[#allocation38_spill] sm:$0xff]  ;;  %v13440_v24 = vld [vmem:[#allocation41_spill] sm:$0xff] }
 0x8df   : > { %v3663_v27 = vmul.f32 %v9024_v34, %v3642_v44  ;;  %v13424_v44 = vld [vmem:[#allocation18_spill] sm:$0xff]  ;;  %vm13435_vm7 = vnez %v13434_v6 }
 0x8e0   : > { %v13441_v34 = vld [vmem:[#allocation54_spill] sm:$0xff] }
 0x8e1   : > { %v3670_v42 = vadd.f32 %v3669_v56, %v3663_v27  ;;  %v13443_v27 = vld [vmem:[#allocation47_spill] sm:$0xff]  ;;  %v13445_v56 = vld [vmem:[#allocation76_spill] sm:$0xff] }
 0x8e2   : > { %v3595_v41 = vpop.f32.mrf.mxu2  ;;  %v3649_v55 = vpop.f32.mrf.mxu3 }
 0x8e3   : > { %v3596_v39 = vadd.f32 %v3595_v41, %v3538_v47  ;;  %v3490_v41 = vadd.f32 %v3489_v29, %v3431_v0  ;;  %v13438_v29 = vld [vmem:[#allocation39_spill] sm:$0xff] }
 0x8e5   : > { %v3646_v11 = vadd.f32 %v3645_v38, %v3596_v39  ;;  %v3556_v4 = vadd.f32 %v3555_v25, %v3490_v41  ;;  %v13418_v39 = vld [vmem:[#allocation10_spill] sm:$0xff]  ;;  %v13449_v25 = vld [vmem:[#allocation63_spill] sm:$0xff] }
 0x8e6   : > { %v13439_v41 = vld [vmem:[#allocation46_spill] sm:$0xff] }
 0x8e7   : > { %v3664_v33 = vmul.f32 %v9025_v16, %v3646_v11  ;;  %v13436_v11 = vld [vmem:[#allocation37_spill] sm:$0xff] }
 0x8e8   : > { %v13446_v16 = vld [vmem:[#allocation49_spill] sm:$0xff] }
 0x8e9   : > { %v3671_v38 = vadd.f32 %v3670_v42, %v3664_v33  ;;  %v13447_v33 = vld [vmem:[#allocation58_spill] sm:$0xff] }
 0x8ea   : > { %v3599_v62 = vpop.f32.mrf.mxu2  ;;  %v3653_v3 = vpop.f32.mrf.mxu3 }
 0x8eb   : > { %v3600_v59 = vadd.f32 %v3599_v62, %v3544_v49 }
 0x8ed   : > { %v3650_v28 = vadd.f32 %v3649_v55, %v3600_v59  ;;  %v9028_v55 = vld [vmem:[%s9249_s24 + $0x38] sm:$0xff] }
 0x8ee   : > { %v13425_v59 = vld [vmem:[#allocation28_spill] sm:$0xff] }
 0x8ef   : > { %v3665_v51 = vmul.f32 %v9026_v45, %v3650_v28  ;;  %vm13426_vm12 = vnez %v13425_v59  ;;  %v13444_v28 = vld [vmem:[#allocation57_spill] sm:$0xff] }
 0x8f1   : > { %v3672_v7 = vadd.f32 %v3671_v38, %v3665_v51 }
 0x8f2   : > { %v3603_v14 = vpop.f32.mrf.mxu2  ;;  %v3657_v5 = vpop.f32.mrf.mxu3 }
 0x8f3   : > { %v3604_v50 = vadd.f32 %v3603_v14, %v3550_v60  ;;  %v13420_v60 = vld [vmem:[#allocation12_spill] sm:$0xff]  ;;  %v13428_v14 = vld [vmem:[#allocation30_spill] sm:$0xff] }
 0x8f4   : > { %vm13429_vm2 = vnez %v13428_v14 }
 0x8f5   : > { %v3654_v58 = vadd.f32 %v3653_v3, %v3604_v50  ;;  %v13427_v3 = vld [vmem:[#allocation20_spill] sm:$0xff] }
 0x8f6   : > { %v13437_v50 = vld [vmem:[#allocation44_spill] sm:$0xff] }
 0x8f7   : > { %v3666_v31 = vmul.f32 %v9027_v10, %v3654_v58  ;;  %v13448_v58 = vld [vmem:[#allocation60_spill] sm:$0xff] }
 0x8f9   : > { %v3673_v57 = vadd.f32 %v3672_v7, %v3666_v31 }
 0x8fa   : > { %v3607_v63 = vpop.f32.mrf.mxu2 }
 0x8fb   : > { %v3608_v20 = vadd.f32 %v3607_v63, %v3556_v4 }
 0x8fd   : > { %v3658_v40 = vadd.f32 %v3657_v5, %v3608_v20 }
 0x8ff   : > { %v3667_v18 = vmul.f32 %v9028_v55, %v3658_v40  ;;  %v11241_v55 = vld [vmem:[%s9249_s24 + $0x40] sm:$0xff] }
 0x900   : > { %13451 = vst [vmem:[#allocation50_spill] sm:$0xff] %v11241_v55 }
 0x901   : > { %v3674_v48 = vadd.f32 %v3673_v57, %v3667_v18  ;;  %v11244_v18 = vld [vmem:[%s9249_s24 + $0x48] sm:$0xff] }
 0x902   : > { %13452 = vst [vmem:[#allocation51_spill] sm:$0xff] %v11244_v18 }
 0x903   : > { %v3675_v62 = vrot.slane %v3674_v48, 4 }
 0x905   : > { %v3676_v2 = vadd.f32 %v3675_v62, %v3674_v48  ;;  %v4213_v48 = vadd.f32 %v11244_v18, %v11241_v55  ;;  %v13486_v18 = vld [vmem:[#allocation36_spill] sm:$0xff] }
 0x906   : > { %v13487_v55 = vld [vmem:[#allocation40_spill] sm:$0xff] }
 0x907   : > { %v3677_v17 = vrot.slane %v3676_v2, 2 }
 0x909   : > { %v3678_v23 = vadd.f32 %v3677_v17, %v3676_v2  ;;  %v11249_v2 = vld [vmem:[%s9249_s24 + $0x50] sm:$0xff] }
 0x90a   : > { %13453 = vst [vmem:[#allocation56_spill] sm:$0xff] %v11249_v2  ;;  %v4214_v17 = vadd.f32 %v11249_v2, %v4213_v48  ;;  %v13464_v48 = vld [vmem:[#allocation32_spill] sm:$0xff]  ;;  %v13485_v2 = vld [vmem:[#allocation29_spill] sm:$0xff] }
 0x90b   : > { %v3679_v37 = vrot.slane %v3678_v23, 1 }
 0x90d   : > { %v11163_v9 = vadd.f32 %v3679_v37, %v3678_v23  ;;  %v11256_v37 = vld [vmem:[%s9249_s24 + $0x58] sm:$0xff] }
 0x90e   : > { %13454 = vst [vmem:[#allocation61_spill] sm:$0xff] %v11256_v37 }
 0x90f   : > { %v3682_v46 = vmul.f32 %v11163_v9, %v11163_v9 }
 0x911   : > { %v3715_v54 = vand.u32 4294901760, %v3682_v46 }
 0x913   : > { %3821 = vmatmul.f32.vlgmr.msra.gmra.mxu1 %v3715_v54  ;;  %v3716_v47 = vsub.f32 %v3682_v46, %v3715_v54  ;;  %v4215_v46 = vadd.f32 %v11256_v37, %v4214_v17  ;;  %v13482_v37 = vld [vmem:[#allocation19_spill] sm:$0xff] }
 0x914   : > { %8555 = vmatpush.msk.msra.mxu1 %vm13358_vm10, %v13179_v61 }
 0x915   : > { %3875 = vmatmul.f32.vlgmr.msra.gmra.mxu2 %v3716_v47  ;;  %v3717_v52 = vand.u32 4294901760, %v3716_v47 }
 0x916   : > { %4096 = vmatpush.msra.mxu2 %v9920_v1  ;;  %8556 = vmatpush.msk.msra.mxu1 %vm9295_vm15, %v13179_v61 }
 0x917   : > { %3914 = vmatmul.f32.vlgmr.msra.gmra.mxu3 %v3717_v52  ;;  %v3718_v35 = vsub.f32 %v3716_v47, %v3717_v52  ;;  %v11260_v47 = vld [vmem:[%s9249_s24 + $0x60] sm:$0xff] }
 0x918   : > { %8529 = vmatpush.msk.msra.mxu3 %vm13417_vm14, %v13179_v61  ;;  %8557 = vmatpush.msk.msra.mxu1 %vm9312_vm0, %v13179_v61  ;;  %13455 = vst [vmem:[#allocation66_spill] sm:$0xff] %v11260_v47  ;;  %v4216_v52 = vadd.f32 %v11260_v47, %v4215_v46 }
 0x919   : > { %v3719_v53 = vand.u32 4294901760, %v3718_v35 }
 0x91a   : > { %8558 = vmatpush.msk.msra.mxu1 %vm9334_vm1, %v13179_v61 }
 0x91b   : > { %3720 = vmatmul.f32.vlgmr.msra.gmra.mxu0 %v3719_v53  ;;  %4020 = vmatmul.f32.vlgmr.msrb.gmra.mxu1 %v3715_v54  ;;  %v11264_v53 = vld [vmem:[%s9249_s24 + $0x68] sm:$0xff] }
 0x91c   : > { %4373 = vmatpush.msra.mxu0 %v9316_v22  ;;  %8559 = vmatpush.msk.msra.mxu1 %vm9355_vm3, %v13179_v61  ;;  %13456 = vst [vmem:[#allocation69_spill] sm:$0xff] %v11264_v53 }
 0x91e   : > { %4376 = vmatpush.msra.mxu0 %v13418_v39  ;;  %8560 = vmatpush.msk.msra.mxu1 %vm9376_vm4, %v13179_v61 }
 0x920   : > { %4379 = vmatpush.msra.mxu0 %v13420_v60  ;;  %8561 = vmatpush.msk.msra.mxu1 %vm9398_vm5, %v13179_v61 }
 0x922   : > { %4382 = vmatpush.msra.mxu0 %v13422_v12  ;;  %8562 = vmatpush.msk.msra.mxu1 %vm13192_vm9, %v13179_v61 }
 0x923   : > { %3983 = vmatmul.f32.vlgmr.msrb.gmra.mxu0 %v3715_v54 }
 0x924   : > { %4385 = vmatpush.msra.mxu0 %v13424_v44  ;;  %8563 = vmatpush.msk.msra.mxu1 %vm13426_vm12, %v13179_v61 }
 0x926   : > { %4388 = vmatpush.msra.mxu0 %v13427_v3  ;;  %8564 = vmatpush.msk.msra.mxu1 %vm13429_vm2, %v13179_v61 }
 0x928   : > { %4391 = vmatpush.msra.mxu0 %v13430_v8  ;;  %8565 = vmatpush.msk.msra.mxu1 %vm13432_vm6, %v13179_v61  ;;  %vm13442_vm6 = vnez %v13441_v34 }
 0x92a   : > { %4394 = vmatpush.msra.mxu0 %v13433_v36  ;;  %8566 = vmatpush.msk.msra.mxu1 %vm13435_vm7, %v13179_v61 }
 0x92c   : > { %4397 = vmatpush.msra.mxu0 %v13436_v11  ;;  %8567 = vmatpush.msk.msra.mxu1 %vm13395_vm8, %v13179_v61 }
 0x92e   : > { %4400 = vmatpush.msra.mxu0 %v13438_v29  ;;  %8568 = vmatpush.msk.msra.mxu1 %vm13397_vm11, %v13179_v61 }
 0x930   : > { %4403 = vmatpush.msra.mxu0 %v13440_v24  ;;  %8569 = vmatpush.msk.msra.mxu1 %vm13442_vm6, %v13179_v61 }
 0x932   : > { %4406 = vmatpush.msra.mxu0 %v13443_v27  ;;  %8570 = vmatpush.msk.msra.mxu1 %vm13405_vm13, %v13179_v61  ;;  %vm13450_vm13 = vcmask 64512  }
 0x934   : > { %4619 = vmatpush.msrb.mxu1 %v13445_v56  ;;  %4409 = vmatpush.msra.mxu0 %v13446_v16 }
 0x936   : > { %4412 = vmatpush.msra.mxu0 %v13447_v33 }
 0x938   : > { %4415 = vmatpush.msra.mxu0 %v13448_v58 }
 0x93a   : > { %4418 = vmatpush.msra.mxu0 %v13449_v25 }
 0x93c   : > { %8587 = vmatpush.msk.msrb.mxu0 %vm13417_vm14, %v13179_v61 }
 0x990   : > { %v3822_v42 = vpop.f32.mrf.mxu1 }
 0x998   : > { %v3721_v45 = vpop.f32.mrf.mxu0  ;;  %v3876_v4 = vpop.f32.mrf.mxu2 }
 0x999   : > { %v3823_v51 = vadd.f32 %v3822_v42, %v3721_v45  ;;  %v4021_v5 = vpop.f32.mrf.mxu1  ;;  %v4217_v42 = vadd.f32 %v11264_v53, %v4216_v52  ;;  %v11268_v45 = vld [vmem:[%s9249_s24 + $0x70] sm:$0xff]  ;;  %v13467_v52 = vld [vmem:[#allocation48_spill] sm:$0xff] }
 0x99a   : > { %v3915_v38 = vpop.f32.mrf.mxu3  ;;  %13457 = vst [vmem:[#allocation77_spill] sm:$0xff] %v11268_v45 }
 0x99b   : > { %v3877_v63 = vadd.f32 %v3876_v4, %v3823_v51  ;;  %v13458_v51 = vld [vmem:[#allocation75_spill] sm:$0xff]  ;;  %v13459_v4 = vld [vmem:[#allocation21_spill] sm:$0xff] }
 0x99d   : > { %v3916_v10 = vadd.f32 %v3915_v38, %v3877_v63  ;;  %v4218_v63 = vadd.f32 %v11268_v45, %v4217_v42  ;;  %v11274_v38 = vld [vmem:[%s9249_s24 + $0x78] sm:$0xff]  ;;  %v13477_v45 = vld [vmem:[#allocation73_spill] sm:$0xff] }
 0x99e   : > { %13460 = vst [vmem:[#allocation78_spill] sm:$0xff] %v11274_v38  ;;  %v13468_v42 = vld [vmem:[#allocation52_spill] sm:$0xff] }
 0x9a0   : > { %v3984_v31 = vpop.f32.mrf.mxu0 }
 0x9a1   : > { %v3985_v20 = vadd.f32 %v3984_v31, %v3916_v10  ;;  %v13461_v10 = vld [vmem:[#allocation25_spill] sm:$0xff]  ;;  %v4219_v31 = vadd.f32 %v11274_v38, %v4218_v63  ;;  %v13474_v38 = vld [vmem:[#allocation71_spill] sm:$0xff] }
 0x9a3   : > { %v4022_v7 = vadd.f32 %v4021_v5, %v3985_v20  ;;  %v13462_v20 = vld [vmem:[#allocation27_spill] sm:$0xff]  ;;  %v4220_v5 = vrot.slane %v4219_v31, 4 }
 0x9a5   : > { %v4025_v40 = vsel %vm13450_vm13, %v4022_v7, 0  ;;  %v13463_v7 = vld [vmem:[#allocation31_spill] sm:$0xff]  ;;  %vm13475_vm13 = vnez %v13431_v19 }
 0x9a6   : > { %v4044_v57 = vand.u32 4294901760, %v4025_v40 }
 0x9a8   : > { %v4045_v62 = vsub.f32 %v4025_v40, %v4044_v57  ;;  %4075 = vmatmul.f32.vlgmr.msrb.gmra.mxu3 %v4044_v57  ;;  %v4221_v40 = vadd.f32 %v4220_v5, %v4219_v31  ;;  %v13470_v31 = vld [vmem:[#allocation59_spill] sm:$0xff] }
 0x9a9   : > { %8530 = vmatpush.msk.msrb.mxu3 %vm13417_vm14, %v13179_v61 }
 0x9aa   : > { %v4046_v23 = vand.u32 4294901760, %v4045_v62  ;;  %v4222_v17 = vrot.slane %v4221_v40, 2 }
 0x9ac   : > { %v4047_v54 = vsub.f32 %v4045_v62, %v4046_v23  ;;  %v4223_v46 = vadd.f32 %v4222_v17, %v4221_v40  ;;  %v13472_v17 = vld [vmem:[#allocation67_spill] sm:$0xff] }
 0x9ae   : > { %v4048_v35 = vand.u32 4294901760, %v4047_v54  ;;  %v4224_v54 = vrot.slane %v4223_v46, 1 }
 0x9b0   : > { %4049 = vmatmul.f32.vlgmr.msrb.gmra.mxu2 %v4048_v35  ;;  %4123 = vmatmul.f32.vlgmr.msra.gmra.mxu3 %v4046_v23  ;;  %v13465_v23 = vld [vmem:[#allocation35_spill] sm:$0xff]  ;;  %v4225_v35 = vadd.f32 %v4224_v54, %v4223_v46  ;;  %v13473_v54 = vld [vmem:[#allocation70_spill] sm:$0xff] }
 0x9b1   : > { %4145 = vmatpush.msrb.mxu2 %v13458_v51  ;;  %4275 = vmatpush.msra.mxu3 %v13459_v4 }
 0x9b2   : > { %v11300_v63 = vmul.f32 0.125, %v4225_v35 }
 0x9b3   : > { %4281 = vmatpush.msra.mxu3 %v13461_v10 }
 0x9b4   : > { %13469 = vst [vmem:[#allocation79_spill] sm:$0xff] %v11300_v63  ;;  %v4228_v5 = vmul.f32 %v11300_v63, %v11300_v63  ;;  %v13488_v63 = vld [vmem:[#allocation42_spill] sm:$0xff] }
 0x9b5   : > { %4287 = vmatpush.msra.mxu3 %v13462_v20 }
 0x9b6   : > { %v4261_v40 = vand.u32 4294901760, %v4228_v5 }
 0x9b7   : > { %4293 = vmatpush.msra.mxu3 %v13463_v7 }
 0x9b8   : > { %4099 = vmatmul.f32.vlgmr.msra.gmra.mxu2 %v4045_v62  ;;  %4169 = vmatmul.f32.vlgmr.msrb.gmra.mxu3 %v4044_v57  ;;  %v13466_v62 = vld [vmem:[#allocation43_spill] sm:$0xff]  ;;  %v4262_v46 = vsub.f32 %v4228_v5, %v4261_v40  ;;  %v13476_v5 = vld [vmem:[#allocation72_spill] sm:$0xff] }
 0x9b9   : > { %8539 = vmatpush.msk.msra.mxu2 %vm13358_vm10, %v13179_v61  ;;  %4299 = vmatpush.msra.mxu3 %v13464_v48 }
 0x9ba   : > { %v4263_v35 = vand.u32 4294901760, %v4262_v46  ;;  %4421 = vmatmul.f32.vlgmr.msra.gmra.mxu0 %v4262_v46 }
 0x9bb   : > { %8540 = vmatpush.msk.msra.mxu2 %vm9295_vm15, %v13179_v61  ;;  %4305 = vmatpush.msra.mxu3 %v13465_v23 }
 0x9bc   : > { %4460 = vmatmul.f32.vlgmr.msra.gmra.mxu1 %v4263_v35  ;;  %4642 = vmatpush.msra.mxu0 %v9920_v1  ;;  %v4264_v53 = vsub.f32 %v4262_v46, %v4263_v35  ;;  %v13479_v46 = vld [vmem:[#allocation11_spill] sm:$0xff]  ;;  %v13480_v35 = vld [vmem:[#allocation13_spill] sm:$0xff]  ;;  %v13483_v1 = vld [vmem:[#allocation22_spill] sm:$0xff] }
 0x9bd   : > { %8541 = vmatpush.msk.msra.mxu2 %vm9312_vm0, %v13179_v61  ;;  %4311 = vmatpush.msra.mxu3 %v13466_v62 }
 0x9be   : > { %8588 = vmatpush.msk.msra.mxu1 %vm13417_vm14, %v13179_v61  ;;  %v4265_v47 = vand.u32 4294901760, %v4264_v53  ;;  %vm13478_vm14 = vnez %v13444_v28  ;;  %v13481_v53 = vld [vmem:[#allocation16_spill] sm:$0xff] }
 0x9bf   : > { %8542 = vmatpush.msk.msra.mxu2 %vm9334_vm1, %v13179_v61  ;;  %4317 = vmatpush.msra.mxu3 %v13467_v52 }
 0x9c0   : > { %4147 = vmatmul.f32.vlgmr.msrb.gmra.mxu2 %v4044_v57  ;;  %v13471_v57 = vld [vmem:[#allocation64_spill] sm:$0xff] }
 0x9c1   : > { %8543 = vmatpush.msk.msra.mxu2 %vm9355_vm3, %v13179_v61  ;;  %4323 = vmatpush.msra.mxu3 %v13468_v42 }
 0x9c3   : > { %8544 = vmatpush.msk.msra.mxu2 %vm9376_vm4, %v13179_v61  ;;  %4329 = vmatpush.msra.mxu3 %v13470_v31 }
 0x9c5   : > { %8545 = vmatpush.msk.msra.mxu2 %vm9398_vm5, %v13179_v61  ;;  %4335 = vmatpush.msra.mxu3 %v13471_v57 }
 0x9c7   : > { %8546 = vmatpush.msk.msra.mxu2 %vm13192_vm9, %v13179_v61  ;;  %4341 = vmatpush.msra.mxu3 %v13472_v17 }
 0x9c9   : > { %8547 = vmatpush.msk.msra.mxu2 %vm13426_vm12, %v13179_v61  ;;  %4347 = vmatpush.msra.mxu3 %v13473_v54 }
 0x9cb   : > { %8548 = vmatpush.msk.msra.mxu2 %vm13429_vm2, %v13179_v61  ;;  %4353 = vmatpush.msra.mxu3 %v13474_v38 }
 0x9cd   : > { %8549 = vmatpush.msk.msra.mxu2 %vm13475_vm13, %v13179_v61  ;;  %4359 = vmatpush.msra.mxu3 %v13476_v5 }
 0x9cf   : > { %8550 = vmatpush.msk.msra.mxu2 %vm13435_vm7, %v13179_v61  ;;  %4365 = vmatpush.msra.mxu3 %v13477_v45 }
 0x9d0   : > { %4367 = vmatmul.f32.vlgmr.msra.gmra.mxu3 %v4261_v40 }
 0x9d1   : > { %8571 = vmatpush.msk.msrb.mxu3 %vm13358_vm10, %v13179_v61  ;;  %8551 = vmatpush.msk.msra.mxu2 %vm13395_vm8, %v13179_v61 }
 0x9d3   : > { %8572 = vmatpush.msk.msrb.mxu3 %vm9295_vm15, %v13179_v61  ;;  %8552 = vmatpush.msk.msra.mxu2 %vm13397_vm11, %v13179_v61 }
 0x9d5   : > { %8573 = vmatpush.msk.msrb.mxu3 %vm9312_vm0, %v13179_v61  ;;  %8553 = vmatpush.msk.msra.mxu2 %vm13442_vm6, %v13179_v61 }
 0x9d7   : > { %8574 = vmatpush.msk.msrb.mxu3 %vm9334_vm1, %v13179_v61  ;;  %8554 = vmatpush.msk.msra.mxu2 %vm13478_vm14, %v13179_v61 }
 0x9d8   : > { %4266 = vmatmul.f32.vlgmr.msra.gmra.mxu2 %v4265_v47  ;;  %v13484_v47 = vld [vmem:[#allocation26_spill] sm:$0xff] }
 0x9d9   : > { %4467 = vmatpush.msrb.mxu2 %v13479_v46  ;;  %8575 = vmatpush.msk.msrb.mxu3 %vm9355_vm3, %v13179_v61 }
 0x9db   : > { %4471 = vmatpush.msrb.mxu2 %v13480_v35  ;;  %8576 = vmatpush.msk.msrb.mxu3 %vm9376_vm4, %v13179_v61 }
 0x9dd   : > { %4475 = vmatpush.msrb.mxu2 %v13481_v53  ;;  %8577 = vmatpush.msk.msrb.mxu3 %vm9398_vm5, %v13179_v61 }
 0x9df   : > { %4479 = vmatpush.msrb.mxu2 %v13482_v37  ;;  %8578 = vmatpush.msk.msrb.mxu3 %vm13192_vm9, %v13179_v61 }
 0x9e1   : > { %4483 = vmatpush.msrb.mxu2 %v13483_v1  ;;  %8579 = vmatpush.msk.msrb.mxu3 %vm13426_vm12, %v13179_v61 }
 0x9e3   : > { %4487 = vmatpush.msrb.mxu2 %v13484_v47  ;;  %8580 = vmatpush.msk.msrb.mxu3 %vm13429_vm2, %v13179_v61 }
 0x9e5   : > { %4491 = vmatpush.msrb.mxu2 %v13485_v2  ;;  %8581 = vmatpush.msk.msrb.mxu3 %vm13475_vm13, %v13179_v61  ;;  %v13489_v2 = vld [vmem:[#allocation45_spill] sm:$0xff] }
 0x9e7   : > { %4495 = vmatpush.msrb.mxu2 %v13486_v18  ;;  %8582 = vmatpush.msk.msrb.mxu3 %vm13435_vm7, %v13179_v61  ;;  %v13490_v18 = vld [vmem:[#allocation53_spill] sm:$0xff] }
 0x9e9   : > { %4499 = vmatpush.msrb.mxu2 %v13487_v55  ;;  %8583 = vmatpush.msk.msrb.mxu3 %vm13395_vm8, %v13179_v61  ;;  %v13491_v55 = vld [vmem:[#allocation55_spill] sm:$0xff] }
 0x9eb   : > { %4503 = vmatpush.msrb.mxu2 %v13488_v63  ;;  %8584 = vmatpush.msk.msrb.mxu3 %vm13397_vm11, %v13179_v61  ;;  %v13492_v63 = vld [vmem:[#allocation62_spill] sm:$0xff] }
 0x9ed   : > { %4507 = vmatpush.msrb.mxu2 %v13489_v2  ;;  %8585 = vmatpush.msk.msrb.mxu3 %vm13442_vm6, %v13179_v61  ;;  %v13493_v2 = vld [vmem:[#allocation65_spill] sm:$0xff] }
 0x9ef   : > { %4511 = vmatpush.msrb.mxu2 %v13490_v18  ;;  %8586 = vmatpush.msk.msrb.mxu3 %vm13478_vm14, %v13179_v61  ;;  %v13494_v18 = vld [vmem:[#allocation68_spill] sm:$0xff] }
 0x9f0   : > { %4566 = vmatmul.f32.vlgmr.msrb.gmra.mxu3 %v4261_v40 }
 0x9f1   : > { %4515 = vmatpush.msrb.mxu2 %v13491_v55  ;;  %8606 = vmatpush.msk.msra.mxu3 %vm13358_vm10, %v13179_v61 }
 0x9f3   : > { %4519 = vmatpush.msrb.mxu2 %v13492_v63  ;;  %8607 = vmatpush.msk.msra.mxu3 %vm9295_vm15, %v13179_v61 }
 0x9f5   : > { %4523 = vmatpush.msrb.mxu2 %v13493_v2  ;;  %8608 = vmatpush.msk.msra.mxu3 %vm9312_vm0, %v13179_v61 }
 0x9f7   : > { %4527 = vmatpush.msrb.mxu2 %v13494_v18  ;;  %8609 = vmatpush.msk.msra.mxu3 %vm9334_vm1, %v13179_v61 }
 0x9f8   : > { %4529 = vmatmul.f32.vlgmr.msrb.gmra.mxu2 %v4261_v40 }
 0x9f9   : > { %4985 = vmatpush.msra.mxu2 %v9316_v22  ;;  %8610 = vmatpush.msk.msra.mxu3 %vm9355_vm3, %v13179_v61 }
 0x9fb   : > { %4988 = vmatpush.msra.mxu2 %v13418_v39  ;;  %8611 = vmatpush.msk.msra.mxu3 %vm9376_vm4, %v13179_v61 }
 0x9fd   : > { %4991 = vmatpush.msra.mxu2 %v13420_v60  ;;  %8612 = vmatpush.msk.msra.mxu3 %vm9398_vm5, %v13179_v61 }
 0x9ff   : > { %4994 = vmatpush.msra.mxu2 %v13422_v12  ;;  %8613 = vmatpush.msk.msra.mxu3 %vm13192_vm9, %v13179_v61 }
 0xa01   : > { %4997 = vmatpush.msra.mxu2 %v13424_v44  ;;  %8614 = vmatpush.msk.msra.mxu3 %vm13426_vm12, %v13179_v61 }
 0xa03   : > { %5000 = vmatpush.msra.mxu2 %v13427_v3  ;;  %8615 = vmatpush.msk.msra.mxu3 %vm13429_vm2, %v13179_v61 }
 0xa05   : > { %5003 = vmatpush.msra.mxu2 %v13430_v8  ;;  %8616 = vmatpush.msk.msra.mxu3 %vm13475_vm13, %v13179_v61 }
 0xa07   : > { %5006 = vmatpush.msra.mxu2 %v13433_v36  ;;  %8617 = vmatpush.msk.msra.mxu3 %vm13435_vm7, %v13179_v61 }
 0xa09   : > { %5009 = vmatpush.msra.mxu2 %v13436_v11  ;;  %8618 = vmatpush.msk.msra.mxu3 %vm13395_vm8, %v13179_v61 }
 0xa0b   : > { %5012 = vmatpush.msra.mxu2 %v13438_v29  ;;  %8619 = vmatpush.msk.msra.mxu3 %vm13397_vm11, %v13179_v61  ;;  %vm13495_vm11 = vnez %v13195_v32 }
 0xa0d   : > { %5015 = vmatpush.msra.mxu2 %v13440_v24  ;;  %8620 = vmatpush.msk.msra.mxu3 %vm13442_vm6, %v13179_v61 }
 0xa0f   : > { %5018 = vmatpush.msra.mxu2 %v13443_v27  ;;  %8621 = vmatpush.msk.msra.mxu3 %vm13478_vm14, %v13179_v61 }
 0xa11   : > { %5642 = vmatpush.msrb.mxu3 %v13445_v56  ;;  %5021 = vmatpush.msra.mxu2 %v13446_v16 }
 0xa13   : > { %5024 = vmatpush.msra.mxu2 %v13447_v33 }
 0xa15   : > { %5027 = vmatpush.msra.mxu2 %v13448_v58 }
 0xa17   : > { %5030 = vmatpush.msra.mxu2 %v13449_v25 }
 0xa19   : > { %8638 = vmatpush.msk.msrb.mxu2 %vm13495_vm11, %v13179_v61 }
 0xa2b   : > { %v4076_v40 = vpop.f32.mrf.mxu3 }
 0xa33   : > { %v4050_v27 = vpop.f32.mrf.mxu2  ;;  %v4124_v24 = vpop.f32.mrf.mxu3 }
 0xa34   : > { %v4077_v11 = vadd.f32 %v4076_v40, %v4050_v27 }
 0xa39   : > { %v4461_v40 = vpop.f32.mrf.mxu1 }
 0xa3b   : > { %v4100_v29 = vpop.f32.mrf.mxu2  ;;  %v4170_v16 = vpop.f32.mrf.mxu3 }
 0xa3c   : > { %v4101_v36 = vadd.f32 %v4100_v29, %v4077_v11 }
 0xa3e   : > { %v4125_v8 = vadd.f32 %v4124_v24, %v4101_v36 }
 0xa43   : > { %v4148_v56 = vpop.f32.mrf.mxu2 }
 0xa44   : > { %v4149_v3 = vadd.f32 %v4148_v56, %v4125_v8 }
 0xa46   : > { %v4171_v44 = vadd.f32 %v4170_v16, %v4149_v3 }
 0xa48   : > { %v4173_v33 = vadd.f32 1e-06, %v4171_v44  ;;  %v4185_v12 = vadd.f32 1.0, %v4171_v44 }
 0xa4a   : > { %8933 = vrsqrt.f32 %v4173_v33  ;;  %v4197_v36 = vand.u32 2147483648, %v4185_v12  ;;  %vm4191_vm8 = vweird.f32 %v4185_v12  ;;  %v4195_v3 = vand.u32 2147483647, %v4185_v12 }
 0xa4b   : > { %8935 = vrcp.f32 %v4185_v12  ;;  %vm4180_vm7 = vweird.f32 %v4173_v33 }
 0xa4c   : > { %v4198_v56 = vor.u32 1.1754944e-38, %v4197_v36  ;;  %vm4196_vm12 = vcmp.eq.f32.partialorder %v4195_v3, 8.507059e+37 }
 0xa50   : > { %v8934_v25 = vpop.eup %8933 }
 0xa51   : > { %v8936_v58 = vpop.eup %8935  ;;  %v4175_v60 = vmul.f32 %v8934_v25, %v4173_v33  ;;  %vm4181_vm6 = vweird.f32 %v8934_v25  ;;  %v4422_v33 = vpop.f32.mrf.mxu0 }
 0xa52   : > { %v4187_v39 = vmul.f32 %v8936_v58, %v4185_v12  ;;  %vm4192_vm14 = vweird.f32 %v8936_v58  ;;  %vm4182_vm2 = vmor %vm4180_vm7, %vm4181_vm6  ;;  %vm13500_vm6 = vnez %v13434_v6  ;;  %vm13501_vm7 = vnez %v13437_v50 }
 0xa53   : > { %v4176_v22 = vmul.f32 %v8934_v25, %v4175_v60  ;;  %vm4193_vm13 = vmor %vm4191_vm8, %vm4192_vm14  ;;  %v4368_v12 = vpop.f32.mrf.mxu3  ;;  %vm13496_vm8 = vcmask 64512   ;;  %vm13497_vm14 = vnez %v13425_v59 }
 0xa54   : > { %v4188_v18 = vsub.f32 1.0, %v4187_v39 }
 0xa55   : > { %v4177_v2 = vmul.f32 0.5, %v4176_v22 }
 0xa56   : > { %v4189_v63 = vmul.f32 %v8936_v58, %v4188_v18 }
 0xa57   : > { %v4178_v11 = vsub.f32 1.5, %v4177_v2 }
 0xa58   : > { %v4190_v8 = vadd.f32 %v8936_v58, %v4189_v63 }
 0xa59   : > { %v4179_v29 = vmul.f32 %v8934_v25, %v4178_v11 }
 0xa5a   : > { %v4194_v24 = vsel %vm4193_vm13, %v8936_v58, %v4190_v8  ;;  %vm13502_vm13 = vnez %v13439_v41 }
 0xa5b   : > { %v4183_v27 = vsel %vm4182_vm2, %v8934_v25, %v4179_v29  ;;  %v4199_v22 = vsel %vm4196_vm12, %v4198_v56, %v4194_v24  ;;  %v4267_v18 = vpop.f32.mrf.mxu2  ;;  %vm13498_vm12 = vnez %v13428_v14  ;;  %vm13499_vm2 = vnez %v13431_v19  ;;  %v13505_v56 = vld [vmem:[#allocation29_spill] sm:$0xff] }
 0xa5c   : > { %v4184_v16 = vmul.f32 %v4183_v27, %v4171_v44  ;;  %v4369_v2 = vadd.f32 %v4368_v12, %v4267_v18  ;;  %v13510_v18 = vld [vmem:[#allocation53_spill] sm:$0xff]  ;;  %v13511_v12 = vld [vmem:[#allocation62_spill] sm:$0xff] }
 0xa5e   : > { %v4200_v39 = vmul.f32 %v4199_v22, %v4184_v16  ;;  %v4423_v63 = vadd.f32 %v4422_v33, %v4369_v2  ;;  %v13506_v16 = vld [vmem:[#allocation36_spill] sm:$0xff]  ;;  %v13512_v2 = vld [vmem:[#allocation65_spill] sm:$0xff] }
 0xa5f   : > { %v13507_v22 = vld [vmem:[#allocation40_spill] sm:$0xff] }
 0xa60   : > { %v4201_v60 = vmul.f32 %v4200_v39, %v11163_v9  ;;  %v4462_v58 = vadd.f32 %v4461_v40, %v4423_v63  ;;  %v13508_v39 = vld [vmem:[#allocation42_spill] sm:$0xff]  ;;  %v13513_v33 = vld [vmem:[#allocation68_spill] sm:$0xff] }
 0xa62   : > { %4202 = vst [vmem:[%s11482_s25] sm:$0x1] %v4201_v60  ;;  %v13509_v60 = vld [vmem:[#allocation45_spill] sm:$0xff] }
 0xa73   : > { %v4567_v11 = vpop.f32.mrf.mxu3 }
 0xa7b   : > { %v4530_v25 = vpop.f32.mrf.mxu2 }
 0xa7c   : > { %v4531_v44 = vadd.f32 %v4530_v25, %v4462_v58 }
 0xa7e   : > { %v4568_v36 = vadd.f32 %v4567_v11, %v4531_v44 }
 0xa80   : > { %v4571_v8 = vsel %vm13496_vm8, %v4568_v36, 0  ;;  %vm13503_vm8 = vnez %v13441_v34 }
 0xa81   : > { %v4590_v3 = vand.u32 4294901760, %v4571_v8 }
 0xa83   : > { %v4591_v29 = vsub.f32 %v4571_v8, %v4590_v3  ;;  %4621 = vmatmul.f32.vlgmr.msrb.gmra.mxu1 %v4590_v3 }
 0xa84   : > { %8589 = vmatpush.msk.msrb.mxu1 %vm13495_vm11, %v13179_v61 }
 0xa85   : > { %v4592_v9 = vand.u32 4294901760, %v4591_v29 }
 0xa87   : > { %v4593_v24 = vsub.f32 %v4591_v29, %v4592_v9 }
 0xa89   : > { %v4594_v27 = vand.u32 4294901760, %v4593_v24 }
 0xa8b   : > { %4595 = vmatmul.f32.vlgmr.msrb.gmra.mxu0 %v4594_v27  ;;  %4669 = vmatmul.f32.vlgmr.msra.gmra.mxu1 %v4592_v9 }
 0xa8c   : > { %4691 = vmatpush.msrb.mxu0 %v13458_v51  ;;  %4859 = vmatpush.msra.mxu1 %v13459_v4 }
 0xa8e   : > { %4865 = vmatpush.msra.mxu1 %v13461_v10 }
 0xa90   : > { %4871 = vmatpush.msra.mxu1 %v13462_v20 }
 0xa92   : > { %4877 = vmatpush.msra.mxu1 %v13463_v7 }
 0xa93   : > { %4645 = vmatmul.f32.vlgmr.msra.gmra.mxu0 %v4591_v29  ;;  %4715 = vmatmul.f32.vlgmr.msrb.gmra.mxu1 %v4590_v3 }
 0xa94   : > { %8590 = vmatpush.msk.msra.mxu0 %vm13358_vm10, %v13179_v61  ;;  %4883 = vmatpush.msra.mxu1 %v13464_v48 }
 0xa96   : > { %8591 = vmatpush.msk.msra.mxu0 %vm9295_vm15, %v13179_v61  ;;  %4889 = vmatpush.msra.mxu1 %v13465_v23 }
 0xa98   : > { %8592 = vmatpush.msk.msra.mxu0 %vm9312_vm0, %v13179_v61  ;;  %4895 = vmatpush.msra.mxu1 %v13466_v62 }
 0xa9a   : > { %8593 = vmatpush.msk.msra.mxu0 %vm9334_vm1, %v13179_v61  ;;  %4901 = vmatpush.msra.mxu1 %v13467_v52 }
 0xa9b   : > { %4693 = vmatmul.f32.vlgmr.msrb.gmra.mxu0 %v4590_v3 }
 0xa9c   : > { %8594 = vmatpush.msk.msra.mxu0 %vm9355_vm3, %v13179_v61  ;;  %4907 = vmatpush.msra.mxu1 %v13468_v42 }
 0xa9e   : > { %8595 = vmatpush.msk.msra.mxu0 %vm9376_vm4, %v13179_v61  ;;  %4913 = vmatpush.msra.mxu1 %v13470_v31 }
 0xaa0   : > { %8596 = vmatpush.msk.msra.mxu0 %vm9398_vm5, %v13179_v61  ;;  %4919 = vmatpush.msra.mxu1 %v13471_v57 }
 0xaa2   : > { %8597 = vmatpush.msk.msra.mxu0 %vm13192_vm9, %v13179_v61  ;;  %4925 = vmatpush.msra.mxu1 %v13472_v17 }
 0xaa4   : > { %8598 = vmatpush.msk.msra.mxu0 %vm13497_vm14, %v13179_v61  ;;  %4931 = vmatpush.msra.mxu1 %v13473_v54 }
 0xaa6   : > { %8599 = vmatpush.msk.msra.mxu0 %vm13498_vm12, %v13179_v61  ;;  %4937 = vmatpush.msra.mxu1 %v13474_v38 }
 0xaa8   : > { %8600 = vmatpush.msk.msra.mxu0 %vm13499_vm2, %v13179_v61  ;;  %4943 = vmatpush.msra.mxu1 %v13476_v5 }
 0xaaa   : > { %8601 = vmatpush.msk.msra.mxu0 %vm13500_vm6, %v13179_v61  ;;  %4949 = vmatpush.msra.mxu1 %v13477_v45 }
 0xaac   : > { %8622 = vmatpush.msk.msrb.mxu1 %vm13358_vm10, %v13179_v61  ;;  %8602 = vmatpush.msk.msra.mxu0 %vm13501_vm7, %v13179_v61  ;;  %vm13504_vm10 = vnez %v13444_v28 }
 0xaae   : > { %8623 = vmatpush.msk.msrb.mxu1 %vm9295_vm15, %v13179_v61  ;;  %8603 = vmatpush.msk.msra.mxu0 %vm13502_vm13, %v13179_v61 }
 0xab0   : > { %8624 = vmatpush.msk.msrb.mxu1 %vm9312_vm0, %v13179_v61  ;;  %8604 = vmatpush.msk.msra.mxu0 %vm13503_vm8, %v13179_v61 }
 0xab2   : > { %8625 = vmatpush.msk.msrb.mxu1 %vm9334_vm1, %v13179_v61  ;;  %8605 = vmatpush.msk.msra.mxu0 %vm13504_vm10, %v13179_v61 }
 0xab4   : > { %5156 = vmatpush.msrb.mxu0 %v13479_v46  ;;  %8626 = vmatpush.msk.msrb.mxu1 %vm9355_vm3, %v13179_v61 }
 0xab6   : > { %5160 = vmatpush.msrb.mxu0 %v13480_v35  ;;  %8627 = vmatpush.msk.msrb.mxu1 %vm9376_vm4, %v13179_v61 }
 0xab8   : > { %5164 = vmatpush.msrb.mxu0 %v13481_v53  ;;  %8628 = vmatpush.msk.msrb.mxu1 %vm9398_vm5, %v13179_v61 }
 0xaba   : > { %5168 = vmatpush.msrb.mxu0 %v13482_v37  ;;  %8629 = vmatpush.msk.msrb.mxu1 %vm13192_vm9, %v13179_v61 }
 0xabc   : > { %5172 = vmatpush.msrb.mxu0 %v13483_v1  ;;  %8630 = vmatpush.msk.msrb.mxu1 %vm13497_vm14, %v13179_v61 }
 0xabe   : > { %5176 = vmatpush.msrb.mxu0 %v13484_v47  ;;  %8631 = vmatpush.msk.msrb.mxu1 %vm13498_vm12, %v13179_v61 }
 0xac0   : > { %5180 = vmatpush.msrb.mxu0 %v13505_v56  ;;  %8632 = vmatpush.msk.msrb.mxu1 %vm13499_vm2, %v13179_v61 }
 0xac2   : > { %5184 = vmatpush.msrb.mxu0 %v13506_v16  ;;  %8633 = vmatpush.msk.msrb.mxu1 %vm13500_vm6, %v13179_v61 }
 0xac4   : > { %5188 = vmatpush.msrb.mxu0 %v13507_v22  ;;  %8634 = vmatpush.msk.msrb.mxu1 %vm13501_vm7, %v13179_v61 }
 0xac6   : > { %5192 = vmatpush.msrb.mxu0 %v13508_v39  ;;  %8635 = vmatpush.msk.msrb.mxu1 %vm13502_vm13, %v13179_v61 }
 0xac8   : > { %5196 = vmatpush.msrb.mxu0 %v13509_v60  ;;  %8636 = vmatpush.msk.msrb.mxu1 %vm13503_vm8, %v13179_v61 }
 0xaca   : > { %5200 = vmatpush.msrb.mxu0 %v13510_v18  ;;  %8637 = vmatpush.msk.msrb.mxu1 %vm13504_vm10, %v13179_v61 }
 0xacc   : > { %5204 = vmatpush.msrb.mxu0 %v13491_v55 }
 0xace   : > { %5208 = vmatpush.msrb.mxu0 %v13511_v12 }
 0xad0   : > { %5212 = vmatpush.msrb.mxu0 %v13512_v2 }
 0xad2   : > { %5216 = vmatpush.msrb.mxu0 %v13513_v33 }
 0xb00   : > { %v4622_v63 = vpop.f32.mrf.mxu1 }
 0xb08   : > { %v4596_v40 = vpop.f32.mrf.mxu0  ;;  %v4670_v58 = vpop.f32.mrf.mxu1 }
 0xb09   : > { %v4623_v11 = vadd.f32 %v4622_v63, %v4596_v40 }
 0xb10   : > { %v4646_v25 = vpop.f32.mrf.mxu0  ;;  %v4716_v29 = vpop.f32.mrf.mxu1 }
 0xb11   : > { %v4647_v44 = vadd.f32 %v4646_v25, %v4623_v11 }
 0xb13   : > { %v4671_v36 = vadd.f32 %v4670_v58, %v4647_v44 }
 0xb18   : > { %v4694_v8 = vpop.f32.mrf.mxu0 }
 0xb19   : > { %v4695_v3 = vadd.f32 %v4694_v8, %v4671_v36 }
 0xb1b   : > { %v4717_v9 = vadd.f32 %v4716_v29, %v4695_v3 }
 0xb1d   : > { %v4719_v24 = vadd.f32 1e-06, %v4717_v9  ;;  %v4731_v27 = vadd.f32 1.0, %v4717_v9 }
 0xb1f   : > { %8937 = vrsqrt.f32 %v4719_v24  ;;  %v4743_v40 = vand.u32 2147483648, %v4731_v27  ;;  %vm4737_vm13 = vweird.f32 %v4731_v27  ;;  %v4741_v25 = vand.u32 2147483647, %v4731_v27 }
 0xb20   : > { %8939 = vrcp.f32 %v4731_v27  ;;  %vm4726_vm7 = vweird.f32 %v4719_v24 }
 0xb21   : > { %v4744_v8 = vor.u32 1.1754944e-38, %v4743_v40  ;;  %vm4742_vm12 = vcmp.eq.f32.partialorder %v4741_v25, 8.507059e+37  ;;  %v13517_v40 = vld [vmem:[#allocation56_spill] sm:$0xff] }
 0xb25   : > { %v8938_v12 = vpop.eup %8937 }
 0xb26   : > { %v8940_v55 = vpop.eup %8939  ;;  %v4721_v2 = vmul.f32 %v8938_v12, %v4719_v24  ;;  %vm4727_vm8 = vweird.f32 %v8938_v12 }
 0xb27   : > { %v4733_v18 = vmul.f32 %v8940_v55, %v4731_v27  ;;  %vm4738_vm10 = vweird.f32 %v8940_v55  ;;  %vm4728_vm2 = vmor %vm4726_vm7, %vm4727_vm8  ;;  %v13516_v27 = vld [vmem:[#allocation51_spill] sm:$0xff]  ;;  %vm13528_vm7 = vnez %v13437_v50  ;;  %vm13530_vm8 = vnez %v13441_v34 }
 0xb28   : > { %v4722_v33 = vmul.f32 %v8938_v12, %v4721_v2  ;;  %vm4739_vm6 = vmor %vm4737_vm13, %vm4738_vm10  ;;  %vm13524_vm10 = vnez %v13094_v13  ;;  %vm13529_vm13 = vnez %v13439_v41 }
 0xb29   : > { %v4734_v60 = vsub.f32 1.0, %v4733_v18 }
 0xb2a   : > { %v4723_v39 = vmul.f32 0.5, %v4722_v33  ;;  %v13514_v33 = vld [vmem:[#allocation79_spill] sm:$0xff] }
 0xb2b   : > { %v4735_v22 = vmul.f32 %v8940_v55, %v4734_v60 }
 0xb2c   : > { %v4724_v63 = vsub.f32 1.5, %v4723_v39  ;;  %v13515_v39 = vld [vmem:[#allocation50_spill] sm:$0xff] }
 0xb2d   : > { %v4736_v58 = vadd.f32 %v8940_v55, %v4735_v22 }
 0xb2e   : > { %v4725_v11 = vmul.f32 %v8938_v12, %v4724_v63 }
 0xb2f   : > { %v4740_v44 = vsel %vm4739_vm6, %v8940_v55, %v4736_v58  ;;  %vm13527_vm6 = vnez %v13434_v6 }
 0xb30   : > { %v4729_v36 = vsel %vm4728_vm2, %v8938_v12, %v4725_v11  ;;  %v4745_v2 = vsel %vm4742_vm12, %v4744_v8, %v4740_v44  ;;  %v13518_v8 = vld [vmem:[#allocation74_spill] sm:$0xff]  ;;  %vm13525_vm12 = vnez %v13428_v14  ;;  %vm13526_vm2 = vnez %v13431_v19 }
 0xb31   : > { %v4730_v3 = vmul.f32 %v4729_v36, %v4717_v9 }
 0xb33   : > { %v4746_v18 = vmul.f32 %v4745_v2, %v4730_v3 }
 0xb35   : > { %v4747_v60 = vmul.f32 %v4746_v18, %v13514_v33  ;;  %v13519_v18 = vld [vmem:[#allocation61_spill] sm:$0xff] }
 0xb37   : > { %v11619_v29 = vperm.slane %v4747_v60, 0 }
 0xb39   : > { %v4749_v22 = vmul.f32 %v13515_v39, %v11619_v29  ;;  %v4750_v63 = vmul.f32 %v13516_v27, %v11619_v29  ;;  %v4751_v58 = vmul.f32 %v13517_v40, %v11619_v29  ;;  %v4752_v33 = vmul.f32 %v13519_v18, %v11619_v29 }
 0xb3b   : > { %v11625_v24 = vand.u32 4294901760, %v4749_v22  ;;  %v11627_v16 = vand.u32 4294901760, %v4750_v63  ;;  %v11641_v36 = vand.u32 4294901760, %v4751_v58 }
 0xb3d   : > { %4951 = vmatmul.f32.vlgmr.msra.gmra.mxu1 %v11625_v24  ;;  %v4790_v55 = vsub.f32 %v4749_v22, %v11625_v24  ;;  %v4798_v9 = vsub.f32 %v4750_v63, %v11627_v16  ;;  %v4806_v2 = vsub.f32 %v4751_v58, %v11641_v36  ;;  %v11648_v22 = vand.u32 4294901760, %v4752_v33 }
 0xb3e   : > { %8639 = vmatpush.msk.msra.mxu1 %vm13495_vm11, %v13179_v61 }
 0xb3f   : > { %5033 = vmatmul.f32.vlgmr.msra.gmra.mxu2 %v4790_v55  ;;  %v4791_v12 = vand.u32 4294901760, %v4790_v55  ;;  %v4799_v44 = vand.u32 4294901760, %v4798_v9  ;;  %v4807_v39 = vand.u32 4294901760, %v4806_v2  ;;  %v4814_v63 = vsub.f32 %v4752_v33, %v11648_v22 }
 0xb40   : > { %5819 = vmatpush.msra.mxu2 %v13458_v51 }
 0xb41   : > { %5107 = vmatmul.f32.vlgmr.msra.gmra.mxu3 %v4791_v12  ;;  %v4792_v25 = vsub.f32 %v4790_v55, %v4791_v12  ;;  %v4800_v3 = vsub.f32 %v4798_v9, %v4799_v44  ;;  %v4808_v27 = vsub.f32 %v4806_v2, %v4807_v39  ;;  %v13520_v55 = vld [vmem:[#allocation66_spill] sm:$0xff]  ;;  %v4815_v40 = vand.u32 4294901760, %v4814_v63 }
 0xb42   : > { %8640 = vmatpush.msk.msra.mxu3 %vm13495_vm11, %v13179_v61  ;;  %v4753_v12 = vmul.f32 %v13520_v55, %v11619_v29  ;;  %vm13531_vm11 = vnez %v13444_v28 }
 0xb43   : > { %v4793_v11 = vand.u32 4294901760, %v4792_v25  ;;  %v4801_v60 = vand.u32 4294901760, %v4800_v3  ;;  %v4816_v25 = vsub.f32 %v4814_v63, %v4815_v40 }
 0xb44   : > { %v11654_v58 = vand.u32 4294901760, %v4753_v12 }
 0xb45   : > { %4794 = vmatmul.f32.vlgmr.msra.gmra.mxu0 %v4793_v11  ;;  %4955 = vmatmul.f32.gmra.mxu1 %v11627_v16 }
 0xb46   : > { %5693 = vmatpush.msra.mxu0 %v13518_v8  ;;  %v4822_v11 = vsub.f32 %v4753_v12, %v11654_v58 }
 0xb47   : > { %5038 = vmatmul.f32.gmra.mxu2 %v4798_v9  ;;  %v4809_v9 = vand.u32 4294901760, %v4808_v27  ;;  %v13522_v27 = vld [vmem:[#allocation77_spill] sm:$0xff] }
 0xb48   : > { %v4823_v18 = vand.u32 4294901760, %v4822_v11 }
 0xb49   : > { %5113 = vmatmul.f32.gmra.mxu3 %v4799_v44  ;;  %v13521_v44 = vld [vmem:[#allocation69_spill] sm:$0xff] }
 0xb4a   : > { %v4754_v3 = vmul.f32 %v13521_v44, %v11619_v29  ;;  %v13523_v44 = vld [vmem:[#allocation78_spill] sm:$0xff] }
 0xb4c   : > { %v11660_v33 = vand.u32 4294901760, %v4754_v3 }
 0xb4d   : > { %4802 = vmatmul.f32.gmra.mxu0 %v4801_v60  ;;  %4959 = vmatmul.f32.gmra.mxu1 %v11641_v36  ;;  %v4824_v60 = vsub.f32 %v4822_v11, %v4823_v18 }
 0xb4f   : > { %5043 = vmatmul.f32.gmra.mxu2 %v4806_v2  ;;  %v4817_v2 = vand.u32 4294901760, %v4816_v25  ;;  %v4825_v55 = vand.u32 4294901760, %v4824_v60 }
 0xb51   : > { %5119 = vmatmul.f32.gmra.mxu3 %v4807_v39  ;;  %v4830_v39 = vsub.f32 %v4754_v3, %v11660_v33 }
 0xb53   : > { %v4831_v12 = vand.u32 4294901760, %v4830_v39 }
 0xb55   : > { %4810 = vmatmul.f32.gmra.mxu0 %v4809_v9  ;;  %4963 = vmatmul.f32.gmra.mxu1 %v11648_v22 }
 0xb57   : > { %5048 = vmatmul.f32.gmra.mxu2 %v4814_v63  ;;  %v4755_v63 = vmul.f32 %v13522_v27, %v11619_v29 }
 0xb59   : > { %5125 = vmatmul.f32.gmra.mxu3 %v4815_v40  ;;  %v11666_v9 = vand.u32 4294901760, %v4755_v63  ;;  %v4832_v40 = vsub.f32 %v4830_v39, %v4831_v12 }
 0xb5b   : > { %v4838_v25 = vsub.f32 %v4755_v63, %v11666_v9  ;;  %v4833_v3 = vand.u32 4294901760, %v4832_v40 }
 0xb5d   : > { %4818 = vmatmul.f32.gmra.mxu0 %v4817_v2  ;;  %4967 = vmatmul.f32.gmra.mxu1 %v11654_v58  ;;  %v4839_v2 = vand.u32 4294901760, %v4838_v25 }
 0xb5f   : > { %5053 = vmatmul.f32.gmra.mxu2 %v4822_v11  ;;  %v4756_v11 = vmul.f32 %v13523_v44, %v11619_v29 }
 0xb61   : > { %5131 = vmatmul.f32.gmra.mxu3 %v4823_v18  ;;  %v11672_v51 = vand.u32 4294901760, %v4756_v11  ;;  %v4840_v18 = vsub.f32 %v4838_v25, %v4839_v2 }
 0xb63   : > { %v4846_v60 = vsub.f32 %v4756_v11, %v11672_v51  ;;  %v4841_v27 = vand.u32 4294901760, %v4840_v18 }
 0xb65   : > { %4826 = vmatmul.f32.gmra.mxu0 %v4825_v55  ;;  %4971 = vmatmul.f32.gmra.mxu1 %v11660_v33 }
 0xb67   : > { %5058 = vmatmul.f32.gmra.mxu2 %v4830_v39  ;;  %v4847_v39 = vand.u32 4294901760, %v4846_v60 }
 0xb69   : > { %5137 = vmatmul.f32.gmra.mxu3 %v4831_v12  ;;  %v4848_v29 = vsub.f32 %v4846_v60, %v4847_v39 }
 0xb6b   : > { %v4849_v63 = vand.u32 4294901760, %v4848_v29 }
 0xb6d   : > { %4834 = vmatmul.f32.gmra.mxu0 %v4833_v3  ;;  %4975 = vmatmul.f32.gmra.mxu1 %v11666_v9 }
 0xb6f   : > { %5063 = vmatmul.f32.gmra.mxu2 %v4838_v25 }
 0xb71   : > { %5143 = vmatmul.f32.gmra.mxu3 %v4839_v2 }
 0xb75   : > { %4842 = vmatmul.f32.gmra.mxu0 %v4841_v27  ;;  %4979 = vmatmul.f32.gmra.mxu1 %v11672_v51 }
 0xb77   : > { %5068 = vmatmul.f32.gmra.mxu2 %v4846_v60 }
 0xb79   : > { %5149 = vmatmul.f32.gmra.mxu3 %v4847_v39 }
 0xb7d   : > { %4850 = vmatmul.f32.gmra.mxu0 %v4849_v63  ;;  %5283 = vmatmul.f32.vlgmr.msrb.gmra.mxu1 %v11625_v24 }
 0xb7e   : > { %5972 = vmatpush.msrb.mxu1 %v13459_v4 }
 0xb80   : > { %5978 = vmatpush.msrb.mxu1 %v13461_v10 }
 0xb82   : > { %5984 = vmatpush.msrb.mxu1 %v13462_v20 }
 0xb84   : > { %5990 = vmatpush.msrb.mxu1 %v13463_v7 }
 0xb85   : > { %5218 = vmatmul.f32.vlgmr.msrb.gmra.mxu0 %v11625_v24  ;;  %5287 = vmatmul.f32.gmra.mxu1 %v11627_v16 }
 0xb86   : > { %8641 = vmatpush.msk.msrb.mxu0 %vm13524_vm10, %v13179_v61  ;;  %5996 = vmatpush.msrb.mxu1 %v13464_v48 }
 0xb88   : > { %8642 = vmatpush.msk.msrb.mxu0 %vm9295_vm15, %v13179_v61  ;;  %6002 = vmatpush.msrb.mxu1 %v13465_v23 }
 0xb8a   : > { %8643 = vmatpush.msk.msrb.mxu0 %vm9312_vm0, %v13179_v61  ;;  %6008 = vmatpush.msrb.mxu1 %v13466_v62 }
 0xb8c   : > { %8644 = vmatpush.msk.msrb.mxu0 %vm9334_vm1, %v13179_v61  ;;  %6014 = vmatpush.msrb.mxu1 %v13467_v52 }
 0xb8d   : > { %5222 = vmatmul.f32.gmra.mxu0 %v11627_v16  ;;  %5291 = vmatmul.f32.gmra.mxu1 %v11641_v36 }
 0xb8e   : > { %8645 = vmatpush.msk.msrb.mxu0 %vm9355_vm3, %v13179_v61  ;;  %6020 = vmatpush.msrb.mxu1 %v13468_v42 }
 0xb90   : > { %8646 = vmatpush.msk.msrb.mxu0 %vm9376_vm4, %v13179_v61  ;;  %6026 = vmatpush.msrb.mxu1 %v13470_v31 }
 0xb92   : > { %8647 = vmatpush.msk.msrb.mxu0 %vm9398_vm5, %v13179_v61  ;;  %6032 = vmatpush.msrb.mxu1 %v13471_v57 }
 0xb94   : > { %8648 = vmatpush.msk.msrb.mxu0 %vm13192_vm9, %v13179_v61  ;;  %6038 = vmatpush.msrb.mxu1 %v13472_v17 }
 0xb95   : > { %5226 = vmatmul.f32.gmra.mxu0 %v11641_v36  ;;  %5295 = vmatmul.f32.gmra.mxu1 %v11648_v22 }
 0xb96   : > { %8649 = vmatpush.msk.msrb.mxu0 %vm13497_vm14, %v13179_v61  ;;  %6044 = vmatpush.msrb.mxu1 %v13473_v54 }
 0xb98   : > { %8650 = vmatpush.msk.msrb.mxu0 %vm13525_vm12, %v13179_v61  ;;  %6050 = vmatpush.msrb.mxu1 %v13474_v38 }
 0xb9a   : > { %8651 = vmatpush.msk.msrb.mxu0 %vm13526_vm2, %v13179_v61  ;;  %6056 = vmatpush.msrb.mxu1 %v13476_v5  ;;  %vm13551_vm2 = vcmask 64512  }
 0xb9c   : > { %8652 = vmatpush.msk.msrb.mxu0 %vm13527_vm6, %v13179_v61  ;;  %6062 = vmatpush.msrb.mxu1 %v13477_v45 }
 0xb9d   : > { %5230 = vmatmul.f32.gmra.mxu0 %v11648_v22  ;;  %5299 = vmatmul.f32.gmra.mxu1 %v11654_v58 }
 0xb9e   : > { %8653 = vmatpush.msk.msrb.mxu0 %vm13528_vm7, %v13179_v61 }
 0xba0   : > { %8654 = vmatpush.msk.msrb.mxu0 %vm13529_vm13, %v13179_v61 }
 0xba2   : > { %8655 = vmatpush.msk.msrb.mxu0 %vm13530_vm8, %v13179_v61 }
 0xba4   : > { %8656 = vmatpush.msk.msrb.mxu0 %vm13531_vm11, %v13179_v61  ;;  %vm13532_vm11 = vcmask 64512  }
 0xba5   : > { %5234 = vmatmul.f32.gmra.mxu0 %v11654_v58  ;;  %5303 = vmatmul.f32.gmra.mxu1 %v11660_v33  ;;  %vm13533_vm8 = vmmov %vm13532_vm11 }
 0xba6   : > { %vm13534_vm13 = vmmov %vm13533_vm8 }
 0xba7   : > { %vm13535_vm7 = vmmov %vm13533_vm8 }
 0xbad   : > { %5238 = vmatmul.f32.gmra.mxu0 %v11660_v33  ;;  %5307 = vmatmul.f32.gmra.mxu1 %v11666_v9 }
 0xbb5   : > { %5242 = vmatmul.f32.gmra.mxu0 %v11666_v9  ;;  %5311 = vmatmul.f32.gmra.mxu1 %v11672_v51 }
 0xbba   : > { %v4952_v16 = vpop.f32.mrf.mxu1 }
 0xbbd   : > { %5246 = vmatmul.f32.gmra.mxu0 %v11672_v51 }
 0xbc2   : > { %v4795_v24 = vpop.f32.mrf.mxu0  ;;  %v4956_v36 = vpop.f32.mrf.mxu1 }
 0xbc3   : > { %v5034_v2 = vpop.f32.mrf.mxu2  ;;  %v4953_v27 = vadd.f32 %v4952_v16, %v4795_v24 }
 0xbc4   : > { %v5108_v9 = vpop.f32.mrf.mxu3 }
 0xbc5   : > { %v5035_v45 = vadd.f32 %v5034_v2, %v4953_v27 }
 0xbc7   : > { %v5109_v5 = vadd.f32 %v5108_v9, %v5035_v45 }
 0xbca   : > { %v4803_v22 = vpop.f32.mrf.mxu0  ;;  %v4960_v55 = vpop.f32.mrf.mxu1 }
 0xbcb   : > { %v5039_v51 = vpop.f32.mrf.mxu2  ;;  %v4957_v38 = vadd.f32 %v4956_v36, %v4803_v22 }
 0xbcc   : > { %v5114_v63 = vpop.f32.mrf.mxu3 }
 0xbcd   : > { %v5040_v42 = vadd.f32 %v5039_v51, %v4957_v38 }
 0xbcf   : > { %v5115_v24 = vadd.f32 %v5114_v63, %v5040_v42 }
 0xbd2   : > { %v4811_v12 = vpop.f32.mrf.mxu0  ;;  %v4964_v40 = vpop.f32.mrf.mxu1 }
 0xbd3   : > { %v5044_v54 = vpop.f32.mrf.mxu2  ;;  %v4961_v23 = vadd.f32 %v4960_v55, %v4811_v12 }
 0xbd4   : > { %v5120_v62 = vpop.f32.mrf.mxu3 }
 0xbd5   : > { %v5045_v9 = vadd.f32 %v5044_v54, %v4961_v23 }
 0xbda   : > { %v4819_v58 = vpop.f32.mrf.mxu0  ;;  %v4968_v25 = vpop.f32.mrf.mxu1 }
 0xbdb   : > { %v5049_v22 = vpop.f32.mrf.mxu2 }
 0xbe2   : > { %v4827_v44 = vpop.f32.mrf.mxu0  ;;  %v4972_v11 = vpop.f32.mrf.mxu1 }
 0xbe3   : > { %v5054_v63 = vpop.f32.mrf.mxu2  ;;  %v4969_v54 = vadd.f32 %v4968_v25, %v4827_v44 }
 0xbea   : > { %v4835_v33 = vpop.f32.mrf.mxu0  ;;  %v11757_v3 = vpop.f32.mrf.mxu1 }
 0xbf2   : > { %v11759_v18 = vpop.f32.mrf.mxu0  ;;  %v11761_v60 = vpop.f32.mrf.mxu1 }
 0xbfa   : > { %v11763_v39 = vpop.f32.mrf.mxu0  ;;  %v5284_v29 = vpop.f32.mrf.mxu1 }
 0xc02   : > { %v5219_v17 = vpop.f32.mrf.mxu0  ;;  %v5288_v57 = vpop.f32.mrf.mxu1 }
 0xc03   : > { %v5220_v31 = vadd.f32 %v5219_v17, %v5109_v5  ;;  %v5121_v17 = vadd.f32 %v5120_v62, %v5045_v9  ;;  %v4965_v5 = vadd.f32 %v4964_v40, %v4819_v58  ;;  %v5055_v40 = vadd.f32 %v5054_v63, %v4969_v54 }
 0xc04   : > { %v4973_v9 = vadd.f32 %v4972_v11, %v4835_v33 }
 0xc05   : > { %v11765_v52 = vadd.f32 %v5284_v29, %v5220_v31  ;;  %v5126_v31 = vpop.f32.mrf.mxu3  ;;  %v5050_v12 = vadd.f32 %v5049_v22, %v4965_v5 }
 0xc07   : > { %5316 = vst.msk [vmem:[#allocation2 + $0x40] sm:$0xff] %vm13532_vm11, %v11765_v52  ;;  %v5324_v16 = vsel %vm13533_vm8, %v11765_v52, -inf  ;;  %vm13536_vm11 = vmmov %vm13535_vm7 }
 0xc08   : > { %5325 = vmax.xlane.f32.xlu2 %v5324_v16  ;;  %vm13537_vm8 = vmmov %vm13535_vm7 }
 0xc0a   : > { %v5223_v2 = vpop.f32.mrf.mxu0  ;;  %v5292_v45 = vpop.f32.mrf.mxu1 }
 0xc0b   : > { %v5224_v36 = vadd.f32 %v5223_v2, %v5115_v24 }
 0xc0d   : > { %v11771_v27 = vadd.f32 %v5288_v57, %v5224_v36  ;;  %v5127_v57 = vadd.f32 %v5126_v31, %v5050_v12  ;;  %v5132_v16 = vpop.f32.mrf.mxu3  ;;  %v5059_v36 = vpop.f32.mrf.mxu2 }
 0xc0e   : > { %v5133_v22 = vadd.f32 %v5132_v16, %v5055_v40  ;;  %v5060_v44 = vadd.f32 %v5059_v36, %v4973_v9 }
 0xc0f   : > { %5317 = vst.msk [vmem:[#allocation2 + $0x48] sm:$0xff] %vm13534_vm13, %v11771_v27  ;;  %v5327_v38 = vsel %vm13535_vm7, %v11771_v27, -inf  ;;  %vm13538_vm13 = vmmov %vm13535_vm7 }
 0xc10   : > { %5328 = vmax.xlane.f32.xlu0 %v5327_v38 }
 0xc12   : > { %v5227_v51 = vpop.f32.mrf.mxu0  ;;  %v5296_v55 = vpop.f32.mrf.mxu1 }
 0xc13   : > { %v5228_v42 = vadd.f32 %v5227_v51, %v5121_v17 }
 0xc15   : > { %v11777_v29 = vadd.f32 %v5292_v45, %v5228_v42  ;;  %v5138_v25 = vpop.f32.mrf.mxu3  ;;  %v5064_v12 = vpop.f32.mrf.mxu2 }
 0xc16   : > { %v5139_v42 = vadd.f32 %v5138_v25, %v5060_v44 }
 0xc17   : > { %5318 = vst.msk [vmem:[#allocation2 + $0x50] sm:$0xff] %vm13536_vm11, %v11777_v29  ;;  %v5330_v23 = vsel %vm13537_vm8, %v11777_v29, -inf  ;;  %vm13539_vm11 = vmmov %vm13535_vm7 }
 0xc18   : > { %5331 = vmax.xlane.f32.xlu1 %v5330_v23  ;;  %vm13540_vm8 = vmmov %vm13535_vm7 }
 0xc1a   : > { %v5231_v24 = vpop.f32.mrf.mxu0  ;;  %v5300_v2 = vpop.f32.mrf.mxu1 }
 0xc1b   : > { %v5232_v62 = vadd.f32 %v5231_v24, %v5127_v57  ;;  %v4981_v24 = vadd.f32 %v11761_v60, %v11763_v39 }
 0xc1d   : > { %v11783_v58 = vadd.f32 %v5296_v55, %v5232_v62  ;;  %v4977_v55 = vadd.f32 %v11757_v3, %v11759_v18  ;;  %v5144_v57 = vpop.f32.mrf.mxu3 }
 0xc1f   : > { %5319 = vst.msk [vmem:[#allocation2 + $0x58] sm:$0xff] %vm13535_vm7, %v11783_v58  ;;  %v5333_v45 = vsel %vm13538_vm13, %v11783_v58, -inf  ;;  %v5065_v63 = vadd.f32 %v5064_v12, %v4977_v55  ;;  %vm13541_vm13 = vmmov %vm13535_vm7 }
 0xc20   : > { %5334 = vmax.xlane.f32.xlu2 %v5333_v45  ;;  %v5069_v45 = vpop.f32.mrf.mxu2 }
 0xc21   : > { %v5145_v16 = vadd.f32 %v5144_v57, %v5065_v63  ;;  %v5070_v3 = vadd.f32 %v5069_v45, %v4981_v24 }
 0xc22   : > { %v5235_v38 = vpop.f32.mrf.mxu0  ;;  %v5304_v51 = vpop.f32.mrf.mxu1 }
 0xc23   : > { %v5236_v31 = vadd.f32 %v5235_v38, %v5133_v22 }
 0xc25   : > { %v11789_v17 = vadd.f32 %v5300_v2, %v5236_v31  ;;  %v5150_v22 = vpop.f32.mrf.mxu3 }
 0xc26   : > { %v5151_v9 = vadd.f32 %v5150_v22, %v5070_v3 }
 0xc27   : > { %5320 = vst.msk [vmem:[#allocation2 + $0x60] sm:$0xff] %vm13539_vm11, %v11789_v17  ;;  %v5336_v5 = vsel %vm13540_vm8, %v11789_v17, -inf  ;;  %vm13542_vm11 = vmmov %vm13535_vm7 }
 0xc28   : > { %5337 = vmax.xlane.f32.xlu0 %v5336_v5  ;;  %vm13543_vm8 = vmmov %vm13535_vm7 }
 0xc2a   : > { %v5239_v11 = vpop.f32.mrf.mxu0  ;;  %v5308_v62 = vpop.f32.mrf.mxu1 }
 0xc2b   : > { %v5240_v33 = vadd.f32 %v5239_v11, %v5139_v42 }
 0xc2d   : > { %v5305_v23 = vadd.f32 %v5304_v51, %v5240_v33 }
 0xc2f   : > { %5321 = vst.msk [vmem:[#allocation2 + $0x68] sm:$0xff] %vm13535_vm7, %v5305_v23  ;;  %v5339_v54 = vsel %vm13541_vm13, %v5305_v23, -inf  ;;  %vm13544_vm13 = vmmov %vm13535_vm7 }
 0xc30   : > { %5340 = vmax.xlane.f32.xlu1 %v5339_v54 }
 0xc32   : > { %v5243_v40 = vpop.f32.mrf.mxu0  ;;  %v5312_v25 = vpop.f32.mrf.mxu1 }
 0xc33   : > { %v5244_v2 = vadd.f32 %v5243_v40, %v5145_v16 }
 0xc35   : > { %v5309_v18 = vadd.f32 %v5308_v62, %v5244_v2 }
 0xc37   : > { %5322 = vst.msk [vmem:[#allocation2 + $0x70] sm:$0xff] %vm13542_vm11, %v5309_v18  ;;  %v5342_v36 = vsel %vm13543_vm8, %v5309_v18, -inf  ;;  %vm13545_vm11 = vmmov %vm13535_vm7 }
 0xc38   : > { %5343 = vmax.xlane.f32.xlu2 %v5342_v36  ;;  %vm13546_vm8 = vmmov %vm13535_vm7 }
 0xc3a   : > { %v5247_v38 = vpop.f32.mrf.mxu0 }
 0xc3b   : > { %v5248_v31 = vadd.f32 %v5247_v38, %v5151_v9 }
 0xc3d   : > { %v5313_v44 = vadd.f32 %v5312_v25, %v5248_v31 }
 0xc3f   : > { %5323 = vst.msk [vmem:[#allocation2 + $0x78] sm:$0xff] %vm13535_vm7, %v5313_v44  ;;  %v5345_v60 = vsel %vm13544_vm13, %v5313_v44, -inf  ;;  %vm13547_vm13 = vmmov %vm13535_vm7 }
 0xc40   : > { %5346 = vmax.xlane.f32.xlu1 %v5345_v60 }
 0xc7b   : > { %v5326_v39 = vpop.xlane.xlu2 %5325 }
 0xc7c   : > { %v5348_v5 = vsub.f32 %v11765_v52, %v5326_v39 }
 0xc7e   : > { %v5356_v51 = vmul.f32 1.442695, %v5348_v5 }
 0xc80   : > { %8941 = vpow2.f32 %v5356_v51 }
 0xc83   : > { %v5329_v42 = vpop.xlane.xlu0 %5328 }
 0xc84   : > { %v5349_v55 = vsub.f32 %v11771_v27, %v5329_v42 }
 0xc86   : > { %v11807_v12 = vpop.eup %8941  ;;  %v5358_v11 = vmul.f32 1.442695, %v5349_v55 }
 0xc87   : > { %v5372_v33 = vsel %vm13545_vm11, %v11807_v12, 0.0  ;;  %vm13548_vm11 = vmmov %vm13535_vm7 }
 0xc88   : > { %8943 = vpow2.f32 %v5358_v11  ;;  %5373 = vadd.xlane.f32.xlu0 %v5372_v33 }
 0xc8b   : > { %v5332_v63 = vpop.xlane.xlu1 %5331 }
 0xc8c   : > { %v5350_v57 = vsub.f32 %v11777_v29, %v5332_v63 }
 0xc8e   : > { %v11812_v54 = vpop.eup %8943  ;;  %v5360_v16 = vmul.f32 1.442695, %v5350_v57 }
 0xc8f   : > { %v5375_v52 = vsel %vm13546_vm8, %v11812_v54, 0.0  ;;  %vm13549_vm8 = vmmov %vm13535_vm7 }
 0xc90   : > { %8945 = vpow2.f32 %v5360_v16  ;;  %5376 = vadd.xlane.f32.xlu2 %v5375_v52 }
 0xc93   : > { %v5335_v27 = vpop.xlane.xlu2 %5334 }
 0xc94   : > { %v5351_v24 = vsub.f32 %v11783_v58, %v5335_v27 }
 0xc96   : > { %v11817_v62 = vpop.eup %8945  ;;  %v5362_v40 = vmul.f32 1.442695, %v5351_v24 }
 0xc97   : > { %v5378_v2 = vsel %vm13535_vm7, %v11817_v62, 0.0 }
 0xc98   : > { %8947 = vpow2.f32 %v5362_v40  ;;  %5379 = vadd.xlane.f32.xlu0 %v5378_v2 }
 0xc9b   : > { %v5338_v29 = vpop.xlane.xlu0 %5337 }
 0xc9c   : > { %v5352_v45 = vsub.f32 %v11789_v17, %v5338_v29 }
 0xc9e   : > { %v11822_v3 = vpop.eup %8947  ;;  %v5364_v36 = vmul.f32 1.442695, %v5352_v45 }
 0xc9f   : > { %v5381_v22 = vsel %vm13547_vm13, %v11822_v3, 0.0  ;;  %vm13550_vm13 = vmmov %vm13535_vm7 }
 0xca0   : > { %8949 = vpow2.f32 %v5364_v36  ;;  %5382 = vadd.xlane.f32.xlu1 %v5381_v22 }
 0xca3   : > { %v5341_v58 = vpop.xlane.xlu1 %5340 }
 0xca4   : > { %v5353_v9 = vsub.f32 %v5305_v23, %v5341_v58 }
 0xca6   : > { %v11826_v38 = vpop.eup %8949  ;;  %v5366_v31 = vmul.f32 1.442695, %v5353_v9 }
 0xca7   : > { %v5384_v25 = vsel %vm13548_vm11, %v11826_v38, 0.0 }
 0xca8   : > { %8951 = vpow2.f32 %v5366_v31  ;;  %5385 = vadd.xlane.f32.xlu2 %v5384_v25 }
 0xcab   : > { %v5344_v60 = vpop.xlane.xlu2 %5343 }
 0xcac   : > { %v5354_v17 = vsub.f32 %v5309_v18, %v5344_v60 }
 0xcae   : > { %v11830_v39 = vpop.eup %8951  ;;  %v5368_v5 = vmul.f32 1.442695, %v5354_v17 }
 0xcaf   : > { %v5387_v51 = vsel %vm13549_vm8, %v11830_v39, 0.0 }
 0xcb0   : > { %8953 = vpow2.f32 %v5368_v5  ;;  %5388 = vadd.xlane.f32.xlu0 %v5387_v51 }
 0xcb3   : > { %v5347_v42 = vpop.xlane.xlu1 %5346 }
 0xcb4   : > { %v5355_v23 = vsub.f32 %v5313_v44, %v5347_v42 }
 0xcb6   : > { %v11834_v55 = vpop.eup %8953  ;;  %v5370_v11 = vmul.f32 1.442695, %v5355_v23 }
 0xcb7   : > { %v5390_v33 = vsel %vm13535_vm7, %v11834_v55, 0.0 }
 0xcb8   : > { %8955 = vpow2.f32 %v5370_v11  ;;  %5391 = vadd.xlane.f32.xlu1 %v5390_v33 }
 0xcbe   : > { %v11838_v63 = vpop.eup %8955 }
 0xcbf   : > { %v5393_v18 = vsel %vm13550_vm13, %v11838_v63, 0.0 }
 0xcc0   : > { %5394 = vadd.xlane.f32.xlu2 %v5393_v18 }
 0xcfb   : > { %v5374_v57 = vpop.xlane.xlu0 %5373 }
 0xcfc   : > { %8957 = vrcp.f32 %v5374_v57  ;;  %v5407_v24 = vand.u32 2147483648, %v5374_v57  ;;  %v5405_v2 = vand.u32 2147483647, %v5374_v57  ;;  %vm5401_vm8 = vweird.f32 %v5374_v57 }
 0xcfe   : > { %v5408_v36 = vor.u32 1.1754944e-38, %v5407_v24  ;;  %vm5406_vm6 = vcmp.eq.f32.partialorder %v5405_v2, 8.507059e+37 }
 0xd02   : > { %v8958_v16 = vpop.eup %8957 }
 0xd03   : > { %v5397_v52 = vmul.f32 %v8958_v16, %v5374_v57  ;;  %v5377_v27 = vpop.xlane.xlu2 %5376  ;;  %vm5402_vm11 = vweird.f32 %v8958_v16 }
 0xd04   : > { %8959 = vrcp.f32 %v5377_v27  ;;  %vm5403_vm7 = vmor %vm5401_vm8, %vm5402_vm11  ;;  %v5422_v17 = vand.u32 2147483648, %v5377_v27  ;;  %v5420_v51 = vand.u32 2147483647, %v5377_v27  ;;  %vm5416_vm11 = vweird.f32 %v5377_v27 }
 0xd05   : > { %v5398_v44 = vsub.f32 1.0, %v5397_v52 }
 0xd06   : > { %v5423_v18 = vor.u32 1.1754944e-38, %v5422_v17 }
 0xd07   : > { %v5399_v40 = vmul.f32 %v8958_v16, %v5398_v44 }
 0xd09   : > { %v5400_v29 = vadd.f32 %v8958_v16, %v5399_v40 }
 0xd0a   : > { %v8960_v45 = vpop.eup %8959 }
 0xd0b   : > { %v5404_v22 = vsel %vm5403_vm7, %v8958_v16, %v5400_v29  ;;  %v5412_v58 = vmul.f32 %v8960_v45, %v5377_v27  ;;  %v5380_v9 = vpop.xlane.xlu0 %5379  ;;  %vm5417_vm13 = vweird.f32 %v8960_v45  ;;  %vm13552_vm7 = vcmask 64512  }
 0xd0c   : > { %v5409_v31 = vsel %vm5406_vm6, %v5408_v36, %v5404_v22  ;;  %8961 = vrcp.f32 %v5380_v9  ;;  %vm5418_vm8 = vmor %vm5416_vm11, %vm5417_vm13  ;;  %vm5421_vm6 = vcmp.eq.f32.partialorder %v5420_v51, 8.507059e+37  ;;  %v5435_v2 = vand.u32 2147483647, %v5380_v9 }
 0xd0d   : > { %v5410_v25 = vmul.f32 %v11807_v12, %v5409_v31  ;;  %v5413_v60 = vsub.f32 1.0, %v5412_v58  ;;  %v5437_v29 = vand.u32 2147483648, %v5380_v9  ;;  %vm5431_vm13 = vweird.f32 %v5380_v9 }
 0xd0f   : > { %v5414_v5 = vmul.f32 %v8960_v45, %v5413_v60  ;;  %v5517_v42 = vsel %vm13551_vm2, %v5410_v25, 0  ;;  %v5438_v60 = vor.u32 1.1754944e-38, %v5437_v29 }
 0xd10   : > { %v11844_v23 = vand.u32 4294901760, %v5517_v42 }
 0xd11   : > { %v5415_v11 = vadd.f32 %v8960_v45, %v5414_v5 }
 0xd12   : > { %v8962_v33 = vpop.eup %8961  ;;  %5644 = vmatmul.f32.vlgmr.msrb.gmra.mxu3 %v11844_v23  ;;  %v5558_v57 = vsub.f32 %v5517_v42, %v11844_v23 }
 0xd13   : > { %v5419_v16 = vsel %vm5418_vm8, %v8960_v45, %v5415_v11  ;;  %v5427_v12 = vmul.f32 %v8962_v33, %v5380_v9  ;;  %v11848_v52 = vpop.xlane.xlu1 %5382  ;;  %8657 = vmatpush.msk.msrb.mxu3 %vm13524_vm10, %v13179_v61  ;;  %vm5432_vm2 = vweird.f32 %v8962_v33  ;;  %vm5436_vm8 = vcmp.eq.f32.partialorder %v5435_v2, 8.507059e+37  ;;  %v13553_v11 = vld [vmem:[#allocation9_spill] sm:$0xff]  ;;  %v13556_v2 = vld [vmem:[#allocation12_spill] sm:$0xff] }
 0xd14   : > { %v5424_v44 = vsel %vm5421_vm6, %v5423_v18, %v5419_v16  ;;  %8963 = vrcp.f32 %v11848_v52  ;;  %5696 = vmatmul.f32.vlgmr.msra.gmra.mxu0 %v5558_v57  ;;  %v5559_v24 = vand.u32 4294901760, %v5558_v57  ;;  %vm5433_vm11 = vmor %vm5431_vm13, %vm5432_vm2  ;;  %v5450_v16 = vand.u32 2147483647, %v11848_v52 }
 0xd15   : > { %v5428_v27 = vsub.f32 1.0, %v5427_v12  ;;  %v5425_v40 = vmul.f32 %v11812_v54, %v5424_v44  ;;  %8658 = vmatpush.msk.msrb.mxu3 %vm9295_vm15, %v13179_v61  ;;  %6164 = vmatpush.msra.mxu0 %v13479_v46  ;;  %v5452_v12 = vand.u32 2147483648, %v11848_v52  ;;  %v13554_v44 = vld [vmem:[#allocation10_spill] sm:$0xff]  ;;  %vm13555_vm2 = vmmov %vm13552_vm7 }
 0xd16   : > { %5755 = vmatmul.f32.vlgmr.msra.gmra.mxu1 %v5559_v24  ;;  %v5560_v36 = vsub.f32 %v5558_v57, %v5559_v24 }
 0xd17   : > { %v5429_v45 = vmul.f32 %v8962_v33, %v5428_v27  ;;  %v5520_v22 = vsel %vm13552_vm7, %v5425_v40, 0  ;;  %8659 = vmatpush.msk.msrb.mxu3 %vm9312_vm0, %v13179_v61  ;;  %8673 = vmatpush.msk.msra.mxu1 %vm13524_vm10, %v13179_v61  ;;  %vm5446_vm7 = vweird.f32 %v11848_v52 }
 0xd18   : > { %v11863_v58 = vand.u32 4294901760, %v5520_v22  ;;  %6168 = vmatpush.msra.mxu0 %v13480_v35  ;;  %v5561_v31 = vand.u32 4294901760, %v5560_v36 }
 0xd19   : > { %v5430_v54 = vadd.f32 %v8962_v33, %v5429_v45  ;;  %8660 = vmatpush.msk.msrb.mxu3 %vm9334_vm1, %v13179_v61  ;;  %8674 = vmatpush.msk.msra.mxu1 %vm9295_vm15, %v13179_v61 }
 0xd1a   : > { %v8964_v25 = vpop.eup %8963  ;;  %5648 = vmatmul.f32.gmra.mxu3 %v11863_v58  ;;  %v5566_v17 = vsub.f32 %v5520_v22, %v11863_v58  ;;  %5562 = vmatmul.f32.vlgmr.msrb.gmra.mxu2 %v5561_v31  ;;  %v5453_v22 = vor.u32 1.1754944e-38, %v5452_v12  ;;  %v13557_v31 = vld [vmem:[#allocation15_spill] sm:$0xff] }
 0xd1b   : > { %v5434_v5 = vsel %vm5433_vm11, %v8962_v33, %v5430_v54  ;;  %v5442_v9 = vmul.f32 %v8964_v25, %v11848_v52  ;;  %v11878_v51 = vpop.xlane.xlu2 %5385  ;;  %8661 = vmatpush.msk.msrb.mxu3 %vm9355_vm3, %v13179_v61  ;;  %6070 = vmatpush.msrb.mxu2 %v13553_v11  ;;  %vm5447_vm6 = vweird.f32 %v8964_v25  ;;  %vm5451_vm11 = vcmp.eq.f32.partialorder %v5450_v16, 8.507059e+37  ;;  %v13559_v16 = vld [vmem:[#allocation20_spill] sm:$0xff] }
 0xd1c   : > { %v5439_v42 = vsel %vm5436_vm8, %v5438_v60, %v5434_v5  ;;  %8965 = vrcp.f32 %v11878_v51  ;;  %5701 = vmatmul.f32.gmra.mxu0 %v5566_v17  ;;  %v5567_v57 = vand.u32 4294901760, %v5566_v17  ;;  %8675 = vmatpush.msk.msra.mxu1 %vm9312_vm0, %v13179_v61  ;;  %vm5448_vm13 = vmor %vm5446_vm7, %vm5447_vm6  ;;  %vm5461_vm7 = vweird.f32 %v11878_v51 }
 0xd1d   : > { %v5443_v18 = vsub.f32 1.0, %v5442_v9  ;;  %v5440_v33 = vmul.f32 %v11817_v62, %v5439_v42  ;;  %8662 = vmatpush.msk.msrb.mxu3 %vm9376_vm4, %v13179_v61  ;;  %6073 = vmatpush.msrb.mxu2 %v13554_v44  ;;  %v13558_v9 = vld [vmem:[#allocation18_spill] sm:$0xff]  ;;  %vm13560_vm6 = vmmov %vm13555_vm2 }
 0xd1e   : > { %6172 = vmatpush.msra.mxu0 %v13481_v53  ;;  %5761 = vmatmul.f32.gmra.mxu1 %v5567_v57  ;;  %v5568_v62 = vsub.f32 %v5566_v17, %v5567_v57  ;;  %v5465_v57 = vand.u32 2147483647, %v11878_v51 }
 0xd1f   : > { %v5444_v27 = vmul.f32 %v8964_v25, %v5443_v18  ;;  %v5523_v24 = vsel %vm13555_vm2, %v5440_v33, 0  ;;  %8663 = vmatpush.msk.msrb.mxu3 %vm9398_vm5, %v13179_v61  ;;  %6076 = vmatpush.msrb.mxu2 %v13556_v2  ;;  %v5467_v33 = vand.u32 2147483648, %v11878_v51  ;;  %vm13561_vm2 = vnez %v13431_v19 }
 0xd20   : > { %v11900_v40 = vand.u32 4294901760, %v5523_v24  ;;  %8676 = vmatpush.msk.msra.mxu1 %vm9334_vm1, %v13179_v61  ;;  %v5569_v45 = vand.u32 4294901760, %v5568_v62  ;;  %6176 = vmatpush.msra.mxu0 %v13482_v37 }
 0xd21   : > { %v5445_v29 = vadd.f32 %v8964_v25, %v5444_v27  ;;  %8664 = vmatpush.msk.msrb.mxu3 %vm13192_vm9, %v13179_v61  ;;  %6079 = vmatpush.msrb.mxu2 %v13557_v31 }
 0xd22   : > { %v8966_v36 = vpop.eup %8965  ;;  %5652 = vmatmul.f32.gmra.mxu3 %v11900_v40  ;;  %v5574_v54 = vsub.f32 %v5523_v24, %v11900_v40  ;;  %5570 = vmatmul.f32.gmra.mxu2 %v5569_v45  ;;  %v13562_v24 = vld [vmem:[#allocation24_spill] sm:$0xff] }
 0xd23   : > { %v5449_v60 = vsel %vm5448_vm13, %v8964_v25, %v5445_v29  ;;  %v5457_v52 = vmul.f32 %v8966_v36, %v11878_v51  ;;  %v11915_v17 = vpop.xlane.xlu0 %5388  ;;  %8665 = vmatpush.msk.msrb.mxu3 %vm13497_vm14, %v13179_v61  ;;  %6082 = vmatpush.msrb.mxu2 %v13558_v9  ;;  %vm5462_vm8 = vweird.f32 %v8966_v36  ;;  %vm13563_vm13 = vnez %v13434_v6 }
 0xd24   : > { %v5454_v5 = vsel %vm5451_vm11, %v5453_v22, %v5449_v60  ;;  %8967 = vrcp.f32 %v11915_v17  ;;  %5706 = vmatmul.f32.gmra.mxu0 %v5574_v54  ;;  %v5575_v18 = vand.u32 4294901760, %v5574_v54  ;;  %8677 = vmatpush.msk.msra.mxu1 %vm9355_vm3, %v13179_v61  ;;  %vm5463_vm11 = vmor %vm5461_vm7, %vm5462_vm8  ;;  %vm13566_vm8 = vnez %v13437_v50 }
 0xd25   : > { %v5458_v42 = vsub.f32 1.0, %v5457_v52  ;;  %v5455_v25 = vmul.f32 %v11822_v3, %v5454_v5  ;;  %8666 = vmatpush.msk.msrb.mxu3 %vm13525_vm12, %v13179_v61  ;;  %6085 = vmatpush.msrb.mxu2 %v13559_v16  ;;  %v13564_v52 = vld [vmem:[#allocation33_spill] sm:$0xff] }
 0xd26   : > { %6180 = vmatpush.msra.mxu0 %v13483_v1  ;;  %5767 = vmatmul.f32.gmra.mxu1 %v5575_v18  ;;  %v5576_v3 = vsub.f32 %v5574_v54, %v5575_v18  ;;  %v5468_v54 = vor.u32 1.1754944e-38, %v5467_v33 }
 0xd27   : > { %v5459_v12 = vmul.f32 %v8966_v36, %v5458_v42  ;;  %v5526_v27 = vsel %vm13560_vm6, %v5455_v25, 0  ;;  %8667 = vmatpush.msk.msrb.mxu3 %vm13561_vm2, %v13179_v61  ;;  %6088 = vmatpush.msrb.mxu2 %v13562_v24  ;;  %vm5466_vm6 = vcmp.eq.f32.partialorder %v5465_v57, 8.507059e+37  ;;  %v13565_v25 = vld [vmem:[#allocation37_spill] sm:$0xff]  ;;  %v5480_v57 = vand.u32 2147483647, %v11915_v17 }
 0xd28   : > { %v11937_v62 = vand.u32 4294901760, %v5526_v27  ;;  %8678 = vmatpush.msk.msra.mxu1 %vm9376_vm4, %v13179_v61  ;;  %v5577_v45 = vand.u32 4294901760, %v5576_v3  ;;  %6184 = vmatpush.msra.mxu0 %v13484_v47  ;;  %v5482_v3 = vand.u32 2147483648, %v11915_v17 }
 0xd29   : > { %v5460_v29 = vadd.f32 %v8966_v36, %v5459_v12  ;;  %8668 = vmatpush.msk.msrb.mxu3 %vm13563_vm13, %v13179_v61  ;;  %6091 = vmatpush.msrb.mxu2 %v13564_v52 }
 0xd2a   : > { %v8968_v22 = vpop.eup %8967  ;;  %5656 = vmatmul.f32.gmra.mxu3 %v11937_v62  ;;  %v5582_v60 = vsub.f32 %v5526_v27, %v11937_v62  ;;  %5578 = vmatmul.f32.gmra.mxu2 %v5577_v45  ;;  %v13567_v27 = vld [vmem:[#allocation39_spill] sm:$0xff] }
 0xd2b   : > { %v5464_v5 = vsel %vm5463_vm11, %v8966_v36, %v5460_v29  ;;  %v5472_v51 = vmul.f32 %v8968_v22, %v11915_v17  ;;  %v11952_v42 = vpop.xlane.xlu1 %5391  ;;  %8679 = vmatpush.msk.msra.mxu1 %vm9398_vm5, %v13179_v61  ;;  %6094 = vmatpush.msrb.mxu2 %v13565_v25  ;;  %vm5477_vm7 = vweird.f32 %v8968_v22  ;;  %vm13568_vm11 = vcmask 64512  }
 0xd2c   : > { %v5469_v18 = vsel %vm5466_vm6, %v5468_v54, %v5464_v5  ;;  %8969 = vrcp.f32 %v11952_v42  ;;  %5711 = vmatmul.f32.gmra.mxu0 %v5582_v60  ;;  %v5583_v12 = vand.u32 4294901760, %v5582_v60  ;;  %8669 = vmatpush.msk.msrb.mxu3 %vm13566_vm8, %v13179_v61  ;;  %vm13569_vm6 = vnez %v13439_v41  ;;  %v13570_v5 = vld [vmem:[#allocation41_spill] sm:$0xff] }
 0xd2d   : > { %v5473_v33 = vsub.f32 1.0, %v5472_v51  ;;  %v5470_v36 = vmul.f32 %v11826_v38, %v5469_v18  ;;  %8680 = vmatpush.msk.msra.mxu1 %vm13192_vm9, %v13179_v61  ;;  %6097 = vmatpush.msrb.mxu2 %v13567_v27  ;;  %vm5476_vm9 = vweird.f32 %v11915_v17 }
 0xd2e   : > { %6188 = vmatpush.msra.mxu0 %v13505_v56  ;;  %5773 = vmatmul.f32.gmra.mxu1 %v5583_v12  ;;  %v5584_v38 = vsub.f32 %v5582_v60, %v5583_v12  ;;  %vm5478_vm5 = vmor %vm5476_vm9, %vm5477_vm7  ;;  %v5483_v12 = vor.u32 1.1754944e-38, %v5482_v3  ;;  %v13573_v56 = vld [vmem:[#allocation47_spill] sm:$0xff]  ;;  %v13574_v3 = vld [vmem:[#allocation49_spill] sm:$0xff]  ;;  %vm5491_vm7 = vweird.f32 %v11952_v42 }
 0xd2f   : > { %v5474_v29 = vmul.f32 %v8968_v22, %v5473_v33  ;;  %v5529_v45 = vsel %vm13568_vm11, %v5470_v36, 0  ;;  %8670 = vmatpush.msk.msrb.mxu3 %vm13569_vm6, %v13179_v61  ;;  %6100 = vmatpush.msrb.mxu2 %v13570_v5  ;;  %v13571_v33 = vld [vmem:[#allocation36_spill] sm:$0xff]  ;;  %vm13572_vm11 = vnez %v13441_v34 }
 0xd30   : > { %v11974_v54 = vand.u32 4294901760, %v5529_v45  ;;  %8681 = vmatpush.msk.msra.mxu1 %vm13497_vm14, %v13179_v61  ;;  %v5585_v18 = vand.u32 4294901760, %v5584_v38  ;;  %6192 = vmatpush.msra.mxu0 %v13571_v33  ;;  %vm5481_vm14 = vcmp.eq.f32.partialorder %v5480_v57, 8.507059e+37  ;;  %v13575_v57 = vld [vmem:[#allocation40_spill] sm:$0xff] }
 0xd31   : > { %v5475_v51 = vadd.f32 %v8968_v22, %v5474_v29  ;;  %8671 = vmatpush.msk.msrb.mxu3 %vm13572_vm11, %v13179_v61  ;;  %6103 = vmatpush.msrb.mxu2 %v13573_v56 }
 0xd32   : > { %v8970_v60 = vpop.eup %8969  ;;  %5660 = vmatmul.f32.gmra.mxu3 %v11974_v54  ;;  %v5590_v36 = vsub.f32 %v5529_v45, %v11974_v54  ;;  %5586 = vmatmul.f32.gmra.mxu2 %v5585_v18  ;;  %v5497_v18 = vand.u32 2147483648, %v11952_v42 }
 0xd33   : > { %v5479_v47 = vsel %vm5478_vm5, %v8968_v22, %v5475_v51  ;;  %v5487_v17 = vmul.f32 %v8970_v60, %v11952_v42  ;;  %v11989_v29 = vpop.xlane.xlu2 %5394  ;;  %8682 = vmatpush.msk.msra.mxu1 %vm13525_vm12, %v13179_v61  ;;  %6106 = vmatpush.msrb.mxu2 %v13574_v3  ;;  %v5495_v51 = vand.u32 2147483647, %v11952_v42  ;;  %vm13577_vm5 = vnez %v13444_v28 }
 0xd34   : > { %v5484_v38 = vsel %vm5481_vm14, %v5483_v12, %v5479_v47  ;;  %8971 = vrcp.f32 %v11989_v29  ;;  %5716 = vmatmul.f32.gmra.mxu0 %v5590_v36  ;;  %v5591_v33 = vand.u32 4294901760, %v5590_v36  ;;  %v13576_v47 = vld [vmem:[#allocation58_spill] sm:$0xff]  ;;  %8672 = vmatpush.msk.msrb.mxu3 %vm13577_vm5, %v13179_v61  ;;  %vm5492_vm9 = vweird.f32 %v8970_v60 }
 0xd35   : > { %v5488_v45 = vsub.f32 1.0, %v5487_v17  ;;  %v5485_v22 = vmul.f32 %v11830_v39, %v5484_v38  ;;  %8683 = vmatpush.msk.msra.mxu1 %vm13561_vm2, %v13179_v61  ;;  %6196 = vmatpush.msra.mxu0 %v13575_v57  ;;  %vm13578_vm14 = vcmask 64512   ;;  %v13579_v38 = vld [vmem:[#allocation42_spill] sm:$0xff]  ;;  %v13580_v57 = vld [vmem:[#allocation60_spill] sm:$0xff]  ;;  %vm5493_vm2 = vmor %vm5491_vm7, %vm5492_vm9  ;;  %vm13584_vm9 = vcmask 64512  }
 0xd36   : > { %6109 = vmatpush.msrb.mxu2 %v13576_v47  ;;  %5779 = vmatmul.f32.gmra.mxu1 %v5591_v33  ;;  %v5592_v39 = vsub.f32 %v5590_v36, %v5591_v33  ;;  %v5498_v33 = vor.u32 1.1754944e-38, %v5497_v18  ;;  %vm5506_vm7 = vweird.f32 %v11989_v29 }
 0xd37   : > { %v5489_v12 = vmul.f32 %v8970_v60, %v5488_v45  ;;  %v5532_v17 = vsel %vm13578_vm14, %v5485_v22, 0  ;;  %6200 = vmatpush.msra.mxu0 %v13579_v38  ;;  %8684 = vmatpush.msk.msra.mxu1 %vm13563_vm13, %v13179_v61  ;;  %v13581_v45 = vld [vmem:[#allocation45_spill] sm:$0xff]  ;;  %v13582_v22 = vld [vmem:[#allocation63_spill] sm:$0xff]  ;;  %vm5496_vm14 = vcmp.eq.f32.partialorder %v5495_v51, 8.507059e+37  ;;  %v5510_v51 = vand.u32 2147483647, %v11989_v29 }
 0xd38   : > { %v12009_v1 = vand.u32 4294901760, %v5532_v17  ;;  %6112 = vmatpush.msrb.mxu2 %v13580_v57  ;;  %v5593_v53 = vand.u32 4294901760, %v5592_v39 }
 0xd39   : > { %v5490_v37 = vadd.f32 %v8970_v60, %v5489_v12  ;;  %6204 = vmatpush.msra.mxu0 %v13581_v45  ;;  %8685 = vmatpush.msk.msra.mxu1 %vm13566_vm8, %v13179_v61 }
 0xd3a   : > { %v8972_v35 = vpop.eup %8971  ;;  %5664 = vmatmul.f32.gmra.mxu3 %v12009_v1  ;;  %v5598_v36 = vsub.f32 %v5532_v17, %v12009_v1  ;;  %6115 = vmatpush.msrb.mxu2 %v13582_v22  ;;  %v13583_v17 = vld [vmem:[#allocation53_spill] sm:$0xff] }
 0xd3b   : > { %v5494_v38 = vsel %vm5493_vm2, %v8970_v60, %v5490_v37  ;;  %v5502_v46 = vmul.f32 %v8972_v35, %v11989_v29  ;;  %5594 = vmatmul.f32.gmra.mxu2 %v5593_v53  ;;  %8686 = vmatpush.msk.msra.mxu1 %vm13569_vm6, %v13179_v61  ;;  %v5512_v37 = vand.u32 2147483648, %v11989_v29  ;;  %vm5507_vm2 = vweird.f32 %v8972_v35 }
 0xd3c   : > { %v5499_v42 = vsel %vm5496_vm14, %v5498_v33, %v5494_v38  ;;  %5721 = vmatmul.f32.gmra.mxu0 %v5598_v36  ;;  %v5599_v12 = vand.u32 4294901760, %v5598_v36  ;;  %v13585_v33 = vld [vmem:[#allocation55_spill] sm:$0xff]  ;;  %vm5508_vm14 = vmor %vm5506_vm7, %vm5507_vm2  ;;  %vm13589_vm2 = vcmask 64512   ;;  %vm13591_vm7 = vnez %v13195_v32 }
 0xd3d   : > { %v5503_v39 = vsub.f32 1.0, %v5502_v46  ;;  %v5500_v18 = vmul.f32 %v11834_v55, %v5499_v42  ;;  %6208 = vmatpush.msra.mxu0 %v13583_v17  ;;  %8687 = vmatpush.msk.msra.mxu1 %vm13572_vm11, %v13179_v61  ;;  %v13586_v17 = vld [vmem:[#allocation62_spill] sm:$0xff] }
 0xd3e   : > { %v5600_v60 = vsub.f32 %v5598_v36, %v5599_v12  ;;  %5785 = vmatmul.f32.gmra.mxu1 %v5599_v12  ;;  %v5513_v36 = vor.u32 1.1754944e-38, %v5512_v37 }
 0xd3f   : > { %v5504_v53 = vmul.f32 %v8972_v35, %v5503_v39  ;;  %v5535_v38 = vsel %vm13584_vm9, %v5500_v18, 0  ;;  %6212 = vmatpush.msra.mxu0 %v13585_v33  ;;  %8688 = vmatpush.msk.msra.mxu1 %vm13577_vm5, %v13179_v61  ;;  %vm5511_vm9 = vcmp.eq.f32.partialorder %v5510_v51, 8.507059e+37  ;;  %v13587_v18 = vld [vmem:[#allocation65_spill] sm:$0xff]  ;;  %v13588_v33 = vld [vmem:[#allocation68_spill] sm:$0xff] }
 0xd40   : > { %v5601_v46 = vand.u32 4294901760, %v5600_v60  ;;  %v5605_v55 = vand.u32 4294901760, %v5535_v38 }
 0xd41   : > { %v5505_v42 = vadd.f32 %v8972_v35, %v5504_v53  ;;  %6216 = vmatpush.msra.mxu0 %v13586_v17 }
 0xd42   : > { %5668 = vmatmul.f32.gmra.mxu3 %v5605_v55  ;;  %v5606_v39 = vsub.f32 %v5535_v38, %v5605_v55 }
 0xd43   : > { %v5509_v12 = vsel %vm5508_vm14, %v8972_v35, %v5505_v42  ;;  %5602 = vmatmul.f32.gmra.mxu2 %v5601_v46  ;;  %6220 = vmatpush.msra.mxu0 %v13587_v18 }
 0xd44   : > { %v5514_v60 = vsel %vm5511_vm9, %v5513_v36, %v5509_v12  ;;  %5726 = vmatmul.f32.gmra.mxu0 %v5606_v39  ;;  %v5607_v53 = vand.u32 4294901760, %v5606_v39 }
 0xd45   : > { %v5515_v29 = vmul.f32 %v11838_v63, %v5514_v60  ;;  %6224 = vmatpush.msra.mxu0 %v13588_v33  ;;  %v13590_v63 = vld [vmem:[#allocation76_spill] sm:$0xff] }
 0xd46   : > { %v5608_v17 = vsub.f32 %v5606_v39, %v5607_v53  ;;  %5791 = vmatmul.f32.gmra.mxu1 %v5607_v53 }
 0xd47   : > { %v5538_v37 = vsel %vm13589_vm2, %v5515_v29, 0 }
 0xd48   : > { %v5609_v38 = vand.u32 4294901760, %v5608_v17  ;;  %v5613_v45 = vand.u32 4294901760, %v5538_v37 }
 0xd4a   : > { %5672 = vmatmul.f32.gmra.mxu3 %v5613_v45  ;;  %v5614_v48 = vsub.f32 %v5538_v37, %v5613_v45 }
 0xd4b   : > { %5610 = vmatmul.f32.gmra.mxu2 %v5609_v38 }
 0xd4c   : > { %5731 = vmatmul.f32.gmra.mxu0 %v5614_v48  ;;  %v5615_v35 = vand.u32 4294901760, %v5614_v48 }
 0xd4e   : > { %v5616_v51 = vsub.f32 %v5614_v48, %v5615_v35  ;;  %5797 = vmatmul.f32.gmra.mxu1 %v5615_v35 }
 0xd50   : > { %v5617_v46 = vand.u32 4294901760, %v5616_v51 }
 0xd52   : > { %5871 = vmatmul.f32.vlgmr.msra.gmra.mxu3 %v11844_v23 }
 0xd53   : > { %5618 = vmatmul.f32.gmra.mxu2 %v5617_v46  ;;  %6316 = vmatpush.msra.mxu3 %v13590_v63 }
 0xd5a   : > { %5875 = vmatmul.f32.gmra.mxu3 %v11863_v58 }
 0xd5b   : > { %5821 = vmatmul.f32.vlgmr.msra.gmra.mxu2 %v11844_v23 }
 0xd5c   : > { %8689 = vmatpush.msk.msra.mxu2 %vm13591_vm7, %v13179_v61 }
 0xd62   : > { %5879 = vmatmul.f32.gmra.mxu3 %v11900_v40 }
 0xd63   : > { %5825 = vmatmul.f32.gmra.mxu2 %v11863_v58 }
 0xd6a   : > { %5883 = vmatmul.f32.gmra.mxu3 %v11937_v62 }
 0xd6b   : > { %5829 = vmatmul.f32.gmra.mxu2 %v11900_v40 }
 0xd72   : > { %5887 = vmatmul.f32.gmra.mxu3 %v11974_v54 }
 0xd73   : > { %5833 = vmatmul.f32.gmra.mxu2 %v11937_v62 }
 0xd7a   : > { %5891 = vmatmul.f32.gmra.mxu3 %v12009_v1 }
 0xd7b   : > { %5837 = vmatmul.f32.gmra.mxu2 %v11974_v54 }
 0xd82   : > { %5895 = vmatmul.f32.gmra.mxu3 %v5605_v55 }
 0xd83   : > { %5841 = vmatmul.f32.gmra.mxu2 %v12009_v1 }
 0xd8a   : > { %5899 = vmatmul.f32.gmra.mxu3 %v5613_v45 }
 0xd8b   : > { %5845 = vmatmul.f32.gmra.mxu2 %v5605_v55 }
 0xd91   : > { %v5697_v54 = vpop.f32.mrf.mxu0 }
 0xd93   : > { %5849 = vmatmul.f32.gmra.mxu2 %v5613_v45  ;;  %v5756_v38 = vpop.f32.mrf.mxu1 }
 0xd95   : > { %v5645_v48 = vpop.f32.mrf.mxu3 }
 0xd99   : > { %v5702_v35 = vpop.f32.mrf.mxu0 }
 0xd9b   : > { %v5762_v51 = vpop.f32.mrf.mxu1 }
 0xd9d   : > { %v5649_v23 = vpop.f32.mrf.mxu3  ;;  %v5563_v58 = vpop.f32.mrf.mxu2 }
 0xd9e   : > { %v5646_v41 = vadd.f32 %v5645_v48, %v5563_v58 }
 0xda0   : > { %v5698_v19 = vadd.f32 %v5697_v54, %v5646_v41 }
 0xda1   : > { %v5707_v33 = vpop.f32.mrf.mxu0 }
 0xda2   : > { %v5757_v2 = vadd.f32 %v5756_v38, %v5698_v19 }
 0xda3   : > { %v5768_v7 = vpop.f32.mrf.mxu1 }
 0xda5   : > { %v5653_v17 = vpop.f32.mrf.mxu3  ;;  %v5571_v42 = vpop.f32.mrf.mxu2 }
 0xda6   : > { %v5650_v34 = vadd.f32 %v5649_v23, %v5571_v42 }
 0xda8   : > { %v5703_v25 = vadd.f32 %v5702_v35, %v5650_v34 }
 0xda9   : > { %v5712_v4 = vpop.f32.mrf.mxu0 }
 0xdaa   : > { %v5763_v9 = vadd.f32 %v5762_v51, %v5703_v25 }
 0xdab   : > { %v5774_v22 = vpop.f32.mrf.mxu1 }
 0xdad   : > { %v5657_v40 = vpop.f32.mrf.mxu3  ;;  %v5579_v36 = vpop.f32.mrf.mxu2 }
 0xdae   : > { %v5654_v27 = vadd.f32 %v5653_v17, %v5579_v36 }
 0xdb0   : > { %v5708_v24 = vadd.f32 %v5707_v33, %v5654_v27 }
 0xdb1   : > { %v5717_v3 = vpop.f32.mrf.mxu0 }
 0xdb2   : > { %v5769_v44 = vadd.f32 %v5768_v7, %v5708_v24 }
 0xdb3   : > { %v5780_v63 = vpop.f32.mrf.mxu1 }
 0xdb5   : > { %v5661_v39 = vpop.f32.mrf.mxu3  ;;  %v5587_v12 = vpop.f32.mrf.mxu2 }
 0xdb6   : > { %v5658_v6 = vadd.f32 %v5657_v40, %v5587_v12 }
 0xdb8   : > { %v5713_v16 = vadd.f32 %v5712_v4, %v5658_v6 }
 0xdb9   : > { %v5722_v5 = vpop.f32.mrf.mxu0 }
 0xdba   : > { %v5775_v17 = vadd.f32 %v5774_v22, %v5713_v16 }
 0xdbb   : > { %v5786_v52 = vpop.f32.mrf.mxu1 }
 0xdbd   : > { %v5665_v62 = vpop.f32.mrf.mxu3 }
 0xdbe   : > { %v5595_v60 = vpop.f32.mrf.mxu2 }
 0xdbf   : > { %v5662_v14 = vadd.f32 %v5661_v39, %v5595_v60  ;;  %v9034_v60 = vld [vmem:[%s9249_s24 + $0x68] sm:$0xff] }
 0xdc1   : > { %v5718_v0 = vadd.f32 %v5717_v3, %v5662_v14  ;;  %v5727_v23 = vpop.f32.mrf.mxu0 }
 0xdc3   : > { %v5781_v6 = vadd.f32 %v5780_v63, %v5718_v0  ;;  %v5792_v4 = vpop.f32.mrf.mxu1 }
 0xdc5   : > { %v5669_v53 = vpop.f32.mrf.mxu3 }
 0xdc6   : > { %v5603_v29 = vpop.f32.mrf.mxu2 }
 0xdc7   : > { %v5666_v59 = vadd.f32 %v5665_v62, %v5603_v29 }
 0xdc9   : > { %v5723_v48 = vadd.f32 %v5722_v5, %v5666_v59 }
 0xdcb   : > { %v5787_v19 = vadd.f32 %v5786_v52, %v5723_v48  ;;  %v5798_v12 = vpop.f32.mrf.mxu1 }
 0xdcd   : > { %v5673_v37 = vpop.f32.mrf.mxu3 }
 0xdce   : > { %v5611_v1 = vpop.f32.mrf.mxu2 }
 0xdcf   : > { %v5670_v43 = vadd.f32 %v5669_v53, %v5611_v1 }
 0xdd1   : > { %v5728_v40 = vadd.f32 %v5727_v23, %v5670_v43 }
 0xdd5   : > { %v5872_v55 = vpop.f32.mrf.mxu3 }
 0xdd6   : > { %v5619_v45 = vpop.f32.mrf.mxu2 }
 0xdd7   : > { %v5674_v7 = vadd.f32 %v5673_v37, %v5619_v45  ;;  %v9035_v37 = vld [vmem:[%s9249_s24 + $0x70] sm:$0xff] }
 0xddd   : > { %v5876_v46 = vpop.f32.mrf.mxu3 }
 0xdde   : > { %v5822_v18 = vpop.f32.mrf.mxu2 }
 0xddf   : > { %v5823_v58 = vadd.f32 %v5822_v18, %v5757_v2 }
 0xde1   : > { %v5873_v25 = vadd.f32 %v5872_v55, %v5823_v58 }
 0xde5   : > { %v5880_v10 = vpop.f32.mrf.mxu3 }
 0xde6   : > { %v5826_v20 = vpop.f32.mrf.mxu2 }
 0xde7   : > { %v5827_v49 = vadd.f32 %v5826_v20, %v5763_v9  ;;  %v5793_v20 = vadd.f32 %v5792_v4, %v5728_v40  ;;  %v9029_v9 = vld [vmem:[%s9249_s24 + $0x48] sm:$0xff] }
 0xde9   : > { %v5877_v41 = vadd.f32 %v5876_v46, %v5827_v49  ;;  %v9030_v49 = vld [vmem:[%s9249_s24 + $0x40] sm:$0xff] }
 0xdea   : > { %v5903_v16 = vmul.f32 %v9030_v49, %v5873_v25  ;;  %v13605_v49 = vld [vmem:[#allocation24_spill] sm:$0xff] }
 0xdeb   : > { %v5904_v24 = vmul.f32 %v9029_v9, %v5877_v41  ;;  %v13597_v9 = vld [vmem:[#allocation15_spill] sm:$0xff] }
 0xded   : > { %v5884_v47 = vpop.f32.mrf.mxu3  ;;  %v5911_v52 = vadd.f32 %v5904_v24, %v5903_v16  ;;  %v13598_v24 = vld [vmem:[#allocation23_spill] sm:$0xff]  ;;  %v13606_v16 = vld [vmem:[#allocation34_spill] sm:$0xff] }
 0xdee   : > { %v5830_v57 = vpop.f32.mrf.mxu2  ;;  %vm13599_vm9 = vnez %v13598_v24 }
 0xdef   : > { %v5831_v34 = vadd.f32 %v5830_v57, %v5769_v44  ;;  %v9032_v57 = vld [vmem:[%s9249_s24 + $0x58] sm:$0xff] }
 0xdf1   : > { %v5881_v33 = vadd.f32 %v5880_v10, %v5831_v34  ;;  %v5732_v10 = vpop.f32.mrf.mxu0 }
 0xdf5   : > { %v5888_v56 = vpop.f32.mrf.mxu3 }
 0xdf6   : > { %v5834_v28 = vpop.f32.mrf.mxu2 }
 0xdf7   : > { %v5835_v27 = vadd.f32 %v5834_v28, %v5775_v17  ;;  %v9031_v28 = vld [vmem:[%s9249_s24 + $0x50] sm:$0xff] }
 0xdf8   : > { %v5905_v0 = vmul.f32 %v9031_v28, %v5881_v33  ;;  %v13608_v28 = vld [vmem:[#allocation33_spill] sm:$0xff] }
 0xdf9   : > { %v5885_v59 = vadd.f32 %v5884_v47, %v5835_v27  ;;  %v9033_v47 = vld [vmem:[%s9249_s24 + $0x60] sm:$0xff] }
 0xdfa   : > { %v5912_v63 = vadd.f32 %v5911_v52, %v5905_v0  ;;  %v13609_v0 = vld [vmem:[#allocation38_spill] sm:$0xff]  ;;  %v13614_v52 = vld [vmem:[#allocation41_spill] sm:$0xff] }
 0xdfb   : > { %v5906_v22 = vmul.f32 %v9032_v57, %v5885_v59  ;;  %v13600_v59 = vld [vmem:[#allocation18_spill] sm:$0xff] }
 0xdfc   : > { %v13615_v57 = vld [vmem:[#allocation54_spill] sm:$0xff] }
 0xdfd   : > { %v5892_v31 = vpop.f32.mrf.mxu3  ;;  %v5913_v62 = vadd.f32 %v5912_v63, %v5906_v22  ;;  %v13616_v22 = vld [vmem:[#allocation47_spill] sm:$0xff]  ;;  %v13618_v63 = vld [vmem:[#allocation76_spill] sm:$0xff] }
 0xdfe   : > { %v5838_v50 = vpop.f32.mrf.mxu2 }
 0xdff   : > { %v5839_v14 = vadd.f32 %v5838_v50, %v5781_v6  ;;  %v5733_v50 = vadd.f32 %v5732_v10, %v5674_v7  ;;  %v13595_v7 = vld [vmem:[#allocation17_spill] sm:$0xff]  ;;  %v13612_v10 = vld [vmem:[#allocation39_spill] sm:$0xff] }
 0xe00   : > { %vm13596_vm14 = vnez %v13595_v7 }
 0xe01   : > { %v5889_v5 = vadd.f32 %v5888_v56, %v5839_v14  ;;  %v5799_v29 = vadd.f32 %v5798_v12, %v5733_v50  ;;  %v13592_v14 = vld [vmem:[#allocation10_spill] sm:$0xff]  ;;  %v13622_v12 = vld [vmem:[#allocation63_spill] sm:$0xff] }
 0xe02   : > { %v13613_v50 = vld [vmem:[#allocation46_spill] sm:$0xff] }
 0xe03   : > { %v5907_v36 = vmul.f32 %v9033_v47, %v5889_v5  ;;  %v13610_v5 = vld [vmem:[#allocation37_spill] sm:$0xff] }
 0xe04   : > { %v13619_v47 = vld [vmem:[#allocation49_spill] sm:$0xff] }
 0xe05   : > { %v5896_v44 = vpop.f32.mrf.mxu3  ;;  %v5914_v56 = vadd.f32 %v5913_v62, %v5907_v36  ;;  %v13620_v36 = vld [vmem:[#allocation58_spill] sm:$0xff] }
 0xe06   : > { %v5842_v42 = vpop.f32.mrf.mxu2 }
 0xe07   : > { %v5843_v2 = vadd.f32 %v5842_v42, %v5787_v19 }
 0xe09   : > { %v5893_v18 = vadd.f32 %v5892_v31, %v5843_v2  ;;  %v9036_v31 = vld [vmem:[%s9249_s24 + $0x78] sm:$0xff] }
 0xe0a   : > { %v13601_v2 = vld [vmem:[#allocation28_spill] sm:$0xff] }
 0xe0b   : > { %v5908_v53 = vmul.f32 %v9034_v60, %v5893_v18  ;;  %vm13602_vm2 = vnez %v13601_v2  ;;  %v13617_v18 = vld [vmem:[#allocation57_spill] sm:$0xff] }
 0xe0d   : > { %v5900_v35 = vpop.f32.mrf.mxu3  ;;  %v5915_v55 = vadd.f32 %v5914_v56, %v5908_v53 }
 0xe0e   : > { %v5846_v43 = vpop.f32.mrf.mxu2 }
 0xe0f   : > { %v5847_v3 = vadd.f32 %v5846_v43, %v5793_v20  ;;  %v13594_v20 = vld [vmem:[#allocation12_spill] sm:$0xff]  ;;  %v13604_v43 = vld [vmem:[#allocation30_spill] sm:$0xff] }
 0xe11   : > { %v5897_v39 = vadd.f32 %v5896_v44, %v5847_v3  ;;  %v13603_v44 = vld [vmem:[#allocation20_spill] sm:$0xff] }
 0xe12   : > { %v13611_v3 = vld [vmem:[#allocation44_spill] sm:$0xff] }
 0xe13   : > { %v5909_v38 = vmul.f32 %v9035_v37, %v5897_v39  ;;  %v13621_v39 = vld [vmem:[#allocation60_spill] sm:$0xff] }
 0xe15   : > { %v5916_v51 = vadd.f32 %v5915_v55, %v5909_v38 }
 0xe16   : > { %v5850_v54 = vpop.f32.mrf.mxu2 }
 0xe17   : > { %v5851_v1 = vadd.f32 %v5850_v54, %v5799_v29 }
 0xe19   : > { %v5901_v45 = vadd.f32 %v5900_v35, %v5851_v1 }
 0xe1b   : > { %v5910_v46 = vmul.f32 %v9036_v31, %v5901_v45 }
 0xe1d   : > { %v5917_v23 = vadd.f32 %v5916_v51, %v5910_v46 }
 0xe1f   : > { %v5918_v42 = vrot.slane %v5917_v23, 4 }
 0xe21   : > { %v5919_v48 = vadd.f32 %v5918_v42, %v5917_v23 }
 0xe23   : > { %v5920_v58 = vrot.slane %v5919_v48, 2 }
 0xe25   : > { %v5921_v34 = vadd.f32 %v5920_v58, %v5919_v48  ;;  %v13624_v48 = vld [vmem:[#allocation75_spill] sm:$0xff]  ;;  %v13625_v58 = vld [vmem:[#allocation21_spill] sm:$0xff] }
 0xe27   : > { %v5922_v17 = vrot.slane %v5921_v34, 1 }
 0xe29   : > { %v12069_v40 = vadd.f32 %v5922_v17, %v5921_v34  ;;  %v13626_v34 = vld [vmem:[#allocation25_spill] sm:$0xff]  ;;  %v13627_v17 = vld [vmem:[#allocation27_spill] sm:$0xff] }
 0xe2b   : > { %v5925_v41 = vmul.f32 %v12069_v40, %v12069_v40 }
 0xe2d   : > { %v5958_v27 = vand.u32 4294901760, %v5925_v41 }
 0xe2f   : > { %6064 = vmatmul.f32.vlgmr.msrb.gmra.mxu1 %v5958_v27  ;;  %v5959_v6 = vsub.f32 %v5925_v41, %v5958_v27  ;;  %v13628_v41 = vld [vmem:[#allocation31_spill] sm:$0xff] }
 0xe30   : > { %8716 = vmatpush.msk.msrb.mxu1 %vm13524_vm10, %v13179_v61 }
 0xe31   : > { %6118 = vmatmul.f32.vlgmr.msrb.gmra.mxu2 %v5959_v6  ;;  %v5960_v4 = vand.u32 4294901760, %v5959_v6 }
 0xe32   : > { %6339 = vmatpush.msrb.mxu2 %v13518_v8  ;;  %8717 = vmatpush.msk.msrb.mxu1 %vm9295_vm15, %v13179_v61 }
 0xe33   : > { %6157 = vmatmul.f32.vlgmr.msrb.gmra.mxu3 %v5960_v4  ;;  %v5961_v25 = vsub.f32 %v5959_v6, %v5960_v4  ;;  %v13630_v6 = vld [vmem:[#allocation35_spill] sm:$0xff] }
 0xe34   : > { %8690 = vmatpush.msk.msrb.mxu3 %vm13591_vm7, %v13179_v61  ;;  %8718 = vmatpush.msk.msrb.mxu1 %vm9312_vm0, %v13179_v61  ;;  %v13631_v4 = vld [vmem:[#allocation43_spill] sm:$0xff] }
 0xe35   : > { %v5962_v33 = vand.u32 4294901760, %v5961_v25  ;;  %v13632_v25 = vld [vmem:[#allocation48_spill] sm:$0xff] }
 0xe36   : > { %8719 = vmatpush.msk.msrb.mxu1 %vm9334_vm1, %v13179_v61 }
 0xe37   : > { %5963 = vmatmul.f32.vlgmr.msrb.gmra.mxu0 %v5962_v33  ;;  %6263 = vmatmul.f32.vlgmr.msra.gmra.mxu1 %v5958_v27  ;;  %v13633_v33 = vld [vmem:[#allocation52_spill] sm:$0xff] }
 0xe38   : > { %6690 = vmatpush.msrb.mxu0 %v13553_v11  ;;  %8720 = vmatpush.msk.msrb.mxu1 %vm9355_vm3, %v13179_v61 }
 0xe3a   : > { %6693 = vmatpush.msrb.mxu0 %v13592_v14  ;;  %8721 = vmatpush.msk.msrb.mxu1 %vm9376_vm4, %v13179_v61 }
 0xe3c   : > { %6696 = vmatpush.msrb.mxu0 %v13594_v20  ;;  %8722 = vmatpush.msk.msrb.mxu1 %vm13596_vm14, %v13179_v61  ;;  %vm13607_vm14 = vnez %v13606_v16 }
 0xe3e   : > { %6699 = vmatpush.msrb.mxu0 %v13597_v9  ;;  %8723 = vmatpush.msk.msrb.mxu1 %vm13599_vm9, %v13179_v61 }
 0xe3f   : > { %6226 = vmatmul.f32.vlgmr.msra.gmra.mxu0 %v5958_v27  ;;  %v13629_v27 = vld [vmem:[#allocation32_spill] sm:$0xff] }
 0xe40   : > { %6702 = vmatpush.msrb.mxu0 %v13600_v59  ;;  %8724 = vmatpush.msk.msrb.mxu1 %vm13602_vm2, %v13179_v61 }
 0xe42   : > { %6705 = vmatpush.msrb.mxu0 %v13603_v44  ;;  %8725 = vmatpush.msk.msrb.mxu1 %vm13525_vm12, %v13179_v61 }
 0xe44   : > { %6708 = vmatpush.msrb.mxu0 %v13605_v49  ;;  %8726 = vmatpush.msk.msrb.mxu1 %vm13607_vm14, %v13179_v61 }
 0xe46   : > { %6711 = vmatpush.msrb.mxu0 %v13608_v28  ;;  %8727 = vmatpush.msk.msrb.mxu1 %vm13563_vm13, %v13179_v61 }
 0xe48   : > { %6714 = vmatpush.msrb.mxu0 %v13610_v5  ;;  %8728 = vmatpush.msk.msrb.mxu1 %vm13566_vm8, %v13179_v61 }
 0xe4a   : > { %6717 = vmatpush.msrb.mxu0 %v13612_v10  ;;  %8729 = vmatpush.msk.msrb.mxu1 %vm13569_vm6, %v13179_v61 }
 0xe4c   : > { %6720 = vmatpush.msrb.mxu0 %v13614_v52  ;;  %8730 = vmatpush.msk.msrb.mxu1 %vm13572_vm11, %v13179_v61 }
 0xe4e   : > { %6723 = vmatpush.msrb.mxu0 %v13616_v22  ;;  %8731 = vmatpush.msk.msrb.mxu1 %vm13577_vm5, %v13179_v61  ;;  %vm13623_vm5 = vcmask 64512  }
 0xe50   : > { %7354 = vmatpush.msra.mxu1 %v13618_v63  ;;  %6726 = vmatpush.msrb.mxu0 %v13619_v47  ;;  %v13653_v63 = vld [vmem:[#allocation45_spill] sm:$0xff] }
 0xe52   : > { %6729 = vmatpush.msrb.mxu0 %v13620_v36  ;;  %v13658_v36 = vld [vmem:[#allocation68_spill] sm:$0xff] }
 0xe54   : > { %6732 = vmatpush.msrb.mxu0 %v13621_v39  ;;  %v13655_v39 = vld [vmem:[#allocation55_spill] sm:$0xff] }
 0xe56   : > { %6735 = vmatpush.msrb.mxu0 %v13622_v12  ;;  %v13654_v12 = vld [vmem:[#allocation53_spill] sm:$0xff] }
 0xe58   : > { %8748 = vmatpush.msk.msra.mxu0 %vm13591_vm7, %v13179_v61 }
 0xeac   : > { %v6065_v62 = vpop.f32.mrf.mxu1 }
 0xeb4   : > { %v5964_v60 = vpop.f32.mrf.mxu0  ;;  %v6119_v29 = vpop.f32.mrf.mxu2 }
 0xeb5   : > { %v6066_v53 = vadd.f32 %v6065_v62, %v5964_v60  ;;  %v6264_v35 = vpop.f32.mrf.mxu1  ;;  %v13634_v62 = vld [vmem:[#allocation59_spill] sm:$0xff]  ;;  %v13636_v60 = vld [vmem:[#allocation64_spill] sm:$0xff] }
 0xeb6   : > { %v6158_v56 = vpop.f32.mrf.mxu3 }
 0xeb7   : > { %v6120_v54 = vadd.f32 %v6119_v29, %v6066_v53  ;;  %v13637_v53 = vld [vmem:[#allocation67_spill] sm:$0xff]  ;;  %v13638_v29 = vld [vmem:[#allocation70_spill] sm:$0xff] }
 0xeb9   : > { %v6159_v37 = vadd.f32 %v6158_v56, %v6120_v54  ;;  %v13639_v54 = vld [vmem:[#allocation71_spill] sm:$0xff]  ;;  %v13640_v56 = vld [vmem:[#allocation72_spill] sm:$0xff] }
 0xebc   : > { %v6227_v38 = vpop.f32.mrf.mxu0 }
 0xebd   : > { %v6228_v1 = vadd.f32 %v6227_v38, %v6159_v37  ;;  %v13641_v37 = vld [vmem:[#allocation73_spill] sm:$0xff]  ;;  %v13643_v38 = vld [vmem:[#allocation11_spill] sm:$0xff] }
 0xebf   : > { %v6265_v55 = vadd.f32 %v6264_v35, %v6228_v1  ;;  %v13644_v1 = vld [vmem:[#allocation13_spill] sm:$0xff]  ;;  %v13645_v35 = vld [vmem:[#allocation16_spill] sm:$0xff] }
 0xec1   : > { %v6268_v45 = vsel %vm13623_vm5, %v6265_v55, 0  ;;  %vm13635_vm5 = vnez %v13595_v7  ;;  %v13646_v55 = vld [vmem:[#allocation19_spill] sm:$0xff] }
 0xec2   : > { %v6287_v51 = vand.u32 4294901760, %v6268_v45 }
 0xec4   : > { %v6288_v31 = vsub.f32 %v6268_v45, %v6287_v51  ;;  %6318 = vmatmul.f32.vlgmr.msra.gmra.mxu3 %v6287_v51  ;;  %v13647_v45 = vld [vmem:[#allocation22_spill] sm:$0xff] }
 0xec5   : > { %8691 = vmatpush.msk.msra.mxu3 %vm13591_vm7, %v13179_v61 }
 0xec6   : > { %v6289_v46 = vand.u32 4294901760, %v6288_v31 }
 0xec8   : > { %v6290_v23 = vsub.f32 %v6288_v31, %v6289_v46 }
 0xeca   : > { %v6291_v42 = vand.u32 4294901760, %v6290_v23  ;;  %v13651_v23 = vld [vmem:[#allocation40_spill] sm:$0xff] }
 0xecc   : > { %6292 = vmatmul.f32.vlgmr.msra.gmra.mxu2 %v6291_v42  ;;  %6366 = vmatmul.f32.vlgmr.msrb.gmra.mxu3 %v6289_v46  ;;  %v13650_v46 = vld [vmem:[#allocation36_spill] sm:$0xff]  ;;  %v13652_v42 = vld [vmem:[#allocation42_spill] sm:$0xff] }
 0xecd   : > { %6388 = vmatpush.msra.mxu2 %v13624_v48  ;;  %6564 = vmatpush.msrb.mxu3 %v13625_v58 }
 0xecf   : > { %6570 = vmatpush.msrb.mxu3 %v13626_v34 }
 0xed1   : > { %6576 = vmatpush.msrb.mxu3 %v13627_v17 }
 0xed3   : > { %6582 = vmatpush.msrb.mxu3 %v13628_v41 }
 0xed4   : > { %6342 = vmatmul.f32.vlgmr.msrb.gmra.mxu2 %v6288_v31  ;;  %6412 = vmatmul.f32.vlgmr.msra.gmra.mxu3 %v6287_v51  ;;  %v13649_v31 = vld [vmem:[#allocation29_spill] sm:$0xff] }
 0xed5   : > { %8700 = vmatpush.msk.msrb.mxu2 %vm13524_vm10, %v13179_v61  ;;  %6588 = vmatpush.msrb.mxu3 %v13629_v27 }
 0xed7   : > { %8701 = vmatpush.msk.msrb.mxu2 %vm9295_vm15, %v13179_v61  ;;  %6594 = vmatpush.msrb.mxu3 %v13630_v6 }
 0xed9   : > { %8702 = vmatpush.msk.msrb.mxu2 %vm9312_vm0, %v13179_v61  ;;  %6600 = vmatpush.msrb.mxu3 %v13631_v4 }
 0xedb   : > { %8703 = vmatpush.msk.msrb.mxu2 %vm9334_vm1, %v13179_v61  ;;  %6606 = vmatpush.msrb.mxu3 %v13632_v25 }
 0xedc   : > { %6390 = vmatmul.f32.vlgmr.msra.gmra.mxu2 %v6287_v51  ;;  %v13648_v51 = vld [vmem:[#allocation26_spill] sm:$0xff] }
 0xedd   : > { %8704 = vmatpush.msk.msrb.mxu2 %vm9355_vm3, %v13179_v61  ;;  %6612 = vmatpush.msrb.mxu3 %v13633_v33 }
 0xedf   : > { %8705 = vmatpush.msk.msrb.mxu2 %vm9376_vm4, %v13179_v61  ;;  %6618 = vmatpush.msrb.mxu3 %v13634_v62 }
 0xee1   : > { %8706 = vmatpush.msk.msrb.mxu2 %vm13635_vm5, %v13179_v61  ;;  %6624 = vmatpush.msrb.mxu3 %v13636_v60 }
 0xee3   : > { %8707 = vmatpush.msk.msrb.mxu2 %vm13599_vm9, %v13179_v61  ;;  %6630 = vmatpush.msrb.mxu3 %v13637_v53 }
 0xee5   : > { %8708 = vmatpush.msk.msrb.mxu2 %vm13602_vm2, %v13179_v61  ;;  %6636 = vmatpush.msrb.mxu3 %v13638_v29 }
 0xee7   : > { %8709 = vmatpush.msk.msrb.mxu2 %vm13525_vm12, %v13179_v61  ;;  %6642 = vmatpush.msrb.mxu3 %v13639_v54 }
 0xee9   : > { %8710 = vmatpush.msk.msrb.mxu2 %vm13607_vm14, %v13179_v61  ;;  %6648 = vmatpush.msrb.mxu3 %v13640_v56 }
 0xeeb   : > { %8711 = vmatpush.msk.msrb.mxu2 %vm13563_vm13, %v13179_v61  ;;  %6654 = vmatpush.msrb.mxu3 %v13641_v37 }
 0xeed   : > { %8732 = vmatpush.msk.msra.mxu3 %vm13524_vm10, %v13179_v61  ;;  %8712 = vmatpush.msk.msrb.mxu2 %vm13566_vm8, %v13179_v61  ;;  %vm13642_vm10 = vnez %v13617_v18 }
 0xeef   : > { %8733 = vmatpush.msk.msra.mxu3 %vm9295_vm15, %v13179_v61  ;;  %8713 = vmatpush.msk.msrb.mxu2 %vm13569_vm6, %v13179_v61 }
 0xef1   : > { %8734 = vmatpush.msk.msra.mxu3 %vm9312_vm0, %v13179_v61  ;;  %8714 = vmatpush.msk.msrb.mxu2 %vm13572_vm11, %v13179_v61 }
 0xef3   : > { %8735 = vmatpush.msk.msra.mxu3 %vm9334_vm1, %v13179_v61  ;;  %8715 = vmatpush.msk.msrb.mxu2 %vm13642_vm10, %v13179_v61 }
 0xef5   : > { %6861 = vmatpush.msra.mxu2 %v13643_v38  ;;  %8736 = vmatpush.msk.msra.mxu3 %vm9355_vm3, %v13179_v61 }
 0xef7   : > { %6865 = vmatpush.msra.mxu2 %v13644_v1  ;;  %8737 = vmatpush.msk.msra.mxu3 %vm9376_vm4, %v13179_v61 }
 0xef9   : > { %6869 = vmatpush.msra.mxu2 %v13645_v35  ;;  %8738 = vmatpush.msk.msra.mxu3 %vm13635_vm5, %v13179_v61 }
 0xefb   : > { %6873 = vmatpush.msra.mxu2 %v13646_v55  ;;  %8739 = vmatpush.msk.msra.mxu3 %vm13599_vm9, %v13179_v61 }
 0xefd   : > { %6877 = vmatpush.msra.mxu2 %v13647_v45  ;;  %8740 = vmatpush.msk.msra.mxu3 %vm13602_vm2, %v13179_v61 }
 0xeff   : > { %6881 = vmatpush.msra.mxu2 %v13648_v51  ;;  %8741 = vmatpush.msk.msra.mxu3 %vm13525_vm12, %v13179_v61 }
 0xf01   : > { %6885 = vmatpush.msra.mxu2 %v13649_v31  ;;  %8742 = vmatpush.msk.msra.mxu3 %vm13607_vm14, %v13179_v61 }
 0xf03   : > { %6889 = vmatpush.msra.mxu2 %v13650_v46  ;;  %8743 = vmatpush.msk.msra.mxu3 %vm13563_vm13, %v13179_v61 }
 0xf05   : > { %6893 = vmatpush.msra.mxu2 %v13651_v23  ;;  %8744 = vmatpush.msk.msra.mxu3 %vm13566_vm8, %v13179_v61  ;;  %v13656_v23 = vld [vmem:[#allocation62_spill] sm:$0xff] }
 0xf07   : > { %6897 = vmatpush.msra.mxu2 %v13652_v42  ;;  %8745 = vmatpush.msk.msra.mxu3 %vm13569_vm6, %v13179_v61  ;;  %v13657_v42 = vld [vmem:[#allocation65_spill] sm:$0xff] }
 0xf09   : > { %6901 = vmatpush.msra.mxu2 %v13653_v63  ;;  %8746 = vmatpush.msk.msra.mxu3 %vm13572_vm11, %v13179_v61 }
 0xf0b   : > { %6905 = vmatpush.msra.mxu2 %v13654_v12  ;;  %8747 = vmatpush.msk.msra.mxu3 %vm13642_vm10, %v13179_v61 }
 0xf0d   : > { %6909 = vmatpush.msra.mxu2 %v13655_v39 }
 0xf0f   : > { %6913 = vmatpush.msra.mxu2 %v13656_v23 }
 0xf11   : > { %6917 = vmatpush.msra.mxu2 %v13657_v42 }
 0xf13   : > { %6921 = vmatpush.msra.mxu2 %v13658_v36 }
 0xf47   : > { %v6319_v47 = vpop.f32.mrf.mxu3 }
 0xf4f   : > { %v6293_v63 = vpop.f32.mrf.mxu2  ;;  %v6367_v22 = vpop.f32.mrf.mxu3 }
 0xf50   : > { %v6320_v52 = vadd.f32 %v6319_v47, %v6293_v63 }
 0xf57   : > { %v6343_v46 = vpop.f32.mrf.mxu2  ;;  %v6413_v28 = vpop.f32.mrf.mxu3 }
 0xf58   : > { %v6344_v31 = vadd.f32 %v6343_v46, %v6320_v52  ;;  %v8693_v46 = vld [vmem:[%s9249_s24 + $0x48] sm:$0xff] }
 0xf5a   : > { %v6368_v10 = vadd.f32 %v6367_v22, %v6344_v31  ;;  %v8692_v31 = vld [vmem:[%s9249_s24 + $0x40] sm:$0xff] }
 0xf5f   : > { %v6391_v12 = vpop.f32.mrf.mxu2 }
 0xf60   : > { %v6392_v5 = vadd.f32 %v6391_v12, %v6368_v10 }
 0xf62   : > { %v6414_v51 = vadd.f32 %v6413_v28, %v6392_v5 }
 0xf64   : > { %v6416_v49 = vadd.f32 1e-06, %v6414_v51  ;;  %v6428_v45 = vadd.f32 1.0, %v6414_v51 }
 0xf66   : > { %8973 = vrsqrt.f32 %v6416_v49  ;;  %v6440_v52 = vand.u32 2147483648, %v6428_v45  ;;  %vm6434_vm6 = vweird.f32 %v6428_v45  ;;  %v6438_v28 = vand.u32 2147483647, %v6428_v45 }
 0xf67   : > { %8975 = vrcp.f32 %v6428_v45  ;;  %vm6423_vm8 = vweird.f32 %v6416_v49 }
 0xf68   : > { %v6441_v12 = vor.u32 1.1754944e-38, %v6440_v52  ;;  %vm6439_vm12 = vcmp.eq.f32.partialorder %v6438_v28, 8.507059e+37 }
 0xf6c   : > { %v8974_v23 = vpop.eup %8973 }
 0xf6d   : > { %v8976_v39 = vpop.eup %8975  ;;  %v6418_v42 = vmul.f32 %v8974_v23, %v6416_v49  ;;  %vm6424_vm11 = vweird.f32 %v8974_v23 }
 0xf6e   : > { %v6430_v44 = vmul.f32 %v8976_v39, %v6428_v45  ;;  %vm6435_vm10 = vweird.f32 %v8976_v39  ;;  %vm6425_vm14 = vmor %vm6423_vm8, %vm6424_vm11  ;;  %vm13662_vm8 = vnez %v13609_v0  ;;  %vm13664_vm11 = vnez %v13613_v50 }
 0xf6f   : > { %v6419_v36 = vmul.f32 %v8974_v23, %v6418_v42  ;;  %vm6436_vm13 = vmor %vm6434_vm6, %vm6435_vm10  ;;  %vm13659_vm10 = vnez %v13094_v13  ;;  %vm13663_vm6 = vnez %v13611_v3 }
 0xf70   : > { %v6431_v59 = vsub.f32 1.0, %v6430_v44 }
 0xf71   : > { %v6420_v9 = vmul.f32 0.5, %v6419_v36 }
 0xf72   : > { %v6432_v55 = vmul.f32 %v8976_v39, %v6431_v59 }
 0xf73   : > { %v6421_v63 = vsub.f32 1.5, %v6420_v9 }
 0xf74   : > { %v6433_v10 = vadd.f32 %v8976_v39, %v6432_v55 }
 0xf75   : > { %v6422_v5 = vmul.f32 %v8974_v23, %v6421_v63 }
 0xf76   : > { %v6437_v22 = vsel %vm6436_vm13, %v8976_v39, %v6433_v10  ;;  %v8694_v39 = vld [vmem:[%s9249_s24 + $0x50] sm:$0xff]  ;;  %vm13661_vm13 = vnez %v13606_v16 }
 0xf77   : > { %v6426_v47 = vsel %vm6425_vm14, %v8974_v23, %v6422_v5  ;;  %v6442_v59 = vsel %vm6439_vm12, %v6441_v12, %v6437_v22  ;;  %vm13660_vm12 = vnez %v13604_v43  ;;  %vm13665_vm14 = vnez %v13615_v57 }
 0xf78   : > { %v6427_v44 = vmul.f32 %v6426_v47, %v6414_v51  ;;  %v8695_v47 = vld [vmem:[%s9249_s24 + $0x58] sm:$0xff] }
 0xf7a   : > { %v6443_v36 = vmul.f32 %v6442_v59, %v6427_v44 }
 0xf7c   : > { %v6444_v9 = vmul.f32 %v6443_v36, %v12069_v40 }
 0xf7e   : > { %v12281_v55 = vperm.slane %v6444_v9, 0 }
 0xf80   : > { %v6454_v45 = vmul.f32 %v8692_v31, %v12281_v55  ;;  %v6455_v49 = vmul.f32 %v8693_v46, %v12281_v55  ;;  %v6456_v52 = vmul.f32 %v8694_v39, %v12281_v55  ;;  %v6457_v59 = vmul.f32 %v8695_v47, %v12281_v55  ;;  %v8696_v46 = vld [vmem:[%s9249_s24 + $0x60] sm:$0xff] }
 0xf81   : > { %v6458_v39 = vmul.f32 %v8696_v46, %v12281_v55 }
 0xf82   : > { %v12285_v42 = vand.u32 4294901760, %v6454_v45  ;;  %v12287_v63 = vand.u32 4294901760, %v6455_v49  ;;  %v12301_v22 = vand.u32 4294901760, %v6456_v52  ;;  %v12308_v31 = vand.u32 4294901760, %v6457_v59 }
 0xf84   : > { %6656 = vmatmul.f32.vlgmr.msrb.gmra.mxu3 %v12285_v42  ;;  %v6495_v51 = vsub.f32 %v6454_v45, %v12285_v42  ;;  %v6503_v23 = vsub.f32 %v6455_v49, %v12287_v63  ;;  %v6511_v44 = vsub.f32 %v6456_v52, %v12301_v22  ;;  %v6519_v49 = vsub.f32 %v6457_v59, %v12308_v31  ;;  %v8697_v52 = vld [vmem:[%s9249_s24 + $0x68] sm:$0xff]  ;;  %v8698_v59 = vld [vmem:[%s9249_s24 + $0x70] sm:$0xff] }
 0xf85   : > { %8749 = vmatpush.msk.msrb.mxu3 %vm13591_vm7, %v13179_v61  ;;  %v6460_v46 = vmul.f32 %v8698_v59, %v12281_v55 }
 0xf86   : > { %6738 = vmatmul.f32.vlgmr.msrb.gmra.mxu0 %v6495_v51  ;;  %v6496_v40 = vand.u32 4294901760, %v6495_v51  ;;  %v6504_v5 = vand.u32 4294901760, %v6503_v23  ;;  %v6512_v9 = vand.u32 4294901760, %v6511_v44 }
 0xf87   : > { %7531 = vmatpush.msrb.mxu0 %v13624_v48 }
 0xf88   : > { %6812 = vmatmul.f32.vlgmr.msrb.gmra.mxu1 %v6496_v40  ;;  %v6497_v10 = vsub.f32 %v6495_v51, %v6496_v40  ;;  %v6505_v12 = vsub.f32 %v6503_v23, %v6504_v5  ;;  %v6513_v45 = vsub.f32 %v6511_v44, %v6512_v9  ;;  %v6520_v40 = vand.u32 4294901760, %v6519_v49 }
 0xf89   : > { %8750 = vmatpush.msk.msrb.mxu1 %vm13591_vm7, %v13179_v61  ;;  %vm13666_vm7 = vnez %v13617_v18 }
 0xf8a   : > { %v6498_v28 = vand.u32 4294901760, %v6497_v10  ;;  %v6506_v36 = vand.u32 4294901760, %v6505_v12  ;;  %v6514_v51 = vand.u32 4294901760, %v6513_v45  ;;  %v6521_v10 = vsub.f32 %v6519_v49, %v6520_v40 }
 0xf8c   : > { %6499 = vmatmul.f32.vlgmr.msrb.gmra.mxu2 %v6498_v28  ;;  %6660 = vmatmul.f32.gmra.mxu3 %v12287_v63  ;;  %v6522_v47 = vand.u32 4294901760, %v6521_v10 }
 0xf8d   : > { %7405 = vmatpush.msrb.mxu2 %v13518_v8 }
 0xf8e   : > { %6743 = vmatmul.f32.gmra.mxu0 %v6503_v23  ;;  %v12314_v23 = vand.u32 4294901760, %v6458_v39 }
 0xf90   : > { %6818 = vmatmul.f32.gmra.mxu1 %v6504_v5  ;;  %v6527_v28 = vsub.f32 %v6458_v39, %v12314_v23  ;;  %v6459_v5 = vmul.f32 %v8697_v52, %v12281_v55  ;;  %v12326_v39 = vand.u32 4294901760, %v6460_v46 }
 0xf92   : > { %v6528_v12 = vand.u32 4294901760, %v6527_v28  ;;  %v6543_v52 = vsub.f32 %v6460_v46, %v12326_v39 }
 0xf94   : > { %6507 = vmatmul.f32.gmra.mxu2 %v6506_v36  ;;  %6664 = vmatmul.f32.gmra.mxu3 %v12301_v22  ;;  %v6529_v36 = vsub.f32 %v6527_v28, %v6528_v12 }
 0xf96   : > { %6748 = vmatmul.f32.gmra.mxu0 %v6511_v44  ;;  %v12320_v44 = vand.u32 4294901760, %v6459_v5  ;;  %v6530_v45 = vand.u32 4294901760, %v6529_v36 }
 0xf98   : > { %6824 = vmatmul.f32.gmra.mxu1 %v6512_v9  ;;  %v6535_v9 = vsub.f32 %v6459_v5, %v12320_v44  ;;  %v6544_v5 = vand.u32 4294901760, %v6543_v52 }
 0xf9c   : > { %6515 = vmatmul.f32.gmra.mxu2 %v6514_v51  ;;  %6668 = vmatmul.f32.gmra.mxu3 %v12308_v31  ;;  %v8699_v51 = vld [vmem:[%s9249_s24 + $0x78] sm:$0xff] }
 0xf9d   : > { %v6461_v10 = vmul.f32 %v8699_v51, %v12281_v55 }
 0xf9e   : > { %6753 = vmatmul.f32.gmra.mxu0 %v6519_v49  ;;  %v6536_v49 = vand.u32 4294901760, %v6535_v9 }
 0xfa0   : > { %6830 = vmatmul.f32.gmra.mxu1 %v6520_v40  ;;  %v6537_v40 = vsub.f32 %v6535_v9, %v6536_v49 }
 0xfa4   : > { %6523 = vmatmul.f32.gmra.mxu2 %v6522_v47  ;;  %6672 = vmatmul.f32.gmra.mxu3 %v12314_v23  ;;  %v6550_v47 = vand.u32 4294901760, %v6461_v10 }
 0xfa6   : > { %6758 = vmatmul.f32.gmra.mxu0 %v6527_v28  ;;  %v6538_v28 = vand.u32 4294901760, %v6537_v40  ;;  %v6551_v59 = vsub.f32 %v6461_v10, %v6550_v47 }
 0xfa8   : > { %6836 = vmatmul.f32.gmra.mxu1 %v6528_v12  ;;  %v6545_v12 = vsub.f32 %v6543_v52, %v6544_v5 }
 0xfaa   : > { %v6546_v36 = vand.u32 4294901760, %v6545_v12  ;;  %v7020_v12 = vld [vmem:[#allocation2 + $0x40] sm:$0xff] }
 0xfac   : > { %6531 = vmatmul.f32.gmra.mxu2 %v6530_v45  ;;  %6676 = vmatmul.f32.gmra.mxu3 %v12320_v44  ;;  %v6552_v45 = vand.u32 4294901760, %v6551_v59 }
 0xfae   : > { %6763 = vmatmul.f32.gmra.mxu0 %v6535_v9  ;;  %v6553_v9 = vsub.f32 %v6551_v59, %v6552_v45 }
 0xfb0   : > { %6842 = vmatmul.f32.gmra.mxu1 %v6536_v49  ;;  %v6554_v46 = vand.u32 4294901760, %v6553_v9 }
 0xfb4   : > { %6539 = vmatmul.f32.gmra.mxu2 %v6538_v28  ;;  %6680 = vmatmul.f32.gmra.mxu3 %v12326_v39 }
 0xfb6   : > { %6768 = vmatmul.f32.gmra.mxu0 %v6543_v52 }
 0xfb8   : > { %6848 = vmatmul.f32.gmra.mxu1 %v6544_v5 }
 0xfbc   : > { %6547 = vmatmul.f32.gmra.mxu2 %v6546_v36  ;;  %6684 = vmatmul.f32.gmra.mxu3 %v6550_v47 }
 0xfbe   : > { %6773 = vmatmul.f32.gmra.mxu0 %v6551_v59 }
 0xfc0   : > { %6854 = vmatmul.f32.gmra.mxu1 %v6552_v45 }
 0xfc4   : > { %6555 = vmatmul.f32.gmra.mxu2 %v6554_v46  ;;  %6988 = vmatmul.f32.vlgmr.msra.gmra.mxu3 %v12285_v42 }
 0xfc5   : > { %7684 = vmatpush.msra.mxu3 %v13625_v58 }
 0xfc7   : > { %7690 = vmatpush.msra.mxu3 %v13626_v34 }
 0xfc9   : > { %7696 = vmatpush.msra.mxu3 %v13627_v17 }
 0xfcb   : > { %7702 = vmatpush.msra.mxu3 %v13628_v41 }
 0xfcc   : > { %6923 = vmatmul.f32.vlgmr.msra.gmra.mxu2 %v12285_v42  ;;  %6992 = vmatmul.f32.gmra.mxu3 %v12287_v63 }
 0xfcd   : > { %8751 = vmatpush.msk.msra.mxu2 %vm13659_vm10, %v13179_v61  ;;  %7708 = vmatpush.msra.mxu3 %v13629_v27 }
 0xfcf   : > { %8752 = vmatpush.msk.msra.mxu2 %vm9295_vm15, %v13179_v61  ;;  %7714 = vmatpush.msra.mxu3 %v13630_v6 }
 0xfd1   : > { %8753 = vmatpush.msk.msra.mxu2 %vm9312_vm0, %v13179_v61  ;;  %7720 = vmatpush.msra.mxu3 %v13631_v4 }
 0xfd3   : > { %8754 = vmatpush.msk.msra.mxu2 %vm9334_vm1, %v13179_v61  ;;  %7726 = vmatpush.msra.mxu3 %v13632_v25 }
 0xfd4   : > { %6927 = vmatmul.f32.gmra.mxu2 %v12287_v63  ;;  %6996 = vmatmul.f32.gmra.mxu3 %v12301_v22 }
 0xfd5   : > { %8755 = vmatpush.msk.msra.mxu2 %vm9355_vm3, %v13179_v61  ;;  %7732 = vmatpush.msra.mxu3 %v13633_v33 }
 0xfd7   : > { %8756 = vmatpush.msk.msra.mxu2 %vm9376_vm4, %v13179_v61  ;;  %7738 = vmatpush.msra.mxu3 %v13634_v62 }
 0xfd9   : > { %8757 = vmatpush.msk.msra.mxu2 %vm13635_vm5, %v13179_v61  ;;  %7744 = vmatpush.msra.mxu3 %v13636_v60 }
 0xfdb   : > { %8758 = vmatpush.msk.msra.mxu2 %vm13599_vm9, %v13179_v61  ;;  %7750 = vmatpush.msra.mxu3 %v13637_v53 }
 0xfdc   : > { %6931 = vmatmul.f32.gmra.mxu2 %v12301_v22  ;;  %7000 = vmatmul.f32.gmra.mxu3 %v12308_v31 }
 0xfdd   : > { %8759 = vmatpush.msk.msra.mxu2 %vm13602_vm2, %v13179_v61  ;;  %7756 = vmatpush.msra.mxu3 %v13638_v29 }
 0xfdf   : > { %8760 = vmatpush.msk.msra.mxu2 %vm13660_vm12, %v13179_v61  ;;  %7762 = vmatpush.msra.mxu3 %v13639_v54 }
 0xfe1   : > { %8761 = vmatpush.msk.msra.mxu2 %vm13661_vm13, %v13179_v61  ;;  %7768 = vmatpush.msra.mxu3 %v13640_v56  ;;  %vm13676_vm13 = vcmask 64512  }
 0xfe3   : > { %8762 = vmatpush.msk.msra.mxu2 %vm13662_vm8, %v13179_v61  ;;  %7774 = vmatpush.msra.mxu3 %v13641_v37 }
 0xfe4   : > { %6935 = vmatmul.f32.gmra.mxu2 %v12308_v31  ;;  %7004 = vmatmul.f32.gmra.mxu3 %v12314_v23 }
 0xfe5   : > { %8763 = vmatpush.msk.msra.mxu2 %vm13663_vm6, %v13179_v61 }
 0xfe7   : > { %8764 = vmatpush.msk.msra.mxu2 %vm13664_vm11, %v13179_v61 }
 0xfe9   : > { %8765 = vmatpush.msk.msra.mxu2 %vm13665_vm14, %v13179_v61 }
 0xfeb   : > { %8766 = vmatpush.msk.msra.mxu2 %vm13666_vm7, %v13179_v61  ;;  %vm13667_vm7 = vcmask 64512  }
 0xfec   : > { %6939 = vmatmul.f32.gmra.mxu2 %v12314_v23  ;;  %7008 = vmatmul.f32.gmra.mxu3 %v12320_v44  ;;  %vm13668_vm14 = vmmov %vm13667_vm7 }
 0xfed   : > { %vm13674_vm11 = vmmov %vm13667_vm7 }
 0xff4   : > { %6943 = vmatmul.f32.gmra.mxu2 %v12320_v44  ;;  %7012 = vmatmul.f32.gmra.mxu3 %v12326_v39 }
 0xffc   : > { %6947 = vmatmul.f32.gmra.mxu2 %v12326_v39  ;;  %7016 = vmatmul.f32.gmra.mxu3 %v6550_v47 }
0x1003   : > { %v6739_v54 = vpop.f32.mrf.mxu0 }
0x1004   : > { %6951 = vmatmul.f32.gmra.mxu2 %v6550_v47 }
0x1005   : > { %v6813_v56 = vpop.f32.mrf.mxu1 }
0x1007   : > { %v6657_v58 = vpop.f32.mrf.mxu3 }
0x100b   : > { %v6744_v42 = vpop.f32.mrf.mxu0 }
0x100d   : > { %v6819_v23 = vpop.f32.mrf.mxu1 }
0x100f   : > { %v6500_v34 = vpop.f32.mrf.mxu2  ;;  %v6661_v17 = vpop.f32.mrf.mxu3 }
0x1010   : > { %v6658_v63 = vadd.f32 %v6657_v58, %v6500_v34 }
0x1012   : > { %v6740_v44 = vadd.f32 %v6739_v54, %v6658_v63 }
0x1013   : > { %v6749_v49 = vpop.f32.mrf.mxu0 }
0x1014   : > { %v6814_v51 = vadd.f32 %v6813_v56, %v6740_v44  ;;  %v7021_v56 = vld [vmem:[#allocation2 + $0x48] sm:$0xff] }
0x1015   : > { %v6825_v47 = vpop.f32.mrf.mxu1 }
0x1017   : > { %v6508_v41 = vpop.f32.mrf.mxu2  ;;  %v6665_v27 = vpop.f32.mrf.mxu3 }
0x1018   : > { %v6662_v39 = vadd.f32 %v6661_v17, %v6508_v41 }
0x101a   : > { %v6745_v28 = vadd.f32 %v6744_v42, %v6662_v39 }
0x101b   : > { %v6754_v17 = vpop.f32.mrf.mxu0 }
0x101c   : > { %v6820_v45 = vadd.f32 %v6819_v23, %v6745_v28  ;;  %v7022_v28 = vld [vmem:[#allocation2 + $0x50] sm:$0xff] }
0x101d   : > { %v6831_v42 = vpop.f32.mrf.mxu1 }
0x101f   : > { %v6516_v6 = vpop.f32.mrf.mxu2  ;;  %v6669_v4 = vpop.f32.mrf.mxu3 }
0x1020   : > { %v6666_v36 = vadd.f32 %v6665_v27, %v6516_v6 }
0x1022   : > { %v6750_v41 = vadd.f32 %v6749_v49, %v6666_v36 }
0x1024   : > { %v6826_v44 = vadd.f32 %v6825_v47, %v6750_v41 }
0x1027   : > { %v6524_v25 = vpop.f32.mrf.mxu2  ;;  %v6673_v33 = vpop.f32.mrf.mxu3 }
0x102f   : > { %v6532_v62 = vpop.f32.mrf.mxu2  ;;  %v6677_v60 = vpop.f32.mrf.mxu3 }
0x1030   : > { %v6674_v49 = vadd.f32 %v6673_v33, %v6532_v62 }
0x1037   : > { %v6540_v53 = vpop.f32.mrf.mxu2  ;;  %v12411_v29 = vpop.f32.mrf.mxu3 }
0x103f   : > { %v12413_v37 = vpop.f32.mrf.mxu2  ;;  %v12415_v55 = vpop.f32.mrf.mxu3 }
0x1047   : > { %v12417_v22 = vpop.f32.mrf.mxu2  ;;  %v6989_v31 = vpop.f32.mrf.mxu3 }
0x104f   : > { %v6924_v40 = vpop.f32.mrf.mxu2  ;;  %v6993_v52 = vpop.f32.mrf.mxu3 }
0x1050   : > { %v6925_v10 = vadd.f32 %v6924_v40, %v6814_v51 }
0x1052   : > { %v6990_v5 = vadd.f32 %v6989_v31, %v6925_v10  ;;  %v6670_v31 = vadd.f32 %v6669_v4, %v6524_v25  ;;  %v6759_v10 = vpop.f32.mrf.mxu0  ;;  %v6837_v4 = vpop.f32.mrf.mxu1 }
0x1053   : > { %v6760_v36 = vadd.f32 %v6759_v10, %v6674_v49 }
0x1054   : > { %v12419_v59 = vadd.f32 %v7020_v12, %v6990_v5  ;;  %v6755_v51 = vadd.f32 %v6754_v17, %v6670_v31  ;;  %v6678_v17 = vadd.f32 %v6677_v60, %v6540_v53 }
0x1055   : > { %v6838_v41 = vadd.f32 %v6837_v4, %v6760_v36  ;;  %v6686_v4 = vadd.f32 %v12415_v55, %v12417_v22 }
0x1056   : > { %v7036_v9 = vsel %vm13667_vm7, %v12419_v59, -inf }
0x1057   : > { %v6928_v46 = vpop.f32.mrf.mxu2  ;;  %v6997_v58 = vpop.f32.mrf.mxu3  ;;  %7037 = vmax.xlane.f32.xlu0 %v7036_v9 }
0x1058   : > { %v6929_v34 = vadd.f32 %v6928_v46, %v6820_v45  ;;  %v7023_v46 = vld [vmem:[#allocation2 + $0x58] sm:$0xff] }
0x105a   : > { %v6994_v54 = vadd.f32 %v6993_v52, %v6929_v34  ;;  %v6832_v52 = vadd.f32 %v6831_v42, %v6755_v51 }
0x105c   : > { %v12423_v63 = vadd.f32 %v7021_v56, %v6994_v54  ;;  %v6843_v56 = vpop.f32.mrf.mxu1 }
0x105e   : > { %v7039_v27 = vsel %vm13668_vm14, %v12423_v63, -inf  ;;  %vm13669_vm14 = vmmov %vm13667_vm7 }
0x105f   : > { %v6932_v6 = vpop.f32.mrf.mxu2  ;;  %7040 = vmax.xlane.f32.xlu1 %v7039_v27  ;;  %v7001_v39 = vpop.f32.mrf.mxu3 }
0x1060   : > { %v6933_v23 = vadd.f32 %v6932_v6, %v6826_v44  ;;  %v7024_v44 = vld [vmem:[#allocation2 + $0x60] sm:$0xff] }
0x1062   : > { %v6998_v40 = vadd.f32 %v6997_v58, %v6933_v23  ;;  %v6764_v58 = vpop.f32.mrf.mxu0  ;;  %v6682_v23 = vadd.f32 %v12411_v29, %v12413_v37 }
0x1063   : > { %v6765_v42 = vadd.f32 %v6764_v58, %v6678_v17  ;;  %v7026_v58 = vld [vmem:[#allocation2 + $0x70] sm:$0xff] }
0x1064   : > { %v12427_v5 = vadd.f32 %v7022_v28, %v6998_v40  ;;  %v6849_v49 = vpop.f32.mrf.mxu1 }
0x1066   : > { %v7042_v12 = vsel %vm13667_vm7, %v12427_v5, -inf }
0x1067   : > { %v6936_v25 = vpop.f32.mrf.mxu2  ;;  %7043 = vmax.xlane.f32.xlu2 %v7042_v12  ;;  %v7005_v9 = vpop.f32.mrf.mxu3 }
0x1068   : > { %v6937_v47 = vadd.f32 %v6936_v25, %v6832_v52  ;;  %v7025_v52 = vld [vmem:[#allocation2 + $0x68] sm:$0xff] }
0x106a   : > { %v7002_v45 = vadd.f32 %v7001_v39, %v6937_v47  ;;  %v6844_v39 = vadd.f32 %v6843_v56, %v6765_v42  ;;  %v6769_v53 = vpop.f32.mrf.mxu0  ;;  %v7027_v42 = vld [vmem:[#allocation2 + $0x78] sm:$0xff] }
0x106b   : > { %v6770_v10 = vadd.f32 %v6769_v53, %v6682_v23 }
0x106c   : > { %v12431_v34 = vadd.f32 %v7023_v46, %v7002_v45 }
0x106d   : > { %v6850_v25 = vadd.f32 %v6849_v49, %v6770_v10 }
0x106e   : > { %v7045_v33 = vsel %vm13669_vm14, %v12431_v34, -inf  ;;  %vm13670_vm14 = vmmov %vm13667_vm7 }
0x106f   : > { %v6940_v62 = vpop.f32.mrf.mxu2  ;;  %7046 = vmax.xlane.f32.xlu0 %v7045_v33  ;;  %v7009_v6 = vpop.f32.mrf.mxu3 }
0x1070   : > { %v6941_v54 = vadd.f32 %v6940_v62, %v6838_v41  ;;  %v6855_v41 = vpop.f32.mrf.mxu1 }
0x1072   : > { %v7006_v31 = vadd.f32 %v7005_v9, %v6941_v54  ;;  %v6774_v45 = vpop.f32.mrf.mxu0 }
0x1073   : > { %v6775_v9 = vadd.f32 %v6774_v45, %v6686_v4 }
0x1074   : > { %v12435_v27 = vadd.f32 %v7024_v44, %v7006_v31 }
0x1075   : > { %v6856_v33 = vadd.f32 %v6855_v41, %v6775_v9 }
0x1076   : > { %v7048_v60 = vsel %vm13667_vm7, %v12435_v27, -inf }
0x1077   : > { %v6944_v51 = vpop.f32.mrf.mxu2  ;;  %7049 = vmax.xlane.f32.xlu1 %v7048_v60  ;;  %v7013_v29 = vpop.f32.mrf.mxu3 }
0x1078   : > { %v6945_v40 = vadd.f32 %v6944_v51, %v6844_v39 }
0x107a   : > { %v7010_v28 = vadd.f32 %v7009_v6, %v6945_v40 }
0x107c   : > { %v7033_v12 = vadd.f32 %v7025_v52, %v7010_v28 }
0x107e   : > { %v7051_v47 = vsel %vm13670_vm14, %v7033_v12, -inf  ;;  %vm13671_vm14 = vmmov %vm13667_vm7 }
0x107f   : > { %v6948_v37 = vpop.f32.mrf.mxu2  ;;  %7052 = vmax.xlane.f32.xlu2 %v7051_v47  ;;  %v7017_v55 = vpop.f32.mrf.mxu3 }
0x1080   : > { %v6949_v36 = vadd.f32 %v6948_v37, %v6850_v25 }
0x1082   : > { %v7014_v46 = vadd.f32 %v7013_v29, %v6949_v36 }
0x1084   : > { %v7034_v17 = vadd.f32 %v7026_v58, %v7014_v46 }
0x1086   : > { %v7054_v62 = vsel %vm13667_vm7, %v7034_v17, -inf }
0x1087   : > { %v6952_v54 = vpop.f32.mrf.mxu2  ;;  %7055 = vmax.xlane.f32.xlu0 %v7054_v62 }
0x1088   : > { %v6953_v56 = vadd.f32 %v6952_v54, %v6856_v33 }
0x108a   : > { %v7018_v22 = vadd.f32 %v7017_v55, %v6953_v56 }
0x108c   : > { %v7035_v31 = vadd.f32 %v7027_v42, %v7018_v22 }
0x108e   : > { %v7057_v44 = vsel %vm13671_vm14, %v7035_v31, -inf  ;;  %vm13672_vm14 = vmmov %vm13667_vm7 }
0x108f   : > { %7058 = vmax.xlane.f32.xlu2 %v7057_v44 }
0x10ca   : > { %v7038_v6 = vpop.xlane.xlu0 %7037 }
0x10cb   : > { %v7060_v23 = vsub.f32 %v12419_v59, %v7038_v6 }
0x10cd   : > { %v7068_v39 = vmul.f32 1.442695, %v7060_v23 }
0x10cf   : > { %8977 = vpow2.f32 %v7068_v39 }
0x10d2   : > { %v7041_v60 = vpop.xlane.xlu1 %7040 }
0x10d3   : > { %v7061_v53 = vsub.f32 %v12423_v63, %v7041_v60 }
0x10d5   : > { %v12448_v51 = vpop.eup %8977  ;;  %v7070_v40 = vmul.f32 1.442695, %v7061_v53 }
0x10d6   : > { %v7084_v10 = vsel %vm13667_vm7, %v12448_v51, 0.0 }
0x10d7   : > { %8979 = vpow2.f32 %v7070_v40  ;;  %7085 = vadd.xlane.f32.xlu1 %v7084_v10 }
0x10da   : > { %v7044_v28 = vpop.xlane.xlu2 %7043 }
0x10db   : > { %v7062_v49 = vsub.f32 %v12427_v5, %v7044_v28 }
0x10dd   : > { %v12453_v52 = vpop.eup %8979  ;;  %v7072_v4 = vmul.f32 1.442695, %v7062_v49 }
0x10de   : > { %v7087_v59 = vsel %vm13672_vm14, %v12453_v52, 0.0  ;;  %vm13673_vm14 = vmmov %vm13667_vm7 }
0x10df   : > { %8981 = vpow2.f32 %v7072_v4  ;;  %7088 = vadd.xlane.f32.xlu0 %v7087_v59 }
0x10e2   : > { %v7047_v63 = vpop.xlane.xlu0 %7046 }
0x10e3   : > { %v7063_v25 = vsub.f32 %v12431_v34, %v7047_v63 }
0x10e5   : > { %v12458_v47 = vpop.eup %8981  ;;  %v7074_v29 = vmul.f32 1.442695, %v7063_v25 }
0x10e6   : > { %v7090_v37 = vsel %vm13667_vm7, %v12458_v47, 0.0 }
0x10e7   : > { %8983 = vpow2.f32 %v7074_v29  ;;  %7091 = vadd.xlane.f32.xlu1 %v7090_v37 }
0x10ea   : > { %v7050_v5 = vpop.xlane.xlu1 %7049 }
0x10eb   : > { %v7064_v36 = vsub.f32 %v12435_v27, %v7050_v5 }
0x10ed   : > { %v12463_v45 = vpop.eup %8983  ;;  %v7076_v9 = vmul.f32 1.442695, %v7064_v36 }
0x10ee   : > { %v7093_v46 = vsel %vm13673_vm14, %v12463_v45, 0.0  ;;  %vm13675_vm14 = vmmov %vm13667_vm7 }
0x10ef   : > { %8985 = vpow2.f32 %v7076_v9  ;;  %7094 = vadd.xlane.f32.xlu2 %v7093_v46 }
0x10f2   : > { %v7053_v34 = vpop.xlane.xlu2 %7052 }
0x10f3   : > { %v7065_v58 = vsub.f32 %v7033_v12, %v7053_v34 }
0x10f5   : > { %v12467_v41 = vpop.eup %8985  ;;  %v7078_v33 = vmul.f32 1.442695, %v7065_v58 }
0x10f6   : > { %v7096_v62 = vsel %vm13667_vm7, %v12467_v41, 0.0 }
0x10f7   : > { %8987 = vpow2.f32 %v7078_v33  ;;  %7097 = vadd.xlane.f32.xlu0 %v7096_v62 }
0x10fa   : > { %v7056_v54 = vpop.xlane.xlu0 %7055 }
0x10fb   : > { %v7066_v27 = vsub.f32 %v7034_v17, %v7056_v54 }
0x10fd   : > { %v12471_v56 = vpop.eup %8987  ;;  %v7080_v55 = vmul.f32 1.442695, %v7066_v27 }
0x10fe   : > { %v7099_v22 = vsel %vm13674_vm11, %v12471_v56, 0.0 }
0x10ff   : > { %8989 = vpow2.f32 %v7080_v55  ;;  %7100 = vadd.xlane.f32.xlu1 %v7099_v22 }
0x1102   : > { %v7059_v42 = vpop.xlane.xlu2 %7058 }
0x1103   : > { %v7067_v12 = vsub.f32 %v7035_v31, %v7059_v42 }
0x1105   : > { %v12475_v44 = vpop.eup %8989  ;;  %v7082_v6 = vmul.f32 1.442695, %v7067_v12 }
0x1106   : > { %v7102_v23 = vsel %vm13675_vm14, %v12475_v44, 0.0 }
0x1107   : > { %8991 = vpow2.f32 %v7082_v6  ;;  %7103 = vadd.xlane.f32.xlu2 %v7102_v23 }
0x110d   : > { %v12479_v39 = vpop.eup %8991 }
0x110e   : > { %v7105_v17 = vsel %vm13667_vm7, %v12479_v39, 0.0 }
0x110f   : > { %7106 = vadd.xlane.f32.xlu0 %v7105_v17 }
0x114a   : > { %v7086_v60 = vpop.xlane.xlu1 %7085 }
0x114b   : > { %8993 = vrcp.f32 %v7086_v60  ;;  %v7119_v28 = vand.u32 2147483648, %v7086_v60  ;;  %v7117_v4 = vand.u32 2147483647, %v7086_v60  ;;  %vm7113_vm14 = vweird.f32 %v7086_v60 }
0x114d   : > { %v7120_v25 = vor.u32 1.1754944e-38, %v7119_v28  ;;  %vm7118_vm8 = vcmp.eq.f32.partialorder %v7117_v4, 8.507059e+37 }
0x1151   : > { %v8994_v53 = vpop.eup %8993 }
0x1152   : > { %v7109_v40 = vmul.f32 %v8994_v53, %v7086_v60  ;;  %v7089_v10 = vpop.xlane.xlu0 %7088  ;;  %vm7114_vm11 = vweird.f32 %v8994_v53 }
0x1153   : > { %8995 = vrcp.f32 %v7089_v10  ;;  %vm7115_vm6 = vmor %vm7113_vm14, %vm7114_vm11  ;;  %v7134_v34 = vand.u32 2147483648, %v7089_v10  ;;  %v7132_v33 = vand.u32 2147483647, %v7089_v10  ;;  %vm7128_vm11 = vweird.f32 %v7089_v10 }
0x1154   : > { %v7110_v31 = vsub.f32 1.0, %v7109_v40  ;;  %vm13677_vm14 = vcmask 64512  }
0x1155   : > { %v7135_v22 = vor.u32 1.1754944e-38, %v7134_v34 }
0x1156   : > { %v7111_v49 = vmul.f32 %v8994_v53, %v7110_v31 }
0x1158   : > { %v7112_v59 = vadd.f32 %v8994_v53, %v7111_v49 }
0x1159   : > { %v8996_v63 = vpop.eup %8995 }
0x115a   : > { %v7116_v29 = vsel %vm7115_vm6, %v8994_v53, %v7112_v59  ;;  %v7124_v37 = vmul.f32 %v8996_v63, %v7089_v10  ;;  %v7092_v5 = vpop.xlane.xlu1 %7091  ;;  %vm7129_vm7 = vweird.f32 %v8996_v63 }
0x115b   : > { %v7121_v36 = vsel %vm7118_vm8, %v7120_v25, %v7116_v29  ;;  %8997 = vrcp.f32 %v7092_v5  ;;  %vm7130_vm6 = vmor %vm7128_vm11, %vm7129_vm7  ;;  %vm7133_vm8 = vcmp.eq.f32.partialorder %v7132_v33, 8.507059e+37  ;;  %v7147_v40 = vand.u32 2147483647, %v7092_v5 }
0x115c   : > { %v7122_v9 = vmul.f32 %v12448_v51, %v7121_v36  ;;  %v7125_v46 = vsub.f32 1.0, %v7124_v37  ;;  %v7149_v10 = vand.u32 2147483648, %v7092_v5  ;;  %vm7143_vm7 = vweird.f32 %v7092_v5 }
0x115e   : > { %v7126_v58 = vmul.f32 %v8996_v63, %v7125_v46  ;;  %v7229_v62 = vsel %vm13676_vm13, %v7122_v9, 0 }
0x115f   : > { %v12485_v54 = vand.u32 4294901760, %v7229_v62 }
0x1160   : > { %v7127_v27 = vadd.f32 %v8996_v63, %v7126_v58  ;;  %v13679_v58 = vld [vmem:[#allocation19_spill] sm:$0xff] }
0x1161   : > { %v8998_v55 = vpop.eup %8997  ;;  %7356 = vmatmul.f32.vlgmr.msra.gmra.mxu1 %v12485_v54  ;;  %v7270_v42 = vsub.f32 %v7229_v62, %v12485_v54 }
0x1162   : > { %v7131_v12 = vsel %vm7130_vm6, %v8996_v63, %v7127_v27  ;;  %v7139_v51 = vmul.f32 %v8998_v55, %v7092_v5  ;;  %v12489_v6 = vpop.xlane.xlu2 %7094  ;;  %8767 = vmatpush.msk.msra.mxu1 %vm13659_vm10, %v13179_v61  ;;  %vm7144_vm13 = vweird.f32 %v8998_v55  ;;  %v7150_v63 = vor.u32 1.1754944e-38, %v7149_v10  ;;  %vm13678_vm6 = vmmov %vm13677_vm14  ;;  %v13680_v27 = vld [vmem:[#allocation15_spill] sm:$0xff] }
0x1163   : > { %v7136_v23 = vsel %vm7133_vm8, %v7135_v22, %v7131_v12  ;;  %8999 = vrcp.f32 %v12489_v6  ;;  %7408 = vmatmul.f32.vlgmr.msrb.gmra.mxu2 %v7270_v42  ;;  %v7271_v60 = vand.u32 4294901760, %v7270_v42  ;;  %vm7145_vm11 = vmor %vm7143_vm7, %vm7144_vm13  ;;  %v7162_v9 = vand.u32 2147483647, %v12489_v6  ;;  %v13681_v12 = vld [vmem:[#allocation18_spill] sm:$0xff] }
0x1164   : > { %v7140_v17 = vsub.f32 1.0, %v7139_v51  ;;  %v7137_v53 = vmul.f32 %v12453_v52, %v7136_v23  ;;  %8768 = vmatpush.msk.msra.mxu1 %vm9295_vm15, %v13179_v61  ;;  %7876 = vmatpush.msrb.mxu2 %v13643_v38  ;;  %v7164_v46 = vand.u32 2147483648, %v12489_v6  ;;  %vm13684_vm13 = vmmov %vm13678_vm6 }
0x1165   : > { %7467 = vmatmul.f32.vlgmr.msrb.gmra.mxu3 %v7271_v60  ;;  %v7272_v28 = vsub.f32 %v7270_v42, %v7271_v60  ;;  %v13682_v60 = vld [vmem:[#allocation20_spill] sm:$0xff] }
0x1166   : > { %v7141_v31 = vmul.f32 %v8998_v55, %v7140_v17  ;;  %v7232_v49 = vsel %vm13677_vm14, %v7137_v53, 0  ;;  %8769 = vmatpush.msk.msra.mxu1 %vm9312_vm0, %v13179_v61  ;;  %8783 = vmatpush.msk.msrb.mxu3 %vm13659_vm10, %v13179_v61  ;;  %vm7148_vm10 = vcmp.eq.f32.partialorder %v7147_v40, 8.507059e+37  ;;  %v7165_v62 = vor.u32 1.1754944e-38, %v7164_v46  ;;  %v13683_v53 = vld [vmem:[#allocation22_spill] sm:$0xff]  ;;  %v13691_v46 = vld [vmem:[#allocation39_spill] sm:$0xff] }
0x1167   : > { %v12504_v4 = vand.u32 4294901760, %v7232_v49  ;;  %7880 = vmatpush.msrb.mxu2 %v13644_v1  ;;  %v7273_v52 = vand.u32 4294901760, %v7272_v28  ;;  %vm13686_vm14 = vnez %v13606_v16 }
0x1168   : > { %v7142_v38 = vadd.f32 %v8998_v55, %v7141_v31  ;;  %8770 = vmatpush.msk.msra.mxu1 %vm9334_vm1, %v13179_v61  ;;  %8784 = vmatpush.msk.msrb.mxu3 %vm9295_vm15, %v13179_v61  ;;  %v13685_v31 = vld [vmem:[#allocation24_spill] sm:$0xff] }
0x1169   : > { %v9000_v59 = vpop.eup %8999  ;;  %7360 = vmatmul.f32.gmra.mxu1 %v12504_v4  ;;  %v7278_v25 = vsub.f32 %v7232_v49, %v12504_v4  ;;  %7274 = vmatmul.f32.vlgmr.msra.gmra.mxu0 %v7273_v52 }
0x116a   : > { %v7146_v13 = vsel %vm7145_vm11, %v8998_v55, %v7142_v38  ;;  %v7154_v1 = vmul.f32 %v9000_v59, %v12489_v6  ;;  %v12519_v29 = vpop.xlane.xlu0 %7097  ;;  %8771 = vmatpush.msk.msra.mxu1 %vm9355_vm3, %v13179_v61  ;;  %7782 = vmatpush.msra.mxu0 %v13553_v11  ;;  %vm7159_vm15 = vweird.f32 %v9000_v59  ;;  %v13687_v38 = vld [vmem:[#allocation26_spill] sm:$0xff]  ;;  %vm13690_vm11 = vnez %v13609_v0 }
0x116b   : > { %v7151_v37 = vsel %vm7148_vm10, %v7150_v63, %v7146_v13  ;;  %9001 = vrcp.f32 %v12519_v29  ;;  %7413 = vmatmul.f32.gmra.mxu2 %v7278_v25  ;;  %v7279_v15 = vand.u32 4294901760, %v7278_v25  ;;  %8785 = vmatpush.msk.msrb.mxu3 %vm9312_vm0, %v13179_v61  ;;  %vm7158_vm0 = vweird.f32 %v12489_v6  ;;  %vm13693_vm10 = vmmov %vm13678_vm6 }
0x116c   : > { %v7155_v5 = vsub.f32 1.0, %v7154_v1  ;;  %v7152_v36 = vmul.f32 %v12458_v47, %v7151_v37  ;;  %8772 = vmatpush.msk.msra.mxu1 %vm9376_vm4, %v13179_v61  ;;  %7785 = vmatpush.msra.mxu0 %v13592_v14  ;;  %vm7160_vm8 = vmor %vm7158_vm0, %vm7159_vm15  ;;  %v7177_v30 = vand.u32 2147483647, %v12519_v29  ;;  %v7179_v17 = vand.u32 2147483648, %v12519_v29  ;;  %v13689_v37 = vld [vmem:[#allocation37_spill] sm:$0xff] }
0x116d   : > { %7884 = vmatpush.msrb.mxu2 %v13645_v35  ;;  %7473 = vmatmul.f32.gmra.mxu3 %v7279_v15  ;;  %v7280_v47 = vsub.f32 %v7278_v25, %v7279_v15  ;;  %v13688_v25 = vld [vmem:[#allocation33_spill] sm:$0xff] }
0x116e   : > { %v7156_v11 = vmul.f32 %v9000_v59, %v7155_v5  ;;  %v7235_v34 = vsel %vm13678_vm6, %v7152_v36, 0  ;;  %8773 = vmatpush.msk.msra.mxu1 %vm13635_vm5, %v13179_v61  ;;  %7788 = vmatpush.msra.mxu0 %v13594_v20  ;;  %vm13696_vm6 = vnez %v13613_v50 }
0x116f   : > { %v12541_v21 = vand.u32 4294901760, %v7235_v34  ;;  %8786 = vmatpush.msk.msrb.mxu3 %vm9334_vm1, %v13179_v61  ;;  %v7281_v35 = vand.u32 4294901760, %v7280_v47  ;;  %7888 = vmatpush.msrb.mxu2 %v13679_v58  ;;  %vm7163_vm1 = vcmp.eq.f32.partialorder %v7162_v9, 8.507059e+37 }
0x1170   : > { %v7157_v14 = vadd.f32 %v9000_v59, %v7156_v11  ;;  %8774 = vmatpush.msk.msra.mxu1 %vm13599_vm9, %v13179_v61  ;;  %7791 = vmatpush.msra.mxu0 %v13680_v27  ;;  %v13692_v11 = vld [vmem:[#allocation29_spill] sm:$0xff] }
0x1171   : > { %v9002_v33 = vpop.eup %9001  ;;  %7364 = vmatmul.f32.gmra.mxu1 %v12541_v21  ;;  %v7286_v20 = vsub.f32 %v7235_v34, %v12541_v21  ;;  %7282 = vmatmul.f32.gmra.mxu0 %v7281_v35 }
0x1172   : > { %v7161_v26 = vsel %vm7160_vm8, %v9000_v59, %v7157_v14  ;;  %v7169_v55 = vmul.f32 %v9002_v33, %v12519_v29  ;;  %v12556_v22 = vpop.xlane.xlu1 %7100  ;;  %8787 = vmatpush.msk.msrb.mxu3 %vm9355_vm3, %v13179_v61  ;;  %7794 = vmatpush.msra.mxu0 %v13681_v12  ;;  %vm7174_vm3 = vweird.f32 %v9002_v33  ;;  %v7180_v59 = vor.u32 1.1754944e-38, %v7179_v17  ;;  %v13695_v14 = vld [vmem:[#allocation41_spill] sm:$0xff]  ;;  %v13701_v17 = vld [vmem:[#allocation58_spill] sm:$0xff] }
0x1173   : > { %v7166_v42 = vsel %vm7163_vm1, %v7165_v62, %v7161_v26  ;;  %9003 = vrcp.f32 %v12556_v22  ;;  %7418 = vmatmul.f32.gmra.mxu2 %v7286_v20  ;;  %v7287_v6 = vand.u32 4294901760, %v7286_v20  ;;  %8775 = vmatpush.msk.msra.mxu1 %vm13602_vm2, %v13179_v61  ;;  %v7192_v24 = vand.u32 2147483647, %v12556_v22  ;;  %v13698_v26 = vld [vmem:[#allocation47_spill] sm:$0xff]  ;;  %v13699_v12 = vld [vmem:[#allocation49_spill] sm:$0xff] }
0x1174   : > { %v7170_v51 = vsub.f32 1.0, %v7169_v55  ;;  %v7167_v23 = vmul.f32 %v12463_v45, %v7166_v42  ;;  %8788 = vmatpush.msk.msrb.mxu3 %vm9376_vm4, %v13179_v61  ;;  %7797 = vmatpush.msra.mxu0 %v13682_v60  ;;  %vm7173_vm4 = vweird.f32 %v12519_v29  ;;  %v7194_v9 = vand.u32 2147483648, %v12556_v22  ;;  %v13702_v60 = vld [vmem:[#allocation40_spill] sm:$0xff] }
0x1175   : > { %7892 = vmatpush.msrb.mxu2 %v13683_v53  ;;  %7479 = vmatmul.f32.gmra.mxu3 %v7287_v6  ;;  %v7288_v45 = vsub.f32 %v7286_v20, %v7287_v6  ;;  %vm7175_vm7 = vmor %vm7173_vm4, %vm7174_vm3  ;;  %vm7188_vm15 = vweird.f32 %v12556_v22  ;;  %vm13700_vm8 = vnez %v13615_v57 }
0x1176   : > { %v7171_v40 = vmul.f32 %v9002_v33, %v7170_v51  ;;  %v7238_v10 = vsel %vm13684_vm13, %v7167_v23, 0  ;;  %8776 = vmatpush.msk.msra.mxu1 %vm13660_vm12, %v13179_v61  ;;  %7800 = vmatpush.msra.mxu0 %v13685_v31  ;;  %v7195_v20 = vor.u32 1.1754944e-38, %v7194_v9  ;;  %vm13703_vm3 = vmmov %vm13693_vm10  ;;  %vm13704_vm13 = vnez %v13617_v18 }
0x1177   : > { %v12578_v19 = vand.u32 4294901760, %v7238_v10  ;;  %8789 = vmatpush.msk.msrb.mxu3 %vm13635_vm5, %v13179_v61  ;;  %v7289_v49 = vand.u32 4294901760, %v7288_v45  ;;  %7896 = vmatpush.msrb.mxu2 %v13687_v38  ;;  %vm7178_vm5 = vcmp.eq.f32.partialorder %v7177_v30, 8.507059e+37  ;;  %v13705_v45 = vld [vmem:[#allocation60_spill] sm:$0xff] }
0x1178   : > { %v7172_v28 = vadd.f32 %v9002_v33, %v7171_v40  ;;  %8777 = vmatpush.msk.msra.mxu1 %vm13686_vm14, %v13179_v61  ;;  %7803 = vmatpush.msra.mxu0 %v13688_v25 }
0x1179   : > { %v9004_v52 = vpop.eup %9003  ;;  %7368 = vmatmul.f32.gmra.mxu1 %v12578_v19  ;;  %v7294_v63 = vsub.f32 %v7238_v10, %v12578_v19  ;;  %7290 = vmatmul.f32.gmra.mxu0 %v7289_v49 }
0x117a   : > { %v7176_v7 = vsel %vm7175_vm7, %v9002_v33, %v7172_v28  ;;  %v7184_v13 = vmul.f32 %v9004_v52, %v12556_v22  ;;  %v12593_v1 = vpop.xlane.xlu2 %7103  ;;  %8790 = vmatpush.msk.msrb.mxu3 %vm13599_vm9, %v13179_v61  ;;  %7806 = vmatpush.msra.mxu0 %v13689_v37  ;;  %vm7189_vm9 = vweird.f32 %v9004_v52  ;;  %v13697_v33 = vld [vmem:[#allocation36_spill] sm:$0xff]  ;;  %v13706_v28 = vld [vmem:[#allocation42_spill] sm:$0xff] }
0x117b   : > { %v7181_v29 = vsel %vm7178_vm5, %v7180_v59, %v7176_v7  ;;  %9005 = vrcp.f32 %v12593_v1  ;;  %7423 = vmatmul.f32.gmra.mxu2 %v7294_v63  ;;  %v7295_v15 = vand.u32 4294901760, %v7294_v63  ;;  %8778 = vmatpush.msk.msra.mxu1 %vm13690_vm11, %v13179_v61  ;;  %vm7190_vm0 = vmor %vm7188_vm15, %vm7189_vm9  ;;  %v7207_v16 = vand.u32 2147483647, %v12593_v1  ;;  %v13707_v59 = vld [vmem:[#allocation63_spill] sm:$0xff] }
0x117c   : > { %v7185_v5 = vsub.f32 1.0, %v7184_v13  ;;  %v7182_v36 = vmul.f32 %v12467_v41, %v7181_v29  ;;  %8791 = vmatpush.msk.msrb.mxu3 %vm13602_vm2, %v13179_v61  ;;  %7809 = vmatpush.msra.mxu0 %v13691_v46  ;;  %vm13694_vm2 = vnez %v13611_v3  ;;  %v7209_v30 = vand.u32 2147483648, %v12593_v1  ;;  %v13708_v29 = vld [vmem:[#allocation45_spill] sm:$0xff]  ;;  %v13711_v46 = vld [vmem:[#allocation55_spill] sm:$0xff]  ;;  %vm13714_vm15 = vmmov %vm13703_vm3 }
0x117d   : > { %7900 = vmatpush.msrb.mxu2 %v13692_v11  ;;  %7485 = vmatmul.f32.gmra.mxu3 %v7295_v15  ;;  %v7296_v41 = vsub.f32 %v7294_v63, %v7295_v15  ;;  %vm7203_vm4 = vweird.f32 %v12593_v1  ;;  %vm7208_vm7 = vcmp.eq.f32.partialorder %v7207_v16, 8.507059e+37 }
0x117e   : > { %v7186_v47 = vmul.f32 %v9004_v52, %v7185_v5  ;;  %v7241_v34 = vsel %vm13693_vm10, %v7182_v36, 0  ;;  %8779 = vmatpush.msk.msra.mxu1 %vm13694_vm2, %v13179_v61  ;;  %7812 = vmatpush.msra.mxu0 %v13695_v14  ;;  %v7210_v38 = vor.u32 1.1754944e-38, %v7209_v30 }
0x117f   : > { %v12615_v2 = vand.u32 4294901760, %v7241_v34  ;;  %8792 = vmatpush.msk.msrb.mxu3 %vm13660_vm12, %v13179_v61  ;;  %v7297_v58 = vand.u32 4294901760, %v7296_v41  ;;  %7904 = vmatpush.msrb.mxu2 %v13697_v33  ;;  %vm7193_vm12 = vcmp.eq.f32.partialorder %v7192_v24, 8.507059e+37  ;;  %v13710_v24 = vld [vmem:[#allocation53_spill] sm:$0xff] }
0x1180   : > { %v7187_v35 = vadd.f32 %v9004_v52, %v7186_v47  ;;  %8780 = vmatpush.msk.msra.mxu1 %vm13696_vm6, %v13179_v61  ;;  %7815 = vmatpush.msra.mxu0 %v13698_v26 }
0x1181   : > { %v9006_v62 = vpop.eup %9005  ;;  %7372 = vmatmul.f32.gmra.mxu1 %v12615_v2  ;;  %v7302_v27 = vsub.f32 %v7241_v34, %v12615_v2  ;;  %7298 = vmatmul.f32.gmra.mxu0 %v7297_v58  ;;  %v13712_v34 = vld [vmem:[#allocation62_spill] sm:$0xff]  ;;  %v13713_v58 = vld [vmem:[#allocation65_spill] sm:$0xff] }
0x1182   : > { %v7191_v43 = vsel %vm7190_vm0, %v9004_v52, %v7187_v35  ;;  %v7199_v55 = vmul.f32 %v9006_v62, %v12593_v1  ;;  %v12630_v22 = vpop.xlane.xlu0 %7106  ;;  %8793 = vmatpush.msk.msrb.mxu3 %vm13686_vm14, %v13179_v61  ;;  %7818 = vmatpush.msra.mxu0 %v13699_v12  ;;  %vm7204_vm1 = vweird.f32 %v9006_v62  ;;  %vm13718_vm0 = vmmov %vm13703_vm3 }
0x1183   : > { %v7196_v42 = vsel %vm7193_vm12, %v7195_v20, %v7191_v43  ;;  %9007 = vrcp.f32 %v12630_v22  ;;  %7428 = vmatmul.f32.gmra.mxu2 %v7302_v27  ;;  %v7303_v23 = vand.u32 4294901760, %v7302_v27  ;;  %8781 = vmatpush.msk.msra.mxu1 %vm13700_vm8, %v13179_v61  ;;  %vm7205_vm14 = vmor %vm7203_vm4, %vm7204_vm1  ;;  %v7224_v37 = vand.u32 2147483648, %v12630_v22  ;;  %v13715_v20 = vld [vmem:[#allocation68_spill] sm:$0xff] }
0x1184   : > { %v7197_v51 = vmul.f32 %v12471_v56, %v7196_v42  ;;  %v7200_v6 = vsub.f32 1.0, %v7199_v55  ;;  %8794 = vmatpush.msk.msrb.mxu3 %vm13690_vm11, %v13179_v61  ;;  %7821 = vmatpush.msra.mxu0 %v13701_v17  ;;  %v7222_v50 = vand.u32 2147483647, %v12630_v22  ;;  %vm13709_vm11 = vmmov %vm13703_vm3  ;;  %vm7218_vm9 = vweird.f32 %v12630_v22 }
0x1185   : > { %7908 = vmatpush.msrb.mxu2 %v13702_v60  ;;  %7491 = vmatmul.f32.gmra.mxu3 %v7303_v23  ;;  %v7304_v56 = vsub.f32 %v7302_v27, %v7303_v23  ;;  %v7225_v11 = vor.u32 1.1754944e-38, %v7224_v37 }
0x1186   : > { %v7201_v53 = vmul.f32 %v9006_v62, %v7200_v6  ;;  %v7244_v40 = vsel %vm13703_vm3, %v7197_v51, 0  ;;  %8782 = vmatpush.msk.msra.mxu1 %vm13704_vm13, %v13179_v61  ;;  %7824 = vmatpush.msra.mxu0 %v13705_v45 }
0x1187   : > { %v12652_v0 = vand.u32 4294901760, %v7244_v40  ;;  %8795 = vmatpush.msk.msrb.mxu3 %vm13694_vm2, %v13179_v61  ;;  %v7305_v31 = vand.u32 4294901760, %v7304_v56  ;;  %7912 = vmatpush.msrb.mxu2 %v13706_v28  ;;  %vm7223_vm2 = vcmp.eq.f32.partialorder %v7222_v50, 8.507059e+37 }
0x1188   : > { %v7202_v10 = vadd.f32 %v9006_v62, %v7201_v53  ;;  %7827 = vmatpush.msra.mxu0 %v13707_v59 }
0x1189   : > { %v9008_v49 = vpop.eup %9007  ;;  %7376 = vmatmul.f32.gmra.mxu1 %v12652_v0  ;;  %v7310_v52 = vsub.f32 %v7244_v40, %v12652_v0  ;;  %7306 = vmatmul.f32.gmra.mxu0 %v7305_v31 }
0x118a   : > { %v7206_v63 = vsel %vm7205_vm14, %v9006_v62, %v7202_v10  ;;  %v7214_v3 = vmul.f32 %v9008_v49, %v12630_v22  ;;  %8796 = vmatpush.msk.msrb.mxu3 %vm13696_vm6, %v13179_v61  ;;  %7916 = vmatpush.msrb.mxu2 %v13708_v29  ;;  %vm7219_vm5 = vweird.f32 %v9008_v49  ;;  %vm13717_vm6 = vnez %v13195_v32 }
0x118b   : > { %v7211_v25 = vsel %vm7208_vm7, %v7210_v38, %v7206_v63  ;;  %7433 = vmatmul.f32.gmra.mxu2 %v7310_v52  ;;  %v7311_v7 = vand.u32 4294901760, %v7310_v52  ;;  %vm7220_vm10 = vmor %vm7218_vm9, %vm7219_vm5 }
0x118c   : > { %v7212_v13 = vmul.f32 %v12475_v44, %v7211_v25  ;;  %v7215_v1 = vsub.f32 1.0, %v7214_v3  ;;  %8797 = vmatpush.msk.msrb.mxu3 %vm13700_vm8, %v13179_v61  ;;  %7920 = vmatpush.msrb.mxu2 %v13710_v24 }
0x118d   : > { %v7312_v5 = vsub.f32 %v7310_v52, %v7311_v7  ;;  %7497 = vmatmul.f32.gmra.mxu3 %v7311_v7 }
0x118e   : > { %v7216_v15 = vmul.f32 %v9008_v49, %v7215_v1  ;;  %v7247_v36 = vsel %vm13709_vm11, %v7212_v13, 0  ;;  %8798 = vmatpush.msk.msrb.mxu3 %vm13704_vm13, %v13179_v61  ;;  %7924 = vmatpush.msrb.mxu2 %v13711_v46 }
0x118f   : > { %v7313_v44 = vand.u32 4294901760, %v7312_v5  ;;  %v7317_v9 = vand.u32 4294901760, %v7247_v36 }
0x1190   : > { %v7217_v57 = vadd.f32 %v9008_v49, %v7216_v15  ;;  %7928 = vmatpush.msrb.mxu2 %v13712_v34  ;;  %v9038_v34 = vld [vmem:[%s9249_s24 + $0x48] sm:$0xff] }
0x1191   : > { %7380 = vmatmul.f32.gmra.mxu1 %v7317_v9  ;;  %v7318_v47 = vsub.f32 %v7247_v36, %v7317_v9  ;;  %7314 = vmatmul.f32.gmra.mxu0 %v7313_v44 }
0x1192   : > { %v7221_v41 = vsel %vm7220_vm10, %v9008_v49, %v7217_v57  ;;  %7932 = vmatpush.msrb.mxu2 %v13713_v58 }
0x1193   : > { %v7226_v14 = vsel %vm7223_vm2, %v7225_v11, %v7221_v41  ;;  %7438 = vmatmul.f32.gmra.mxu2 %v7318_v47  ;;  %v7319_v35 = vand.u32 4294901760, %v7318_v47 }
0x1194   : > { %v7227_v18 = vmul.f32 %v12479_v39, %v7226_v14  ;;  %7936 = vmatpush.msrb.mxu2 %v13715_v20  ;;  %v13716_v39 = vld [vmem:[#allocation76_spill] sm:$0xff] }
0x1195   : > { %v7320_v33 = vsub.f32 %v7318_v47, %v7319_v35  ;;  %7503 = vmatmul.f32.gmra.mxu3 %v7319_v35  ;;  %v9037_v47 = vld [vmem:[%s9249_s24 + $0x40] sm:$0xff] }
0x1196   : > { %v7250_v62 = vsel %vm13714_vm15, %v7227_v18, 0 }
0x1197   : > { %v7321_v27 = vand.u32 4294901760, %v7320_v33  ;;  %v7325_v26 = vand.u32 4294901760, %v7250_v62 }
0x1199   : > { %7384 = vmatmul.f32.gmra.mxu1 %v7325_v26  ;;  %v7326_v43 = vsub.f32 %v7250_v62, %v7325_v26  ;;  %7322 = vmatmul.f32.gmra.mxu0 %v7321_v27 }
0x119b   : > { %7443 = vmatmul.f32.gmra.mxu2 %v7326_v43  ;;  %v7327_v55 = vand.u32 4294901760, %v7326_v43 }
0x119d   : > { %v7328_v22 = vsub.f32 %v7326_v43, %v7327_v55  ;;  %7509 = vmatmul.f32.gmra.mxu3 %v7327_v55  ;;  %v9039_v55 = vld [vmem:[%s9249_s24 + $0x50] sm:$0xff] }
0x119f   : > { %v7329_v42 = vand.u32 4294901760, %v7328_v22 }
0x11a1   : > { %7583 = vmatmul.f32.vlgmr.msrb.gmra.mxu1 %v12485_v54  ;;  %7330 = vmatmul.f32.gmra.mxu0 %v7329_v42 }
0x11a2   : > { %8028 = vmatpush.msrb.mxu1 %v13716_v39 }
0x11a9   : > { %7587 = vmatmul.f32.gmra.mxu1 %v12504_v4  ;;  %7533 = vmatmul.f32.vlgmr.msrb.gmra.mxu0 %v12485_v54 }
0x11aa   : > { %8799 = vmatpush.msk.msrb.mxu0 %vm13717_vm6, %v13179_v61 }
0x11b1   : > { %7591 = vmatmul.f32.gmra.mxu1 %v12541_v21  ;;  %7537 = vmatmul.f32.gmra.mxu0 %v12504_v4 }
0x11b9   : > { %7595 = vmatmul.f32.gmra.mxu1 %v12578_v19  ;;  %7541 = vmatmul.f32.gmra.mxu0 %v12541_v21 }
0x11c1   : > { %7599 = vmatmul.f32.gmra.mxu1 %v12615_v2  ;;  %7545 = vmatmul.f32.gmra.mxu0 %v12578_v19 }
0x11c9   : > { %7603 = vmatmul.f32.gmra.mxu1 %v12652_v0  ;;  %7549 = vmatmul.f32.gmra.mxu0 %v12615_v2 }
0x11d1   : > { %7607 = vmatmul.f32.gmra.mxu1 %v7317_v9  ;;  %7553 = vmatmul.f32.gmra.mxu0 %v12652_v0 }
0x11d9   : > { %7611 = vmatmul.f32.gmra.mxu1 %v7325_v26  ;;  %7557 = vmatmul.f32.gmra.mxu0 %v7317_v9 }
0x11de   : > { %v7357_v54 = vpop.f32.mrf.mxu1 }
0x11e1   : > { %7561 = vmatmul.f32.gmra.mxu0 %v7325_v26 }
0x11e6   : > { %v7361_v4 = vpop.f32.mrf.mxu1  ;;  %v7275_v12 = vpop.f32.mrf.mxu0 }
0x11e7   : > { %v7358_v51 = vadd.f32 %v7357_v54, %v7275_v12  ;;  %v7409_v31 = vpop.f32.mrf.mxu2 }
0x11e8   : > { %v7468_v49 = vpop.f32.mrf.mxu3 }
0x11e9   : > { %v7410_v25 = vadd.f32 %v7409_v31, %v7358_v51  ;;  %v9041_v31 = vld [vmem:[%s9249_s24 + $0x60] sm:$0xff] }
0x11eb   : > { %v7469_v29 = vadd.f32 %v7468_v49, %v7410_v25 }
0x11ee   : > { %v7365_v6 = vpop.f32.mrf.mxu1  ;;  %v7283_v21 = vpop.f32.mrf.mxu0 }
0x11ef   : > { %v7362_v23 = vadd.f32 %v7361_v4, %v7283_v21  ;;  %v7414_v52 = vpop.f32.mrf.mxu2 }
0x11f0   : > { %v7474_v3 = vpop.f32.mrf.mxu3 }
0x11f1   : > { %v7415_v37 = vadd.f32 %v7414_v52, %v7362_v23  ;;  %v9040_v23 = vld [vmem:[%s9249_s24 + $0x58] sm:$0xff] }
0x11f3   : > { %v7475_v50 = vadd.f32 %v7474_v3, %v7415_v37 }
0x11f6   : > { %v7369_v16 = vpop.f32.mrf.mxu1  ;;  %v7291_v30 = vpop.f32.mrf.mxu0 }
0x11f7   : > { %v7366_v19 = vadd.f32 %v7365_v6, %v7291_v30  ;;  %v7419_v13 = vpop.f32.mrf.mxu2 }
0x11f8   : > { %v7480_v5 = vpop.f32.mrf.mxu3 }
0x11f9   : > { %v7420_v46 = vadd.f32 %v7419_v13, %v7366_v19 }
0x11fb   : > { %v7481_v18 = vadd.f32 %v7480_v5, %v7420_v46  ;;  %v9042_v5 = vld [vmem:[%s9249_s24 + $0x68] sm:$0xff]  ;;  %v9043_v46 = vld [vmem:[%s9249_s24 + $0x70] sm:$0xff] }
0x11fe   : > { %v7373_v17 = vpop.f32.mrf.mxu1  ;;  %v7299_v60 = vpop.f32.mrf.mxu0 }
0x11ff   : > { %v7370_v53 = vadd.f32 %v7369_v16, %v7299_v60  ;;  %v7424_v57 = vpop.f32.mrf.mxu2 }
0x1200   : > { %v7486_v35 = vpop.f32.mrf.mxu3 }
0x1201   : > { %v7425_v27 = vadd.f32 %v7424_v57, %v7370_v53 }
0x1203   : > { %v7487_v42 = vadd.f32 %v7486_v35, %v7425_v27 }
0x1206   : > { %v7377_v2 = vpop.f32.mrf.mxu1  ;;  %v7307_v56 = vpop.f32.mrf.mxu0 }
0x1207   : > { %v7374_v40 = vadd.f32 %v7373_v17, %v7307_v56  ;;  %v7429_v43 = vpop.f32.mrf.mxu2 }
0x1208   : > { %v7492_v54 = vpop.f32.mrf.mxu3 }
0x1209   : > { %v7430_v51 = vadd.f32 %v7429_v43, %v7374_v40 }
0x120b   : > { %v7493_v19 = vadd.f32 %v7492_v54, %v7430_v51 }
0x120e   : > { %v12702_v0 = vpop.f32.mrf.mxu1  ;;  %v7315_v45 = vpop.f32.mrf.mxu0 }
0x120f   : > { %v7378_v10 = vadd.f32 %v7377_v2, %v7315_v45  ;;  %v7434_v30 = vpop.f32.mrf.mxu2 }
0x1210   : > { %v7498_v2 = vpop.f32.mrf.mxu3 }
0x1211   : > { %v7435_v56 = vadd.f32 %v7434_v30, %v7378_v10 }
0x1216   : > { %v12704_v28 = vpop.f32.mrf.mxu1  ;;  %v7323_v38 = vpop.f32.mrf.mxu0 }
0x1217   : > { %v7382_v3 = vadd.f32 %v12702_v0, %v7323_v38  ;;  %v7439_v25 = vpop.f32.mrf.mxu2 }
0x1218   : > { %v7504_v37 = vpop.f32.mrf.mxu3 }
0x121e   : > { %v7584_v59 = vpop.f32.mrf.mxu1  ;;  %v12706_v63 = vpop.f32.mrf.mxu0 }
0x121f   : > { %v7386_v10 = vadd.f32 %v12704_v28, %v12706_v63  ;;  %v7444_v0 = vpop.f32.mrf.mxu2 }
0x1221   : > { %v7445_v38 = vadd.f32 %v7444_v0, %v7386_v10 }
0x1226   : > { %v7588_v7 = vpop.f32.mrf.mxu1  ;;  %v7534_v1 = vpop.f32.mrf.mxu0 }
0x1227   : > { %v7535_v15 = vadd.f32 %v7534_v1, %v7469_v29  ;;  %v7440_v1 = vadd.f32 %v7439_v25, %v7382_v3 }
0x1229   : > { %v7585_v44 = vadd.f32 %v7584_v59, %v7535_v15  ;;  %v7499_v59 = vadd.f32 %v7498_v2, %v7435_v56 }
0x122b   : > { %v7615_v41 = vmul.f32 %v9037_v47, %v7585_v44  ;;  %v7510_v47 = vpop.f32.mrf.mxu3 }
0x122e   : > { %v7538_v36 = vpop.f32.mrf.mxu0  ;;  %v7592_v24 = vpop.f32.mrf.mxu1 }
0x122f   : > { %v7539_v9 = vadd.f32 %v7538_v36, %v7475_v50  ;;  %v7505_v50 = vadd.f32 %v7504_v37, %v7440_v1 }
0x1231   : > { %v7589_v11 = vadd.f32 %v7588_v7, %v7539_v9 }
0x1233   : > { %v7616_v14 = vmul.f32 %v9038_v34, %v7589_v11 }
0x1235   : > { %v7623_v58 = vadd.f32 %v7616_v14, %v7615_v41  ;;  %v7511_v41 = vadd.f32 %v7510_v47, %v7445_v38 }
0x1236   : > { %v7542_v33 = vpop.f32.mrf.mxu0  ;;  %v7596_v20 = vpop.f32.mrf.mxu1 }
0x1237   : > { %v7543_v62 = vadd.f32 %v7542_v33, %v7481_v18  ;;  %v9044_v33 = vld [vmem:[%s9249_s24 + $0x78] sm:$0xff] }
0x1239   : > { %v7593_v26 = vadd.f32 %v7592_v24, %v7543_v62 }
0x123b   : > { %v7617_v22 = vmul.f32 %v9039_v55, %v7593_v26 }
0x123d   : > { %v7624_v39 = vadd.f32 %v7623_v58, %v7617_v22 }
0x123e   : > { %v7546_v4 = vpop.f32.mrf.mxu0  ;;  %v7600_v21 = vpop.f32.mrf.mxu1 }
0x123f   : > { %v7547_v12 = vadd.f32 %v7546_v4, %v7487_v42 }
0x1241   : > { %v7597_v6 = vadd.f32 %v7596_v20, %v7547_v12 }
0x1243   : > { %v7618_v16 = vmul.f32 %v9040_v23, %v7597_v6 }
0x1245   : > { %v7625_v17 = vadd.f32 %v7624_v39, %v7618_v16 }
0x1246   : > { %v7550_v60 = vpop.f32.mrf.mxu0  ;;  %v7604_v52 = vpop.f32.mrf.mxu1 }
0x1247   : > { %v7551_v53 = vadd.f32 %v7550_v60, %v7493_v19 }
0x1249   : > { %v7601_v45 = vadd.f32 %v7600_v21, %v7551_v53 }
0x124b   : > { %v7619_v49 = vmul.f32 %v9041_v31, %v7601_v45 }
0x124d   : > { %v7626_v40 = vadd.f32 %v7625_v17, %v7619_v49 }
0x124e   : > { %v7554_v7 = vpop.f32.mrf.mxu0  ;;  %v7608_v24 = vpop.f32.mrf.mxu1 }
0x124f   : > { %v7555_v13 = vadd.f32 %v7554_v7, %v7499_v59 }
0x1251   : > { %v7605_v29 = vadd.f32 %v7604_v52, %v7555_v13 }
0x1253   : > { %v7620_v15 = vmul.f32 %v9042_v5, %v7605_v29 }
0x1255   : > { %v7627_v36 = vadd.f32 %v7626_v40, %v7620_v15 }
0x1256   : > { %v7558_v44 = vpop.f32.mrf.mxu0  ;;  %v7612_v18 = vpop.f32.mrf.mxu1 }
0x1257   : > { %v7559_v9 = vadd.f32 %v7558_v44, %v7505_v50 }
0x1259   : > { %v7609_v57 = vadd.f32 %v7608_v24, %v7559_v9 }
0x125b   : > { %v7621_v11 = vmul.f32 %v9043_v46, %v7609_v57 }
0x125d   : > { %v7628_v34 = vadd.f32 %v7627_v36, %v7621_v11 }
0x125e   : > { %v7562_v14 = vpop.f32.mrf.mxu0 }
0x125f   : > { %v7563_v35 = vadd.f32 %v7562_v14, %v7511_v41 }
0x1261   : > { %v7613_v58 = vadd.f32 %v7612_v18, %v7563_v35 }
0x1263   : > { %v7622_v62 = vmul.f32 %v9044_v33, %v7613_v58 }
0x1265   : > { %v7629_v28 = vadd.f32 %v7628_v34, %v7622_v62 }
0x1267   : > { %v7630_v63 = vrot.slane %v7629_v28, 4 }
0x1269   : > { %v7631_v20 = vadd.f32 %v7630_v63, %v7629_v28 }
0x126b   : > { %v7632_v27 = vrot.slane %v7631_v20, 2 }
0x126d   : > { %v7633_v26 = vadd.f32 %v7632_v27, %v7631_v20 }
0x126f   : > { %v7634_v43 = vrot.slane %v7633_v26, 1 }
0x1271   : > { %v12719_v55 = vadd.f32 %v7634_v43, %v7633_v26 }
0x1273   : > { %v7637_v22 = vmul.f32 %v12719_v55, %v12719_v55 }
0x1275   : > { %v7670_v42 = vand.u32 4294901760, %v7637_v22 }
0x1277   : > { %7776 = vmatmul.f32.vlgmr.msra.gmra.mxu3 %v7670_v42  ;;  %v7671_v39 = vsub.f32 %v7637_v22, %v7670_v42 }
0x1279   : > { %7830 = vmatmul.f32.vlgmr.msra.gmra.mxu0 %v7671_v39  ;;  %v7672_v54 = vand.u32 4294901760, %v7671_v39 }
0x127a   : > { %8051 = vmatpush.msra.mxu0 %v13518_v8 }
0x127b   : > { %7869 = vmatmul.f32.vlgmr.msra.gmra.mxu1 %v7672_v54  ;;  %v7673_v4 = vsub.f32 %v7671_v39, %v7672_v54 }
0x127c   : > { %8800 = vmatpush.msk.msra.mxu1 %vm13717_vm6, %v13179_v61 }
0x127d   : > { %v7674_v12 = vand.u32 4294901760, %v7673_v4 }
0x127f   : > { %7675 = vmatmul.f32.vlgmr.msra.gmra.mxu2 %v7674_v12  ;;  %7975 = vmatmul.f32.vlgmr.msrb.gmra.mxu3 %v7670_v42 }
0x1287   : > { %7938 = vmatmul.f32.vlgmr.msrb.gmra.mxu2 %v7670_v42 }
0x12f6   : > { %v7831_v23 = vpop.f32.mrf.mxu0 }
0x12f8   : > { %v7870_v30 = vpop.f32.mrf.mxu1 }
0x12fa   : > { %v7777_v51 = vpop.f32.mrf.mxu3 }
0x1302   : > { %v7676_v6 = vpop.f32.mrf.mxu2  ;;  %v7976_v8 = vpop.f32.mrf.mxu3 }
0x1303   : > { %v7778_v21 = vadd.f32 %v7777_v51, %v7676_v6 }
0x1305   : > { %v7832_v16 = vadd.f32 %v7831_v23, %v7778_v21 }
0x1307   : > { %v7871_v19 = vadd.f32 %v7870_v30, %v7832_v16 }
0x130a   : > { %v7939_v17 = vpop.f32.mrf.mxu2 }
0x130b   : > { %v7940_v60 = vadd.f32 %v7939_v17, %v7871_v19 }
0x130d   : > { %v7977_v53 = vadd.f32 %v7976_v8, %v7940_v60 }
0x130f   : > { %v7980_v2 = vsel %vm13718_vm0, %v7977_v53, 0 }
0x1310   : > { %v7999_v56 = vand.u32 4294901760, %v7980_v2 }
0x1312   : > { %v8000_v45 = vsub.f32 %v7980_v2, %v7999_v56  ;;  %8030 = vmatmul.f32.vlgmr.msrb.gmra.mxu1 %v7999_v56 }
0x1313   : > { %8801 = vmatpush.msk.msrb.mxu1 %vm13717_vm6, %v13179_v61 }
0x1314   : > { %v8001_v31 = vand.u32 4294901760, %v8000_v45 }
0x1316   : > { %v8002_v49 = vsub.f32 %v8000_v45, %v8001_v31 }
0x1318   : > { %v8003_v52 = vand.u32 4294901760, %v8002_v49 }
0x131a   : > { %8004 = vmatmul.f32.vlgmr.msrb.gmra.mxu0 %v8003_v52  ;;  %8078 = vmatmul.f32.vlgmr.msra.gmra.mxu1 %v8001_v31 }
0x131b   : > { %8100 = vmatpush.msrb.mxu0 %v13624_v48 }
0x1322   : > { %8054 = vmatmul.f32.vlgmr.msra.gmra.mxu0 %v8000_v45  ;;  %8124 = vmatmul.f32.vlgmr.msrb.gmra.mxu1 %v7999_v56 }
0x132a   : > { %8102 = vmatmul.f32.vlgmr.msrb.gmra.mxu0 %v7999_v56 }
0x138f   : > { %v8031_v59 = vpop.f32.mrf.mxu1 }
0x1397   : > { %v8005_v3 = vpop.f32.mrf.mxu0  ;;  %v8079_v40 = vpop.f32.mrf.mxu1 }
0x1398   : > { %v8032_v7 = vadd.f32 %v8031_v59, %v8005_v3 }
0x139f   : > { %v8055_v25 = vpop.f32.mrf.mxu0  ;;  %v8125_v61 = vpop.f32.mrf.mxu1 }
0x13a0   : > { %v8056_v13 = vadd.f32 %v8055_v25, %v8032_v7 }
0x13a2   : > { %v8080_v1 = vadd.f32 %v8079_v40, %v8056_v13 }
0x13a7   : > { %v8103_v29 = vpop.f32.mrf.mxu0 }
0x13a8   : > { %v8104_v32 = vadd.f32 %v8103_v29, %v8080_v1 }
0x13aa   : > { %v8126_v37 = vadd.f32 %v8125_v61, %v8104_v32 }
0x13ac   : > { %v8128_v5 = vadd.f32 1e-06, %v8126_v37  ;;  %v8140_v15 = vadd.f32 1.0, %v8126_v37 }
0x13ae   : > { %9009 = vrsqrt.f32 %v8128_v5  ;;  %v8152_v57 = vand.u32 2147483648, %v8140_v15  ;;  %vm8146_vm1 = vweird.f32 %v8140_v15  ;;  %v8150_v11 = vand.u32 2147483647, %v8140_v15 }
0x13af   : > { %9011 = vrcp.f32 %v8140_v15  ;;  %vm8135_vm3 = vweird.f32 %v8128_v5 }
0x13b0   : > { %v8153_v14 = vor.u32 1.1754944e-38, %v8152_v57  ;;  %vm8151_vm14 = vcmp.eq.f32.partialorder %v8150_v11, 8.507059e+37 }
0x13b4   : > { %v9010_v48 = vpop.eup %9009 }
0x13b5   : > { %v9012_v50 = vpop.eup %9011  ;;  %v8130_v10 = vmul.f32 %v9010_v48, %v8128_v5  ;;  %vm8136_vm8 = vweird.f32 %v9010_v48 }
0x13b6   : > { %v8142_v36 = vmul.f32 %v9012_v50, %v8140_v15  ;;  %vm8147_vm12 = vweird.f32 %v9012_v50  ;;  %vm8137_vm4 = vmor %vm8135_vm3, %vm8136_vm8 }
0x13b7   : > { %v8131_v24 = vmul.f32 %v9010_v48, %v8130_v10  ;;  %vm8148_vm13 = vmor %vm8146_vm1, %vm8147_vm12 }
0x13b8   : > { %v8143_v44 = vsub.f32 1.0, %v8142_v36 }
0x13b9   : > { %v8132_v9 = vmul.f32 0.5, %v8131_v24 }
0x13ba   : > { %v8144_v0 = vmul.f32 %v9012_v50, %v8143_v44 }
0x13bb   : > { %v8133_v38 = vsub.f32 1.5, %v8132_v9 }
0x13bc   : > { %v8145_v46 = vadd.f32 %v9012_v50, %v8144_v0 }
0x13bd   : > { %v8134_v47 = vmul.f32 %v9010_v48, %v8133_v38 }
0x13be   : > { %v8149_v41 = vsel %vm8148_vm13, %v9012_v50, %v8145_v46 }
0x13bf   : > { %v8138_v34 = vsel %vm8137_vm4, %v9010_v48, %v8134_v47  ;;  %v8154_v18 = vsel %vm8151_vm14, %v8153_v14, %v8149_v41 }
0x13c0   : > { %v8139_v35 = vmul.f32 %v8138_v34, %v8126_v37 }
0x13c2   : > { %v8155_v58 = vmul.f32 %v8154_v18, %v8139_v35 }
0x13c4   : > { %v8156_v33 = vmul.f32 %v8155_v58, %v12719_v55 }
0x13c6   : > { %8802 = vst [vmem:[%s11482_s25 + $0x1] sm:$0x1] %v8156_v33 }
0x13c7   : > { %9102 = shalt.err (!%p9099_p4)
}
0x13c8   : > { %s9147_s20 = smov 16   ;;  %s9148_s21 = smov 1  }
0x13c9   : > { %8811 = dma.vmem_to_hbm [thread:$0]  (%p9209_p11), %s8172_s10, 32, %s8174_s30, %s8160_s2, %s9147_s20, %s9147_s20, %s9148_s21  }
0x13ca PF: > { %s8188_s22 = sand.u32 1, %s9129_s6   ;;  %p13719_p7 = scmp.ge.s32.totalorder %s9141_s9, 2 }
0x13cb   : > { %s8189_s23 = scalar_lea.sflag [#allocation5], %s8188_s22 }
0x13cc   : > { %p8818_p5 = pnand %p13719_p7, %p9213_p12 }
0x13ce   : > { %p8819_p8 = pneg %p8818_p5 }
0x13d0   : > { %9124 = dma.done.wait (%p8819_p8), %s8189_s23, 32  }
0x13d1   : > { %9126 = vsyncadd (%p8819_p8), %s8189_s23, 4294967264  ;;  %p14_p10 = scmp.ge.s32.totalorder %s9184_s12, 4   ;;  %s13720_s6 = smov %s9133_s7 }
0x13d2   : > { %s13721_s7 = smov %s9137_s8  ;;  %s13722_s8 = smov %s9196_s15 }
0x13d3   : > { %s13723_s9 = smov %s9184_s12  ;;  %16 = sbr.rel (!%p14_p10) target bundleno = 5 (0x5), region = 72 }
0x13d8   :  { %8195 = vsyncpa [#allocation4], 1 }
0x13d9   :  { %8197 = vsyncpa [#allocation4 + $0x1], 1 }
0x13da   :  { %8198 = vsyncpa [#allocation5], 1 }
0x13db   :  { %8200 = vsyncpa [#allocation5 + $0x1], 1 }

</bundles_post_ra>
